<compile_context>
chip_gen: v7x
topology: tpu7x:2x2x1
jax: 0.10.0
libtpu: 0.0.40
codegen_flags: <defaults>
</compile_context>

<pallas_src>
import jax
import jax.numpy as jnp
from jax import lax
from jax.experimental import pallas as pl
from jax.experimental.pallas import tpu as pltpu


CPAD = 128  # padded channel / class lane width (keeps every store unmasked)


# ----------------------------- Pallas kernels ------------------------------ #

def _conv_pool_kernel(p_ref, w_ref, b_ref, o_ref):
    """Fused conv1-as-matmul + bias + ReLU + 2x2 maxpool.

    p_ref : (4, TM, K) bf16 - four pool-phase im2col blocks (same row order).
    w_ref : (K, 128)  bf16
    b_ref : (1, 128)  f32
    o_ref : (TM, 128) bf16 - pooled activations, lane-dense padded channels.
    """
    ph, tm, k = p_ref.shape
    # Single MXU pass over all four phases, then a VPU max over the phase dim.
    acc = jnp.dot(p_ref[...].reshape(ph * tm, k), w_ref[...],
                  preferred_element_type=jnp.float32)
    acc = acc.reshape(ph, tm, acc.shape[-1]).max(axis=0)
    # relu(pool(conv) + b) == pool(relu(conv + b)) since relu is monotone.
    o_ref[...] = jnp.maximum(acc + b_ref[...], 0.0).astype(o_ref.dtype)


def _conv2_pool_kernel(y_ref, w_ref, b_ref, o_ref):
    """Fully fused conv2 (in-VMEM im2col) + bias + ReLU + 2x2 maxpool.

    y_ref : (2, 2, TN, 40, 128) bf16 - parity-split conv1 output:
            y[pi, pj, n, r*6+s, :] = A1[n, 2r+pi, 2s+pj, :], rows 36..39 pad.
    w_ref : (3200, 128) bf16 - conv2 weights, row = (di*5+dj)*128 + cin_pad.
    b_ref : (1, 128)  f32
    o_ref : (TN*24, 128) bf16 - row n*24 + 6p + q; q<=3 valid, q in {4,5} are
            garbage rows consumed downstream by zero fc1 weight rows.
    """
    _, _, tn, _, c = y_ref.shape
    rows = tn * 24
    y = y_ref[...]
    # 36 distinct contiguous windows of the parity grids (shared across phases/taps).
    win = {}
    for u in range(6):
        for v in range(6):
            m0 = 6 * (u // 2) + (v // 2)
            win[(u, v)] = y[u % 2, v % 2, :, m0:m0 + 24, :].reshape(rows, c)
    # lhs rows: (pool phase a,b) x (image) x (rel=6p+q); lanes: (tap di,dj) x cin.
    phases = []
    for a in range(2):
        for b in range(2):
            taps = [win[(a + di, b + dj)] for di in range(5) for dj in range(5)]
            phases.append(jnp.concatenate(taps, axis=1))       # (rows, 25*c)
    lhs = jnp.concatenate(phases, axis=0)                       # (4*rows, 25*c)
    acc = jnp.dot(lhs, w_ref[...], preferred_element_type=jnp.float32)
    acc = acc.reshape(4, rows, c).max(axis=0)                   # fused 2x2 pool
    o_ref[...] = jnp.maximum(acc + b_ref[...], 0.0).astype(o_ref.dtype)


def _fc_head_kernel(x_ref, w1_ref, b1_ref, w2_ref, b2_ref, o_ref):
    """fc1 + ReLU + fc2 + log_softmax, fully fused (bf16 MXU, f32 epilogue)."""
    h = jnp.dot(x_ref[...], w1_ref[...], preferred_element_type=jnp.float32)
    h = jnp.maximum(h + b1_ref[...], 0.0)
    logits = jnp.dot(h.astype(w2_ref.dtype), w2_ref[...],
                     preferred_element_type=jnp.float32)
    logits = logits + b2_ref[...]          # padded class lanes carry -1e30 bias
    m = jnp.max(logits, axis=-1, keepdims=True)
    s = logits - m
    lse = jnp.log(jnp.sum(jnp.exp(s), axis=-1, keepdims=True))
    o_ref[...] = (s - lse).astype(o_ref.dtype)


# ------------------------------ call wrappers ------------------------------ #

def _round_up(x, m):
    return -(-x // m) * m


def _choose_block(m_rows, tm):
    """Single grid step when the rows fit one tile (no pointless 2-way split)."""
    if m_rows <= tm:
        return m_rows, m_rows
    return _round_up(m_rows, tm), tm


_CPARAMS = dict(dimension_semantics=("parallel",),
                vmem_limit_bytes=32 * 1024 * 1024)


def conv_pool_matmul(p4, w, b, *, tm=2048, out_dtype=jnp.bfloat16):
    """p4: (4, M, K) bf16, w: (K, 128) bf16, b: (1, 128) f32 -> (M, 128)."""
    ph, m_rows, k = p4.shape
    n_out = w.shape[1]
    mp, blk = _choose_block(m_rows, tm)
    if mp != m_rows:
        p4 = jnp.pad(p4, ((0, 0), (0, mp - m_rows), (0, 0)))
    out = pl.pallas_call(
        _conv_pool_kernel,
        out_shape=jax.ShapeDtypeStruct((mp, n_out), out_dtype),
        grid=(mp // blk,),
        in_specs=[
            pl.BlockSpec((ph, blk, k), lambda i: (0, i, 0)),
            pl.BlockSpec((k, n_out), lambda i: (0, 0)),
            pl.BlockSpec((1, n_out), lambda i: (0, 0)),
        ],
        out_specs=pl.BlockSpec((blk, n_out), lambda i: (i, 0)),
        compiler_params=pltpu.CompilerParams(**_CPARAMS),
    )(p4, w, b)
    return out[:m_rows] if mp != m_rows else out


def conv2_pool(y1, w2c, b2, *, out_dtype=jnp.bfloat16):
    """y1: (2, 2, N, 40, 128) bf16 -> (N*24, 128) pooled conv2 activations."""
    n = y1.shape[2]
    tn = next(t for t in (8, 4, 2, 1) if n % t == 0)
    return pl.pallas_call(
        _conv2_pool_kernel,
        out_shape=jax.ShapeDtypeStruct((n * 24, CPAD), out_dtype),
        grid=(n // tn,),
        in_specs=[
            pl.BlockSpec((2, 2, tn, 40, CPAD), lambda i: (0, 0, i, 0, 0)),
            pl.BlockSpec(w2c.shape, lambda i: (0, 0)),
            pl.BlockSpec(b2.shape, lambda i: (0, 0)),
        ],
        out_specs=pl.BlockSpec((tn * 24, CPAD), lambda i: (i, 0)),
        compiler_params=pltpu.CompilerParams(**_CPARAMS),
    )(y1, w2c, b2)


def fc_head(x, w1, b1, w2, b2, *, tm=512):
    """x: (M, 3072) bf16 -> log-probs (M, 128) f32 (first 10 lanes valid)."""
    m_rows, k = x.shape
    n_out = w2.shape[1]
    mp, blk = _choose_block(m_rows, tm)
    if mp != m_rows:
        x = jnp.pad(x, ((0, mp - m_rows), (0, 0)))
    out = pl.pallas_call(
        _fc_head_kernel,
        out_shape=jax.ShapeDtypeStruct((mp, n_out), jnp.float32),
        grid=(mp // blk,),
        in_specs=[
            pl.BlockSpec((blk, k), lambda i: (i, 0)),
            pl.BlockSpec(w1.shape, lambda i: (0, 0)),
            pl.BlockSpec(b1.shape, lambda i: (0, 0)),
            pl.BlockSpec(w2.shape, lambda i: (0, 0)),
            pl.BlockSpec(b2.shape, lambda i: (0, 0)),
        ],
        out_specs=pl.BlockSpec((blk, n_out), lambda i: (i, 0)),
        compiler_params=pltpu.CompilerParams(**_CPARAMS),
    )(x, w1, b1, w2, b2)
    return out[:m_rows] if mp != m_rows else out


# ------------------------------- JAX glue ----------------------------------- #

def build_conv1_patches(x_nhwc):
    """im2col for conv1, with rows ordered so the conv1 kernel's output is
    already in the (pool-phase major, parity-split) layout conv2 consumes.

    Returns (4, 4*N*40, 25): dim0 = conv1 pool offset a*2+b; row index within a
    phase = ((pi*2+pj)*N + n)*40 + r*6 + s, where the pooled conv1 position is
    (p, q) = (2r+pi, 2s+pj).  Rows 36..39 of each 40-group are zero padding
    (they only ever feed garbage rows that fc1 consumes with zero weights).
    """
    n = x_nhwc.shape[0]
    wins = [x_nhwc[:, di:di + 24, dj:dj + 24, 0]
            for di in range(5) for dj in range(5)]
    cols = jnp.stack(wins, axis=-1)                 # (N, 24, 24, 25)
    # conv position i = 4r + 2*pi + a  (same split for j -> s, pj, b)
    cols = cols.reshape(n, 6, 2, 2, 6, 2, 2, 25)    # (n, r, pi, a, s, pj, b, t)
    cols = cols.transpose(3, 6, 2, 5, 0, 1, 4, 7)   # (a, b, pi, pj, n, r, s, t)
    cols = cols.reshape(4, 4, n, 36, 25)
    cols = jnp.pad(cols, ((0, 0), (0, 0), (0, 0), (0, 4), (0, 0)))
    return cols.reshape(4, 4 * n * 40, 25)


def init_params(key):
    """PyTorch-layout parameters (same init scheme as nn.Conv2d / nn.Linear)."""
    ks = jax.random.split(key, 8)

    def u(k, shape, fan_in):
        bound = 1.0 / jnp.sqrt(jnp.float32(fan_in))
        return jax.random.uniform(k, shape, jnp.float32, -bound, bound)

    return {
        "conv1_w": u(ks[0], (20, 1, 5, 5), 25),
        "conv1_b": u(ks[1], (20,), 25),
        "conv2_w": u(ks[2], (50, 20, 5, 5), 500),
        "conv2_b": u(ks[3], (50,), 500),
        "fc1_w": u(ks[4], (500, 4 * 4 * 50), 800),
        "fc1_b": u(ks[5], (500,), 800),
        "fc2_w": u(ks[6], (10, 500), 500),
        "fc2_b": u(ks[7], (10,), 500),
    }


def prepare_params(p):
    """One-time weight prep: transpose / reshape / pad / cast so the forward
    pass needs no per-call weight transforms (lane-dense, MXU-ready bf16)."""
    c1, c2 = 20, 50
    # conv1: (20,1,5,5) -> (25,20) -> pad lanes only -> (25,128); row = di*5+dj.
    w1 = jnp.transpose(p["conv1_w"], (2, 3, 1, 0)).reshape(25, c1)
    w1 = jnp.pad(w1, ((0, 0), (0, CPAD - c1))).astype(jnp.bfloat16)
    b1 = jnp.pad(p["conv1_b"], (0, CPAD - c1)).reshape(1, CPAD).astype(jnp.float32)
    # conv2: (50,20,5,5) -> per-tap im2col weight (25*128, 128); row =
    # (di*5+dj)*128 + cin_pad; padded cin rows are zero so the kernel can eat
    # the 128-lane conv1 output directly.
    w2 = jnp.transpose(p["conv2_w"], (2, 3, 1, 0))          # (di, dj, cin, cout)
    w2 = jnp.pad(w2, ((0, 0), (0, 0), (0, CPAD - c1), (0, CPAD - c2)))
    w2c = w2.reshape(25 * CPAD, CPAD).astype(jnp.bfloat16)  # (3200, 128)
    b2 = jnp.pad(p["conv2_b"], (0, CPAD - c2)).reshape(1, CPAD).astype(jnp.float32)
    # fc1: fold the NCHW flatten (c*16 + p*4 + q) AND the conv2 kernel's
    # (rel = 6p+q, ch) output layout (incl. the garbage q=4,5 rows, which get
    # zero weight rows) into a (3072, 512) weight.
    wf1 = p["fc1_w"].reshape(500, c2, 4, 4)                 # (oc, ch, p, q)
    wf1 = jnp.transpose(wf1, (2, 3, 1, 0))                  # (p, q, ch, oc)
    wf1 = jnp.pad(wf1, ((0, 0), (0, 2), (0, CPAD - c2), (0, 512 - 500)))
    wf1 = wf1.reshape(24 * CPAD, 512).astype(jnp.bfloat16)  # (3072, 512)
    bf1 = jnp.pad(p["fc1_b"], (0, 512 - 500)).reshape(1, 512).astype(jnp.float32)
    # fc2: (10,500) -> (512,128); padded classes get -1e30 bias so the fused
    # log_softmax ignores them exactly (epilogue stays in f32).
    wf2 = jnp.pad(p["fc2_w"].T, ((0, 512 - 500), (0, CPAD - 10))).astype(jnp.bfloat16)
    bf2 = jnp.concatenate(
        [p["fc2_b"], jnp.full((CPAD - 10,), -1e30, jnp.float32)]).reshape(1, CPAD)
    return {"w1": w1, "b1": b1, "w2c": w2c, "b2": b2,
            "wf1": wf1, "bf1": bf1, "wf2": wf2, "bf2": bf2}


def net_forward(params, x):
    n = x.shape[0]
    x_nhwc = x.reshape(n, 28, 28, 1).astype(jnp.bfloat16)

    # conv1 + ReLU + 2x2 pool (output already parity-split for fused conv2).
    p1 = build_conv1_patches(x_nhwc)                         # (4, 160n, 25)
    y1 = conv_pool_matmul(p1, params["w1"], params["b1"], tm=2048)
    y1 = y1.reshape(2, 2, n, 40, CPAD)                       # metadata-only

    # conv2 + ReLU + 2x2 pool, fully fused (no conv2 im2col through HBM).
    y2 = conv2_pool(y1, params["w2c"], params["b2"])         # (24n, 128)

    # fc1 + ReLU + fc2 + log_softmax (flatten perm folded into fc1 weight).
    flat = y2.reshape(n, 24 * CPAD)                          # (n, 3072)
    out = fc_head(flat, params["wf1"], params["bf1"],
                  params["wf2"], params["bf2"], tm=512)
    return out[:, :10]


def reference_forward(p, x):
    """Pure-JAX/XLA reference of the PyTorch Net forward (f32, NCHW)."""
    y = lax.conv_general_dilated(x, p["conv1_w"], (1, 1), "VALID",
                                 dimension_numbers=("NCHW", "OIHW", "NCHW"))
    y = jax.nn.relu(y + p["conv1_b"][None, :, None, None])
    y = y.reshape(y.shape[0], 20, 12, 2, 12, 2).max(axis=(3, 5))
    y = lax.conv_general_dilated(y, p["conv2_w"], (1, 1), "VALID",
                                 dimension_numbers=("NCHW", "OIHW", "NCHW"))
    y = jax.nn.relu(y + p["conv2_b"][None, :, None, None])
    y = y.reshape(y.shape[0], 50, 4, 2, 4, 2).max(axis=(3, 5))
    y = y.reshape(y.shape[0], 800)
    y = jax.nn.relu(y @ p["fc1_w"].T + p["fc1_b"])
    y = y @ p["fc2_w"].T + p["fc2_b"]
    return jax.nn.log_softmax(y, axis=1)


if __name__ == "__main__":
    key = jax.random.PRNGKey(0)
    pkey, xkey = jax.random.split(key)
    raw = init_params(pkey)
    params = prepare_params(raw)
    # MNIST-style input: fc1 expects 4*4*50 features => spatial must be 28x28.
    x = jax.random.normal(xkey, (2, 1, 28, 28), jnp.float32)

    out = jax.jit(net_forward)(params, x)
    out = jax.block_until_ready(out)

    assert out.shape == (2, 10)
    # log_softmax rows must exponentiate-sum to 1
    assert bool(jnp.allclose(jnp.sum(jnp.exp(out), axis=1), 1.0, atol=1e-4))
    # compare against a pure-XLA reference (bf16 stage casts => loose tol)
    ref = reference_forward(raw, x)
    max_err = float(jnp.max(jnp.abs(out - ref)))
    assert max_err < 0.15, f"mismatch vs reference: {max_err}"
    print("KERNEL_OK")
</pallas_src>

<mosaic_0001>
module attributes {stable_mosaic.version = 11 : i64} {
  func.func @_conv_pool_kernel(%arg0: i32, %arg1: memref<4x320x25xbf16, #tpu.memory_space<vmem>>, %arg2: memref<25x128xbf16, #tpu.memory_space<vmem>>, %arg3: memref<1x128xf32, #tpu.memory_space<vmem>>, %arg4: memref<320x128xbf16, #tpu.memory_space<vmem>>) attributes {dimension_semantics = [#tpu.dimension_semantics<parallel>], iteration_bounds = array<i64: 1>, scalar_prefetch = 0 : i64, scratch_operands = 0 : i64, tpu.core_type = #tpu.core_type<tc>, window_params = [{transform_indices = @transform_0, window_bounds = array<i64: 4, 320, 25>}, {pipeline_mode = #tpu.pipeline_mode<synchronous>, transform_indices = @transform_1, window_bounds = array<i64: 25, 128>}, {pipeline_mode = #tpu.pipeline_mode<synchronous>, transform_indices = @transform_2, window_bounds = array<i64: 1, 128>}, {transform_indices = @transform_3, window_bounds = array<i64: 320, 128>}]} {
    %c0 = arith.constant 0 : index
    %c0_0 = arith.constant 0 : index
    %c0_1 = arith.constant 0 : index
    %0 = vector.load %arg1[%c0, %c0_0, %c0_1] : memref<4x320x25xbf16, #tpu.memory_space<vmem>>, vector<4x320x25xbf16>
    %1 = vector.shape_cast %0 : vector<4x320x25xbf16> to vector<1280x25xbf16>
    %c0_2 = arith.constant 0 : index
    %c0_3 = arith.constant 0 : index
    %2 = vector.load %arg2[%c0_2, %c0_3] : memref<25x128xbf16, #tpu.memory_space<vmem>>, vector<25x128xbf16>
    %cst = arith.constant dense<0.000000e+00> : vector<1280x128xf32>
    %3 = tpu.matmul %1, %2, %cst {dimension_numbers = #tpu.dot_dimension_numbers<[1], [0], [0], [1], [0, 0, 1, 1], [], []>} : vector<1280x25xbf16>, vector<25x128xbf16>, vector<1280x128xf32> -> vector<1280x128xf32>
    %4 = vector.shape_cast %3 : vector<1280x128xf32> to vector<4x320x128xf32>
    %cst_4 = arith.constant dense<0xFF800000> : vector<320x128xf32>
    %5 = vector.multi_reduction <maximumf>, %4, %cst_4 [0] : vector<4x320x128xf32> to vector<320x128xf32>
    %c0_5 = arith.constant 0 : index
    %c0_6 = arith.constant 0 : index
    %6 = vector.load %arg3[%c0_5, %c0_6] : memref<1x128xf32, #tpu.memory_space<vmem>>, vector<1x128xf32>
    %7 = vector.broadcast %6 : vector<1x128xf32> to vector<320x128xf32>
    %8 = arith.addf %5, %7 : vector<320x128xf32>
    %cst_7 = arith.constant 0.000000e+00 : f32
    %9 = vector.broadcast %cst_7 : f32 to vector<320x128xf32>
    %10 = arith.maximumf %8, %9 : vector<320x128xf32>
    %11 = arith.truncf %10 : vector<320x128xf32> to vector<320x128xbf16>
    %c0_8 = arith.constant 0 : index
    %c0_9 = arith.constant 0 : index
    %12 = vector.load %arg4[%c0_8, %c0_9] : memref<320x128xbf16, #tpu.memory_space<vmem>>, vector<320x128xbf16>
    tpu.vector_store %arg4[%c0_8, %c0_9], %11 {strides = array<i32>} : memref<320x128xbf16, #tpu.memory_space<vmem>>, vector<320x128xbf16>,
    return
  }
  func.func @transform_0(%arg0: i32) -> (i32, i32, i32) {
    %c0_i32 = arith.constant 0 : i32
    %c0_i32_0 = arith.constant 0 : i32
    %c0_i32_1 = arith.constant 0 : i32
    return %c0_i32, %arg0, %c0_i32_0 : i32, i32, i32
  }
  func.func @transform_1(%arg0: i32) -> (i32, i32) {
    %c0_i32 = arith.constant 0 : i32
    %c0_i32_0 = arith.constant 0 : i32
    %c0_i32_1 = arith.constant 0 : i32
    return %c0_i32, %c0_i32_0 : i32, i32
  }
  func.func @transform_2(%arg0: i32) -> (i32, i32) {
    %c0_i32 = arith.constant 0 : i32
    %c0_i32_0 = arith.constant 0 : i32
    %c0_i32_1 = arith.constant 0 : i32
    return %c0_i32, %c0_i32_0 : i32, i32
  }
  func.func @transform_3(%arg0: i32) -> (i32, i32) {
    %c0_i32 = arith.constant 0 : i32
    %c0_i32_0 = arith.constant 0 : i32
    return %arg0, %c0_i32 : i32, i32
  }
}

module attributes {stable_mosaic.version = 11 : i64} {
  func.func @_conv2_pool_kernel(%arg0: i32, %arg1: memref<2x2x2x40x128xbf16, #tpu.memory_space<vmem>>, %arg2: memref<3200x128xbf16, #tpu.memory_space<vmem>>, %arg3: memref<1x128xf32, #tpu.memory_space<vmem>>, %arg4: memref<48x128xbf16, #tpu.memory_space<vmem>>) attributes {dimension_semantics = [#tpu.dimension_semantics<parallel>], iteration_bounds = array<i64: 1>, scalar_prefetch = 0 : i64, scratch_operands = 0 : i64, tpu.core_type = #tpu.core_type<tc>, window_params = [{transform_indices = @transform_0, window_bounds = array<i64: 2, 2, 2, 40, 128>}, {pipeline_mode = #tpu.pipeline_mode<synchronous>, transform_indices = @transform_1, window_bounds = array<i64: 3200, 128>}, {pipeline_mode = #tpu.pipeline_mode<synchronous>, transform_indices = @transform_2, window_bounds = array<i64: 1, 128>}, {transform_indices = @transform_3, window_bounds = array<i64: 48, 128>}]} {
    %c0 = arith.constant 0 : index
    %c0_0 = arith.constant 0 : index
    %c0_1 = arith.constant 0 : index
    %c0_2 = arith.constant 0 : index
    %c0_3 = arith.constant 0 : index
    %0 = vector.load %arg1[%c0, %c0_0, %c0_1, %c0_2, %c0_3] : memref<2x2x2x40x128xbf16, #tpu.memory_space<vmem>>, vector<2x2x2x40x128xbf16>
    %1 = vector.extract_strided_slice %0 {offsets = [0, 0, 0, 0, 0], sizes = [1, 1, 2, 24, 128], strides = [1, 1, 1, 1, 1]} : vector<2x2x2x40x128xbf16> to vector<1x1x2x24x128xbf16>
    %2 = vector.shape_cast %1 : vector<1x1x2x24x128xbf16> to vector<2x24x128xbf16>
    %3 = vector.shape_cast %2 : vector<2x24x128xbf16> to vector<48x128xbf16>
    %4 = vector.extract_strided_slice %0 {offsets = [0, 1, 0, 0, 0], sizes = [1, 1, 2, 24, 128], strides = [1, 1, 1, 1, 1]} : vector<2x2x2x40x128xbf16> to vector<1x1x2x24x128xbf16>
    %5 = vector.shape_cast %4 : vector<1x1x2x24x128xbf16> to vector<2x24x128xbf16>
    %6 = vector.shape_cast %5 : vector<2x24x128xbf16> to vector<48x128xbf16>
    %7 = vector.extract_strided_slice %0 {offsets = [0, 0, 0, 1, 0], sizes = [1, 1, 2, 24, 128], strides = [1, 1, 1, 1, 1]} : vector<2x2x2x40x128xbf16> to vector<1x1x2x24x128xbf16>
    %8 = vector.shape_cast %7 : vector<1x1x2x24x128xbf16> to vector<2x24x128xbf16>
    %9 = vector.shape_cast %8 : vector<2x24x128xbf16> to vector<48x128xbf16>
    %10 = vector.extract_strided_slice %0 {offsets = [0, 1, 0, 1, 0], sizes = [1, 1, 2, 24, 128], strides = [1, 1, 1, 1, 1]} : vector<2x2x2x40x128xbf16> to vector<1x1x2x24x128xbf16>
    %11 = vector.shape_cast %10 : vector<1x1x2x24x128xbf16> to vector<2x24x128xbf16>
    %12 = vector.shape_cast %11 : vector<2x24x128xbf16> to vector<48x128xbf16>
    %13 = vector.extract_strided_slice %0 {offsets = [0, 0, 0, 2, 0], sizes = [1, 1, 2, 24, 128], strides = [1, 1, 1, 1, 1]} : vector<2x2x2x40x128xbf16> to vector<1x1x2x24x128xbf16>
    %14 = vector.shape_cast %13 : vector<1x1x2x24x128xbf16> to vector<2x24x128xbf16>
    %15 = vector.shape_cast %14 : vector<2x24x128xbf16> to vector<48x128xbf16>
    %16 = vector.extract_strided_slice %0 {offsets = [0, 1, 0, 2, 0], sizes = [1, 1, 2, 24, 128], strides = [1, 1, 1, 1, 1]} : vector<2x2x2x40x128xbf16> to vector<1x1x2x24x128xbf16>
    %17 = vector.shape_cast %16 : vector<1x1x2x24x128xbf16> to vector<2x24x128xbf16>
    %18 = vector.shape_cast %17 : vector<2x24x128xbf16> to vector<48x128xbf16>
    %19 = vector.extract_strided_slice %0 {offsets = [1, 0, 0, 0, 0], sizes = [1, 1, 2, 24, 128], strides = [1, 1, 1, 1, 1]} : vector<2x2x2x40x128xbf16> to vector<1x1x2x24x128xbf16>
    %20 = vector.shape_cast %19 : vector<1x1x2x24x128xbf16> to vector<2x24x128xbf16>
    %21 = vector.shape_cast %20 : vector<2x24x128xbf16> to vector<48x128xbf16>
    %22 = vector.extract_strided_slice %0 {offsets = [1, 1, 0, 0, 0], sizes = [1, 1, 2, 24, 128], strides = [1, 1, 1, 1, 1]} : vector<2x2x2x40x128xbf16> to vector<1x1x2x24x128xbf16>
    %23 = vector.shape_cast %22 : vector<1x1x2x24x128xbf16> to vector<2x24x128xbf16>
    %24 = vector.shape_cast %23 : vector<2x24x128xbf16> to vector<48x128xbf16>
    %25 = vector.extract_strided_slice %0 {offsets = [1, 0, 0, 1, 0], sizes = [1, 1, 2, 24, 128], strides = [1, 1, 1, 1, 1]} : vector<2x2x2x40x128xbf16> to vector<1x1x2x24x128xbf16>
    %26 = vector.shape_cast %25 : vector<1x1x2x24x128xbf16> to vector<2x24x128xbf16>
    %27 = vector.shape_cast %26 : vector<2x24x128xbf16> to vector<48x128xbf16>
    %28 = vector.extract_strided_slice %0 {offsets = [1, 1, 0, 1, 0], sizes = [1, 1, 2, 24, 128], strides = [1, 1, 1, 1, 1]} : vector<2x2x2x40x128xbf16> to vector<1x1x2x24x128xbf16>
    %29 = vector.shape_cast %28 : vector<1x1x2x24x128xbf16> to vector<2x24x128xbf16>
    %30 = vector.shape_cast %29 : vector<2x24x128xbf16> to vector<48x128xbf16>
    %31 = vector.extract_strided_slice %0 {offsets = [1, 0, 0, 2, 0], sizes = [1, 1, 2, 24, 128], strides = [1, 1, 1, 1, 1]} : vector<2x2x2x40x128xbf16> to vector<1x1x2x24x128xbf16>
    %32 = vector.shape_cast %31 : vector<1x1x2x24x128xbf16> to vector<2x24x128xbf16>
    %33 = vector.shape_cast %32 : vector<2x24x128xbf16> to vector<48x128xbf16>
    %34 = vector.extract_strided_slice %0 {offsets = [1, 1, 0, 2, 0], sizes = [1, 1, 2, 24, 128], strides = [1, 1, 1, 1, 1]} : vector<2x2x2x40x128xbf16> to vector<1x1x2x24x128xbf16>
    %35 = vector.shape_cast %34 : vector<1x1x2x24x128xbf16> to vector<2x24x128xbf16>
    %36 = vector.shape_cast %35 : vector<2x24x128xbf16> to vector<48x128xbf16>
    %37 = vector.extract_strided_slice %0 {offsets = [0, 0, 0, 6, 0], sizes = [1, 1, 2, 24, 128], strides = [1, 1, 1, 1, 1]} : vector<2x2x2x40x128xbf16> to vector<1x1x2x24x128xbf16>
    %38 = vector.shape_cast %37 : vector<1x1x2x24x128xbf16> to vector<2x24x128xbf16>
    %39 = vector.shape_cast %38 : vector<2x24x128xbf16> to vector<48x128xbf16>
    %40 = vector.extract_strided_slice %0 {offsets = [0, 1, 0, 6, 0], sizes = [1, 1, 2, 24, 128], strides = [1, 1, 1, 1, 1]} : vector<2x2x2x40x128xbf16> to vector<1x1x2x24x128xbf16>
    %41 = vector.shape_cast %40 : vector<1x1x2x24x128xbf16> to vector<2x24x128xbf16>
    %42 = vector.shape_cast %41 : vector<2x24x128xbf16> to vector<48x128xbf16>
    %43 = vector.extract_strided_slice %0 {offsets = [0, 0, 0, 7, 0], sizes = [1, 1, 2, 24, 128], strides = [1, 1, 1, 1, 1]} : vector<2x2x2x40x128xbf16> to vector<1x1x2x24x128xbf16>
    %44 = vector.shape_cast %43 : vector<1x1x2x24x128xbf16> to vector<2x24x128xbf16>
    %45 = vector.shape_cast %44 : vector<2x24x128xbf16> to vector<48x128xbf16>
    %46 = vector.extract_strided_slice %0 {offsets = [0, 1, 0, 7, 0], sizes = [1, 1, 2, 24, 128], strides = [1, 1, 1, 1, 1]} : vector<2x2x2x40x128xbf16> to vector<1x1x2x24x128xbf16>
    %47 = vector.shape_cast %46 : vector<1x1x2x24x128xbf16> to vector<2x24x128xbf16>
    %48 = vector.shape_cast %47 : vector<2x24x128xbf16> to vector<48x128xbf16>
    %49 = vector.extract_strided_slice %0 {offsets = [0, 0, 0, 8, 0], sizes = [1, 1, 2, 24, 128], strides = [1, 1, 1, 1, 1]} : vector<2x2x2x40x128xbf16> to vector<1x1x2x24x128xbf16>
    %50 = vector.shape_cast %49 : vector<1x1x2x24x128xbf16> to vector<2x24x128xbf16>
    %51 = vector.shape_cast %50 : vector<2x24x128xbf16> to vector<48x128xbf16>
    %52 = vector.extract_strided_slice %0 {offsets = [0, 1, 0, 8, 0], sizes = [1, 1, 2, 24, 128], strides = [1, 1, 1, 1, 1]} : vector<2x2x2x40x128xbf16> to vector<1x1x2x24x128xbf16>
    %53 = vector.shape_cast %52 : vector<1x1x2x24x128xbf16> to vector<2x24x128xbf16>
    %54 = vector.shape_cast %53 : vector<2x24x128xbf16> to vector<48x128xbf16>
    %55 = vector.extract_strided_slice %0 {offsets = [1, 0, 0, 6, 0], sizes = [1, 1, 2, 24, 128], strides = [1, 1, 1, 1, 1]} : vector<2x2x2x40x128xbf16> to vector<1x1x2x24x128xbf16>
    %56 = vector.shape_cast %55 : vector<1x1x2x24x128xbf16> to vector<2x24x128xbf16>
    %57 = vector.shape_cast %56 : vector<2x24x128xbf16> to vector<48x128xbf16>
    %58 = vector.extract_strided_slice %0 {offsets = [1, 1, 0, 6, 0], sizes = [1, 1, 2, 24, 128], strides = [1, 1, 1, 1, 1]} : vector<2x2x2x40x128xbf16> to vector<1x1x2x24x128xbf16>
    %59 = vector.shape_cast %58 : vector<1x1x2x24x128xbf16> to vector<2x24x128xbf16>
    %60 = vector.shape_cast %59 : vector<2x24x128xbf16> to vector<48x128xbf16>
    %61 = vector.extract_strided_slice %0 {offsets = [1, 0, 0, 7, 0], sizes = [1, 1, 2, 24, 128], strides = [1, 1, 1, 1, 1]} : vector<2x2x2x40x128xbf16> to vector<1x1x2x24x128xbf16>
    %62 = vector.shape_cast %61 : vector<1x1x2x24x128xbf16> to vector<2x24x128xbf16>
    %63 = vector.shape_cast %62 : vector<2x24x128xbf16> to vector<48x128xbf16>
    %64 = vector.extract_strided_slice %0 {offsets = [1, 1, 0, 7, 0], sizes = [1, 1, 2, 24, 128], strides = [1, 1, 1, 1, 1]} : vector<2x2x2x40x128xbf16> to vector<1x1x2x24x128xbf16>
    %65 = vector.shape_cast %64 : vector<1x1x2x24x128xbf16> to vector<2x24x128xbf16>
    %66 = vector.shape_cast %65 : vector<2x24x128xbf16> to vector<48x128xbf16>
    %67 = vector.extract_strided_slice %0 {offsets = [1, 0, 0, 8, 0], sizes = [1, 1, 2, 24, 128], strides = [1, 1, 1, 1, 1]} : vector<2x2x2x40x128xbf16> to vector<1x1x2x24x128xbf16>
    %68 = vector.shape_cast %67 : vector<1x1x2x24x128xbf16> to vector<2x24x128xbf16>
    %69 = vector.shape_cast %68 : vector<2x24x128xbf16> to vector<48x128xbf16>
    %70 = vector.extract_strided_slice %0 {offsets = [1, 1, 0, 8, 0], sizes = [1, 1, 2, 24, 128], strides = [1, 1, 1, 1, 1]} : vector<2x2x2x40x128xbf16> to vector<1x1x2x24x128xbf16>
    %71 = vector.shape_cast %70 : vector<1x1x2x24x128xbf16> to vector<2x24x128xbf16>
    %72 = vector.shape_cast %71 : vector<2x24x128xbf16> to vector<48x128xbf16>
    %73 = vector.extract_strided_slice %0 {offsets = [0, 0, 0, 12, 0], sizes = [1, 1, 2, 24, 128], strides = [1, 1, 1, 1, 1]} : vector<2x2x2x40x128xbf16> to vector<1x1x2x24x128xbf16>
    %74 = vector.shape_cast %73 : vector<1x1x2x24x128xbf16> to vector<2x24x128xbf16>
    %75 = vector.shape_cast %74 : vector<2x24x128xbf16> to vector<48x128xbf16>
    %76 = vector.extract_strided_slice %0 {offsets = [0, 1, 0, 12, 0], sizes = [1, 1, 2, 24, 128], strides = [1, 1, 1, 1, 1]} : vector<2x2x2x40x128xbf16> to vector<1x1x2x24x128xbf16>
    %77 = vector.shape_cast %76 : vector<1x1x2x24x128xbf16> to vector<2x24x128xbf16>
    %78 = vector.shape_cast %77 : vector<2x24x128xbf16> to vector<48x128xbf16>
    %79 = vector.extract_strided_slice %0 {offsets = [0, 0, 0, 13, 0], sizes = [1, 1, 2, 24, 128], strides = [1, 1, 1, 1, 1]} : vector<2x2x2x40x128xbf16> to vector<1x1x2x24x128xbf16>
    %80 = vector.shape_cast %79 : vector<1x1x2x24x128xbf16> to vector<2x24x128xbf16>
    %81 = vector.shape_cast %80 : vector<2x24x128xbf16> to vector<48x128xbf16>
    %82 = vector.extract_strided_slice %0 {offsets = [0, 1, 0, 13, 0], sizes = [1, 1, 2, 24, 128], strides = [1, 1, 1, 1, 1]} : vector<2x2x2x40x128xbf16> to vector<1x1x2x24x128xbf16>
    %83 = vector.shape_cast %82 : vector<1x1x2x24x128xbf16> to vector<2x24x128xbf16>
    %84 = vector.shape_cast %83 : vector<2x24x128xbf16> to vector<48x128xbf16>
    %85 = vector.extract_strided_slice %0 {offsets = [0, 0, 0, 14, 0], sizes = [1, 1, 2, 24, 128], strides = [1, 1, 1, 1, 1]} : vector<2x2x2x40x128xbf16> to vector<1x1x2x24x128xbf16>
    %86 = vector.shape_cast %85 : vector<1x1x2x24x128xbf16> to vector<2x24x128xbf16>
    %87 = vector.shape_cast %86 : vector<2x24x128xbf16> to vector<48x128xbf16>
    %88 = vector.extract_strided_slice %0 {offsets = [0, 1, 0, 14, 0], sizes = [1, 1, 2, 24, 128], strides = [1, 1, 1, 1, 1]} : vector<2x2x2x40x128xbf16> to vector<1x1x2x24x128xbf16>
    %89 = vector.shape_cast %88 : vector<1x1x2x24x128xbf16> to vector<2x24x128xbf16>
    %90 = vector.shape_cast %89 : vector<2x24x128xbf16> to vector<48x128xbf16>
    %91 = vector.extract_strided_slice %0 {offsets = [1, 0, 0, 12, 0], sizes = [1, 1, 2, 24, 128], strides = [1, 1, 1, 1, 1]} : vector<2x2x2x40x128xbf16> to vector<1x1x2x24x128xbf16>
    %92 = vector.shape_cast %91 : vector<1x1x2x24x128xbf16> to vector<2x24x128xbf16>
    %93 = vector.shape_cast %92 : vector<2x24x128xbf16> to vector<48x128xbf16>
    %94 = vector.extract_strided_slice %0 {offsets = [1, 1, 0, 12, 0], sizes = [1, 1, 2, 24, 128], strides = [1, 1, 1, 1, 1]} : vector<2x2x2x40x128xbf16> to vector<1x1x2x24x128xbf16>
    %95 = vector.shape_cast %94 : vector<1x1x2x24x128xbf16> to vector<2x24x128xbf16>
    %96 = vector.shape_cast %95 : vector<2x24x128xbf16> to vector<48x128xbf16>
    %97 = vector.extract_strided_slice %0 {offsets = [1, 0, 0, 13, 0], sizes = [1, 1, 2, 24, 128], strides = [1, 1, 1, 1, 1]} : vector<2x2x2x40x128xbf16> to vector<1x1x2x24x128xbf16>
    %98 = vector.shape_cast %97 : vector<1x1x2x24x128xbf16> to vector<2x24x128xbf16>
    %99 = vector.shape_cast %98 : vector<2x24x128xbf16> to vector<48x128xbf16>
    %100 = vector.extract_strided_slice %0 {offsets = [1, 1, 0, 13, 0], sizes = [1, 1, 2, 24, 128], strides = [1, 1, 1, 1, 1]} : vector<2x2x2x40x128xbf16> to vector<1x1x2x24x128xbf16>
    %101 = vector.shape_cast %100 : vector<1x1x2x24x128xbf16> to vector<2x24x128xbf16>
    %102 = vector.shape_cast %101 : vector<2x24x128xbf16> to vector<48x128xbf16>
    %103 = vector.extract_strided_slice %0 {offsets = [1, 0, 0, 14, 0], sizes = [1, 1, 2, 24, 128], strides = [1, 1, 1, 1, 1]} : vector<2x2x2x40x128xbf16> to vector<1x1x2x24x128xbf16>
    %104 = vector.shape_cast %103 : vector<1x1x2x24x128xbf16> to vector<2x24x128xbf16>
    %105 = vector.shape_cast %104 : vector<2x24x128xbf16> to vector<48x128xbf16>
    %106 = vector.extract_strided_slice %0 {offsets = [1, 1, 0, 14, 0], sizes = [1, 1, 2, 24, 128], strides = [1, 1, 1, 1, 1]} : vector<2x2x2x40x128xbf16> to vector<1x1x2x24x128xbf16>
    %107 = vector.shape_cast %106 : vector<1x1x2x24x128xbf16> to vector<2x24x128xbf16>
    %108 = vector.shape_cast %107 : vector<2x24x128xbf16> to vector<48x128xbf16>
    %109 = tpu.concatenate %3, %6, %9, %12, %15, %21, %24, %27, %30, %33, %39, %42, %45, %48, %51, %57 in 1 : vector<48x128xbf16>, vector<48x128xbf16>, vector<48x128xbf16>, vector<48x128xbf16>, vector<48x128xbf16>, vector<48x128xbf16>, vector<48x128xbf16>, vector<48x128xbf16>, vector<48x128xbf16>, vector<48x128xbf16>, vector<48x128xbf16>, vector<48x128xbf16>, vector<48x128xbf16>, vector<48x128xbf16>, vector<48x128xbf16>, vector<48x128xbf16> -> vector<48x2048xbf16>
    %110 = tpu.concatenate %60, %63, %66, %69, %75, %78, %81, %84, %87 in 1 : vector<48x128xbf16>, vector<48x128xbf16>, vector<48x128xbf16>, vector<48x128xbf16>, vector<48x128xbf16>, vector<48x128xbf16>, vector<48x128xbf16>, vector<48x128xbf16>, vector<48x128xbf16> -> vector<48x1152xbf16>
    %111 = tpu.concatenate %109, %110 in 1 : vector<48x2048xbf16>, vector<48x1152xbf16> -> vector<48x3200xbf16>
    %112 = tpu.concatenate %6, %9, %12, %15, %18, %24, %27, %30, %33, %36, %42, %45, %48, %51, %54, %60 in 1 : vector<48x128xbf16>, vector<48x128xbf16>, vector<48x128xbf16>, vector<48x128xbf16>, vector<48x128xbf16>, vector<48x128xbf16>, vector<48x128xbf16>, vector<48x128xbf16>, vector<48x128xbf16>, vector<48x128xbf16>, vector<48x128xbf16>, vector<48x128xbf16>, vector<48x128xbf16>, vector<48x128xbf16>, vector<48x128xbf16>, vector<48x128xbf16> -> vector<48x2048xbf16>
    %113 = tpu.concatenate %63, %66, %69, %72, %78, %81, %84, %87, %90 in 1 : vector<48x128xbf16>, vector<48x128xbf16>, vector<48x128xbf16>, vector<48x128xbf16>, vector<48x128xbf16>, vector<48x128xbf16>, vector<48x128xbf16>, vector<48x128xbf16>, vector<48x128xbf16> -> vector<48x1152xbf16>
    %114 = tpu.concatenate %112, %113 in 1 : vector<48x2048xbf16>, vector<48x1152xbf16> -> vector<48x3200xbf16>
    %115 = tpu.concatenate %21, %24, %27, %30, %33, %39, %42, %45, %48, %51, %57, %60, %63, %66, %69, %75 in 1 : vector<48x128xbf16>, vector<48x128xbf16>, vector<48x128xbf16>, vector<48x128xbf16>, vector<48x128xbf16>, vector<48x128xbf16>, vector<48x128xbf16>, vector<48x128xbf16>, vector<48x128xbf16>, vector<48x128xbf16>, vector<48x128xbf16>, vector<48x128xbf16>, vector<48x128xbf16>, vector<48x128xbf16>, vector<48x128xbf16>, vector<48x128xbf16> -> vector<48x2048xbf16>
    %116 = tpu.concatenate %78, %81, %84, %87, %93, %96, %99, %102, %105 in 1 : vector<48x128xbf16>, vector<48x128xbf16>, vector<48x128xbf16>, vector<48x128xbf16>, vector<48x128xbf16>, vector<48x128xbf16>, vector<48x128xbf16>, vector<48x128xbf16>, vector<48x128xbf16> -> vector<48x1152xbf16>
    %117 = tpu.concatenate %115, %116 in 1 : vector<48x2048xbf16>, vector<48x1152xbf16> -> vector<48x3200xbf16>
    %118 = tpu.concatenate %24, %27, %30, %33, %36, %42, %45, %48, %51, %54, %60, %63, %66, %69, %72, %78 in 1 : vector<48x128xbf16>, vector<48x128xbf16>, vector<48x128xbf16>, vector<48x128xbf16>, vector<48x128xbf16>, vector<48x128xbf16>, vector<48x128xbf16>, vector<48x128xbf16>, vector<48x128xbf16>, vector<48x128xbf16>, vector<48x128xbf16>, vector<48x128xbf16>, vector<48x128xbf16>, vector<48x128xbf16>, vector<48x128xbf16>, vector<48x128xbf16> -> vector<48x2048xbf16>
    %119 = tpu.concatenate %81, %84, %87, %90, %96, %99, %102, %105, %108 in 1 : vector<48x128xbf16>, vector<48x128xbf16>, vector<48x128xbf16>, vector<48x128xbf16>, vector<48x128xbf16>, vector<48x128xbf16>, vector<48x128xbf16>, vector<48x128xbf16>, vector<48x128xbf16> -> vector<48x1152xbf16>
    %120 = tpu.concatenate %118, %119 in 1 : vector<48x2048xbf16>, vector<48x1152xbf16> -> vector<48x3200xbf16>
    %121 = tpu.concatenate %111, %114, %117, %120 in 0 : vector<48x3200xbf16>, vector<48x3200xbf16>, vector<48x3200xbf16>, vector<48x3200xbf16> -> vector<192x3200xbf16>
    %c0_4 = arith.constant 0 : index
    %c0_5 = arith.constant 0 : index
    %122 = vector.load %arg2[%c0_4, %c0_5] : memref<3200x128xbf16, #tpu.memory_space<vmem>>, vector<3200x128xbf16>
    %cst = arith.constant dense<0.000000e+00> : vector<192x128xf32>
    %123 = tpu.matmul %121, %122, %cst {dimension_numbers = #tpu.dot_dimension_numbers<[1], [0], [0], [1], [0, 0, 1, 1], [], []>} : vector<192x3200xbf16>, vector<3200x128xbf16>, vector<192x128xf32> -> vector<192x128xf32>
    %124 = vector.shape_cast %123 : vector<192x128xf32> to vector<4x48x128xf32>
    %cst_6 = arith.constant dense<0xFF800000> : vector<48x128xf32>
    %125 = vector.multi_reduction <maximumf>, %124, %cst_6 [0] : vector<4x48x128xf32> to vector<48x128xf32>
    %c0_7 = arith.constant 0 : index
    %c0_8 = arith.constant 0 : index
    %126 = vector.load %arg3[%c0_7, %c0_8] : memref<1x128xf32, #tpu.memory_space<vmem>>, vector<1x128xf32>
    %127 = vector.broadcast %126 : vector<1x128xf32> to vector<48x128xf32>
    %128 = arith.addf %125, %127 : vector<48x128xf32>
    %cst_9 = arith.constant 0.000000e+00 : f32
    %129 = vector.broadcast %cst_9 : f32 to vector<48x128xf32>
    %130 = arith.maximumf %128, %129 : vector<48x128xf32>
    %131 = arith.truncf %130 : vector<48x128xf32> to vector<48x128xbf16>
    %c0_10 = arith.constant 0 : index
    %c0_11 = arith.constant 0 : index
    %132 = vector.load %arg4[%c0_10, %c0_11] : memref<48x128xbf16, #tpu.memory_space<vmem>>, vector<48x128xbf16>
    tpu.vector_store %arg4[%c0_10, %c0_11], %131 {strides = array<i32>} : memref<48x128xbf16, #tpu.memory_space<vmem>>, vector<48x128xbf16>,
    return
  }
  func.func @transform_0(%arg0: i32) -> (i32, i32, i32, i32, i32) {
    %c0_i32 = arith.constant 0 : i32
    %c0_i32_0 = arith.constant 0 : i32
    %c0_i32_1 = arith.constant 0 : i32
    %c0_i32_2 = arith.constant 0 : i32
    %c0_i32_3 = arith.constant 0 : i32
    return %c0_i32, %c0_i32_0, %arg0, %c0_i32_1, %c0_i32_2 : i32, i32, i32, i32, i32
  }
  func.func @transform_1(%arg0: i32) -> (i32, i32) {
    %c0_i32 = arith.constant 0 : i32
    %c0_i32_0 = arith.constant 0 : i32
    %c0_i32_1 = arith.constant 0 : i32
    return %c0_i32, %c0_i32_0 : i32, i32
  }
  func.func @transform_2(%arg0: i32) -> (i32, i32) {
    %c0_i32 = arith.constant 0 : i32
    %c0_i32_0 = arith.constant 0 : i32
    %c0_i32_1 = arith.constant 0 : i32
    return %c0_i32, %c0_i32_0 : i32, i32
  }
  func.func @transform_3(%arg0: i32) -> (i32, i32) {
    %c0_i32 = arith.constant 0 : i32
    %c0_i32_0 = arith.constant 0 : i32
    return %arg0, %c0_i32 : i32, i32
  }
}

module attributes {stable_mosaic.version = 11 : i64} {
  func.func @_fc_head_kernel(%arg0: i32, %arg1: memref<2x3072xbf16, #tpu.memory_space<vmem>>, %arg2: memref<3072x512xbf16, #tpu.memory_space<vmem>>, %arg3: memref<1x512xf32, #tpu.memory_space<vmem>>, %arg4: memref<512x128xbf16, #tpu.memory_space<vmem>>, %arg5: memref<1x128xf32, #tpu.memory_space<vmem>>, %arg6: memref<2x128xf32, #tpu.memory_space<vmem>>) attributes {dimension_semantics = [#tpu.dimension_semantics<parallel>], iteration_bounds = array<i64: 1>, scalar_prefetch = 0 : i64, scratch_operands = 0 : i64, tpu.core_type = #tpu.core_type<tc>, window_params = [{transform_indices = @transform_0, window_bounds = array<i64: 2, 3072>}, {pipeline_mode = #tpu.pipeline_mode<synchronous>, transform_indices = @transform_1, window_bounds = array<i64: 3072, 512>}, {pipeline_mode = #tpu.pipeline_mode<synchronous>, transform_indices = @transform_2, window_bounds = array<i64: 1, 512>}, {pipeline_mode = #tpu.pipeline_mode<synchronous>, transform_indices = @transform_3, window_bounds = array<i64: 512, 128>}, {pipeline_mode = #tpu.pipeline_mode<synchronous>, transform_indices = @transform_4, window_bounds = array<i64: 1, 128>}, {transform_indices = @transform_5, window_bounds = array<i64: 2, 128>}]} {
    %c0 = arith.constant 0 : index
    %c0_0 = arith.constant 0 : index
    %0 = vector.load %arg1[%c0, %c0_0] : memref<2x3072xbf16, #tpu.memory_space<vmem>>, vector<2x3072xbf16>
    %c0_1 = arith.constant 0 : index
    %c0_2 = arith.constant 0 : index
    %1 = vector.load %arg2[%c0_1, %c0_2] : memref<3072x512xbf16, #tpu.memory_space<vmem>>, vector<3072x512xbf16>
    %cst = arith.constant dense<0.000000e+00> : vector<2x512xf32>
    %2 = tpu.matmul %0, %1, %cst {dimension_numbers = #tpu.dot_dimension_numbers<[1], [0], [0], [1], [0, 0, 1, 1], [], []>} : vector<2x3072xbf16>, vector<3072x512xbf16>, vector<2x512xf32> -> vector<2x512xf32>
    %c0_3 = arith.constant 0 : index
    %c0_4 = arith.constant 0 : index
    %3 = vector.load %arg3[%c0_3, %c0_4] : memref<1x512xf32, #tpu.memory_space<vmem>>, vector<1x512xf32>
    %4 = vector.broadcast %3 : vector<1x512xf32> to vector<2x512xf32>
    %5 = arith.addf %2, %4 : vector<2x512xf32>
    %cst_5 = arith.constant 0.000000e+00 : f32
    %6 = vector.broadcast %cst_5 : f32 to vector<2x512xf32>
    %7 = arith.maximumf %5, %6 : vector<2x512xf32>
    %8 = arith.truncf %7 : vector<2x512xf32> to vector<2x512xbf16>
    %c0_6 = arith.constant 0 : index
    %c0_7 = arith.constant 0 : index
    %9 = vector.load %arg4[%c0_6, %c0_7] : memref<512x128xbf16, #tpu.memory_space<vmem>>, vector<512x128xbf16>
    %cst_8 = arith.constant dense<0.000000e+00> : vector<2x128xf32>
    %10 = tpu.matmul %8, %9, %cst_8 {dimension_numbers = #tpu.dot_dimension_numbers<[1], [0], [0], [1], [0, 0, 1, 1], [], []>} : vector<2x512xbf16>, vector<512x128xbf16>, vector<2x128xf32> -> vector<2x128xf32>
    %c0_9 = arith.constant 0 : index
    %c0_10 = arith.constant 0 : index
    %11 = vector.load %arg5[%c0_9, %c0_10] : memref<1x128xf32, #tpu.memory_space<vmem>>, vector<1x128xf32>
    %12 = vector.broadcast %11 : vector<1x128xf32> to vector<2x128xf32>
    %13 = arith.addf %10, %12 : vector<2x128xf32>
    %cst_11 = arith.constant dense<0xFF800000> : vector<2xf32>
    %14 = vector.multi_reduction <maximumf>, %13, %cst_11 [1] : vector<2x128xf32> to vector<2xf32>
    %15 = vector.shape_cast %14 : vector<2xf32> to vector<2x1xf32>
    %16 = vector.broadcast %15 : vector<2x1xf32> to vector<2x128xf32>
    %17 = arith.subf %13, %16 : vector<2x128xf32>
    %18 = math.exp %17 : vector<2x128xf32>
    %cst_12 = arith.constant dense<0.000000e+00> : vector<2xf32>
    %19 = vector.multi_reduction <add>, %18, %cst_12 [1] : vector<2x128xf32> to vector<2xf32>
    %20 = vector.shape_cast %19 : vector<2xf32> to vector<2x1xf32>
    %21 = math.log %20 : vector<2x1xf32>
    %22 = vector.broadcast %21 : vector<2x1xf32> to vector<2x128xf32>
    %23 = arith.subf %17, %22 : vector<2x128xf32>
    %c0_13 = arith.constant 0 : index
    %c0_14 = arith.constant 0 : index
    %24 = vector.load %arg6[%c0_13, %c0_14] : memref<2x128xf32, #tpu.memory_space<vmem>>, vector<2x128xf32>
    tpu.vector_store %arg6[%c0_13, %c0_14], %23 {strides = array<i32>} : memref<2x128xf32, #tpu.memory_space<vmem>>, vector<2x128xf32>,
    return
  }
  func.func @transform_0(%arg0: i32) -> (i32, i32) {
    %c0_i32 = arith.constant 0 : i32
    %c0_i32_0 = arith.constant 0 : i32
    return %arg0, %c0_i32 : i32, i32
  }
  func.func @transform_1(%arg0: i32) -> (i32, i32) {
    %c0_i32 = arith.constant 0 : i32
    %c0_i32_0 = arith.constant 0 : i32
    %c0_i32_1 = arith.constant 0 : i32
    return %c0_i32, %c0_i32_0 : i32, i32
  }
  func.func @transform_2(%arg0: i32) -> (i32, i32) {
    %c0_i32 = arith.constant 0 : i32
    %c0_i32_0 = arith.constant 0 : i32
    %c0_i32_1 = arith.constant 0 : i32
    return %c0_i32, %c0_i32_0 : i32, i32
  }
  func.func @transform_3(%arg0: i32) -> (i32, i32) {
    %c0_i32 = arith.constant 0 : i32
    %c0_i32_0 = arith.constant 0 : i32
    %c0_i32_1 = arith.constant 0 : i32
    return %c0_i32, %c0_i32_0 : i32, i32
  }
  func.func @transform_4(%arg0: i32) -> (i32, i32) {
    %c0_i32 = arith.constant 0 : i32
    %c0_i32_0 = arith.constant 0 : i32
    %c0_i32_1 = arith.constant 0 : i32
    return %c0_i32, %c0_i32_0 : i32, i32
  }
  func.func @transform_5(%arg0: i32) -> (i32, i32) {
    %c0_i32 = arith.constant 0 : i32
    %c0_i32_0 = arith.constant 0 : i32
    return %arg0, %c0_i32 : i32, i32
  }
}

</mosaic_0001>

<bundles_post_ra>
// kernel: net_forward.3
= control target key start
LH: loop header
LB: loop body
LE: loop exit
PB: predicated region body
PF: predicated region fallthrough
CT: control target
= control target key end

     0   :  { %8 = vsyncpa [#allocation3], 0  ;;  %s3408_s0 = inlined_call_operand.vmem [shape: bf16[4,320,25], index: 0, kind: input, shape index: {}]   ;;  %s3409_s1 = inlined_call_operand.hbm [shape: bf16[25,128], index: 1, kind: input, shape index: {}]   ;;  %s3410_s2 = inlined_call_operand.hbm [shape: f32[1,128], index: 2, kind: input, shape index: {}]   ;;  %s3411_s3 = inlined_call_operand.vmem [shape: bf16[320,128], index: 3, kind: output, shape index: {}]  }
   0x1   :  { %9 = vsyncpa [#allocation5], 0  ;;  %s2697_s12 = smov [#allocation2]   ;;  %s2649_s16 = scalar_lea.hbm %s3409_s1, 256 }
   0x2   :  { %s17_s13 = sshll.u32 %s2697_s12, 4  ;;  %p2650_p0 = scmp.ne.s32.totalorder %s3409_s1, %s2649_s16  ;;  %s18_s13 = int_to_ptr.vmem [resolvable:$true] %s17_s13 }
   0x3   :  { %p2653_p1 = scmp.lt.u32.totalorder %s2649_s16, %s3409_s1 }
   0x5   :  { %p2655_p2 = pnand %p2653_p1, %p2650_p0 }
   0x7   :  { %2658 = shalt.err (!%p2655_p2)
}
   0x8   :  { %s2659_s21 = scalar_lea.vmem %s18_s13, 256  ;;  %p2664_p4 = scmp.lt.s32.totalorder %s18_s13, %s18_s13 }
   0x9   :  { %p2660_p3 = scmp.ne.s32.totalorder %s18_s13, %s2659_s21  ;;  %p2665_p5 = scmp.lt.s32.totalorder %s2659_s21, %s2659_s21 }
   0xb   :  { %p2666_p6 = por %p2665_p5, %p2664_p4 }
   0xd   :  { %p2667_p7 = pnand %p2666_p6, %p2660_p3 }
   0xf   :  { %2670 = shalt.err (!%p2667_p7)
}
  0x10   :  { %s2698_s22 = smov 64   ;;  %s2699_s23 = smov 4  }
  0x11   :  { %23 = dma.hbm_to_vmem [thread:$0]  %s3409_s1, 256, %s18_s13, [#allocation3], %s2698_s22, %s2698_s22, %s2699_s23  }
  0x12   :  { %s2700_s26 = smov [#allocation4]   ;;  %s2671_s30 = scalar_lea.hbm %s3410_s2, 16 }
  0x13   :  { %s30_s27 = sshll.u32 %s2700_s26, 4  ;;  %p2672_p8 = scmp.ne.s32.totalorder %s3410_s2, %s2671_s30  ;;  %s31_s27 = int_to_ptr.vmem [resolvable:$true] %s30_s27 }
  0x14   :  { %p2675_p9 = scmp.lt.u32.totalorder %s2671_s30, %s3410_s2 }
  0x16   :  { %p2677_p10 = pnand %p2675_p9, %p2672_p8 }
  0x18   :  { %2680 = shalt.err (!%p2677_p10)
}
  0x19   :  { %s2681_s8 = scalar_lea.vmem %s31_s27, 16  ;;  %s2685_s1 = scalar_lea.vmem %s31_s27, 32 }
  0x1a   :  { %p2682_p11 = scmp.ne.s32.totalorder %s31_s27, %s2681_s8  ;;  %p2686_p12 = scmp.lt.s32.totalorder %s31_s27, %s31_s27 }
  0x1b   :  { %p2687_p13 = scmp.lt.s32.totalorder %s2685_s1, %s2681_s8 }
  0x1d   :  { %p2688_p0 = por %p2687_p13, %p2686_p12 }
  0x1f   :  { %p2689_p1 = pnand %p2688_p0, %p2682_p11 }
  0x21   :  { %2692 = shalt.err (!%p2689_p1)
}
  0x22   :  { %33 = dma.hbm_to_vmem [thread:$0]  %s3410_s2, 16, %s31_s27, [#allocation5]  }
  0x23   :  { %2693 = dma.done.wait [#allocation3], 256  }
  0x24   :  { %2694 = vsyncadd [#allocation3], 4294967040 }
  0x25   :  { %2695 = dma.done.wait [#allocation5], 16  }
  0x26   :  { %2696 = vsyncadd [#allocation5], 4294967280  ;;  %vm857_vm0 = vcmask 1043456   ;;  %vm858_vm1 = vcmask 1044480   ;;  %v2701_v0 = vmov 65535   ;;  %vm616_vm2 = vcmask 203776  }
  0x27   :  { %v859_v1 = vsel %vm857_vm0, 4294967295, %v2701_v0  ;;  %v2567_v2 = vld [vmem:[#allocation2] sm:$0xff]   ;;  %v2568_v4 = vld [vmem:[#allocation2 + $0x8] sm:$0x1f]   ;;  %v2573_v10 = vld [vmem:[%s3408_s0 + $0x10] sm:$0xff]  }
  0x28   :  { %v860_v3 = vsel %vm858_vm1, %v859_v1, 0  ;;  %2394 = vmatprep.subr.bf16.mxu0 %v2567_v2  ;;  %2558 = vmatprep.subr.bf16.mxu1 %v2567_v2  ;;  %v2569_v5 = vld [vmem:[%s3408_s0] sm:$0xff]   ;;  %v2570_v8 = vld [vmem:[%s3408_s0 + $0x8] sm:$0xff]   ;;  %v2575_v11 = vld [vmem:[%s3408_s0 + $0x150] sm:$0xff]  }
  0x29   :  { %2395 = vmatpush3.bf16.msra.mxu0 %v2567_v2  ;;  %2560 = vmatpush3.bf16.msra.mxu1 %v2567_v2  ;;  %v862_v6 = vand.u32 %v2568_v4, %v860_v3  ;;  %v2571_v7 = vld [vmem:[%s3408_s0 + $0x140] sm:$0xff]   ;;  %v2572_v9 = vld [vmem:[%s3408_s0 + $0x148] sm:$0xff]   ;;  %v2574_v12 = vld [vmem:[%s3408_s0 + $0x18] sm:$0xff]  }
  0x2a   :  { %2398 = vmatprep.mubr.msk.bf16.mxu0 %vm616_vm2, %v2569_v5  ;;  %2478 = vmatprep.mubr.msk.bf16.mxu1 %vm616_vm2, %v2571_v7  ;;  %v2576_v13 = vld [vmem:[%s3408_s0 + $0x158] sm:$0xff]   ;;  %v2577_v14 = vld [vmem:[%s3408_s0 + $0x20] sm:$0xff]   ;;  %v2578_v16 = vld [vmem:[%s3408_s0 + $0x28] sm:$0xff]  }
  0x2b   :  { %2396 = vmatprep.subr.bf16.mxu0 %v862_v6  ;;  %2559 = vmatprep.subr.bf16.mxu1 %v862_v6  ;;  %v2579_v15 = vld [vmem:[%s3408_s0 + $0x160] sm:$0xff]   ;;  %v2580_v17 = vld [vmem:[%s3408_s0 + $0x168] sm:$0xff]   ;;  %v2581_v18 = vld [vmem:[%s3408_s0 + $0x30] sm:$0xff]  }
  0x2c   :  { %v2583_v19 = vld [vmem:[%s3408_s0 + $0x170] sm:$0xff]   ;;  %v2582_v20 = vld [vmem:[%s3408_s0 + $0x38] sm:$0xff]   ;;  %v2585_v22 = vld [vmem:[%s3408_s0 + $0x40] sm:$0xff]  }
  0x2d   :  { %2397 = vmatpush3.bf16.msra.mxu0 %v862_v6  ;;  %2561 = vmatpush3.bf16.msra.mxu1 %v862_v6  ;;  %v2584_v21 = vld [vmem:[%s3408_s0 + $0x178] sm:$0xff]   ;;  %v2587_v23 = vld [vmem:[%s3408_s0 + $0x180] sm:$0xff]   ;;  %v2586_v24 = vld [vmem:[%s3408_s0 + $0x48] sm:$0xff]  }
  0x2e   :  { %v2588_v25 = vld [vmem:[%s3408_s0 + $0x188] sm:$0xff]   ;;  %v2589_v26 = vld [vmem:[%s3408_s0 + $0x50] sm:$0xff]   ;;  %v2590_v28 = vld [vmem:[%s3408_s0 + $0x58] sm:$0xff]  }
  0x2f   :  { %v2591_v27 = vld [vmem:[%s3408_s0 + $0x190] sm:$0xff]   ;;  %v2592_v29 = vld [vmem:[%s3408_s0 + $0x198] sm:$0xff]   ;;  %v2593_v30 = vld [vmem:[%s3408_s0 + $0x60] sm:$0xff]  }
  0x30   :  { %2399 = vmatmul.mubr.msk.bf16.vlgmr.msra.gmra.mrb[0].mxu0 %vm616_vm2, %v2570_v8  ;;  %2479 = vmatmul.mubr.msk.bf16.vlgmr.msra.gmra.mrb[0].mxu1 %vm616_vm2, %v2572_v9  ;;  %v2595_v31 = vld [vmem:[%s3408_s0 + $0x1a0] sm:$0xff]   ;;  %v2594_v32 = vld [vmem:[%s3408_s0 + $0x68] sm:$0xff]   ;;  %v2597_v34 = vld [vmem:[%s3408_s0 + $0x70] sm:$0xff]  }
  0x31   :  { %2402 = vmatprep.mubr.msk.bf16.mxu0 %vm616_vm2, %v2573_v10  ;;  %2482 = vmatprep.mubr.msk.bf16.mxu1 %vm616_vm2, %v2575_v11  ;;  %v2596_v33 = vld [vmem:[%s3408_s0 + $0x1a8] sm:$0xff]   ;;  %v2599_v35 = vld [vmem:[%s3408_s0 + $0x1b0] sm:$0xff]   ;;  %v2598_v36 = vld [vmem:[%s3408_s0 + $0x78] sm:$0xff]  }
  0x32   :  { %v2600_v37 = vld [vmem:[%s3408_s0 + $0x1b8] sm:$0xff]   ;;  %v2601_v38 = vld [vmem:[%s3408_s0 + $0x80] sm:$0xff]   ;;  %v2602_v40 = vld [vmem:[%s3408_s0 + $0x88] sm:$0xff]  }
  0x33   :  { %v2603_v39 = vld [vmem:[%s3408_s0 + $0x1c0] sm:$0xff]   ;;  %v2604_v41 = vld [vmem:[%s3408_s0 + $0x1c8] sm:$0xff]   ;;  %v2605_v42 = vld [vmem:[%s3408_s0 + $0x90] sm:$0xff]  }
  0x34   :  { %v2607_v43 = vld [vmem:[%s3408_s0 + $0x1d0] sm:$0xff]   ;;  %v2606_v44 = vld [vmem:[%s3408_s0 + $0x98] sm:$0xff]   ;;  %v2609_v46 = vld [vmem:[%s3408_s0 + $0xa0] sm:$0xff]  }
  0x35   :  { %v2608_v45 = vld [vmem:[%s3408_s0 + $0x1d8] sm:$0xff]   ;;  %v2611_v47 = vld [vmem:[%s3408_s0 + $0x1e0] sm:$0xff]   ;;  %v2610_v48 = vld [vmem:[%s3408_s0 + $0xa8] sm:$0xff]  }
  0x36   :  { %v2612_v49 = vld [vmem:[%s3408_s0 + $0x1e8] sm:$0xff]   ;;  %v2613_v50 = vld [vmem:[%s3408_s0 + $0xb0] sm:$0xff]   ;;  %v2614_v52 = vld [vmem:[%s3408_s0 + $0xb8] sm:$0xff]  }
  0x37   :  { %v2615_v51 = vld [vmem:[%s3408_s0 + $0x1f0] sm:$0xff]   ;;  %v2616_v53 = vld [vmem:[%s3408_s0 + $0x1f8] sm:$0xff]   ;;  %v2617_v54 = vld [vmem:[%s3408_s0 + $0xc0] sm:$0xff]  }
  0x38   :  { %2403 = vmatmul.mubr.msk.bf16.gmra.mrb[4].mxu0 %vm616_vm2, %v2574_v12  ;;  %2483 = vmatmul.mubr.msk.bf16.gmra.mrb[4].mxu1 %vm616_vm2, %v2576_v13  ;;  %v2619_v55 = vld [vmem:[%s3408_s0 + $0x200] sm:$0xff]   ;;  %v2618_v56 = vld [vmem:[%s3408_s0 + $0xc8] sm:$0xff]   ;;  %v2621_v58 = vld [vmem:[%s3408_s0 + $0xd0] sm:$0xff]  }
  0x39   :  { %2406 = vmatprep.mubr.msk.bf16.mxu0 %vm616_vm2, %v2577_v14  ;;  %2486 = vmatprep.mubr.msk.bf16.mxu1 %vm616_vm2, %v2579_v15  ;;  %v2620_v57 = vld [vmem:[%s3408_s0 + $0x208] sm:$0xff]   ;;  %v2623_v59 = vld [vmem:[%s3408_s0 + $0x210] sm:$0xff]   ;;  %v2622_v60 = vld [vmem:[%s3408_s0 + $0xd8] sm:$0xff]  }
  0x3a   :  { %v2624_v61 = vld [vmem:[%s3408_s0 + $0x218] sm:$0xff]   ;;  %v2625_v62 = vld [vmem:[%s3408_s0 + $0xe0] sm:$0xff]   ;;  %v2626_v0 = vld [vmem:[%s3408_s0 + $0xe8] sm:$0xff]  }
  0x3b   :  { %v2627_v63 = vld [vmem:[%s3408_s0 + $0x220] sm:$0xff]   ;;  %v2628_v1 = vld [vmem:[%s3408_s0 + $0x228] sm:$0xff]   ;;  %v2629_v2 = vld [vmem:[%s3408_s0 + $0xf0] sm:$0xff]  }
  0x3c   :  { %v2631_v3 = vld [vmem:[%s3408_s0 + $0x230] sm:$0xff]   ;;  %v2630_v4 = vld [vmem:[%s3408_s0 + $0xf8] sm:$0xff]   ;;  %v2633_v6 = vld [vmem:[%s3408_s0 + $0x100] sm:$0xff]  }
  0x3d   :  { %v2632_v5 = vld [vmem:[%s3408_s0 + $0x238] sm:$0xff]   ;;  %v2635_v7 = vld [vmem:[%s3408_s0 + $0x240] sm:$0xff]   ;;  %v2634_v8 = vld [vmem:[%s3408_s0 + $0x108] sm:$0xff]  }
  0x3e   :  { %v2636_v9 = vld [vmem:[%s3408_s0 + $0x248] sm:$0xff]   ;;  %v2637_v10 = vld [vmem:[%s3408_s0 + $0x110] sm:$0xff]   ;;  %v2638_v12 = vld [vmem:[%s3408_s0 + $0x118] sm:$0xff]  }
  0x3f   :  { %v2639_v11 = vld [vmem:[%s3408_s0 + $0x250] sm:$0xff]   ;;  %v2640_v13 = vld [vmem:[%s3408_s0 + $0x258] sm:$0xff]   ;;  %v2641_v14 = vld [vmem:[%s3408_s0 + $0x120] sm:$0xff]  }
  0x40   :  { %2407 = vmatmul.mubr.msk.bf16.gmra.mrb[8].mxu0 %vm616_vm2, %v2578_v16  ;;  %2487 = vmatmul.mubr.msk.bf16.gmra.mrb[8].mxu1 %vm616_vm2, %v2580_v17  ;;  %v2643_v15 = vld [vmem:[%s3408_s0 + $0x260] sm:$0xff]   ;;  %v2642_v16 = vld [vmem:[%s3408_s0 + $0x128] sm:$0xff]  }
  0x41   :  { %2410 = vmatprep.mubr.msk.bf16.mxu0 %vm616_vm2, %v2581_v18  ;;  %2490 = vmatprep.mubr.msk.bf16.mxu1 %vm616_vm2, %v2583_v19  ;;  %v2644_v17 = vld [vmem:[%s3408_s0 + $0x268] sm:$0xff]   ;;  %v2645_v18 = vld [vmem:[%s3408_s0 + $0x130] sm:$0xff]  }
  0x42   :  { %v2647_v19 = vld [vmem:[%s3408_s0 + $0x270] sm:$0xff]  }
  0x48   :  { %2411 = vmatmul.mubr.msk.bf16.gmra.mrb[12].mxu0 %vm616_vm2, %v2582_v20  ;;  %2491 = vmatmul.mubr.msk.bf16.gmra.mrb[12].mxu1 %vm616_vm2, %v2584_v21  ;;  %v2646_v20 = vld [vmem:[%s3408_s0 + $0x138] sm:$0xff]  }
  0x49   :  { %2414 = vmatprep.mubr.msk.bf16.mxu0 %vm616_vm2, %v2585_v22  ;;  %2494 = vmatprep.mubr.msk.bf16.mxu1 %vm616_vm2, %v2587_v23  ;;  %v2648_v21 = vld [vmem:[%s3408_s0 + $0x278] sm:$0xff]  }
  0x50   :  { %2415 = vmatmul.mubr.msk.bf16.gmra.mrb[16].mxu0 %vm616_vm2, %v2586_v24  ;;  %2495 = vmatmul.mubr.msk.bf16.gmra.mrb[16].mxu1 %vm616_vm2, %v2588_v25 }
  0x51   :  { %2418 = vmatprep.mubr.msk.bf16.mxu0 %vm616_vm2, %v2589_v26  ;;  %2498 = vmatprep.mubr.msk.bf16.mxu1 %vm616_vm2, %v2591_v27 }
  0x58   :  { %2419 = vmatmul.mubr.msk.bf16.gmra.mrb[20].mxu0 %vm616_vm2, %v2590_v28  ;;  %2499 = vmatmul.mubr.msk.bf16.gmra.mrb[20].mxu1 %vm616_vm2, %v2592_v29 }
  0x59   :  { %2422 = vmatprep.mubr.msk.bf16.mxu0 %vm616_vm2, %v2593_v30  ;;  %2502 = vmatprep.mubr.msk.bf16.mxu1 %vm616_vm2, %v2595_v31 }
  0x60   :  { %2423 = vmatmul.mubr.msk.bf16.gmra.mrb[24].mxu0 %vm616_vm2, %v2594_v32  ;;  %2503 = vmatmul.mubr.msk.bf16.gmra.mrb[24].mxu1 %vm616_vm2, %v2596_v33 }
  0x61   :  { %2426 = vmatprep.mubr.msk.bf16.mxu0 %vm616_vm2, %v2597_v34  ;;  %2506 = vmatprep.mubr.msk.bf16.mxu1 %vm616_vm2, %v2599_v35 }
  0x68   :  { %2427 = vmatmul.mubr.msk.bf16.gmra.mrb[28].mxu0 %vm616_vm2, %v2598_v36  ;;  %2507 = vmatmul.mubr.msk.bf16.gmra.mrb[28].mxu1 %vm616_vm2, %v2600_v37 }
  0x69   :  { %2430 = vmatprep.mubr.msk.bf16.mxu0 %vm616_vm2, %v2601_v38  ;;  %2510 = vmatprep.mubr.msk.bf16.mxu1 %vm616_vm2, %v2603_v39 }
  0x70   :  { %2431 = vmatmul.mubr.msk.bf16.gmra.mrb[32].mxu0 %vm616_vm2, %v2602_v40  ;;  %2511 = vmatmul.mubr.msk.bf16.gmra.mrb[32].mxu1 %vm616_vm2, %v2604_v41 }
  0x71   :  { %2434 = vmatprep.mubr.msk.bf16.mxu0 %vm616_vm2, %v2605_v42  ;;  %2514 = vmatprep.mubr.msk.bf16.mxu1 %vm616_vm2, %v2607_v43 }
  0x78   :  { %2435 = vmatmul.mubr.msk.bf16.gmra.mrb[36].mxu0 %vm616_vm2, %v2606_v44  ;;  %2515 = vmatmul.mubr.msk.bf16.gmra.mrb[36].mxu1 %vm616_vm2, %v2608_v45 }
  0x79   :  { %2438 = vmatprep.mubr.msk.bf16.mxu0 %vm616_vm2, %v2609_v46  ;;  %2518 = vmatprep.mubr.msk.bf16.mxu1 %vm616_vm2, %v2611_v47 }
  0x80   :  { %2439 = vmatmul.mubr.msk.bf16.gmra.mrb[40].mxu0 %vm616_vm2, %v2610_v48  ;;  %2519 = vmatmul.mubr.msk.bf16.gmra.mrb[40].mxu1 %vm616_vm2, %v2612_v49 }
  0x81   :  { %2442 = vmatprep.mubr.msk.bf16.mxu0 %vm616_vm2, %v2613_v50  ;;  %2522 = vmatprep.mubr.msk.bf16.mxu1 %vm616_vm2, %v2615_v51 }
  0x88   :  { %2443 = vmatmul.mubr.msk.bf16.gmra.mrb[44].mxu0 %vm616_vm2, %v2614_v52  ;;  %2523 = vmatmul.mubr.msk.bf16.gmra.mrb[44].mxu1 %vm616_vm2, %v2616_v53 }
  0x89   :  { %2446 = vmatprep.mubr.msk.bf16.mxu0 %vm616_vm2, %v2617_v54  ;;  %2526 = vmatprep.mubr.msk.bf16.mxu1 %vm616_vm2, %v2619_v55 }
  0x90   :  { %2447 = vmatmul.mubr.msk.bf16.gmra.mrb[48].mxu0 %vm616_vm2, %v2618_v56  ;;  %2527 = vmatmul.mubr.msk.bf16.gmra.mrb[48].mxu1 %vm616_vm2, %v2620_v57 }
  0x91   :  { %2450 = vmatprep.mubr.msk.bf16.mxu0 %vm616_vm2, %v2621_v58  ;;  %2530 = vmatprep.mubr.msk.bf16.mxu1 %vm616_vm2, %v2623_v59 }
  0x98   :  { %2451 = vmatmul.mubr.msk.bf16.gmra.mrb[52].mxu0 %vm616_vm2, %v2622_v60  ;;  %2531 = vmatmul.mubr.msk.bf16.gmra.mrb[52].mxu1 %vm616_vm2, %v2624_v61 }
  0x99   :  { %2454 = vmatprep.mubr.msk.bf16.mxu0 %vm616_vm2, %v2625_v62  ;;  %2534 = vmatprep.mubr.msk.bf16.mxu1 %vm616_vm2, %v2627_v63 }
  0xa0   :  { %2455 = vmatmul.mubr.msk.bf16.gmra.mrb[56].mxu0 %vm616_vm2, %v2626_v0  ;;  %2535 = vmatmul.mubr.msk.bf16.gmra.mrb[56].mxu1 %vm616_vm2, %v2628_v1 }
  0xa1   :  { %2458 = vmatprep.mubr.msk.bf16.mxu0 %vm616_vm2, %v2629_v2  ;;  %2538 = vmatprep.mubr.msk.bf16.mxu1 %vm616_vm2, %v2631_v3 }
  0xa8   :  { %2459 = vmatmul.mubr.msk.bf16.gmra.mrb[60].mxu0 %vm616_vm2, %v2630_v4  ;;  %2539 = vmatmul.mubr.msk.bf16.gmra.mrb[60].mxu1 %vm616_vm2, %v2632_v5 }
  0xa9   :  { %2462 = vmatprep.mubr.msk.bf16.mxu0 %vm616_vm2, %v2633_v6  ;;  %2542 = vmatprep.mubr.msk.bf16.mxu1 %vm616_vm2, %v2635_v7 }
  0xb0   :  { %2463 = vmatmul.mubr.msk.bf16.gmra.mrb[64].mxu0 %vm616_vm2, %v2634_v8  ;;  %2543 = vmatmul.mubr.msk.bf16.gmra.mrb[64].mxu1 %vm616_vm2, %v2636_v9 }
  0xb1   :  { %2466 = vmatprep.mubr.msk.bf16.mxu0 %vm616_vm2, %v2637_v10  ;;  %2546 = vmatprep.mubr.msk.bf16.mxu1 %vm616_vm2, %v2639_v11 }
  0xb8   :  { %2467 = vmatmul.mubr.msk.bf16.gmra.mrb[68].mxu0 %vm616_vm2, %v2638_v12  ;;  %2547 = vmatmul.mubr.msk.bf16.gmra.mrb[68].mxu1 %vm616_vm2, %v2640_v13 }
  0xb9   :  { %2470 = vmatprep.mubr.msk.bf16.mxu0 %vm616_vm2, %v2641_v14  ;;  %2550 = vmatprep.mubr.msk.bf16.mxu1 %vm616_vm2, %v2643_v15 }
  0xc0   :  { %2471 = vmatmul.mubr.msk.bf16.gmra.mrb[72].mxu0 %vm616_vm2, %v2642_v16  ;;  %2551 = vmatmul.mubr.msk.bf16.gmra.mrb[72].mxu1 %vm616_vm2, %v2644_v17 }
  0xc1   :  { %2474 = vmatprep.mubr.msk.bf16.mxu0 %vm616_vm2, %v2645_v18  ;;  %2554 = vmatprep.mubr.msk.bf16.mxu1 %vm616_vm2, %v2647_v19 }
  0xc8   :  { %2475 = vmatmul.mubr.msk.bf16.gmra.mrb[76].mxu0 %vm616_vm2, %v2646_v20  ;;  %2555 = vmatmul.mubr.msk.bf16.gmra.mrb[76].mxu1 %vm616_vm2, %v2648_v21 }
 0x103   :  { %v3066_v22 = vpop.f32.mrb[0].mxu0  ;;  %v3068_v23 = vpop.f32.mrb[0].mxu1 }
 0x104   :  { %v3070_v24 = vpop.f32.mrb[1].mxu0  ;;  %v3072_v25 = vpop.f32.mrb[1].mxu1 }
 0x105   :  { %v3074_v26 = vpop.f32.mrb[2].mxu0  ;;  %v3076_v27 = vpop.f32.mrb[2].mxu1 }
 0x106   :  { %v3078_v28 = vpop.f32.mrb[3].mxu0  ;;  %v3080_v29 = vpop.f32.mrb[3].mxu1 }
 0x10b   :  { %v3082_v30 = vpop.f32.mrb[4].mxu0  ;;  %v3084_v31 = vpop.f32.mrb[4].mxu1 }
 0x10c   :  { %v3086_v32 = vpop.f32.mrb[5].mxu0  ;;  %v3088_v33 = vpop.f32.mrb[5].mxu1 }
 0x10d   :  { %v3090_v34 = vpop.f32.mrb[6].mxu0  ;;  %v3092_v35 = vpop.f32.mrb[6].mxu1 }
 0x10e   :  { %v3094_v36 = vpop.f32.mrb[7].mxu0  ;;  %v3096_v37 = vpop.f32.mrb[7].mxu1 }
 0x113   :  { %v3098_v38 = vpop.f32.mrb[8].mxu0  ;;  %v3100_v39 = vpop.f32.mrb[8].mxu1 }
 0x114   :  { %v3102_v40 = vpop.f32.mrb[9].mxu0  ;;  %v3104_v41 = vpop.f32.mrb[9].mxu1 }
 0x115   :  { %v3106_v42 = vpop.f32.mrb[10].mxu0  ;;  %v3108_v43 = vpop.f32.mrb[10].mxu1 }
 0x116   :  { %v3110_v44 = vpop.f32.mrb[11].mxu0  ;;  %v3112_v45 = vpop.f32.mrb[11].mxu1 }
 0x11b   :  { %v3114_v46 = vpop.f32.mrb[12].mxu0  ;;  %v3116_v47 = vpop.f32.mrb[12].mxu1 }
 0x11c   :  { %v3118_v48 = vpop.f32.mrb[13].mxu0  ;;  %v3120_v49 = vpop.f32.mrb[13].mxu1 }
 0x11d   :  { %v3122_v50 = vpop.f32.mrb[14].mxu0  ;;  %v3124_v51 = vpop.f32.mrb[14].mxu1 }
 0x11e   :  { %v3126_v52 = vpop.f32.mrb[15].mxu0  ;;  %v3128_v53 = vpop.f32.mrb[15].mxu1 }
 0x123   :  { %v3130_v54 = vpop.f32.mrb[16].mxu0  ;;  %v3132_v55 = vpop.f32.mrb[16].mxu1 }
 0x124   :  { %v3134_v56 = vpop.f32.mrb[17].mxu0  ;;  %v3136_v57 = vpop.f32.mrb[17].mxu1 }
 0x125   :  { %v3138_v58 = vpop.f32.mrb[18].mxu0  ;;  %v3140_v59 = vpop.f32.mrb[18].mxu1 }
 0x126   :  { %v3142_v60 = vpop.f32.mrb[19].mxu0  ;;  %v3144_v61 = vpop.f32.mrb[19].mxu1 }
 0x12b   :  { %v3146_v62 = vpop.f32.mrb[20].mxu0  ;;  %v3148_v63 = vpop.f32.mrb[20].mxu1 }
 0x12c   :  { %v3150_v0 = vpop.f32.mrb[21].mxu0  ;;  %v3152_v1 = vpop.f32.mrb[21].mxu1 }
 0x12d   :  { %v3154_v2 = vpop.f32.mrb[22].mxu0  ;;  %v3156_v3 = vpop.f32.mrb[22].mxu1 }
 0x12e   :  { %3412 = vst [vmem:[#allocation8_spill] sm:$0xff] %v3156_v3  ;;  %v3158_v4 = vpop.f32.mrb[23].mxu0  ;;  %v3160_v5 = vpop.f32.mrb[23].mxu1 }
 0x12f   :  { %3413 = vst [vmem:[#allocation9_spill] sm:$0xff] %v3160_v5 }
 0x133   :  { %v3162_v6 = vpop.f32.mrb[24].mxu0  ;;  %v3164_v7 = vpop.f32.mrb[24].mxu1 }
 0x134   :  { %3414 = vst [vmem:[#allocation10_spill] sm:$0xff] %v3162_v6  ;;  %3415 = vst [vmem:[#allocation11_spill] sm:$0xff] %v3164_v7  ;;  %v3166_v8 = vpop.f32.mrb[25].mxu0  ;;  %v3168_v9 = vpop.f32.mrb[25].mxu1 }
 0x135   :  { %3416 = vst [vmem:[#allocation12_spill] sm:$0xff] %v3166_v8  ;;  %3417 = vst [vmem:[#allocation13_spill] sm:$0xff] %v3168_v9  ;;  %v3170_v10 = vpop.f32.mrb[26].mxu0  ;;  %v3172_v11 = vpop.f32.mrb[26].mxu1  ;;  %v3230_v8 = vld [vmem:[#allocation4] ss:$0 sm:$0xff] }
 0x136   :  { %3418 = vst [vmem:[#allocation14_spill] sm:$0xff] %v3170_v10  ;;  %3419 = vst [vmem:[#allocation15_spill] sm:$0xff] %v3172_v11  ;;  %v3174_v12 = vpop.f32.mrb[27].mxu0  ;;  %v3176_v13 = vpop.f32.mrb[27].mxu1 }
 0x137   :  { %3420 = vst [vmem:[#allocation16_spill] sm:$0xff] %v3174_v12  ;;  %3421 = vst [vmem:[#allocation17_spill] sm:$0xff] %v3176_v13 }
 0x13b   :  { %v3178_v14 = vpop.f32.mrb[28].mxu0  ;;  %v3180_v15 = vpop.f32.mrb[28].mxu1 }
 0x13c   :  { %3422 = vst [vmem:[#allocation18_spill] sm:$0xff] %v3178_v14  ;;  %3423 = vst [vmem:[#allocation19_spill] sm:$0xff] %v3180_v15  ;;  %v3182_v16 = vpop.f32.mrb[29].mxu0  ;;  %v3184_v17 = vpop.f32.mrb[29].mxu1 }
 0x13d   :  { %3424 = vst [vmem:[#allocation20_spill] sm:$0xff] %v3182_v16  ;;  %3425 = vst [vmem:[#allocation21_spill] sm:$0xff] %v3184_v17  ;;  %v3186_v18 = vpop.f32.mrb[30].mxu0  ;;  %v3188_v19 = vpop.f32.mrb[30].mxu1 }
 0x13e   :  { %3426 = vst [vmem:[#allocation22_spill] sm:$0xff] %v3186_v18  ;;  %3427 = vst [vmem:[#allocation23_spill] sm:$0xff] %v3188_v19  ;;  %v3190_v20 = vpop.f32.mrb[31].mxu0  ;;  %v3192_v21 = vpop.f32.mrb[31].mxu1 }
 0x13f   :  { %3428 = vst [vmem:[#allocation24_spill] sm:$0xff] %v3190_v20  ;;  %3429 = vst [vmem:[#allocation25_spill] sm:$0xff] %v3192_v21 }
 0x143   :  { %v3194_v11 = vpop.f32.mrb[32].mxu0  ;;  %v3196_v12 = vpop.f32.mrb[32].mxu1 }
 0x144   :  { %3430 = vst [vmem:[#allocation26_spill] sm:$0xff] %v3194_v11  ;;  %3431 = vst [vmem:[#allocation27_spill] sm:$0xff] %v3196_v12  ;;  %v3198_v13 = vpop.f32.mrb[33].mxu0  ;;  %v3200_v14 = vpop.f32.mrb[33].mxu1 }
 0x145   :  { %3432 = vst [vmem:[#allocation28_spill] sm:$0xff] %v3198_v13  ;;  %3433 = vst [vmem:[#allocation29_spill] sm:$0xff] %v3200_v14  ;;  %v3202_v15 = vpop.f32.mrb[34].mxu0  ;;  %v3204_v16 = vpop.f32.mrb[34].mxu1 }
 0x146   :  { %3434 = vst [vmem:[#allocation30_spill] sm:$0xff] %v3202_v15  ;;  %3435 = vst [vmem:[#allocation31_spill] sm:$0xff] %v3204_v16  ;;  %v3206_v17 = vpop.f32.mrb[35].mxu0  ;;  %v3208_v18 = vpop.f32.mrb[35].mxu1 }
 0x147   :  { %3436 = vst [vmem:[#allocation32_spill] sm:$0xff] %v3206_v17  ;;  %3437 = vst [vmem:[#allocation33_spill] sm:$0xff] %v3208_v18 }
 0x14b   :  { %v3210_v19 = vpop.f32.mrb[36].mxu0  ;;  %v3212_v20 = vpop.f32.mrb[36].mxu1 }
 0x14c   :  { %3438 = vst [vmem:[#allocation34_spill] sm:$0xff] %v3210_v19  ;;  %3439 = vst [vmem:[#allocation35_spill] sm:$0xff] %v3212_v20  ;;  %v3214_v21 = vpop.f32.mrb[37].mxu0  ;;  %v3216_v11 = vpop.f32.mrb[37].mxu1 }
 0x14d   :  { %3440 = vst [vmem:[#allocation36_spill] sm:$0xff] %v3214_v21  ;;  %3441 = vst [vmem:[#allocation37_spill] sm:$0xff] %v3216_v11  ;;  %v3218_v12 = vpop.f32.mrb[38].mxu0  ;;  %v3220_v13 = vpop.f32.mrb[38].mxu1 }
 0x14e   :  { %3442 = vst [vmem:[#allocation38_spill] sm:$0xff] %v3218_v12  ;;  %3443 = vst [vmem:[#allocation39_spill] sm:$0xff] %v3220_v13  ;;  %v3222_v14 = vpop.f32.mrb[39].mxu0  ;;  %v3224_v15 = vpop.f32.mrb[39].mxu1 }
 0x14f   :  { %3444 = vst [vmem:[#allocation40_spill] sm:$0xff] %v3222_v14  ;;  %3445 = vst [vmem:[#allocation41_spill] sm:$0xff] %v3224_v15 }
 0x153   :  { %v2440_v16 = vpop.f32.mrb[40].mxu0  ;;  %v2520_v17 = vpop.f32.mrb[40].mxu1 }
 0x154   :  { %v1543_v18 = vmax.f32 %v3066_v22, %v2440_v16  ;;  %v1058_v9 = vpop.f32.mrb[41].mxu0  ;;  %v1378_v19 = vpop.f32.mrb[41].mxu1 }
 0x155   :  { %v1537_v20 = vmax.f32 %v3070_v24, %v1058_v9  ;;  %v2441_v10 = vpop.f32.mrb[42].mxu0  ;;  %v2521_v21 = vpop.f32.mrb[42].mxu1 }
 0x156   :  { %v1544_v11 = vmax.f32 %v1543_v18, %v3068_v23  ;;  %v1546_v12 = vmax.f32 %v3074_v26, %v2441_v10  ;;  %v1061_v7 = vpop.f32.mrb[43].mxu0  ;;  %v1381_v13 = vpop.f32.mrb[43].mxu1 }
 0x157   :  { %v1538_v15 = vmax.f32 %v1537_v20, %v3072_v25  ;;  %v1540_v14 = vmax.f32 %v3078_v28, %v1061_v7 }
 0x158   :  { %v1545_v6 = vmax.f32 %v1544_v11, %v2520_v17  ;;  %v1547_v22 = vmax.f32 %v1546_v12, %v3076_v27 }
 0x159   :  { %v1539_v16 = vmax.f32 %v1538_v15, %v1378_v19  ;;  %v1541_v24 = vmax.f32 %v1540_v14, %v3080_v29 }
 0x15a   :  { %v1666_v9 = vadd.f32 %v3230_v8, %v1545_v6  ;;  %v1548_v5 = vmax.f32 %v1547_v22, %v2521_v21 }
 0x15b   :  { %v1664_v23 = vadd.f32 %v3230_v8, %v1539_v16  ;;  %v1542_v26 = vmax.f32 %v1541_v24, %v1381_v13  ;;  %v2444_v10 = vpop.f32.mrb[44].mxu0  ;;  %v2524_v18 = vpop.f32.mrb[44].mxu1 }
 0x15c   :  { %v1667_v3 = vadd.f32 %v3230_v8, %v1548_v5  ;;  %v1555_v25 = vmax.f32 %v3082_v30, %v2444_v10  ;;  %v1074_v20 = vpop.f32.mrb[45].mxu0  ;;  %v1394_v28 = vpop.f32.mrb[45].mxu1  ;;  %v1706_v12 = vmax.f32 %v1666_v9, 0.0 }
 0x15d   :  { %v1665_v7 = vadd.f32 %v3230_v8, %v1542_v26  ;;  %v1549_v27 = vmax.f32 %v3086_v32, %v1074_v20  ;;  %v2445_v11 = vpop.f32.mrb[46].mxu0  ;;  %v2525_v29 = vpop.f32.mrb[46].mxu1  ;;  %v1704_v19 = vmax.f32 %v1664_v23, 0.0 }
 0x15e   :  { %v1707_v6 = vmax.f32 %v1667_v3, 0.0  ;;  %v1556_v14 = vmax.f32 %v1555_v25, %v3084_v31  ;;  %v1558_v13 = vmax.f32 %v3090_v34, %v2445_v11  ;;  %v1077_v15 = vpop.f32.mrb[47].mxu0  ;;  %v1397_v17 = vpop.f32.mrb[47].mxu1 }
 0x15f   :  { %v1705_v5 = vmax.f32 %v1665_v7, 0.0  ;;  %v1550_v30 = vmax.f32 %v1549_v27, %v3088_v33  ;;  %v1552_v21 = vmax.f32 %v3094_v36, %v1077_v15 }
 0x160   :  { %v2201_v22 = vpack.c.bf16 %v1707_v6, %v1706_v12  ;;  %v1557_v16 = vmax.f32 %v1556_v14, %v2524_v18  ;;  %v1559_v32 = vmax.f32 %v1558_v13, %v3092_v35 }
 0x161   :  { %v2196_v24 = vpack.c.bf16 %v1705_v5, %v1704_v19  ;;  %v1551_v26 = vmax.f32 %v1550_v30, %v1394_v28  ;;  %v1553_v3 = vmax.f32 %v1552_v21, %v3096_v37 }
 0x162   :  { %2293 = vst [vmem:[%s3411_s3 + $0x8] sm:$0xff] %v2201_v22   ;;  %v1670_v31 = vadd.f32 %v3230_v8, %v1557_v16  ;;  %v1560_v34 = vmax.f32 %v1559_v32, %v2525_v29 }
 0x163   :  { %2197 = vst [vmem:[%s3411_s3] sm:$0xff] %v2196_v24   ;;  %v1668_v33 = vadd.f32 %v3230_v8, %v1551_v26  ;;  %v1554_v36 = vmax.f32 %v1553_v3, %v1397_v17  ;;  %v2448_v9 = vpop.f32.mrb[48].mxu0  ;;  %v2528_v35 = vpop.f32.mrb[48].mxu1 }
 0x164   :  { %v1671_v23 = vadd.f32 %v3230_v8, %v1560_v34  ;;  %v1567_v37 = vmax.f32 %v3098_v38, %v2448_v9  ;;  %v1090_v10 = vpop.f32.mrb[49].mxu0  ;;  %v1410_v18 = vpop.f32.mrb[49].mxu1  ;;  %v1710_v27 = vmax.f32 %v1670_v31, 0.0 }
 0x165   :  { %v1669_v25 = vadd.f32 %v3230_v8, %v1554_v36  ;;  %v1561_v20 = vmax.f32 %v3102_v40, %v1090_v10  ;;  %v2449_v28 = vpop.f32.mrb[50].mxu0  ;;  %v2529_v7 = vpop.f32.mrb[50].mxu1  ;;  %v1708_v13 = vmax.f32 %v1668_v33, 0.0 }
 0x166   :  { %v1711_v11 = vmax.f32 %v1671_v23, 0.0  ;;  %v1568_v29 = vmax.f32 %v1567_v37, %v3100_v39  ;;  %v1570_v12 = vmax.f32 %v3106_v42, %v2449_v28  ;;  %v1093_v6 = vpop.f32.mrb[51].mxu0  ;;  %v1413_v14 = vpop.f32.mrb[51].mxu1 }
 0x167   :  { %v1709_v15 = vmax.f32 %v1669_v25, 0.0  ;;  %v1562_v38 = vmax.f32 %v1561_v20, %v3104_v41  ;;  %v1564_v17 = vmax.f32 %v3110_v44, %v1093_v6 }
 0x168   :  { %v2211_v19 = vpack.c.bf16 %v1711_v11, %v1710_v27  ;;  %v1569_v5 = vmax.f32 %v1568_v29, %v2528_v35  ;;  %v1571_v40 = vmax.f32 %v1570_v12, %v3108_v43 }
 0x169   :  { %v2206_v30 = vpack.c.bf16 %v1709_v15, %v1708_v13  ;;  %v1563_v21 = vmax.f32 %v1562_v38, %v1410_v18  ;;  %v1565_v22 = vmax.f32 %v1564_v17, %v3112_v45 }
 0x16a   :  { %2295 = vst [vmem:[%s3411_s3 + $0x18] sm:$0xff] %v2211_v19   ;;  %v1674_v39 = vadd.f32 %v3230_v8, %v1569_v5  ;;  %v1572_v42 = vmax.f32 %v1571_v40, %v2529_v7 }
 0x16b   :  { %2294 = vst [vmem:[%s3411_s3 + $0x10] sm:$0xff] %v2206_v30   ;;  %v1672_v41 = vadd.f32 %v3230_v8, %v1563_v21  ;;  %v1566_v44 = vmax.f32 %v1565_v22, %v1413_v14  ;;  %v2452_v16 = vpop.f32.mrb[52].mxu0  ;;  %v2532_v43 = vpop.f32.mrb[52].mxu1 }
 0x16c   :  { %v1675_v32 = vadd.f32 %v3230_v8, %v1572_v42  ;;  %v1579_v45 = vmax.f32 %v3114_v46, %v2452_v16  ;;  %v1106_v24 = vpop.f32.mrb[53].mxu0  ;;  %v1426_v26 = vpop.f32.mrb[53].mxu1  ;;  %v1714_v36 = vmax.f32 %v1674_v39, 0.0 }
 0x16d   :  { %v1673_v3 = vadd.f32 %v3230_v8, %v1566_v44  ;;  %v1573_v31 = vmax.f32 %v3118_v48, %v1106_v24  ;;  %v2453_v34 = vpop.f32.mrb[54].mxu0  ;;  %v2533_v33 = vpop.f32.mrb[54].mxu1  ;;  %v1712_v18 = vmax.f32 %v1672_v41, 0.0 }
 0x16e   :  { %v1715_v9 = vmax.f32 %v1675_v32, 0.0  ;;  %v1580_v35 = vmax.f32 %v1579_v45, %v3116_v47  ;;  %v1582_v23 = vmax.f32 %v3122_v50, %v2453_v34  ;;  %v1109_v37 = vpop.f32.mrb[55].mxu0  ;;  %v1429_v10 = vpop.f32.mrb[55].mxu1 }
 0x16f   :  { %v1713_v25 = vmax.f32 %v1673_v3, 0.0  ;;  %v1574_v46 = vmax.f32 %v1573_v31, %v3120_v49  ;;  %v1576_v20 = vmax.f32 %v3126_v52, %v1109_v37 }
 0x170   :  { %v2221_v28 = vpack.c.bf16 %v1715_v9, %v1714_v36  ;;  %v1581_v7 = vmax.f32 %v1580_v35, %v2532_v43  ;;  %v1583_v48 = vmax.f32 %v1582_v23, %v3124_v51 }
 0x171   :  { %v2216_v27 = vpack.c.bf16 %v1713_v25, %v1712_v18  ;;  %v1575_v11 = vmax.f32 %v1574_v46, %v1426_v26  ;;  %v1577_v29 = vmax.f32 %v1576_v20, %v3128_v53 }
 0x172   :  { %2297 = vst [vmem:[%s3411_s3 + $0x28] sm:$0xff] %v2221_v28   ;;  %v1678_v47 = vadd.f32 %v3230_v8, %v1581_v7  ;;  %v1584_v50 = vmax.f32 %v1583_v48, %v2533_v33 }
 0x173   :  { %2296 = vst [vmem:[%s3411_s3 + $0x20] sm:$0xff] %v2216_v27   ;;  %v1676_v49 = vadd.f32 %v3230_v8, %v1575_v11  ;;  %v1578_v52 = vmax.f32 %v1577_v29, %v1429_v10  ;;  %v2456_v12 = vpop.f32.mrb[56].mxu0  ;;  %v2536_v51 = vpop.f32.mrb[56].mxu1  ;;  %v3446_v11 = vld [vmem:[#allocation8_spill] sm:$0xff] }
 0x174   :  { %v1679_v6 = vadd.f32 %v3230_v8, %v1584_v50  ;;  %v1591_v53 = vmax.f32 %v3130_v54, %v2456_v12  ;;  %v1122_v14 = vpop.f32.mrb[57].mxu0  ;;  %v1442_v13 = vpop.f32.mrb[57].mxu1  ;;  %v1718_v5 = vmax.f32 %v1678_v47, 0.0  ;;  %v3447_v50 = vld [vmem:[#allocation9_spill] sm:$0xff] }
 0x175   :  { %v1677_v15 = vadd.f32 %v3230_v8, %v1578_v52  ;;  %v1585_v38 = vmax.f32 %v3134_v56, %v1122_v14  ;;  %v2457_v17 = vpop.f32.mrb[58].mxu0  ;;  %v2537_v19 = vpop.f32.mrb[58].mxu1  ;;  %v1716_v42 = vmax.f32 %v1676_v49, 0.0 }
 0x176   :  { %v1719_v40 = vmax.f32 %v1679_v6, 0.0  ;;  %v1592_v30 = vmax.f32 %v1591_v53, %v3132_v55  ;;  %v1594_v21 = vmax.f32 %v3138_v58, %v2457_v17  ;;  %v1125_v22 = vpop.f32.mrb[59].mxu0  ;;  %v1445_v39 = vpop.f32.mrb[59].mxu1  ;;  %v3448_v6 = vld [vmem:[#allocation10_spill] sm:$0xff] }
 0x177   :  { %v1717_v41 = vmax.f32 %v1677_v15, 0.0  ;;  %v1586_v54 = vmax.f32 %v1585_v38, %v3136_v57  ;;  %v1588_v44 = vmax.f32 %v3142_v60, %v1125_v22  ;;  %v3449_v38 = vld [vmem:[#allocation12_spill] sm:$0xff] }
 0x178   :  { %v2231_v16 = vpack.c.bf16 %v1719_v40, %v1718_v5  ;;  %v1593_v43 = vmax.f32 %v1592_v30, %v2536_v51  ;;  %v1595_v56 = vmax.f32 %v1594_v21, %v3140_v59  ;;  %v3450_v21 = vld [vmem:[#allocation11_spill] sm:$0xff] }
 0x179   :  { %v2226_v32 = vpack.c.bf16 %v1717_v41, %v1716_v42  ;;  %v1587_v45 = vmax.f32 %v1586_v54, %v1442_v13  ;;  %v1589_v24 = vmax.f32 %v1588_v44, %v3144_v61 }
 0x17a   :  { %2299 = vst [vmem:[%s3411_s3 + $0x38] sm:$0xff] %v2231_v16   ;;  %v1682_v55 = vadd.f32 %v3230_v8, %v1593_v43  ;;  %v1596_v58 = vmax.f32 %v1595_v56, %v2537_v19  ;;  %v3452_v43 = vld [vmem:[#allocation13_spill] sm:$0xff] }
 0x17b   :  { %2298 = vst [vmem:[%s3411_s3 + $0x30] sm:$0xff] %v2226_v32   ;;  %v1680_v57 = vadd.f32 %v3230_v8, %v1587_v45  ;;  %v1590_v60 = vmax.f32 %v1589_v24, %v1445_v39  ;;  %v2460_v26 = vpop.f32.mrb[60].mxu0  ;;  %v2540_v59 = vpop.f32.mrb[60].mxu1  ;;  %v3451_v39 = vld [vmem:[#allocation14_spill] sm:$0xff]  ;;  %v3453_v32 = vld [vmem:[#allocation16_spill] sm:$0xff] }
 0x17c   :  { %v1683_v3 = vadd.f32 %v3230_v8, %v1596_v58  ;;  %v1603_v61 = vmax.f32 %v3146_v62, %v2460_v26  ;;  %v1138_v31 = vpop.f32.mrb[61].mxu0  ;;  %v1458_v34 = vpop.f32.mrb[61].mxu1  ;;  %v1722_v23 = vmax.f32 %v1682_v55, 0.0  ;;  %v3454_v58 = vld [vmem:[#allocation15_spill] sm:$0xff] }
 0x17d   :  { %v1681_v33 = vadd.f32 %v3230_v8, %v1590_v60  ;;  %v1597_v36 = vmax.f32 %v3150_v0, %v1138_v31  ;;  %v2461_v9 = vpop.f32.mrb[62].mxu0  ;;  %v2541_v35 = vpop.f32.mrb[62].mxu1  ;;  %v1720_v20 = vmax.f32 %v1680_v57, 0.0 }
 0x17e   :  { %v1723_v37 = vmax.f32 %v1683_v3, 0.0  ;;  %v1604_v10 = vmax.f32 %v1603_v61, %v3148_v63  ;;  %v1606_v18 = vmax.f32 %v3154_v2, %v2461_v9  ;;  %v1141_v25 = vpop.f32.mrb[63].mxu0  ;;  %v1461_v46 = vpop.f32.mrb[63].mxu1 }
 0x17f   :  { %v1721_v28 = vmax.f32 %v1681_v33, 0.0  ;;  %v1598_v62 = vmax.f32 %v1597_v36, %v3152_v1  ;;  %v1600_v7 = vmax.f32 %v3158_v4, %v1141_v25 }
 0x180   :  { %v2241_v48 = vpack.c.bf16 %v1723_v37, %v1722_v23  ;;  %v1605_v27 = vmax.f32 %v1604_v10, %v2540_v59  ;;  %v1607_v0 = vmax.f32 %v1606_v18, %v3446_v11  ;;  %v3455_v59 = vld [vmem:[#allocation17_spill] sm:$0xff]  ;;  %v3456_v23 = vld [vmem:[#allocation18_spill] sm:$0xff] }
 0x181   :  { %v2236_v29 = vpack.c.bf16 %v1721_v28, %v1720_v20  ;;  %v1599_v47 = vmax.f32 %v1598_v62, %v1458_v34  ;;  %v1601_v49 = vmax.f32 %v1600_v7, %v3447_v50 }
 0x182   :  { %2301 = vst [vmem:[%s3411_s3 + $0x48] sm:$0xff] %v2241_v48   ;;  %v1686_v63 = vadd.f32 %v3230_v8, %v1605_v27  ;;  %v1608_v2 = vmax.f32 %v1607_v0, %v2541_v35  ;;  %v3458_v27 = vld [vmem:[#allocation19_spill] sm:$0xff]  ;;  %v3459_v0 = vld [vmem:[#allocation22_spill] sm:$0xff] }
 0x183   :  { %2300 = vst [vmem:[%s3411_s3 + $0x40] sm:$0xff] %v2236_v29   ;;  %v1684_v1 = vadd.f32 %v3230_v8, %v1599_v47  ;;  %v1602_v4 = vmax.f32 %v1601_v49, %v1461_v46  ;;  %v2464_v52 = vpop.f32.mrb[64].mxu0  ;;  %v2544_v12 = vpop.f32.mrb[64].mxu1  ;;  %v3457_v46 = vld [vmem:[#allocation20_spill] sm:$0xff] }
 0x184   :  { %v1687_v51 = vadd.f32 %v3230_v8, %v1608_v2  ;;  %v1615_v53 = vmax.f32 %v3448_v6, %v2464_v52  ;;  %v1154_v14 = vpop.f32.mrb[65].mxu0  ;;  %v1474_v13 = vpop.f32.mrb[65].mxu1  ;;  %v1726_v40 = vmax.f32 %v1686_v63, 0.0  ;;  %v3460_v2 = vld [vmem:[#allocation21_spill] sm:$0xff]  ;;  %v3462_v6 = vld [vmem:[#allocation23_spill] sm:$0xff] }
 0x185   :  { %v1685_v15 = vadd.f32 %v3230_v8, %v1602_v4  ;;  %v1609_v17 = vmax.f32 %v3449_v38, %v1154_v14  ;;  %v2465_v19 = vpop.f32.mrb[66].mxu0  ;;  %v2545_v5 = vpop.f32.mrb[66].mxu1  ;;  %v1724_v44 = vmax.f32 %v1684_v1, 0.0  ;;  %v3461_v4 = vld [vmem:[#allocation24_spill] sm:$0xff] }
 0x186   :  { %v1727_v30 = vmax.f32 %v1687_v51, 0.0  ;;  %v1616_v22 = vmax.f32 %v1615_v53, %v3450_v21  ;;  %v1618_v42 = vmax.f32 %v3451_v39, %v2465_v19  ;;  %v1157_v41 = vpop.f32.mrb[67].mxu0  ;;  %v1477_v54 = vpop.f32.mrb[67].mxu1  ;;  %v3464_v39 = vld [vmem:[#allocation26_spill] sm:$0xff] }
 0x187   :  { %v1725_v16 = vmax.f32 %v1685_v15, 0.0  ;;  %v1610_v56 = vmax.f32 %v1609_v17, %v3452_v43  ;;  %v1612_v45 = vmax.f32 %v3453_v32, %v1157_v41  ;;  %v3463_v15 = vld [vmem:[#allocation25_spill] sm:$0xff] }
 0x188   :  { %v2251_v24 = vpack.c.bf16 %v1727_v30, %v1726_v40  ;;  %v1617_v55 = vmax.f32 %v1616_v22, %v2544_v12  ;;  %v1619_v57 = vmax.f32 %v1618_v42, %v3454_v58 }
 0x189   :  { %v2246_v60 = vpack.c.bf16 %v1725_v16, %v1724_v44  ;;  %v1611_v26 = vmax.f32 %v1610_v56, %v1474_v13  ;;  %v1613_v3 = vmax.f32 %v1612_v45, %v3455_v59  ;;  %v3465_v16 = vld [vmem:[#allocation28_spill] sm:$0xff] }
 0x18a   :  { %2303 = vst [vmem:[%s3411_s3 + $0x58] sm:$0xff] %v2251_v24   ;;  %v1690_v61 = vadd.f32 %v3230_v8, %v1617_v55  ;;  %v1620_v31 = vmax.f32 %v1619_v57, %v2545_v5  ;;  %v3466_v55 = vld [vmem:[#allocation27_spill] sm:$0xff]  ;;  %v3467_v57 = vld [vmem:[#allocation30_spill] sm:$0xff] }
 0x18b   :  { %2302 = vst [vmem:[%s3411_s3 + $0x50] sm:$0xff] %v2246_v60   ;;  %v1688_v34 = vadd.f32 %v3230_v8, %v1611_v26  ;;  %v1614_v33 = vmax.f32 %v1613_v3, %v1477_v54  ;;  %v2468_v36 = vpop.f32.mrb[68].mxu0  ;;  %v2548_v9 = vpop.f32.mrb[68].mxu1 }
 0x18c   :  { %v1691_v35 = vadd.f32 %v3230_v8, %v1620_v31  ;;  %v1627_v37 = vmax.f32 %v3456_v23, %v2468_v36  ;;  %v1170_v10 = vpop.f32.mrb[69].mxu0  ;;  %v1490_v18 = vpop.f32.mrb[69].mxu1  ;;  %v1730_v7 = vmax.f32 %v1690_v61, 0.0  ;;  %v3468_v31 = vld [vmem:[#allocation29_spill] sm:$0xff]  ;;  %v3470_v23 = vld [vmem:[#allocation31_spill] sm:$0xff] }
 0x18d   :  { %v1689_v25 = vadd.f32 %v3230_v8, %v1614_v33  ;;  %v1621_v20 = vmax.f32 %v3457_v46, %v1170_v10  ;;  %v2469_v28 = vpop.f32.mrb[70].mxu0  ;;  %v2549_v62 = vpop.f32.mrb[70].mxu1  ;;  %v1728_v49 = vmax.f32 %v1688_v34, 0.0  ;;  %v3469_v33 = vld [vmem:[#allocation32_spill] sm:$0xff] }
 0x18e   :  { %v1731_v48 = vmax.f32 %v1691_v35, 0.0  ;;  %v1628_v11 = vmax.f32 %v1627_v37, %v3458_v27  ;;  %v1630_v29 = vmax.f32 %v3459_v0, %v2469_v28  ;;  %v1173_v47 = vpop.f32.mrb[71].mxu0  ;;  %v1493_v50 = vpop.f32.mrb[71].mxu1  ;;  %v3472_v0 = vld [vmem:[#allocation34_spill] sm:$0xff] }
 0x18f   :  { %v1729_v63 = vmax.f32 %v1689_v25, 0.0  ;;  %v1622_v1 = vmax.f32 %v1621_v20, %v3460_v2  ;;  %v1624_v52 = vmax.f32 %v3461_v4, %v1173_v47  ;;  %v3471_v25 = vld [vmem:[#allocation33_spill] sm:$0xff] }
 0x190   :  { %v2261_v12 = vpack.c.bf16 %v1731_v48, %v1730_v7  ;;  %v1629_v51 = vmax.f32 %v1628_v11, %v2548_v9  ;;  %v1631_v53 = vmax.f32 %v1630_v29, %v3462_v6 }
 0x191   :  { %v2256_v14 = vpack.c.bf16 %v1729_v63, %v1728_v49  ;;  %v1623_v13 = vmax.f32 %v1622_v1, %v1490_v18  ;;  %v1625_v38 = vmax.f32 %v1624_v52, %v3463_v15  ;;  %v3473_v63 = vld [vmem:[#allocation36_spill] sm:$0xff] }
 0x192   :  { %2305 = vst [vmem:[%s3411_s3 + $0x68] sm:$0xff] %v2261_v12   ;;  %v1694_v17 = vadd.f32 %v3230_v8, %v1629_v51  ;;  %v1632_v19 = vmax.f32 %v1631_v53, %v2549_v62  ;;  %v3474_v51 = vld [vmem:[#allocation35_spill] sm:$0xff]  ;;  %v3475_v53 = vld [vmem:[#allocation38_spill] sm:$0xff] }
 0x193   :  { %2304 = vst [vmem:[%s3411_s3 + $0x60] sm:$0xff] %v2256_v14   ;;  %v1692_v5 = vadd.f32 %v3230_v8, %v1623_v13  ;;  %v1626_v40 = vmax.f32 %v1625_v38, %v1493_v50  ;;  %v2472_v30 = vpop.f32.mrb[72].mxu0  ;;  %v2552_v21 = vpop.f32.mrb[72].mxu1 }
 0x194   :  { %v1695_v22 = vadd.f32 %v3230_v8, %v1632_v19  ;;  %v1639_v42 = vmax.f32 %v3464_v39, %v2472_v30  ;;  %v1186_v41 = vpop.f32.mrb[73].mxu0  ;;  %v1506_v54 = vpop.f32.mrb[73].mxu1  ;;  %v1734_v45 = vmax.f32 %v1694_v17, 0.0  ;;  %v3476_v19 = vld [vmem:[#allocation37_spill] sm:$0xff]  ;;  %v3478_v39 = vld [vmem:[#allocation39_spill] sm:$0xff] }
 0x195   :  { %v1693_v44 = vadd.f32 %v3230_v8, %v1626_v40  ;;  %v1633_v43 = vmax.f32 %v3465_v16, %v1186_v41  ;;  %v2473_v56 = vpop.f32.mrb[74].mxu0  ;;  %v2553_v32 = vpop.f32.mrb[74].mxu1  ;;  %v1732_v3 = vmax.f32 %v1692_v5, 0.0  ;;  %v3477_v40 = vld [vmem:[#allocation40_spill] sm:$0xff] }
 0x196   :  { %v1735_v24 = vmax.f32 %v1695_v22, 0.0  ;;  %v1640_v58 = vmax.f32 %v1639_v42, %v3466_v55  ;;  %v1642_v60 = vmax.f32 %v3467_v57, %v2473_v56  ;;  %v1189_v26 = vpop.f32.mrb[75].mxu0  ;;  %v1509_v59 = vpop.f32.mrb[75].mxu1 }
 0x197   :  { %v1733_v61 = vmax.f32 %v1693_v44, 0.0  ;;  %v1634_v34 = vmax.f32 %v1633_v43, %v3468_v31  ;;  %v1636_v36 = vmax.f32 %v3469_v33, %v1189_v26  ;;  %v3479_v44 = vld [vmem:[#allocation41_spill] sm:$0xff] }
 0x198   :  { %v2271_v9 = vpack.c.bf16 %v1735_v24, %v1734_v45  ;;  %v1641_v35 = vmax.f32 %v1640_v58, %v2552_v21  ;;  %v1643_v37 = vmax.f32 %v1642_v60, %v3470_v23 }
 0x199   :  { %v2266_v10 = vpack.c.bf16 %v1733_v61, %v1732_v3  ;;  %v1635_v18 = vmax.f32 %v1634_v34, %v1506_v54  ;;  %v1637_v46 = vmax.f32 %v1636_v36, %v3471_v25 }
 0x19a   :  { %2307 = vst [vmem:[%s3411_s3 + $0x78] sm:$0xff] %v2271_v9   ;;  %v1698_v20 = vadd.f32 %v3230_v8, %v1641_v35  ;;  %v1644_v28 = vmax.f32 %v1643_v37, %v2553_v32 }
 0x19b   :  { %2306 = vst [vmem:[%s3411_s3 + $0x70] sm:$0xff] %v2266_v10   ;;  %v1696_v62 = vadd.f32 %v3230_v8, %v1635_v18  ;;  %v1638_v7 = vmax.f32 %v1637_v46, %v1509_v59  ;;  %v2476_v48 = vpop.f32.mrb[76].mxu0  ;;  %v2556_v27 = vpop.f32.mrb[76].mxu1 }
 0x19c   :  { %v1699_v11 = vadd.f32 %v3230_v8, %v1644_v28  ;;  %v1651_v29 = vmax.f32 %v3472_v0, %v2476_v48  ;;  %v1202_v47 = vpop.f32.mrb[77].mxu0  ;;  %v1522_v50 = vpop.f32.mrb[77].mxu1  ;;  %v1738_v52 = vmax.f32 %v1698_v20, 0.0 }
 0x19d   :  { %v1697_v49 = vadd.f32 %v3230_v8, %v1638_v7  ;;  %v1645_v2 = vmax.f32 %v3473_v63, %v1202_v47  ;;  %v2477_v1 = vpop.f32.mrb[78].mxu0  ;;  %v2557_v4 = vpop.f32.mrb[78].mxu1  ;;  %v1736_v38 = vmax.f32 %v1696_v62, 0.0 }
 0x19e   :  { %v1739_v12 = vmax.f32 %v1699_v11, 0.0  ;;  %v1652_v6 = vmax.f32 %v1651_v29, %v3474_v51  ;;  %v1654_v14 = vmax.f32 %v3475_v53, %v2477_v1  ;;  %v1205_v13 = vpop.f32.mrb[79].mxu0  ;;  %v1525_v15 = vpop.f32.mrb[79].mxu1 }
 0x19f   :  { %v1737_v17 = vmax.f32 %v1697_v49, 0.0  ;;  %v1646_v5 = vmax.f32 %v1645_v2, %v3476_v19  ;;  %v1648_v30 = vmax.f32 %v3477_v40, %v1205_v13 }
 0x1a0   :  { %v2281_v21 = vpack.c.bf16 %v1739_v12, %v1738_v52  ;;  %v1653_v22 = vmax.f32 %v1652_v6, %v2556_v27  ;;  %v1655_v42 = vmax.f32 %v1654_v14, %v3478_v39 }
 0x1a1   :  { %v2276_v41 = vpack.c.bf16 %v1737_v17, %v1736_v38  ;;  %v1647_v54 = vmax.f32 %v1646_v5, %v1522_v50  ;;  %v1649_v16 = vmax.f32 %v1648_v30, %v3479_v44 }
 0x1a2   :  { %2309 = vst [vmem:[%s3411_s3 + $0x88] sm:$0xff] %v2281_v21   ;;  %v1702_v43 = vadd.f32 %v3230_v8, %v1653_v22  ;;  %v1656_v56 = vmax.f32 %v1655_v42, %v2557_v4 }
 0x1a3   :  { %2308 = vst [vmem:[%s3411_s3 + $0x80] sm:$0xff] %v2276_v41   ;;  %v1700_v32 = vadd.f32 %v3230_v8, %v1647_v54  ;;  %v1650_v45 = vmax.f32 %v1649_v16, %v1525_v15 }
 0x1a4   :  { %v1703_v24 = vadd.f32 %v3230_v8, %v1656_v56  ;;  %v1742_v58 = vmax.f32 %v1702_v43, 0.0 }
 0x1a5   :  { %v1701_v55 = vadd.f32 %v3230_v8, %v1650_v45  ;;  %v1740_v60 = vmax.f32 %v1700_v32, 0.0 }
 0x1a6   :  { %v1743_v57 = vmax.f32 %v1703_v24, 0.0 }
 0x1a7   :  { %v1741_v26 = vmax.f32 %v1701_v55, 0.0 }
 0x1a8   :  { %v2291_v59 = vpack.c.bf16 %v1743_v57, %v1742_v58 }
 0x1a9   :  { %v2286_v3 = vpack.c.bf16 %v1741_v26, %v1740_v60 }
 0x1aa   :  { %2311 = vst [vmem:[%s3411_s3 + $0x98] sm:$0xff] %v2291_v59  }
 0x1ab   :  { %2310 = vst [vmem:[%s3411_s3 + $0x90] sm:$0xff] %v2286_v3  }
 0x1ac   :  { %1948 = vsyncpa [#allocation3], 1 }
 0x1ad   :  { %1949 = vsyncpa [#allocation5], 1 }

// kernel: net_forward.4
= control target key start
LH: loop header
LB: loop body
LE: loop exit
PB: predicated region body
PF: predicated region fallthrough
CT: control target
= control target key end

     0   :  { %8 = vsyncpa [#allocation3], 0  ;;  %s6530_s12 = smov [#allocation2]   ;;  %s8971_s0 = inlined_call_operand.vmem [shape: bf16[2,2,2,40,128], index: 0, kind: input, shape index: {}]   ;;  %s8972_s1 = inlined_call_operand.hbm [shape: bf16[3200,128], index: 1, kind: input, shape index: {}]   ;;  %s8973_s2 = inlined_call_operand.vmem [shape: f32[1,128], index: 2, kind: input, shape index: {}]   ;;  %s8974_s3 = inlined_call_operand.vmem [shape: bf16[48,128], index: 3, kind: output, shape index: {}]  }
   0x1   :  { %s16_s13 = sshll.u32 %s6530_s12, 4  ;;  %s6506_s16 = scalar_lea.hbm %s8972_s1, 25600  ;;  %s17_s13 = int_to_ptr.vmem [resolvable:$true] %s16_s13 }
   0x2   :  { %p6507_p0 = scmp.ne.s32.totalorder %s8972_s1, %s6506_s16  ;;  %p6510_p1 = scmp.lt.u32.totalorder %s6506_s16, %s8972_s1 }
   0x4   :  { %p6512_p2 = pnand %p6510_p1, %p6507_p0 }
   0x6   :  { %6515 = shalt.err (!%p6512_p2)
}
   0x7   :  { %s6516_s21 = scalar_lea.vmem %s17_s13, 25600  ;;  %p6521_p4 = scmp.lt.s32.totalorder %s17_s13, %s17_s13 }
   0x8   :  { %p6517_p3 = scmp.ne.s32.totalorder %s17_s13, %s6516_s21  ;;  %p6522_p5 = scmp.lt.s32.totalorder %s6516_s21, %s6516_s21 }
   0xa   :  { %p6523_p6 = por %p6522_p5, %p6521_p4 }
   0xc   :  { %p6524_p7 = pnand %p6523_p6, %p6517_p3 }
   0xe   :  { %6527 = shalt.err (!%p6524_p7)
}
   0xf   :  { %s6531_s22 = smov 64   ;;  %s6532_s23 = smov 4  }
  0x10   :  { %22 = dma.hbm_to_vmem [thread:$0]  %s8972_s1, 25600, %s17_s13, [#allocation3], %s6531_s22, %s6531_s22, %s6532_s23  }
  0x11   :  { %6528 = dma.done.wait [#allocation3], 25600  }
  0x12   :  { %6529 = vsyncadd [#allocation3], 4294941696  ;;  %v6221_v0 = vld [vmem:[#allocation2 + $0x40] sm:$0xff]   ;;  %v6225_v4 = vld [vmem:[#allocation2 + $0x48] sm:$0xff]   ;;  %vm69_vm0 = vsmask.f32 3328 }
  0x13   :  { %v6222_v1 = vld [vmem:[#allocation2 + $0xc0] sm:$0xff]   ;;  %5086 = vmatprep.subr.bf16.mxu0 %v6221_v0  ;;  %v6226_v5 = vld [vmem:[#allocation2 + $0xc8] sm:$0xff]   ;;  %v6229_v8 = vld [vmem:[#allocation2 + $0x50] sm:$0xff]   ;;  %vm70_vm1 = vsmask.f32 7440  ;;  %vm216_vm3 = vcmask 1042432  }
  0x14   :  { %v6223_v2 = vld [vmem:[#allocation2] sm:$0xff]   ;;  %5174 = vmatprep.subr.bf16.mxu1 %v6222_v1  ;;  %v6227_v6 = vld [vmem:[#allocation2 + $0x8] sm:$0xff]   ;;  %v6230_v9 = vld [vmem:[#allocation2 + $0xd0] sm:$0xff]   ;;  %vm217_vm4 = vcmask 1046532   ;;  %vm459_vm6 = vcmask 1040384   ;;  %vm460_vm7 = vcmask 1044484  }
  0x15   :  { %v6224_v3 = vld [vmem:[#allocation2 + $0x80] sm:$0xff]   ;;  %5087 = vmatpush3.bf16.msra.mxu0 %v6223_v2  ;;  %v6228_v7 = vld [vmem:[#allocation2 + $0x88] sm:$0xff]   ;;  %v6231_v10 = vld [vmem:[#allocation2 + $0x10] sm:$0xff]   ;;  %vm502_vm9 = vsmask.f32 256  ;;  %vm667_vm12 = vcmask 1041408  }
  0x16   :  { %5175 = vmatpush3.bf16.msra.mxu1 %v6224_v3  ;;  %5088 = vmatprep.subr.bf16.mxu0 %v6225_v4  ;;  %v6232_v11 = vld [vmem:[#allocation2 + $0x90] sm:$0xff]   ;;  %v6233_v12 = vld [vmem:[#allocation2 + $0x58] sm:$0xff]   ;;  %v6237_v16 = vld [vmem:[#allocation2 + $0x60] sm:$0xff]   ;;  %vm503_vm10 = vsmask.f32 4368  ;;  %vm668_vm13 = vcmask 1045508  }
  0x17   :  { %5176 = vmatprep.subr.bf16.mxu1 %v6226_v5  ;;  %v6234_v13 = vld [vmem:[#allocation2 + $0xd8] sm:$0xff]   ;;  %v6238_v17 = vld [vmem:[#allocation2 + $0xe0] sm:$0xff]   ;;  %v6241_v20 = vld [vmem:[#allocation2 + $0x68] sm:$0xff]   ;;  %vm712_vm15 = vsmask.f32 1280 }
  0x18   :  { %v6235_v14 = vld [vmem:[#allocation2 + $0x18] sm:$0xff]   ;;  %v6239_v18 = vld [vmem:[#allocation2 + $0x20] sm:$0xff]   ;;  %v6242_v21 = vld [vmem:[#allocation2 + $0xe8] sm:$0xff]  }
  0x19   :  { %5089 = vmatpush3.bf16.msra.mxu0 %v6227_v6  ;;  %v6236_v15 = vld [vmem:[#allocation2 + $0x98] sm:$0xff]   ;;  %v6240_v19 = vld [vmem:[#allocation2 + $0xa0] sm:$0xff]   ;;  %v6243_v22 = vld [vmem:[#allocation2 + $0x28] sm:$0xff]  }
  0x1a   :  { %5177 = vmatpush3.bf16.msra.mxu1 %v6228_v7  ;;  %5090 = vmatprep.subr.bf16.mxu0 %v6229_v8  ;;  %v6244_v23 = vld [vmem:[#allocation2 + $0xa8] sm:$0xff]   ;;  %v6245_v24 = vld [vmem:[#allocation2 + $0x70] sm:$0xff]   ;;  %v6249_v28 = vld [vmem:[#allocation2 + $0x78] sm:$0xff]  }
  0x1b   :  { %5178 = vmatprep.subr.bf16.mxu1 %v6230_v9  ;;  %v6246_v25 = vld [vmem:[#allocation2 + $0xf0] sm:$0xff]   ;;  %v6250_v29 = vld [vmem:[#allocation2 + $0xf8] sm:$0xff]   ;;  %v6568_v32 = vld [vmem:[%s8971_s0 + $0x28] sm:$0xf] }
  0x1c   :  { %v6247_v26 = vld [vmem:[#allocation2 + $0x30] sm:$0xff]   ;;  %v6251_v30 = vld [vmem:[#allocation2 + $0x38] sm:$0xff]   ;;  %9114 = vst [vmem:[#allocation5_spill] sm:$0xff] %v6568_v32  ;;  %v40_v33 = vld [vmem:[%s8971_s0 + $0x2c] sm:$0xf]  ;;  %v8976_v36 = vshrl.u32 %v6568_v32, 16 }
  0x1d   :  { %5091 = vmatpush3.bf16.msra.mxu0 %v6231_v10  ;;  %v6248_v27 = vld [vmem:[#allocation2 + $0xb0] sm:$0xff]   ;;  %v6252_v31 = vld [vmem:[#allocation2 + $0xb8] sm:$0xff]   ;;  %v6577_v35 = vcombine.low %v6568_v32, %v40_v33  ;;  %v144_v37 = vshll.u32 %v6568_v32, 16  ;;  %v6581_v38 = vshll.u32 %v40_v33, 16  ;;  %v6586_v39 = vld [vmem:[%s8971_s0] sm:$0xf] }
  0x1e   :  { %5179 = vmatpush3.bf16.msra.mxu1 %v6232_v11  ;;  %5092 = vmatprep.subr.bf16.mxu0 %v6233_v12  ;;  %v41_v34 = vld [vmem:[%s8971_s0 + $0x30] sm:$0xf]  ;;  %v6255_v40 = vld [vmem:[#allocation2 + $0x140] sm:$0xff]   ;;  %v6588_v41 = vshrl.u32 %v40_v33, 16  ;;  %v8979_v45 = vshrl.u32 %v6586_v39, 16  ;;  %v143_v46 = vrot.slane %v8976_v36, 4  ;;  %vm6625_vm2 = vmor %vm69_vm0, %vm70_vm1 }
  0x1f   :  { %5180 = vmatprep.subr.bf16.mxu1 %v6234_v13  ;;  %9115 = vst [vmem:[#allocation6_spill] sm:$0xff] %v6581_v38  ;;  %v6590_v42 = vshll.u32 %v41_v34, 16  ;;  %v6592_v43 = vshrl.u32 %v41_v34, 16  ;;  %v6597_v44 = vld [vmem:[%s8971_s0 + $0x4] sm:$0xf]  ;;  %2999 = vmatprep.mubr.bf16.mxu0 %v6577_v35  ;;  %v146_v47 = vrot.slane %v144_v37, 5  ;;  %vm6767_vm5 = vmor %vm216_vm3, %vm217_vm4 }
  0x20   :  { %9116 = vst [vmem:[#allocation7_spill] sm:$0xff] %v6588_v41  ;;  %v152_v48 = vrot.slane %v6581_v38, 5  ;;  %v4748_v49 = vcombine.low %v6586_v39, %v6597_v44  ;;  %v6609_v50 = vld [vmem:[%s8971_s0 + $0x8] sm:$0xf]  ;;  %v6256_v51 = vld [vmem:[#allocation2 + $0x100] sm:$0xff]   ;;  %v156_v52 = vrot.slane %v6588_v41, 4  ;;  %vm7098_vm8 = vmor %vm459_vm6, %vm460_vm7 }
  0x21   :  { %5093 = vmatpush3.bf16.msra.mxu0 %v6235_v14  ;;  %9117 = vst [vmem:[#allocation8_spill] sm:$0xff] %v6590_v42  ;;  %9118 = vst [vmem:[#allocation9_spill] sm:$0xff] %v6592_v43  ;;  %v162_v53 = vrot.slane %v6590_v42, 5  ;;  %v166_v54 = vrot.slane %v6592_v43, 4  ;;  %v75_v55 = vrot.slane %v8979_v45, 4  ;;  %v147_v56 = vor.u32 %v146_v47, %v143_v46  ;;  %v6257_v60 = vld [vmem:[#allocation2 + $0x1c0] sm:$0xff]  }
  0x22   :  { %5181 = vmatpush3.bf16.msra.mxu1 %v6236_v15  ;;  %5094 = vmatprep.subr.bf16.mxu0 %v6237_v16  ;;  %v76_v57 = vshll.u32 %v6586_v39, 16  ;;  %v6618_v58 = vshll.u32 %v6597_v44, 16  ;;  %v6621_v59 = vshrl.u32 %v6597_v44, 16  ;;  %v157_v62 = vor.u32 %v156_v52, %v152_v48  ;;  %v6640_v10 = vld [vmem:[%s8971_s0 + $0x3c] sm:$0xf]  ;;  %v6284_v42 = vld [vmem:[#allocation2 + $0x128] sm:$0xff]   ;;  %vm7282_vm11 = vmor %vm502_vm9, %vm503_vm10 }
  0x23   :  { %5182 = vmatprep.subr.bf16.mxu1 %v6238_v17  ;;  %v167_v63 = vor.u32 %v166_v54, %v162_v53  ;;  %v6630_v0 = vshll.u32 %v6609_v50, 16  ;;  %v148_v1 = vrot.slane %v147_v56, 4  ;;  %9124 = vst [vmem:[#allocation13_spill] sm:$0xff] %v6640_v10  ;;  %v42_v11 = vld [vmem:[%s8971_s0 + $0x34] sm:$0xf]  ;;  %v6648_v13 = vcombine.low %v41_v34, %v6640_v10  ;;  %vm7902_vm14 = vmor %vm667_vm12, %vm668_vm13 }
  0x24   :  { %9119 = vst [vmem:[#allocation10_spill] sm:$0xff] %v6618_v58  ;;  %9120 = vst [vmem:[#allocation11_spill] sm:$0xff] %v6621_v59  ;;  %v78_v2 = vrot.slane %v76_v57, 5  ;;  %v84_v3 = vrot.slane %v6618_v58, 5  ;;  %v88_v4 = vrot.slane %v6621_v59, 4  ;;  %v158_v5 = vrot.slane %v157_v62, 4 }
  0x25   :  { %5095 = vmatpush3.bf16.msra.mxu0 %v6239_v18  ;;  %9123 = vst [vmem:[#allocation12_spill] sm:$0xff] %v6630_v0  ;;  %v94_v6 = vrot.slane %v6630_v0, 5  ;;  %v153_v7 = vsel %vm6625_vm2, %v148_v1, %v152_v48  ;;  %v45_v14 = vld [vmem:[%s8971_s0 + $0x40] sm:$0xf]  ;;  %v168_v15 = vrot.slane %v167_v63, 4  ;;  %v6653_v16 = vshll.u32 %v42_v11, 16 }
  0x26   :  { %5183 = vmatpush3.bf16.msra.mxu1 %v6240_v19  ;;  %5096 = vmatprep.subr.bf16.mxu0 %v6241_v20  ;;  %v79_v8 = vor.u32 %v78_v2, %v75_v55  ;;  %v89_v9 = vor.u32 %v88_v4, %v84_v3  ;;  %v163_v12 = vsel %vm6625_vm2, %v158_v5, %v162_v53  ;;  %v6658_v17 = vld [vmem:[%s8971_s0 + $0x14] sm:$0xf]  ;;  %v6688_v37 = vshrl.u32 %v6609_v50, 16  ;;  %v46_v54 = vld [vmem:[%s8971_s0 + $0x44] sm:$0xf]  ;;  %v6265_v5 = vld [vmem:[#allocation2 + $0x1c8] sm:$0xff]  }
  0x27   :  { %5184 = vmatprep.subr.bf16.mxu1 %v6242_v21  ;;  %9125 = vst [vmem:[#allocation14_spill] sm:$0xff] %v6653_v16  ;;  %v6660_v18 = vcombine.low %v153_v7, %v163_v12  ;;  %v6258_v21 = vld [vmem:[#allocation2 + $0x180] sm:$0xff]   ;;  %v8978_v52 = vshrl.u32 %v6658_v17, 16  ;;  %v110_v53 = vshll.u32 %v6658_v17, 16  ;;  %v6705_v57 = vcombine.low %v45_v14, %v46_v54  ;;  %v6718_v4 = vld [vmem:[%s8971_s0 + $0x1c] sm:$0xf] }
  0x28   :  { %v80_v19 = vrot.slane %v79_v8, 4  ;;  %v90_v20 = vrot.slane %v89_v9, 4  ;;  %9127 = vst [vmem:[#allocation16_spill] sm:$0xff] %v6688_v37  ;;  %v6710_v62 = vshrl.u32 %v45_v14, 16  ;;  %v6728_v11 = vld [vmem:[%s8971_s0 + $0x20] sm:$0xf] }
  0x29   :  { %5097 = vmatpush3.bf16.msra.mxu0 %v6243_v22  ;;  %v8975_v22 = vshrl.u32 %v6640_v10, 16  ;;  %3128 = vmatprep.mubr.bf16.mxu1 %v6660_v18  ;;  %v109_v2 = vrot.slane %v8978_v52, 4  ;;  %v6290_v32 = vld [vmem:[#allocation2 + $0x130] sm:$0xff]   ;;  %vm713_vm0 = vsmask.f32 5392 }
  0x2a   :  { %5185 = vmatpush3.bf16.msra.mxu1 %v6244_v23  ;;  %5098 = vmatprep.subr.bf16.mxu0 %v6245_v24  ;;  %v6666_v23 = vld [vmem:[%s8971_s0 + $0xc] sm:$0xf]  ;;  %v95_v33 = vsel %vm6625_vm2, %v90_v20, %v94_v6  ;;  %9130 = vst [vmem:[#allocation19_spill] sm:$0xff] %v6710_v62  ;;  %v190_v9 = vrot.slane %v6710_v62, 4  ;;  %vm8154_vm1 = vmor %vm712_vm15, %vm713_vm0 }
  0x2b   :  { %5186 = vmatprep.subr.bf16.mxu1 %v6246_v25  ;;  %v6261_v24 = vld [vmem:[#allocation2 + $0x148] sm:$0xff]   ;;  %v172_v25 = vrot.slane %v6653_v16, 5  ;;  %v177_v34 = vrot.slane %v8975_v22, 4 }
  0x2c   :  { %v6266_v20 = vld [vmem:[#allocation2 + $0x188] sm:$0xff]  }
  0x2d   :  { %5099 = vmatpush3.bf16.msra.mxu0 %v6247_v26  ;;  %v178_v26 = vshll.u32 %v6640_v10, 16  ;;  %v173_v46 = vsel %vm6625_vm2, %v168_v15, %v172_v25  ;;  %v6730_v15 = vshrl.u32 %v46_v54, 16  ;;  %v6283_v16 = vld [vmem:[#allocation2 + $0x168] sm:$0xff]  }
  0x2e   :  { %5187 = vmatpush3.bf16.msra.mxu1 %v6248_v27  ;;  %5100 = vmatprep.subr.bf16.mxu0 %v6249_v28  ;;  %v6671_v27 = vshll.u32 %v45_v14, 16  ;;  %v4749_v28 = vcombine.low %v6609_v50, %v6658_v17 }
  0x2f   :  { %5188 = vmatprep.subr.bf16.mxu1 %v6250_v29  ;;  %v6678_v29 = vld [vmem:[%s8971_s0 + $0x18] sm:$0xf]  ;;  %v180_v47 = vrot.slane %v178_v26, 5  ;;  %9132 = vst [vmem:[#allocation21_spill] sm:$0xff] %v6730_v15 }
  0x30   :  { %9126 = vst [vmem:[#allocation15_spill] sm:$0xff] %v6671_v27  ;;  %v186_v48 = vrot.slane %v6671_v27, 5  ;;  %v6703_v56 = vshll.u32 %v6678_v29, 16  ;;  %v4750_v26 = vcombine.low %v6678_v29, %v6718_v4 }
  0x31   :  { %5101 = vmatpush3.bf16.msra.mxu0 %v6251_v30  ;;  %v6262_v30 = vld [vmem:[#allocation2 + $0x108] sm:$0xff]   ;;  %v181_v55 = vor.u32 %v180_v47, %v177_v34  ;;  %v200_v34 = vrot.slane %v6730_v15, 4 }
  0x32   :  { %5189 = vmatpush3.bf16.msra.mxu1 %v6252_v31  ;;  %5262 = vmatprep.subr.bf16.mxu0 %v6255_v40  ;;  %v85_v31 = vsel %vm6625_vm2, %v80_v19, %v84_v3  ;;  %9129 = vst [vmem:[#allocation18_spill] sm:$0xff] %v6703_v56  ;;  %v112_v3 = vrot.slane %v110_v53, 5  ;;  %v118_v8 = vrot.slane %v6703_v56, 5  ;;  %v6749_v53 = vshll.u32 %v6718_v4, 16 }
  0x33   :  { %5350 = vmatprep.subr.bf16.mxu1 %v6257_v60  ;;  %v4754_v40 = vcombine.low %v85_v31, %v95_v33  ;;  %v47_v60 = vld [vmem:[%s8971_s0 + $0x48] sm:$0xf]  ;;  %v182_v7 = vrot.slane %v181_v55, 4  ;;  %v6755_v55 = vshrl.u32 %v6718_v4, 16 }
  0x34   :  { %3000 = vmatmul.mubr.bf16.vlgmr.msra.gmra.mrb[0].mxu0 %v4748_v49  ;;  %v98_v49 = vrot.slane %v6688_v37, 4  ;;  %v113_v14 = vor.u32 %v112_v3, %v109_v2  ;;  %v6732_v19 = vshll.u32 %v47_v60, 16  ;;  %9135 = vst [vmem:[#allocation24_spill] sm:$0xff] %v6749_v53  ;;  %v6758_v60 = vshll.u32 %v6728_v11, 16 }
  0x35   :  { %5263 = vmatpush3.bf16.msra.mxu0 %v6256_v51  ;;  %3007 = vmatprep.mubr.bf16.mxu0 %v6648_v13  ;;  %v6695_v51 = vshll.u32 %v6666_v23, 16  ;;  %9136 = vst [vmem:[#allocation25_spill] sm:$0xff] %v6755_v55 }
  0x36   :  { %5264 = vmatprep.subr.bf16.mxu0 %v6261_v24  ;;  %3129 = vmatmul.mubr.bf16.vlgmr.msra.gmra.mrb[0].mxu1 %v4754_v40  ;;  %v99_v63 = vor.u32 %v98_v49, %v94_v6  ;;  %v6723_v6 = vshll.u32 %v46_v54, 16  ;;  %9133 = vst [vmem:[#allocation22_spill] sm:$0xff] %v6732_v19  ;;  %v191_v24 = vor.u32 %v190_v9, %v186_v48  ;;  %v114_v33 = vrot.slane %v113_v14, 4 }
  0x37   :  { %9128 = vst [vmem:[#allocation17_spill] sm:$0xff] %v6695_v51  ;;  %5351 = vmatpush3.bf16.msra.mxu1 %v6258_v21  ;;  %v104_v1 = vrot.slane %v6695_v51, 5  ;;  %v187_v21 = vsel %vm6625_vm2, %v182_v7, %v186_v48  ;;  %v206_v49 = vrot.slane %v6732_v19, 5  ;;  %v6746_v48 = vshrl.u32 %v6678_v29, 16  ;;  %9137 = vst [vmem:[#allocation26_spill] sm:$0xff] %v6758_v60 }
  0x38   :  { %9131 = vst [vmem:[#allocation20_spill] sm:$0xff] %v6723_v6  ;;  %v100_v12 = vrot.slane %v99_v63, 4  ;;  %5352 = vmatprep.subr.bf16.mxu1 %v6265_v5  ;;  %v196_v25 = vrot.slane %v6723_v6, 5  ;;  %v192_v47 = vrot.slane %v191_v24, 4  ;;  %v6268_v63 = vld [vmem:[#allocation2 + $0x110] sm:$0xff]   ;;  %v128_v5 = vrot.slane %v6749_v53, 5 }
  0x39   :  { %5265 = vmatpush3.bf16.msra.mxu0 %v6262_v30  ;;  %v6739_v30 = vcombine.low %v173_v46, %v187_v21  ;;  %9134 = vst [vmem:[#allocation23_spill] sm:$0xff] %v6746_v48  ;;  %v119_v46 = vsel %vm6625_vm2, %v114_v33, %v118_v8  ;;  %v122_v3 = vrot.slane %v6746_v48, 4  ;;  %v221_v21 = vrot.slane %v6597_v44, 5 }
  0x3a   :  { %v105_v31 = vsel %vm6625_vm2, %v100_v12, %v104_v1  ;;  %v201_v54 = vor.u32 %v200_v34, %v196_v25  ;;  %v6269_v1 = vld [vmem:[#allocation2 + $0x1d0] sm:$0xff]   ;;  %v197_v7 = vsel %vm6625_vm2, %v192_v47, %v196_v25  ;;  %v132_v12 = vrot.slane %v6755_v55, 4 }
  0x3b   :  { %5353 = vmatpush3.bf16.msra.mxu1 %v6266_v20  ;;  %3136 = vmatprep.mubr.bf16.mxu1 %v6739_v30  ;;  %v4755_v2 = vcombine.low %v105_v31, %v119_v46  ;;  %v123_v20 = vor.u32 %v122_v3, %v118_v8  ;;  %v224_v24 = vrot.slane %v6609_v50, 5  ;;  %v6270_v25 = vld [vmem:[#allocation2 + $0x190] sm:$0xff]   ;;  %v138_v31 = vrot.slane %v6758_v60, 5  ;;  %v6271_v8 = vld [vmem:[#allocation2 + $0x158] sm:$0xff]  }
  0x3c   :  { %3008 = vmatmul.mubr.bf16.gmra.mrb[4].mxu0 %v4749_v28  ;;  %v6267_v28 = vld [vmem:[#allocation2 + $0x150] sm:$0xff]   ;;  %v202_v9 = vrot.slane %v201_v54, 4  ;;  %5354 = vmatprep.subr.bf16.mxu1 %v6269_v1  ;;  %v223_v46 = vrot.slane %v221_v21, 4  ;;  %v6272_v54 = vld [vmem:[#allocation2 + $0x118] sm:$0xff]   ;;  %v227_v1 = vrot.slane %v6666_v23, 5 }
  0x3d   :  { %3015 = vmatprep.mubr.bf16.mxu0 %v6705_v57  ;;  %5266 = vmatprep.subr.bf16.mxu0 %v6267_v28  ;;  %v133_v28 = vor.u32 %v132_v12, %v128_v5  ;;  %v124_v34 = vrot.slane %v123_v20, 4  ;;  %v6273_v3 = vld [vmem:[#allocation2 + $0x1d8] sm:$0xff]   ;;  %v231_v12 = vrot.slane %v6678_v29, 5  ;;  %v6292_v60 = vld [vmem:[#allocation2 + $0x1b0] sm:$0xff]  }
  0x3e   :  { %5267 = vmatpush3.bf16.msra.mxu0 %v6268_v63  ;;  %3137 = vmatmul.mubr.bf16.gmra.mrb[4].mxu1 %v4755_v2 }
  0x3f   :  { %5355 = vmatpush3.bf16.msra.mxu1 %v6270_v25  ;;  %v134_v63 = vrot.slane %v133_v28, 4  ;;  %5268 = vmatprep.subr.bf16.mxu0 %v6271_v8  ;;  %v6274_v25 = vld [vmem:[#allocation2 + $0x198] sm:$0xff]   ;;  %v6277_v28 = vld [vmem:[#allocation2 + $0x160] sm:$0xff]   ;;  %v233_v52 = vrot.slane %v231_v12, 4 }
  0x40   :  { %5356 = vmatprep.subr.bf16.mxu1 %v6273_v3  ;;  %v6826_v3 = vld [vmem:[%s8971_s0 + $0x80] sm:$0xf] }
  0x42   :  { %5269 = vmatpush3.bf16.msra.mxu0 %v6272_v54 }
  0x43   :  { %5357 = vmatpush3.bf16.msra.mxu1 %v6274_v25  ;;  %5270 = vmatprep.subr.bf16.mxu0 %v6277_v28 }
  0x44   :  { %3016 = vmatmul.mubr.bf16.gmra.mrb[8].mxu0 %v4750_v26  ;;  %v207_v26 = vsel %vm6625_vm2, %v202_v9, %v206_v49  ;;  %v129_v49 = vsel %vm6625_vm2, %v124_v34, %v128_v5  ;;  %v4717_v9 = vrot.slane %v6658_v17, 9  ;;  %v6802_v5 = vld [vmem:[%s8971_s0 + $0x7c] sm:$0xf]  ;;  %v6278_v34 = vld [vmem:[#allocation2 + $0x120] sm:$0xff]  }
  0x45   :  { %3023 = vmatprep.mubr.bf16.mxu0 %v4754_v40  ;;  %v4716_v40 = vrot.slane %v6586_v39, 9  ;;  %v6777_v33 = vcombine.low %v197_v7, %v207_v26  ;;  %v225_v7 = vsel %vm6767_vm5, %v223_v46, %v224_v24  ;;  %v6815_v46 = vld [vmem:[%s8971_s0 + $0x50] sm:$0xf] }
  0x46   :  { %v232_v54 = vsel %vm6767_vm5, %v4717_v9, %v231_v12  ;;  %5271 = vmatpush3.bf16.msra.mxu0 %v6278_v34  ;;  %v271_v28 = vshll.u32 %v6815_v46, 16  ;;  %v237_v34 = vrot.slane %v6728_v11, 5  ;;  %v6860_v12 = vshrl.u32 %v6826_v3, 16 }
  0x47   :  { %v222_v47 = vsel %vm6767_vm5, %v4716_v40, %v221_v21  ;;  %3144 = vmatprep.mubr.bf16.mxu1 %v6777_v33  ;;  %v139_v40 = vsel %vm6625_vm2, %v134_v63, %v138_v31  ;;  %v226_v21 = vrot.slane %v224_v24, 4  ;;  %v6807_v31 = vshll.u32 %v6802_v5, 16  ;;  %5272 = vmatprep.subr.bf16.mxu0 %v6283_v16 }
  0x48   :  { %v6792_v20 = vcombine.low %v222_v47, %v225_v7  ;;  %v4756_v26 = vcombine.low %v129_v49, %v139_v40  ;;  %v6810_v47 = vshrl.u32 %v6802_v5, 16  ;;  %v234_v63 = vrot.slane %v6718_v4, 5  ;;  %v6831_v49 = vld [vmem:[%s8971_s0 + $0x54] sm:$0xf]  ;;  %v6279_v7 = vld [vmem:[#allocation2 + $0x1e0] sm:$0xff]   ;;  %9147 = vst [vmem:[#allocation33_spill] sm:$0xff] %v6860_v12 }
  0x49   :  { %9141 = vst [vmem:[#allocation28_spill] sm:$0xff] %v6807_v31  ;;  %v228_v8 = vsel %vm6767_vm5, %v226_v21, %v227_v1  ;;  %v347_v21 = vrot.slane %v6807_v31, 5  ;;  %5358 = vmatprep.subr.bf16.mxu1 %v6279_v7  ;;  %v6841_v22 = vshll.u32 %v6831_v49, 16  ;;  %v6844_v36 = vshrl.u32 %v6831_v49, 16 }
  0x4a   :  { %3145 = vmatmul.mubr.bf16.gmra.mrb[8].mxu1 %v4756_v26  ;;  %9142 = vst [vmem:[#allocation29_spill] sm:$0xff] %v6810_v47  ;;  %v351_v25 = vrot.slane %v6810_v47, 4  ;;  %v236_v45 = vrot.slane %v234_v63, 4  ;;  %v6850_v31 = vshll.u32 %v6826_v3, 16  ;;  %v9146_v7 = vshrl.u32 %v6815_v46, 16  ;;  %5273 = vmatpush3.bf16.msra.mxu0 %v6284_v42 }
  0x4b   :  { %3152 = vmatprep.mubr.bf16.mxu1 %v6792_v20  ;;  %9143 = vst [vmem:[#allocation30_spill] sm:$0xff] %v6841_v22  ;;  %9144 = vst [vmem:[#allocation31_spill] sm:$0xff] %v6844_v36  ;;  %v9160_v43 = vrot.slane %v6841_v22, 5 }
  0x4c   :  { %3024 = vmatmul.mubr.bf16.gmra.mrb[12].mxu0 %v6577_v35  ;;  %v6797_v35 = vld [vmem:[%s8971_s0 + $0x78] sm:$0xf]  ;;  %9145 = vst [vmem:[#allocation32_spill] sm:$0xff] %v6850_v31  ;;  %v270_v47 = vrot.slane %v9146_v7, 4  ;;  %v6887_v7 = vld [vmem:[%s8971_s0 + $0x90] sm:$0xf] }
  0x4d   :  { %3031 = vmatprep.mubr.bf16.mxu0 %v4755_v2  ;;  %9140 = vst [vmem:[#allocation27_spill] sm:$0xff] %v6797_v35  ;;  %v8977_v2 = vshrl.u32 %v6797_v35, 16  ;;  %v339_v24 = vshll.u32 %v6797_v35, 16 }
  0x4f   :  { %v338_v40 = vrot.slane %v8977_v2, 4  ;;  %v341_v1 = vrot.slane %v339_v24, 5  ;;  %v6280_v2 = vld [vmem:[#allocation2 + $0x1a0] sm:$0xff]   ;;  %v6846_v24 = vcombine.low %v228_v8, %v232_v54  ;;  %v352_v8 = vor.u32 %v351_v25, %v347_v21 }
  0x50   :  { %5359 = vmatpush3.bf16.msra.mxu1 %v6280_v2  ;;  %v273_v54 = vrot.slane %v271_v28, 5  ;;  %v235_v2 = vsel %vm6767_vm5, %v233_v52, %v234_v63  ;;  %v238_v25 = vsel %vm6767_vm5, %v236_v45, %v237_v34  ;;  %v6882_v28 = vld [vmem:[%s8971_s0 + $0x84] sm:$0xf]  ;;  %v357_v63 = vrot.slane %v6850_v31, 5 }
  0x51   :  { %v342_v9 = vor.u32 %v341_v1, %v338_v40  ;;  %v283_v40 = vrot.slane %v6844_v36, 4  ;;  %v6868_v1 = vld [vmem:[%s8971_s0 + $0x8c] sm:$0xf]  ;;  %9149 = vst [vmem:[#allocation35_spill] sm:$0xff] %v6882_v28  ;;  %v353_v36 = vrot.slane %v352_v8, 4  ;;  %v6905_v27 = vshll.u32 %v6882_v28, 16 }
  0x52   :  { %3153 = vmatmul.mubr.bf16.gmra.mrb[12].mxu1 %v6660_v18  ;;  %9148 = vst [vmem:[#allocation34_spill] sm:$0xff] %v6868_v1  ;;  %v6877_v18 = vcombine.low %v6797_v35, %v6802_v5  ;;  %v6898_v35 = vld [vmem:[%s8971_s0 + $0x64] sm:$0xf]  ;;  %v274_v19 = vor.u32 %v273_v54, %v270_v47  ;;  %v373_v6 = vshll.u32 %v6868_v1, 16  ;;  %v6908_v34 = vshll.u32 %v6887_v7, 16 }
  0x53   :  { %3160 = vmatprep.mubr.bf16.mxu1 %v6846_v24  ;;  %v343_v52 = vrot.slane %v342_v9, 4  ;;  %v9151_v9 = vrot.slane %v6841_v22, 5  ;;  %9152 = vst [vmem:[#allocation37_spill] sm:$0xff] %v6905_v27  ;;  %v6910_v15 = vcombine.low %v235_v2, %v238_v25  ;;  %v9154_v47 = vshrl.u32 %v6868_v1, 16  ;;  %v6291_v22 = vld [vmem:[#allocation2 + $0x1f0] sm:$0xff]  }
  0x54   :  { %3032 = vmatmul.mubr.bf16.gmra.mrb[16].mxu0 %v6648_v13  ;;  %v6855_v13 = vld [vmem:[%s8971_s0 + $0x58] sm:$0xf]  ;;  %9153 = vst [vmem:[#allocation38_spill] sm:$0xff] %v6908_v34  ;;  %v375_v54 = vrot.slane %v373_v6, 5  ;;  %v358_v25 = vsel %vm6625_vm2, %v353_v36, %v357_v63  ;;  %v275_v38 = vrot.slane %v274_v19, 4  ;;  %v6927_v6 = vcombine.low %v6826_v3, %v6868_v1 }
  0x55   :  { %3039 = vmatprep.mubr.bf16.mxu0 %v4756_v26  ;;  %v361_v26 = vrot.slane %v6860_v12, 4  ;;  %v6892_v45 = vshll.u32 %v6855_v13, 16  ;;  %v284_v12 = vor.u32 %v283_v40, %v9151_v9  ;;  %v372_v8 = vrot.slane %v9154_v47, 4  ;;  %v6287_v9 = vld [vmem:[#allocation2 + $0x1e8] sm:$0xff]  }
  0x56   :  { %v348_v2 = vsel %vm6625_vm2, %v343_v52, %v347_v21  ;;  %v6932_v16 = vshrl.u32 %v6855_v13, 16  ;;  %v6937_v21 = vld [vmem:[%s8971_s0 + $0x94] sm:$0xf]  ;;  %5360 = vmatprep.subr.bf16.mxu1 %v6287_v9  ;;  %v381_v42 = vrot.slane %v6908_v34, 5  ;;  %v9156_v19 = vshrl.u32 %v6898_v35, 16 }
  0x57   :  { %9150 = vst [vmem:[#allocation36_spill] sm:$0xff] %v6892_v45  ;;  %v362_v31 = vor.u32 %v361_v26, %v357_v63  ;;  %v6918_v26 = vcombine.low %v6815_v46, %v6831_v49  ;;  %v289_v40 = vrot.slane %v6892_v45, 5  ;;  %v285_v47 = vrot.slane %v284_v12, 4  ;;  %v6947_v12 = vld [vmem:[%s8971_s0 + $0x5c] sm:$0xf]  ;;  %v6288_v63 = vld [vmem:[#allocation2 + $0x1a8] sm:$0xff]  }
  0x58   :  { %v367_v45 = vrot.slane %v6905_v27, 5  ;;  %9155 = vst [vmem:[#allocation39_spill] sm:$0xff] %v6932_v16  ;;  %v376_v36 = vor.u32 %v375_v54, %v372_v8  ;;  %v6950_v52 = vshrl.u32 %v6887_v7, 16  ;;  %v6955_v8 = vld [vmem:[%s8971_s0 + $0x68] sm:$0xf]  ;;  %v6958_v54 = vshll.u32 %v6937_v21, 16  ;;  %5361 = vmatpush3.bf16.msra.mxu1 %v6288_v63 }
  0x59   :  { %v6961_v9 = vshrl.u32 %v6937_v21, 16  ;;  %v293_v34 = vrot.slane %v6932_v16, 4  ;;  %v6970_v1 = vld [vmem:[%s8971_s0 + $0x6c] sm:$0xf]  ;;  %v6289_v27 = vld [vmem:[#allocation2 + $0x170] sm:$0xff]   ;;  %v280_v41 = vsel %vm6625_vm2, %v275_v38, %v9160_v43  ;;  %v6998_v43 = vshll.u32 %v6955_v8, 16  ;;  %5362 = vmatprep.subr.bf16.mxu1 %v6291_v22 }
  0x5a   :  { %3161 = vmatmul.mubr.bf16.gmra.mrb[16].mxu1 %v6739_v30  ;;  %v304_v30 = vrot.slane %v9156_v19, 4  ;;  %9157 = vst [vmem:[#allocation40_spill] sm:$0xff] %v6950_v52  ;;  %9158 = vst [vmem:[#allocation41_spill] sm:$0xff] %v6958_v54  ;;  %v6963_v19 = vcombine.low %v348_v2, %v358_v25  ;;  %v377_v62 = vrot.slane %v376_v36, 4  ;;  %v6976_v2 = vld [vmem:[%s8971_s0 + $0x98] sm:$0xf]  ;;  %5274 = vmatprep.subr.bf16.mxu0 %v6289_v27 }
  0x5b   :  { %3168 = vmatprep.mubr.bf16.mxu1 %v6910_v15  ;;  %9159 = vst [vmem:[#allocation42_spill] sm:$0xff] %v6961_v9  ;;  %v385_v25 = vrot.slane %v6950_v52, 4  ;;  %v391_v16 = vrot.slane %v6958_v54, 5  ;;  %v395_v63 = vrot.slane %v6961_v9, 4  ;;  %v290_v36 = vsel %vm6625_vm2, %v285_v47, %v289_v40  ;;  %9162 = vst [vmem:[#allocation44_spill] sm:$0xff] %v6998_v43  ;;  %5275 = vmatpush3.bf16.msra.mxu0 %v6290_v32  ;;  %v6294_v32 = vld [vmem:[#allocation2 + $0x138] sm:$0xff]  }
  0x5c   :  { %3040 = vmatmul.mubr.bf16.gmra.mrb[20].mxu0 %v6705_v57  ;;  %v363_v57 = vrot.slane %v362_v31, 4  ;;  %v305_v31 = vshll.u32 %v6898_v35, 16  ;;  %v6991_v52 = vcombine.low %v6855_v13, %v6898_v35  ;;  %v6994_v54 = vshll.u32 %v6947_v12, 16  ;;  %5363 = vmatpush3.bf16.msra.mxu1 %v6292_v60 }
  0x5d   :  { %3047 = vmatprep.mubr.bf16.mxu0 %v6877_v18  ;;  %v294_v38 = vor.u32 %v293_v34, %v289_v40  ;;  %v7002_v27 = vcombine.low %v6887_v7, %v6937_v21  ;;  %v382_v47 = vsel %vm6625_vm2, %v377_v62, %v381_v42  ;;  %v7014_v34 = vshrl.u32 %v6970_v1, 16  ;;  %v6295_v62 = vld [vmem:[#allocation2 + $0x1f8] sm:$0xff]  }
  0x5e   :  { %v307_v10 = vrot.slane %v305_v31, 5  ;;  %v368_v31 = vsel %vm6625_vm2, %v363_v57, %v367_v45  ;;  %9161 = vst [vmem:[#allocation43_spill] sm:$0xff] %v6994_v54  ;;  %v7005_v45 = vshrl.u32 %v6955_v8, 16  ;;  %v6293_v57 = vld [vmem:[#allocation2 + $0x178] sm:$0xff]   ;;  %v386_v7 = vor.u32 %v385_v25, %v381_v42  ;;  %5364 = vmatprep.subr.bf16.mxu1 %v6295_v62 }
  0x5f   :  { %9165 = vst [vmem:[#allocation47_spill] sm:$0xff] %v7014_v34  ;;  %v396_v40 = vor.u32 %v395_v63, %v391_v16  ;;  %v7017_v53 = vshll.u32 %v6976_v2, 16  ;;  %5276 = vmatprep.subr.bf16.mxu0 %v6293_v57  ;;  %v299_v55 = vrot.slane %v6994_v54, 5  ;;  %v7027_v56 = vcombine.low %v368_v31, %v382_v47  ;;  %v6296_v31 = vld [vmem:[#allocation2 + $0x1b8] sm:$0xff]  }
  0x60   :  { %9163 = vst [vmem:[#allocation45_spill] sm:$0xff] %v7005_v45  ;;  %v308_v9 = vor.u32 %v307_v10, %v304_v30  ;;  %v7023_v10 = vld [vmem:[%s8971_s0 + $0x70] sm:$0xf]  ;;  %v7025_v30 = vcombine.low %v280_v41, %v290_v36  ;;  %v313_v22 = vrot.slane %v6998_v43, 5  ;;  %v317_v60 = vrot.slane %v7005_v45, 4  ;;  %5277 = vmatpush3.bf16.msra.mxu0 %v6294_v32  ;;  %5365 = vmatpush3.bf16.msra.mxu1 %v6296_v31 }
  0x61   :  { %9166 = vst [vmem:[#allocation48_spill] sm:$0xff] %v7017_v53  ;;  %v295_v42 = vrot.slane %v294_v38, 4  ;;  %v327_v57 = vrot.slane %v7014_v34, 4  ;;  %v387_v54 = vrot.slane %v386_v7, 4  ;;  %v397_v41 = vrot.slane %v396_v40, 4  ;;  %v6299_v34 = vld [vmem:[#allocation2 + $0x2c0] sm:$0xff]  }
  0x62   :  { %3169 = vmatmul.mubr.bf16.gmra.mrb[20].mxu1 %v6777_v33  ;;  %v7011_v33 = vshll.u32 %v6970_v1, 16  ;;  %v309_v25 = vrot.slane %v308_v9, 4  ;;  %v401_v36 = vrot.slane %v7017_v53, 5  ;;  %v7039_v47 = vcombine.low %v6955_v8, %v6970_v1  ;;  %5526 = vmatprep.subr.bf16.mxu1 %v6299_v34 }
  0x63   :  { %3176 = vmatprep.mubr.bf16.mxu1 %v6963_v19  ;;  %v318_v9 = vor.u32 %v317_v60, %v313_v22  ;;  %v7042_v38 = vshll.u32 %v7023_v10, 16  ;;  %v300_v7 = vsel %vm6625_vm2, %v295_v42, %v299_v55  ;;  %v392_v62 = vsel %vm6625_vm2, %v387_v54, %v391_v16 }
  0x64   :  { %3048 = vmatmul.mubr.bf16.gmra.mrb[24].mxu0 %v6918_v26  ;;  %9164 = vst [vmem:[#allocation46_spill] sm:$0xff] %v7011_v33  ;;  %v323_v63 = vrot.slane %v7011_v33, 5  ;;  %v6297_v33 = vld [vmem:[#allocation2 + $0x240] sm:$0xff]   ;;  %v314_v40 = vsel %vm6625_vm2, %v309_v25, %v313_v22  ;;  %v402_v60 = vsel %vm6625_vm2, %v397_v41, %v401_v36  ;;  %v413_v53 = vrot.slane %v6831_v49, 5 }
  0x65   :  { %3055 = vmatprep.mubr.bf16.mxu0 %v6927_v6  ;;  %9167 = vst [vmem:[#allocation49_spill] sm:$0xff] %v7042_v38  ;;  %5438 = vmatprep.subr.bf16.mxu0 %v6297_v33  ;;  %v7054_v43 = vcombine.low %v300_v7, %v314_v40  ;;  %v319_v55 = vrot.slane %v318_v9, 4  ;;  %v333_v42 = vrot.slane %v7042_v38, 5  ;;  %v7058_v22 = vcombine.low %v392_v62, %v402_v60 }
  0x66   :  { %v328_v32 = vor.u32 %v327_v57, %v323_v63  ;;  %v4720_v16 = vrot.slane %v6815_v46, 9  ;;  %v415_v54 = vrot.slane %v413_v53, 4  ;;  %v416_v49 = vrot.slane %v6855_v13, 5 }
  0x67   :  { %v324_v33 = vsel %vm6625_vm2, %v319_v55, %v323_v63  ;;  %v419_v31 = vrot.slane %v6947_v12, 5  ;;  %v4721_v63 = vrot.slane %v6898_v35, 9  ;;  %v423_v9 = vrot.slane %v6955_v8, 5 }
  0x68   :  { %v329_v25 = vrot.slane %v328_v32, 4  ;;  %v414_v41 = vsel %vm6767_vm5, %v4720_v16, %v413_v53  ;;  %v417_v36 = vsel %vm6767_vm5, %v415_v54, %v416_v49  ;;  %v418_v61 = vrot.slane %v416_v49, 4 }
  0x69   :  { %v7076_v13 = vcombine.low %v414_v41, %v417_v36  ;;  %v9049_v53 = vrot.slane %v6597_v44, 7  ;;  %v426_v7 = vrot.slane %v6970_v1, 5  ;;  %v424_v32 = vsel %vm6767_vm5, %v4721_v63, %v423_v9  ;;  %v38_v36 = vld [vmem:[%s8971_s0 + $0x24] sm:$0xf] }
  0x6a   :  { %3177 = vmatmul.mubr.bf16.gmra.mrb[24].mxu1 %v7025_v30  ;;  %v334_v57 = vsel %vm6625_vm2, %v329_v25, %v333_v42  ;;  %v420_v40 = vsel %vm6767_vm5, %v418_v61, %v419_v31  ;;  %v467_v8 = vrot.slane %v6609_v50, 7  ;;  %v429_v1 = vrot.slane %v7023_v10, 5 }
  0x6b   :  { %3184 = vmatprep.mubr.bf16.mxu1 %v7027_v56  ;;  %v7073_v34 = vcombine.low %v324_v33, %v334_v57  ;;  %v466_v12 = vrot.slane %v9049_v53, 4  ;;  %v7094_v62 = vcombine.low %v420_v40, %v424_v32  ;;  %v9168_v60 = vmov 0  ;;  %v33_v57 = vld [vmem:[%s8971_s0 + $0x10] sm:$0xf] }
  0x6c   :  { %3056 = vmatmul.mubr.bf16.gmra.mrb[28].mxu0 %v6991_v52  ;;  %v9169_v60 = vsel %vm7098_vm8, 4294967295, %v9168_v60  ;;  %v425_v55 = vrot.slane %v423_v9, 4  ;;  %v428_v42 = vrot.slane %v426_v7, 4  ;;  %v469_v25 = vrot.slane %v467_v8, 4 }
  0x6d   :  { %3063 = vmatprep.mubr.bf16.mxu0 %v7002_v27  ;;  %9170 = vst [vmem:[#allocation50_spill] sm:$0xff] %v9169_v60  ;;  %v470_v16 = vrot.slane %v6666_v23, 7  ;;  %v7106_v50 = vsel %vm7098_vm8, %v466_v12, %v467_v8  ;;  %v9048_v10 = vrot.slane %v6678_v29, 7  ;;  %v477_v31 = vrot.slane %v6718_v4, 7 }
  0x6e   :  { %v427_v23 = vsel %vm6767_vm5, %v425_v55, %v426_v7  ;;  %v430_v33 = vsel %vm6767_vm5, %v428_v42, %v429_v1  ;;  %v480_v63 = vrot.slane %v6728_v11, 7  ;;  %v808_v7 = vrot.slane %v33_v57, 7  ;;  %v6298_v11 = vld [vmem:[#allocation2 + $0x200] sm:$0xff]   ;;  %v6301_v42 = vld [vmem:[#allocation2 + $0x248] sm:$0xff]   ;;  %v6309_v57 = vld [vmem:[#allocation2 + $0x258] sm:$0xff]  }
  0x6f   :  { %v7110_v54 = vsel %vm7098_vm8, %v469_v25, %v470_v16  ;;  %v476_v41 = vrot.slane %v9048_v10, 4  ;;  %v7133_v61 = vcombine.low %v427_v23, %v430_v33  ;;  %v807_v9 = vrot.slane %v470_v16, 4  ;;  %v6302_v16 = vld [vmem:[#allocation2 + $0x208] sm:$0xff]   ;;  %v6305_v23 = vld [vmem:[#allocation2 + $0x250] sm:$0xff]   ;;  %v6325_v10 = vld [vmem:[#allocation2 + $0x278] sm:$0xff]  }
  0x70   :  { %v7116_v49 = vcombine.low %v7106_v50, %v7110_v54  ;;  %v479_v40 = vrot.slane %v477_v31, 4  ;;  %v810_v8 = vrot.slane %v480_v63, 4  ;;  %v811_v1 = vrot.slane %v38_v36, 7  ;;  %v6306_v33 = vld [vmem:[#allocation2 + $0x210] sm:$0xff]   ;;  %v6303_v36 = vld [vmem:[#allocation2 + $0x2c8] sm:$0xff]  }
  0x71   :  { %v7138_v32 = vsel %vm7098_vm8, %v476_v41, %v477_v31  ;;  %v809_v12 = vsel %vm7098_vm8, %v807_v9, %v808_v7  ;;  %v6300_v41 = vld [vmem:[#allocation2 + $0x280] sm:$0xff]   ;;  %v6310_v31 = vld [vmem:[#allocation2 + $0x218] sm:$0xff]   ;;  %v7178_v7 = vld [vmem:[%s8971_s0 + $0x30] sm:$0xf]  ;;  %v9056_v53 = vrot.slane %v6802_v5, 7 }
  0x72   :  { %3185 = vmatmul.mubr.bf16.gmra.mrb[28].mxu1 %v7054_v43  ;;  %9171 = vst [vmem:[#allocation51_spill] sm:$0xff] %v7116_v49  ;;  %v7144_v4 = vcombine.low %v809_v12, %v7138_v32  ;;  %v812_v55 = vsel %vm7098_vm8, %v810_v8, %v811_v1  ;;  %v6313_v9 = vld [vmem:[#allocation2 + $0x260] sm:$0xff]   ;;  %v6307_v8 = vld [vmem:[#allocation2 + $0x2d0] sm:$0xff]  }
  0x73   :  { %3192 = vmatprep.mubr.bf16.mxu1 %v7058_v22  ;;  %v6314_v1 = vld [vmem:[#allocation2 + $0x220] sm:$0xff]  }
  0x74   :  { %3064 = vmatmul.mubr.bf16.gmra.mrb[32].mxu0 %v7039_v47  ;;  %9172 = vst [vmem:[#allocation52_spill] sm:$0xff] %v7144_v4 }
  0x75   :  { %3071 = vmatprep.mubr.bf16.mxu0 %v7025_v30 }
  0x7a   :  { %3193 = vmatmul.mubr.bf16.gmra.mrb[32].mxu1 %v7073_v34 }
  0x7b   :  { %3200 = vmatprep.mubr.bf16.mxu1 %v7076_v13 }
  0x7c   :  { %3072 = vmatmul.mubr.bf16.gmra.mrb[36].mxu0 %v6877_v18 }
  0x7d   :  { %3079 = vmatprep.mubr.bf16.mxu0 %v7054_v43 }
  0x82   :  { %3201 = vmatmul.mubr.bf16.gmra.mrb[36].mxu1 %v6963_v19 }
  0x83   :  { %3208 = vmatprep.mubr.bf16.mxu1 %v7094_v62 }
  0x84   :  { %3080 = vmatmul.mubr.bf16.gmra.mrb[40].mxu0 %v6927_v6 }
  0x85   :  { %3087 = vmatprep.mubr.bf16.mxu0 %v7073_v34 }
  0x8a   :  { %3209 = vmatmul.mubr.bf16.gmra.mrb[40].mxu1 %v7027_v56 }
  0x8b   :  { %3216 = vmatprep.mubr.bf16.mxu1 %v7133_v61 }
  0x8c   :  { %3088 = vmatmul.mubr.bf16.gmra.mrb[44].mxu0 %v7002_v27 }
  0x8d   :  { %3257 = vmatprep.mubr.bf16.mxu0 %v6918_v26  ;;  %v7149_v26 = vsel %vm7098_vm8, %v479_v40, %v480_v63  ;;  %v7171_v63 = vld [vmem:[%s8971_s0 + $0x28] sm:$0xf]  ;;  %v252_v40 = vrot.slane %v7178_v7, 5 }
  0x8e   :  { %v7154_v25 = vcombine.low %v7149_v26, %v812_v55  ;;  %v6317_v55 = vld [vmem:[#allocation2 + $0x268] sm:$0xff]  }
  0x90   :  { %9173 = vst [vmem:[#allocation53_spill] sm:$0xff] %v7154_v25  ;;  %v6326_v25 = vld [vmem:[#allocation2 + $0x238] sm:$0xff]  }
  0x92   :  { %3217 = vmatmul.mubr.bf16.gmra.mrb[44].mxu1 %v7058_v22 }
  0x93   :  { %3386 = vmatprep.mubr.bf16.mxu1 %v7025_v30 }
  0x94   :  { %3258 = vmatmul.mubr.bf16.vlgmr.msra.gmra.mrb[48].mxu0 %v6792_v20  ;;  %v7165_v20 = vld [vmem:[%s8971_s0 + $0x2c] sm:$0xf] }
  0x95   :  { %5439 = vmatpush3.bf16.msra.mxu0 %v6298_v11  ;;  %3265 = vmatprep.mubr.bf16.mxu0 %v6991_v52  ;;  %v249_v52 = vrot.slane %v7165_v20, 5  ;;  %v6308_v11 = vld [vmem:[#allocation2 + $0x290] sm:$0xff]  }
  0x96   :  { %5440 = vmatprep.subr.bf16.mxu0 %v6301_v42  ;;  %v6311_v42 = vld [vmem:[#allocation2 + $0x2d8] sm:$0xff]  }
  0x97   :  { %v251_v12 = vrot.slane %v249_v52, 4 }
  0x99   :  { %5441 = vmatpush3.bf16.msra.mxu0 %v6302_v16 }
  0x9a   :  { %5442 = vmatprep.subr.bf16.mxu0 %v6305_v23  ;;  %3387 = vmatmul.mubr.bf16.vlgmr.msra.gmra.mrb[48].mxu1 %v6877_v18  ;;  %v253_v23 = vsel %vm6767_vm5, %v251_v12, %v252_v40  ;;  %v6312_v12 = vld [vmem:[#allocation2 + $0x298] sm:$0xff]  }
  0x9b   :  { %5527 = vmatpush3.bf16.msra.mxu1 %v6300_v41  ;;  %3394 = vmatprep.mubr.bf16.mxu1 %v7054_v43 }
  0x9c   :  { %3266 = vmatmul.mubr.bf16.gmra.mrb[52].mxu0 %v6846_v24  ;;  %v4718_v24 = vrot.slane %v7171_v63, 9  ;;  %5528 = vmatprep.subr.bf16.mxu1 %v6303_v36  ;;  %v254_v36 = vrot.slane %v252_v40, 4 }
  0x9d   :  { %3273 = vmatprep.mubr.bf16.mxu0 %v7039_v47  ;;  %5443 = vmatpush3.bf16.msra.mxu0 %v6306_v33  ;;  %v6304_v47 = vld [vmem:[#allocation2 + $0x288] sm:$0xff]  }
  0x9e   :  { %5444 = vmatprep.subr.bf16.mxu0 %v6309_v57  ;;  %v250_v16 = vsel %vm6767_vm5, %v4718_v24, %v249_v52  ;;  %v6318_v33 = vld [vmem:[#allocation2 + $0x228] sm:$0xff]   ;;  %v7191_v57 = vld [vmem:[%s8971_s0 + $0x44] sm:$0xf]  ;;  %v7198_v52 = vld [vmem:[%s8971_s0 + $0x34] sm:$0xf] }
  0x9f   :  { %5529 = vmatpush3.bf16.msra.mxu1 %v6304_v47  ;;  %v262_v41 = vrot.slane %v7191_v57, 5  ;;  %9174 = vst [vmem:[#allocation54_spill] sm:$0xff] %v7198_v52  ;;  %v7204_v24 = vld [vmem:[%s8971_s0 + $0x40] sm:$0xf]  ;;  %v7211_v47 = vld [vmem:[%s8971_s0 + $0x3c] sm:$0xf] }
  0xa0   :  { %5530 = vmatprep.subr.bf16.mxu1 %v6307_v8  ;;  %v4719_v40 = vrot.slane %v7211_v47, 9 }
  0xa1   :  { %5445 = vmatpush3.bf16.msra.mxu0 %v6310_v31  ;;  %v255_v31 = vrot.slane %v7198_v52, 5 }
  0xa2   :  { %5446 = vmatprep.subr.bf16.mxu0 %v6313_v9  ;;  %3395 = vmatmul.mubr.bf16.gmra.mrb[52].mxu1 %v6927_v6  ;;  %v259_v9 = vrot.slane %v7204_v24, 5 }
  0xa3   :  { %3402 = vmatprep.mubr.bf16.mxu1 %v7073_v34  ;;  %5531 = vmatpush3.bf16.msra.mxu1 %v6308_v11  ;;  %v6319_v11 = vld [vmem:[#allocation2 + $0x2e8] sm:$0xff]   ;;  %v256_v4 = vsel %vm6767_vm5, %v254_v36, %v255_v31  ;;  %v6453_v36 = vld [vmem:[%s8971_s0] sm:$0xf] }
  0xa4   :  { %3274 = vmatmul.mubr.bf16.gmra.mrb[56].mxu0 %v6910_v15  ;;  %v6321_v15 = vld [vmem:[#allocation2 + $0x270] sm:$0xff]   ;;  %v261_v8 = vrot.slane %v259_v9, 4  ;;  %5532 = vmatprep.subr.bf16.mxu1 %v6311_v42  ;;  %v260_v42 = vsel %vm6767_vm5, %v4719_v40, %v259_v9  ;;  %v4724_v31 = vrot.slane %v6453_v36, 11  ;;  %v6320_v9 = vld [vmem:[#allocation2 + $0x2a8] sm:$0xff]   ;;  %v590_v40 = vrot.slane %v6826_v3, 7 }
  0xa5   :  { %3281 = vmatprep.mubr.bf16.mxu0 %v6877_v18  ;;  %5447 = vmatpush3.bf16.msra.mxu0 %v6314_v1  ;;  %v4823_v18 = vcombine.low %v250_v16, %v253_v23  ;;  %v6315_v1 = vld [vmem:[#allocation2 + $0x2e0] sm:$0xff]   ;;  %v264_v16 = vrot.slane %v262_v41, 4 }
  0xa6   :  { %5448 = vmatprep.subr.bf16.mxu0 %v6317_v55  ;;  %v6322_v55 = vld [vmem:[#allocation2 + $0x230] sm:$0xff]   ;;  %v6316_v23 = vld [vmem:[#allocation2 + $0x2a0] sm:$0xff]   ;;  %v263_v3 = vsel %vm6767_vm5, %v261_v8, %v262_v41  ;;  %v9184_v8 = vshrl.u32 %v6658_v17, 16 }
  0xa7   :  { %5533 = vmatpush3.bf16.msra.mxu1 %v6312_v12  ;;  %v592_v12 = vrot.slane %v590_v40, 4  ;;  %v7314_v17 = vld [vmem:[%s8971_s0 + $0x20] sm:$0xf] }
  0xa8   :  { %5534 = vmatprep.subr.bf16.mxu1 %v6315_v1  ;;  %v9052_v1 = vrot.slane %v6882_v28, 7  ;;  %9185 = vst [vmem:[#allocation59_spill] sm:$0xff] %v7314_v17 }
  0xa9   :  { %5449 = vmatpush3.bf16.msra.mxu0 %v6318_v33  ;;  %v6329_v33 = vld [vmem:[#allocation2 + $0x340] sm:$0xff]  }
  0xaa   :  { %5450 = vmatprep.subr.bf16.mxu0 %v6321_v15  ;;  %3403 = vmatmul.mubr.bf16.gmra.mrb[56].mxu1 %v7002_v27  ;;  %v4824_v15 = vcombine.low %v256_v4, %v260_v42  ;;  %v589_v4 = vrot.slane %v9056_v53, 4  ;;  %v9176_v42 = vrot.slane %v6597_v44, 7  ;;  %v7253_v41 = vsel %vm7098_vm8, %v592_v12, %v9052_v1 }
  0xab   :  { %3410 = vmatprep.mubr.bf16.mxu1 %v6963_v19  ;;  %5535 = vmatpush3.bf16.msra.mxu1 %v6316_v23  ;;  %v6324_v23 = vld [vmem:[#allocation2 + $0x2b0] sm:$0xff]   ;;  %9178 = vst [vmem:[#allocation57_spill] sm:$0xff] %v7253_v41  ;;  %v4726_v12 = vrot.slane %v7171_v63, 11 }
  0xac   :  { %3282 = vmatmul.mubr.bf16.gmra.mrb[60].mxu0 %v4823_v18  ;;  %v7224_v18 = vld [vmem:[%s8971_s0 + $0x48] sm:$0xf]  ;;  %5536 = vmatprep.subr.bf16.mxu1 %v6319_v11  ;;  %v6327_v11 = vld [vmem:[#allocation2 + $0x2f8] sm:$0xff]   ;;  %v465_v36 = vsel %vm7098_vm8, %v4724_v31, %v9176_v42  ;;  %v9055_v31 = vrot.slane %v6937_v21, 7  ;;  %v603_v42 = vrot.slane %v6976_v2, 7  ;;  %v4729_v2 = vrot.slane %v9184_v8, 11 }
  0xad   :  { %3289 = vmatprep.mubr.bf16.mxu0 %v6927_v6  ;;  %5451 = vmatpush3.bf16.msra.mxu0 %v6322_v55  ;;  %9175 = vst [vmem:[#allocation55_spill] sm:$0xff] %v7224_v18  ;;  %v265_v6 = vrot.slane %v7224_v18, 5  ;;  %v9053_v8 = vshrl.u32 %v7314_v17, 16 }
  0xae   :  { %5452 = vmatprep.subr.bf16.mxu0 %v6325_v10  ;;  %v6323_v10 = vld [vmem:[#allocation2 + $0x2f0] sm:$0xff]  }
  0xaf   :  { %v266_v55 = vsel %vm6767_vm5, %v264_v16, %v265_v6  ;;  %5537 = vmatpush3.bf16.msra.mxu1 %v6320_v9  ;;  %v511_v16 = vrot.slane %v6688_v37, 7  ;;  %v6328_v6 = vld [vmem:[#allocation2 + $0x2b8] sm:$0xff]   ;;  %v9179_v9 = vshrl.u32 %v6586_v39, 16 }
  0xb0   :  { %5538 = vmatprep.subr.bf16.mxu1 %v6323_v10  ;;  %v4825_v44 = vcombine.low %v263_v3, %v266_v55  ;;  %v7275_v3 = vld [vmem:[%s8971_s0 + $0xc] sm:$0xf] }
  0xb1   :  { %5453 = vmatpush3.bf16.msra.mxu0 %v6326_v25  ;;  %v507_v25 = vrot.slane %v6621_v59, 7  ;;  %9180 = vst [vmem:[#allocation58_spill] sm:$0xff] %v7275_v3  ;;  %v9054_v39 = vshrl.u32 %v7275_v3, 16  ;;  %v512_v63 = vor.u32 %v511_v16, %v6630_v0 }
  0xb2   :  { %5614 = vmatprep.subr.bf16.mxu0 %v6329_v33  ;;  %3411 = vmatmul.mubr.bf16.gmra.mrb[60].mxu1 %v7025_v30  ;;  %v484_v33 = vrot.slane %v7165_v20, 7  ;;  %v6454_v30 = vld [vmem:[%s8971_s0 + $0x14] sm:$0xf] }
  0xb3   :  { %3418 = vmatprep.mubr.bf16.mxu1 %v7027_v56  ;;  %5539 = vmatpush3.bf16.msra.mxu1 %v6324_v23  ;;  %v4725_v10 = vrot.slane %v6454_v30, 11  ;;  %v510_v20 = vrot.slane %v507_v25, 4  ;;  %v508_v55 = vor.u32 %v507_v25, %v6618_v58  ;;  %v964_v30 = vrot.slane %v603_v42, 4 }
  0xb4   :  { %3290 = vmatmul.mubr.bf16.gmra.mrb[64].mxu0 %v4824_v15  ;;  %v7262_v15 = vcombine.low %v465_v36, %v7106_v50  ;;  %5540 = vmatprep.subr.bf16.mxu1 %v6327_v11  ;;  %v487_v50 = vrot.slane %v7178_v7, 7  ;;  %v486_v7 = vrot.slane %v484_v33, 4  ;;  %v602_v11 = vrot.slane %v9055_v31, 4 }
  0xb5   :  { %3297 = vmatprep.mubr.bf16.mxu0 %v7002_v27  ;;  %v7247_v27 = vsel %vm7098_vm8, %v589_v4, %v590_v40  ;;  %v4728_v40 = vrot.slane %v9179_v9, 11  ;;  %v6331_v4 = vld [vmem:[#allocation2 + $0x3c0] sm:$0xff]   ;;  %v9183_v36 = vrot.slane %v6678_v29, 7  ;;  %v68_v9 = vld [vmem:[%s8971_s0 + $0x9c] sm:$0xf]  ;;  %v522_v29 = vrot.slane %v6746_v48, 7 }
  0xb6   :  { %9177 = vst [vmem:[#allocation56_spill] sm:$0xff] %v7247_v27  ;;  %v965_v1 = vrot.slane %v68_v9, 7  ;;  %v494_v9 = vrot.slane %v7204_v24, 7  ;;  %v7353_v24 = vcombine.low %v7138_v32, %v7149_v26  ;;  %v9192_v32 = vld [vmem:[#allocation26_spill] sm:$0xff] }
  0xb7   :  { %5541 = vmatpush3.bf16.msra.mxu1 %v6328_v6  ;;  %v475_v25 = vsel %vm7098_vm8, %v4725_v10, %v9183_v36  ;;  %v517_v6 = vrot.slane %v9054_v39, 7  ;;  %v513_v10 = vsel %vm7282_vm11, %v510_v20, %v512_v63  ;;  %v7319_v36 = vsel %vm7098_vm8, %v602_v11, %v603_v42  ;;  %v9188_v63 = vld [vmem:[#allocation18_spill] sm:$0xff]  ;;  %v9193_v39 = vld [vmem:[#allocation5_spill] sm:$0xff]  ;;  %v7376_v11 = vld [vmem:[%s8971_s0 + $0x78] sm:$0xf] }
  0xb8   :  { %5702 = vmatprep.subr.bf16.mxu1 %v6331_v4  ;;  %v7309_v4 = vcombine.low %v7110_v54, %v475_v25  ;;  %9186 = vst [vmem:[#allocation60_spill] sm:$0xff] %v7319_v36  ;;  %v523_v25 = vor.u32 %v522_v29, %v9188_v63  ;;  %v4727_v42 = vrot.slane %v7211_v47, 11  ;;  %v532_v54 = vrot.slane %v9053_v8, 7 }
  0xba   :  { %3419 = vmatmul.mubr.bf16.gmra.mrb[64].mxu1 %v7054_v43  ;;  %v489_v43 = vrot.slane %v487_v50, 4  ;;  %v533_v26 = vor.u32 %v532_v54, %v9192_v32 }
  0xbb   :  { %3426 = vmatprep.mubr.bf16.mxu1 %v7058_v22 }
  0xbc   :  { %3298 = vmatmul.mubr.bf16.gmra.mrb[68].mxu0 %v4825_v44  ;;  %v514_v44 = vrot.slane %v511_v16, 4  ;;  %v509_v16 = vsel %vm7282_vm11, %v4728_v40, %v508_v55  ;;  %v7323_v40 = vsel %vm7098_vm8, %v964_v30, %v965_v1  ;;  %v518_v55 = vor.u32 %v517_v6, %v6695_v51 }
  0xbd   :  { %3305 = vmatprep.mubr.bf16.mxu0 %v7262_v15  ;;  %9187 = vst [vmem:[#allocation61_spill] sm:$0xff] %v7323_v40  ;;  %v7328_v20 = vcombine.low %v509_v16, %v513_v10  ;;  %v485_v1 = vsel %vm7098_vm8, %v4726_v12, %v484_v33  ;;  %v525_v30 = vrot.slane %v522_v29, 4  ;;  %v9189_v16 = vld [vmem:[#allocation25_spill] sm:$0xff]  ;;  %v7345_v6 = vsel %vm7098_vm8, %v486_v7, %v487_v50  ;;  %v6457_v12 = vld [vmem:[%s8971_s0 + $0x7c] sm:$0xf] }
  0xbe   :  { %v526_v10 = vrot.slane %v9189_v16, 7  ;;  %9190 = vst [vmem:[#allocation62_spill] sm:$0xff] %v7345_v6  ;;  %v519_v47 = vsel %vm7282_vm11, %v514_v44, %v518_v55  ;;  %v496_v33 = vrot.slane %v494_v9, 4  ;;  %v441_v29 = vrot.slane %v6457_v12, 5  ;;  %v9191_v7 = vld [vmem:[#allocation24_spill] sm:$0xff] }
  0xbf   :  { %v7359_v8 = vcombine.low %v485_v1, %v7345_v6  ;;  %v497_v55 = vrot.slane %v7191_v57, 7  ;;  %v9194_v12 = vshrl.u32 %v9193_v39, 16  ;;  %v9195_v1 = vld [vmem:[#allocation7_spill] sm:$0xff]  ;;  %v6459_v57 = vld [vmem:[%s8971_s0 + $0x80] sm:$0xf]  ;;  %v495_v40 = vsel %vm7098_vm8, %v4727_v42, %v494_v9 }
  0xc0   :  { %v527_v44 = vor.u32 %v526_v10, %v9191_v7  ;;  %v537_v53 = vrot.slane %v9195_v1, 7  ;;  %v443_v54 = vrot.slane %v441_v29, 4  ;;  %v444_v39 = vrot.slane %v6459_v57, 5  ;;  %v9199_v9 = vld [vmem:[#allocation13_spill] sm:$0xff] }
  0xc1   :  { %v4730_v31 = vrot.slane %v9194_v12, 11  ;;  %v9197_v12 = vrot.slane %v7198_v52, 7  ;;  %v499_v49 = vrot.slane %v497_v55, 4 }
  0xc2   :  { %3427 = vmatmul.mubr.bf16.gmra.mrb[68].mxu1 %v7073_v34  ;;  %v524_v34 = vsel %vm7282_vm11, %v4729_v2, %v523_v25  ;;  %v529_v2 = vrot.slane %v526_v10, 4  ;;  %v4722_v10 = vrot.slane %v7376_v11, 9  ;;  %v528_v28 = vsel %vm7282_vm11, %v525_v30, %v527_v44 }
  0xc3   :  { %3434 = vmatprep.mubr.bf16.mxu1 %v7328_v20  ;;  %v7361_v50 = vcombine.low %v519_v47, %v524_v34  ;;  %v9196_v47 = vld [vmem:[#allocation9_spill] sm:$0xff]  ;;  %v7388_v25 = vsel %vm7098_vm8, %v489_v43, %v9197_v12  ;;  %v540_v32 = vrot.slane %v537_v53, 4  ;;  %v445_v42 = vsel %vm6767_vm5, %v443_v54, %v444_v39 }
  0xc4   :  { %3306 = vmatmul.mubr.bf16.gmra.mrb[72].mxu0 %v7076_v13  ;;  %v541_v34 = vrot.slane %v9196_v47, 7  ;;  %9198 = vst [vmem:[#allocation5_spill] sm:$0xff] %v7388_v25  ;;  %v534_v6 = vsel %vm7282_vm11, %v529_v2, %v533_v26  ;;  %v7398_v1 = vcombine.low %v7388_v25, %v495_v40  ;;  %v442_v43 = vsel %vm6767_vm5, %v4722_v10, %v441_v29  ;;  %v9201_v2 = vld [vmem:[#allocation19_spill] sm:$0xff]  ;;  %v9203_v25 = vld [vmem:[#allocation8_spill] sm:$0xff] }
  0xc5   :  { %3313 = vmatprep.mubr.bf16.mxu0 %v7309_v4  ;;  %v7400_v7 = vcombine.low %v528_v28, %v534_v6  ;;  %v9200_v30 = vshrl.u32 %v9199_v9, 16  ;;  %v552_v26 = vrot.slane %v9201_v2, 7  ;;  %v446_v12 = vrot.slane %v444_v39, 4  ;;  %v6460_v28 = vld [vmem:[%s8971_s0 + $0x84] sm:$0xf]  ;;  %v9202_v6 = vld [vmem:[#allocation6_spill] sm:$0xff] }
  0xc6   :  { %v544_v57 = vrot.slane %v541_v34, 4  ;;  %v447_v40 = vrot.slane %v6460_v28, 5  ;;  %v538_v47 = vor.u32 %v537_v53, %v9202_v6  ;;  %v542_v29 = vor.u32 %v541_v34, %v9203_v25  ;;  %v7423_v9 = vld [vmem:[%s8971_s0 + $0x8c] sm:$0xf]  ;;  %v7430_v53 = vld [vmem:[%s8971_s0 + $0x90] sm:$0xf] }
  0xc7   :  { %v4731_v44 = vrot.slane %v9200_v30, 11  ;;  %v7416_v10 = vcombine.low %v442_v43, %v445_v42  ;;  %v9204_v54 = vshrl.u32 %v7198_v52, 16  ;;  %v4723_v39 = vrot.slane %v7423_v9, 9  ;;  %v9205_v42 = vld [vmem:[#allocation21_spill] sm:$0xff]  ;;  %v6463_v28 = vld [vmem:[%s8971_s0 + $0x94] sm:$0xf] }
  0xc8   :  { %v451_v34 = vrot.slane %v7430_v53, 5  ;;  %v555_v43 = vrot.slane %v552_v26, 4  ;;  %v556_v30 = vrot.slane %v9205_v42, 7  ;;  %v9207_v2 = vrot.slane %v7224_v18, 7 }
  0xc9   :  { %v547_v16 = vrot.slane %v9204_v54, 7  ;;  %v7438_v54 = vsel %vm7098_vm8, %v496_v33, %v497_v55  ;;  %v539_v25 = vsel %vm7282_vm11, %v4730_v31, %v538_v47  ;;  %v543_v42 = vsel %vm7282_vm11, %v540_v32, %v542_v29  ;;  %v9209_v55 = vld [vmem:[#allocation14_spill] sm:$0xff] }
  0xca   :  { %3435 = vmatmul.mubr.bf16.gmra.mrb[72].mxu1 %v7359_v8  ;;  %9206 = vst [vmem:[#allocation13_spill] sm:$0xff] %v7438_v54  ;;  %v7444_v52 = vsel %vm7098_vm8, %v499_v49, %v9207_v2  ;;  %v453_v6 = vrot.slane %v451_v34, 4  ;;  %v454_v63 = vrot.slane %v6463_v28, 5  ;;  %v7458_v49 = vcombine.low %v539_v25, %v543_v42  ;;  %v9210_v2 = vld [vmem:[#allocation15_spill] sm:$0xff] }
  0xcb   :  { %3442 = vmatprep.mubr.bf16.mxu1 %v7361_v50  ;;  %9208 = vst [vmem:[#allocation63_spill] sm:$0xff] %v7444_v52  ;;  %v7455_v33 = vcombine.low %v7438_v54, %v7444_v52  ;;  %v448_v31 = vsel %vm6767_vm5, %v446_v12, %v447_v40  ;;  %v452_v32 = vsel %vm6767_vm5, %v4723_v39, %v451_v34  ;;  %v9211_v52 = vshrl.u32 %v7224_v18, 16  ;;  %v6464_v54 = vld [vmem:[%s8971_s0 + $0x98] sm:$0xf]  ;;  %v7650_v18 = vld [vmem:[%s8971_s0 + $0x6c] sm:$0xf] }
  0xcc   :  { %3314 = vmatmul.mubr.bf16.gmra.mrb[76].mxu0 %v7094_v62  ;;  %v548_v47 = vor.u32 %v547_v16, %v9209_v55  ;;  %v553_v29 = vor.u32 %v552_v26, %v9210_v2  ;;  %v7468_v28 = vcombine.low %v448_v31, %v452_v32  ;;  %v456_v42 = vrot.slane %v454_v63, 4  ;;  %v9213_v32 = vld [vmem:[#allocation22_spill] sm:$0xff]  ;;  %9220 = vst [vmem:[#allocation68_spill] sm:$0xff] %v7650_v18  ;;  %v9224_v2 = vld [vmem:[#allocation31_spill] sm:$0xff] }
  0xcd   :  { %3321 = vmatprep.mubr.bf16.mxu0 %v7353_v24  ;;  %v562_v25 = vrot.slane %v9211_v52, 7  ;;  %v457_v12 = vrot.slane %v6464_v54, 5  ;;  %v559_v52 = vrot.slane %v556_v30, 4  ;;  %v455_v39 = vsel %vm6767_vm5, %v453_v6, %v454_v63  ;;  %v9212_v54 = vld [vmem:[#allocation20_spill] sm:$0xff]  ;;  %v6330_v63 = vld [vmem:[#allocation2 + $0x300] sm:$0xff]   ;;  %v6333_v6 = vld [vmem:[#allocation2 + $0x348] sm:$0xff]  }
  0xce   :  { %v549_v16 = vsel %vm7282_vm11, %v544_v57, %v548_v47  ;;  %v554_v26 = vsel %vm7282_vm11, %v4731_v44, %v553_v29  ;;  %v557_v31 = vor.u32 %v556_v30, %v9212_v54  ;;  %v6337_v30 = vld [vmem:[#allocation2 + $0x350] sm:$0xff]   ;;  %v607_v55 = vrot.slane %v9224_v2, 7 }
  0xcf   :  { %v7481_v40 = vcombine.low %v549_v16, %v554_v26  ;;  %v458_v34 = vsel %vm6767_vm5, %v456_v42, %v457_v12  ;;  %v563_v57 = vor.u32 %v562_v25, %v9213_v32  ;;  %v6338_v25 = vld [vmem:[#allocation2 + $0x310] sm:$0xff]   ;;  %v6341_v42 = vld [vmem:[#allocation2 + $0x358] sm:$0xff]   ;;  %v6332_v12 = vld [vmem:[#allocation2 + $0x380] sm:$0xff]  }
  0xd0   :  { %v7491_v44 = vcombine.low %v455_v39, %v458_v34  ;;  %v558_v47 = vsel %vm7282_vm11, %v555_v43, %v557_v31  ;;  %v6334_v43 = vld [vmem:[#allocation2 + $0x308] sm:$0xff]   ;;  %v6342_v16 = vld [vmem:[#allocation2 + $0x318] sm:$0xff]   ;;  %v6346_v26 = vld [vmem:[#allocation2 + $0x360] sm:$0xff]  }
  0xd1   :  { %v564_v29 = vsel %vm7282_vm11, %v559_v52, %v563_v57  ;;  %v6336_v52 = vld [vmem:[#allocation2 + $0x388] sm:$0xff]   ;;  %v6339_v39 = vld [vmem:[#allocation2 + $0x3d0] sm:$0xff]   ;;  %v6347_v34 = vld [vmem:[#allocation2 + $0x320] sm:$0xff]  }
  0xd2   :  { %3443 = vmatmul.mubr.bf16.gmra.mrb[76].mxu1 %v7398_v1  ;;  %v7499_v14 = vcombine.low %v558_v47, %v564_v29  ;;  %v6340_v31 = vld [vmem:[#allocation2 + $0x390] sm:$0xff]   ;;  %v6343_v47 = vld [vmem:[#allocation2 + $0x3d8] sm:$0xff]  }
  0xd3   :  { %3450 = vmatprep.mubr.bf16.mxu1 %v7400_v7 }
  0xd4   :  { %3322 = vmatmul.mubr.bf16.gmra.mrb[80].mxu0 %v7133_v61 }
  0xd5   :  { %3329 = vmatprep.mubr.bf16.mxu0 %v7359_v8 }
  0xda   :  { %3451 = vmatmul.mubr.bf16.gmra.mrb[80].mxu1 %v7455_v33 }
  0xdb   :  { %3458 = vmatprep.mubr.bf16.mxu1 %v7458_v49 }
  0xdc   :  { %3330 = vmatmul.mubr.bf16.gmra.mrb[84].mxu0 %v7416_v10 }
  0xdd   :  { %3337 = vmatprep.mubr.bf16.mxu0 %v7398_v1 }
  0xe2   :  { %3459 = vmatmul.mubr.bf16.gmra.mrb[84].mxu1 %v7328_v20 }
  0xe3   :  { %3466 = vmatprep.mubr.bf16.mxu1 %v7481_v40 }
  0xe4   :  { %3338 = vmatmul.mubr.bf16.gmra.mrb[88].mxu0 %v7468_v28 }
  0xe5   :  { %3345 = vmatprep.mubr.bf16.mxu0 %v7455_v33 }
  0xea   :  { %3467 = vmatmul.mubr.bf16.gmra.mrb[88].mxu1 %v7361_v50 }
  0xeb   :  { %3474 = vmatprep.mubr.bf16.mxu1 %v7499_v14 }
  0xec   :  { %3346 = vmatmul.mubr.bf16.gmra.mrb[92].mxu0 %v7491_v44 }
  0xed   :  { %3515 = vmatprep.mubr.bf16.mxu0 %v7076_v13 }
  0xf2   :  { %3475 = vmatmul.mubr.bf16.gmra.mrb[92].mxu1 %v7400_v7 }
  0xf3   :  { %3644 = vmatprep.mubr.bf16.mxu1 %v7359_v8 }
  0xf4   :  { %3516 = vmatmul.mubr.bf16.vlgmr.msra.gmra.mrb[96].mxu0 %v6963_v19  ;;  %v6335_v19 = vld [vmem:[#allocation2 + $0x3c8] sm:$0xff]  }
  0xf5   :  { %5615 = vmatpush3.bf16.msra.mxu0 %v6330_v63  ;;  %3523 = vmatprep.mubr.bf16.mxu0 %v7094_v62  ;;  %v6357_v63 = vld [vmem:[#allocation2 + $0x370] sm:$0xff]  }
  0xf6   :  { %5616 = vmatprep.subr.bf16.mxu0 %v6333_v6 }
  0xf9   :  { %5617 = vmatpush3.bf16.msra.mxu0 %v6334_v43 }
  0xfa   :  { %5618 = vmatprep.subr.bf16.mxu0 %v6337_v30  ;;  %3645 = vmatmul.mubr.bf16.vlgmr.msra.gmra.mrb[96].mxu1 %v7262_v15  ;;  %v6352_v15 = vld [vmem:[#allocation2 + $0x328] sm:$0xff]  }
  0xfb   :  { %5703 = vmatpush3.bf16.msra.mxu1 %v6332_v12  ;;  %3652 = vmatprep.mubr.bf16.mxu1 %v7398_v1  ;;  %v6362_v12 = vld [vmem:[#allocation2 + $0x378] sm:$0xff]  }
  0xfc   :  { %3524 = vmatmul.mubr.bf16.gmra.mrb[100].mxu0 %v7027_v56  ;;  %5704 = vmatprep.subr.bf16.mxu1 %v6335_v19  ;;  %v6351_v56 = vld [vmem:[#allocation2 + $0x368] sm:$0xff]  }
  0xfd   :  { %3531 = vmatprep.mubr.bf16.mxu0 %v7133_v61  ;;  %5619 = vmatpush3.bf16.msra.mxu0 %v6338_v25  ;;  %v6354_v19 = vld [vmem:[#allocation2 + $0x3e8] sm:$0xff]  }
  0xfe   :  { %5620 = vmatprep.subr.bf16.mxu0 %v6341_v42  ;;  %v6358_v42 = vld [vmem:[#allocation2 + $0x330] sm:$0xff]  }
  0xff   :  { %5705 = vmatpush3.bf16.msra.mxu1 %v6336_v52  ;;  %v6367_v52 = vld [vmem:[#allocation2 + $0x440] sm:$0xff]  }
 0x100   :  { %5706 = vmatprep.subr.bf16.mxu1 %v6339_v39 }
 0x101   :  { %5621 = vmatpush3.bf16.msra.mxu0 %v6342_v16  ;;  %v6363_v16 = vld [vmem:[#allocation2 + $0x338] sm:$0xff]  }
 0x102   :  { %5622 = vmatprep.subr.bf16.mxu0 %v6346_v26  ;;  %3653 = vmatmul.mubr.bf16.gmra.mrb[100].mxu1 %v7309_v4  ;;  %v6349_v4 = vld [vmem:[#allocation2 + $0x3a0] sm:$0xff]  }
 0x103   :  { %3660 = vmatprep.mubr.bf16.mxu1 %v7455_v33  ;;  %5707 = vmatpush3.bf16.msra.mxu1 %v6340_v31 }
 0x104   :  { %3532 = vmatmul.mubr.bf16.gmra.mrb[104].mxu0 %v7058_v22  ;;  %v6344_v22 = vld [vmem:[#allocation2 + $0x398] sm:$0xff]   ;;  %5708 = vmatprep.subr.bf16.mxu1 %v6343_v47  ;;  %v6359_v47 = vld [vmem:[#allocation2 + $0x3f0] sm:$0xff]  }
 0x105   :  { %3539 = vmatprep.mubr.bf16.mxu0 %v7416_v10  ;;  %5623 = vmatpush3.bf16.msra.mxu0 %v6347_v34  ;;  %v6348_v10 = vld [vmem:[#allocation2 + $0x3e0] sm:$0xff]  }
 0x106   :  { %5624 = vmatprep.subr.bf16.mxu0 %v6351_v56 }
 0x107   :  { %v5102_v57 = vpop.f32.mrb[0].mxu0  ;;  %5709 = vmatpush3.bf16.msra.mxu1 %v6344_v22 }
 0x108   :  { %v5103_v29 = vpop.f32.mrb[1].mxu0  ;;  %5710 = vmatprep.subr.bf16.mxu1 %v6348_v10  ;;  %v6365_v10 = vld [vmem:[#allocation2 + $0x3f8] sm:$0xff]  }
 0x109   :  { %v5104_v6 = vadd.f32 %v5103_v29, %v5102_v57  ;;  %v5105_v43 = vpop.f32.mrb[2].mxu0  ;;  %5625 = vmatpush3.bf16.msra.mxu0 %v6352_v15  ;;  %v5190_v34 = vpop.f32.mrb[0].mxu1 }
 0x10a   :  { %v5106_v30 = vpop.f32.mrb[3].mxu0  ;;  %5626 = vmatprep.subr.bf16.mxu0 %v6357_v63  ;;  %3661 = vmatmul.mubr.bf16.gmra.mrb[104].mxu1 %v7353_v24 }
 0x10b   :  { %v5107_v25 = vadd.f32 %v5106_v30, %v5105_v43  ;;  %3668 = vmatprep.mubr.bf16.mxu1 %v7328_v20  ;;  %5711 = vmatpush3.bf16.msra.mxu1 %v6349_v4  ;;  %v6360_v30 = vld [vmem:[#allocation2 + $0x3b0] sm:$0xff]  }
 0x10c   :  { %3540 = vmatmul.mubr.bf16.gmra.mrb[108].mxu0 %v7076_v13  ;;  %v6355_v13 = vld [vmem:[#allocation2 + $0x3a8] sm:$0xff]   ;;  %5712 = vmatprep.subr.bf16.mxu1 %v6354_v19 }
 0x10d   :  { %3547 = vmatprep.mubr.bf16.mxu0 %v7468_v28  ;;  %5627 = vmatpush3.bf16.msra.mxu0 %v6358_v42  ;;  %v5191_v28 = vpop.f32.mrb[1].mxu1 }
 0x10e   :  { %5628 = vmatprep.subr.bf16.mxu0 %v6362_v12  ;;  %v5192_v15 = vadd.f32 %v5191_v28, %v5190_v34  ;;  %v5193_v29 = vpop.f32.mrb[2].mxu1 }
 0x10f   :  { %v5108_v26 = vpop.f32.mrb[4].mxu0  ;;  %v5194_v43 = vpop.f32.mrb[3].mxu1  ;;  %5713 = vmatpush3.bf16.msra.mxu1 %v6355_v13 }
 0x110   :  { %v5109_v39 = vpop.f32.mrb[5].mxu0  ;;  %v5195_v24 = vadd.f32 %v5194_v43, %v5193_v29  ;;  %v7522_v22 = vadd.f32 %v5192_v15, %v5104_v6  ;;  %5714 = vmatprep.subr.bf16.mxu1 %v6359_v47 }
 0x111   :  { %v5110_v56 = vadd.f32 %v5109_v39, %v5108_v26  ;;  %v5111_v31 = vpop.f32.mrb[6].mxu0  ;;  %5629 = vmatpush3.bf16.msra.mxu0 %v6363_v16  ;;  %v6369_v26 = vld [vmem:[#allocation2 + $0x4c0] sm:$0xff]  }
 0x112   :  { %v5112_v57 = vpop.f32.mrb[7].mxu0  ;;  %5790 = vmatprep.subr.bf16.mxu0 %v6367_v52  ;;  %v7524_v12 = vadd.f32 %v5195_v24, %v5107_v25  ;;  %3669 = vmatmul.mubr.bf16.gmra.mrb[108].mxu1 %v7359_v8  ;;  %v6366_v8 = vld [vmem:[#allocation2 + $0x3b8] sm:$0xff]   ;;  %v5196_v52 = vpop.f32.mrb[4].mxu1 }
 0x113   :  { %v5113_v63 = vadd.f32 %v5112_v57, %v5111_v31  ;;  %3676 = vmatprep.mubr.bf16.mxu1 %v7361_v50  ;;  %5715 = vmatpush3.bf16.msra.mxu1 %v6360_v30  ;;  %v5197_v34 = vpop.f32.mrb[5].mxu1  ;;  %v4734_v57 = vrot.slane %v7376_v11, 11  ;;  %v7552_v30 = vld [vmem:[%s8971_s0 + $0x54] sm:$0xf]  ;;  %v7558_v11 = vld [vmem:[%s8971_s0 + $0x18] sm:$0xf] }
 0x114   :  { %3548 = vmatmul.mubr.bf16.gmra.mrb[112].mxu0 %v7094_v62  ;;  %v7531_v62 = vld [vmem:[%s8971_s0 + $0x4] sm:$0xf]  ;;  %5716 = vmatprep.subr.bf16.mxu1 %v6365_v10  ;;  %v5198_v31 = vadd.f32 %v5197_v34, %v5196_v52  ;;  %v5199_v13 = vpop.f32.mrb[6].mxu1  ;;  %v567_v10 = vrot.slane %v7552_v30, 7  ;;  %v6469_v52 = vld [vmem:[%s8971_s0 + $0x50] sm:$0xf] }
 0x115   :  { %3555 = vmatprep.mubr.bf16.mxu0 %v7491_v44  ;;  %v7536_v44 = vld [vmem:[%s8971_s0 + $0x8] sm:$0xf]  ;;  %v5200_v28 = vpop.f32.mrb[7].mxu1  ;;  %v4732_v34 = vrot.slane %v6469_v52, 11 }
 0x116   :  { %v7540_v6 = vcombine.low %v7531_v62, %v7536_v44  ;;  %v5201_v47 = vadd.f32 %v5200_v28, %v5199_v13  ;;  %v7545_v29 = vadd.f32 %v5198_v31, %v5110_v56  ;;  %v7582_v28 = vld [vmem:[%s8971_s0 + $0x58] sm:$0xf] }
 0x117   :  { %v5114_v42 = vpop.f32.mrb[8].mxu0  ;;  %5717 = vmatpush3.bf16.msra.mxu1 %v6366_v8 }
 0x118   :  { %v5115_v4 = vpop.f32.mrb[9].mxu0  ;;  %5878 = vmatprep.subr.bf16.mxu1 %v6369_v26  ;;  %v7564_v56 = vadd.f32 %v5201_v47, %v5113_v63 }
 0x119   :  { %v5116_v19 = vadd.f32 %v5115_v4, %v5114_v42  ;;  %v5117_v16 = vpop.f32.mrb[10].mxu0  ;;  %v9214_v4 = vrot.slane %v6802_v5, 7  ;;  %v569_v5 = vrot.slane %v567_v10, 4 }
 0x11a   :  { %v5118_v25 = vpop.f32.mrb[11].mxu0  ;;  %3677 = vmatmul.mubr.bf16.gmra.mrb[112].mxu1 %v7398_v1  ;;  %v7562_v1 = vcombine.low %v7275_v3, %v7558_v11 }
 0x11b   :  { %v5119_v39 = vadd.f32 %v5118_v25, %v5117_v16  ;;  %3684 = vmatprep.mubr.bf16.mxu1 %v7400_v7  ;;  %v588_v16 = vsel %vm7098_vm8, %v4734_v57, %v9214_v4  ;;  %v570_v57 = vrot.slane %v7582_v28, 7 }
 0x11c   :  { %3556 = vmatmul.mubr.bf16.gmra.mrb[116].mxu0 %v7133_v61  ;;  %v7577_v13 = vcombine.low %v588_v16, %v7247_v27  ;;  %v568_v16 = vsel %vm7098_vm8, %v4732_v34, %v567_v10 }
 0x11d   :  { %3563 = vmatprep.mubr.bf16.mxu0 %v7540_v6  ;;  %v5202_v8 = vpop.f32.mrb[8].mxu1 }
 0x11e   :  { %v5203_v26 = vpop.f32.mrb[9].mxu1 }
 0x11f   :  { %v5120_v15 = vpop.f32.mrb[12].mxu0  ;;  %v5204_v31 = vadd.f32 %v5203_v26, %v5202_v8  ;;  %v5205_v63 = vpop.f32.mrb[10].mxu1  ;;  %v7596_v26 = vsel %vm7098_vm8, %v569_v5, %v570_v57 }
 0x120   :  { %v5121_v43 = vpop.f32.mrb[13].mxu0  ;;  %v5206_v47 = vpop.f32.mrb[11].mxu1  ;;  %9215 = vst [vmem:[#allocation64_spill] sm:$0xff] %v7596_v26 }
 0x121   :  { %v5122_v24 = vadd.f32 %v5121_v43, %v5120_v15  ;;  %v5123_v61 = vpop.f32.mrb[14].mxu0  ;;  %v4735_v15 = vrot.slane %v7423_v9, 11  ;;  %v597_v43 = vrot.slane %v7430_v53, 7  ;;  %v7588_v4 = vadd.f32 %v5204_v31, %v5116_v19  ;;  %v7603_v53 = vld [vmem:[%s8971_s0 + $0x1c] sm:$0xf] }
 0x122   :  { %v5124_v42 = vpop.f32.mrb[15].mxu0  ;;  %3685 = vmatmul.mubr.bf16.gmra.mrb[116].mxu1 %v7455_v33  ;;  %v7607_v33 = vcombine.low %v7603_v53, %v7314_v17  ;;  %v9225_v17 = vld [vmem:[#allocation39_spill] sm:$0xff] }
 0x123   :  { %v7570_v25 = vadd.f32 %v5124_v42, %v5123_v61  ;;  %v5207_v61 = vadd.f32 %v5206_v47, %v5205_v63  ;;  %3692 = vmatprep.mubr.bf16.mxu1 %v7577_v13  ;;  %v598_v34 = vsel %vm7098_vm8, %v4735_v15, %v597_v43  ;;  %v7616_v47 = vcombine.low %v568_v16, %v7596_v26  ;;  %v6473_v16 = vld [vmem:[%s8971_s0 + $0x64] sm:$0xf] }
 0x124   :  { %3564 = vmatmul.mubr.bf16.gmra.mrb[120].mxu0 %v7458_v49  ;;  %v7626_v15 = vcombine.low %v7253_v41, %v598_v34  ;;  %v611_v48 = vrot.slane %v9225_v17, 7  ;;  %v9229_v17 = vld [vmem:[#allocation36_spill] sm:$0xff] }
 0x125   :  { %3571 = vmatprep.mubr.bf16.mxu0 %v7562_v1  ;;  %v7609_v19 = vadd.f32 %v5207_v61, %v5119_v39  ;;  %v5208_v31 = vpop.f32.mrb[12].mxu1 }
 0x126   :  { %v5209_v5 = vpop.f32.mrb[13].mxu1  ;;  %v612_v2 = vor.u32 %v611_v48, %v9229_v17  ;;  %v622_v17 = vrot.slane %v7005_v45, 7  ;;  %v9236_v45 = vshrl.u32 %v6898_v35, 16  ;;  %v7765_v35 = vld [vmem:[%s8971_s0 + $0x44] sm:$0xf] }
 0x127   :  { %v5126_v42 = vpop.f32.mrb[16].mxu0  ;;  %v5210_v61 = vadd.f32 %v5209_v5, %v5208_v31  ;;  %v5211_v27 = vpop.f32.mrb[14].mxu1  ;;  %v599_v31 = vrot.slane %v597_v43, 4  ;;  %v580_v43 = vrot.slane %v7650_v18, 7  ;;  %9238 = vst [vmem:[#allocation76_spill] sm:$0xff] %v7765_v35 }
 0x128   :  { %v5127_v8 = vpop.f32.mrb[17].mxu0  ;;  %v5212_v39 = vpop.f32.mrb[15].mxu1 }
 0x129   :  { %v7598_v52 = vadd.f32 %v5127_v8, %v5126_v42  ;;  %v5129_v9 = vpop.f32.mrb[18].mxu0  ;;  %v572_v42 = vrot.slane %v570_v57, 4  ;;  %v7622_v8 = vld [vmem:[%s8971_s0 + $0x5c] sm:$0xf]  ;;  %v7634_v57 = vld [vmem:[%s8971_s0 + $0x68] sm:$0xf]  ;;  %v5213_v5 = vadd.f32 %v5212_v39, %v5211_v27  ;;  %v7638_v34 = vadd.f32 %v5210_v61, %v5122_v24 }
 0x12a   :  { %v5130_v10 = vpop.f32.mrb[19].mxu0  ;;  %9216 = vst [vmem:[#allocation65_spill] sm:$0xff] %v7622_v8  ;;  %9217 = vst [vmem:[#allocation66_spill] sm:$0xff] %v7634_v57  ;;  %3693 = vmatmul.mubr.bf16.gmra.mrb[120].mxu1 %v7616_v47  ;;  %v9218_v41 = vrot.slane %v7622_v8, 7 }
 0x12b   :  { %v7613_v63 = vadd.f32 %v5130_v10, %v5129_v9  ;;  %v4733_v9 = vrot.slane %v6473_v16, 11  ;;  %v577_v10 = vrot.slane %v7634_v57, 7  ;;  %3700 = vmatprep.mubr.bf16.mxu1 %v7626_v15  ;;  %v7673_v54 = vadd.f32 %v5213_v5, %v7570_v25 }
 0x12c   :  { %3572 = vmatmul.mubr.bf16.gmra.mrb[124].mxu0 %v7481_v40  ;;  %v7645_v16 = vsel %vm7098_vm8, %v572_v42, %v9218_v41  ;;  %v7661_v41 = vld [vmem:[%s8971_s0 + $0x2c] sm:$0xf]  ;;  %v7666_v42 = vld [vmem:[%s8971_s0 + $0x30] sm:$0xf]  ;;  %v582_v5 = vrot.slane %v580_v43, 4 }
 0x12d   :  { %3579 = vmatprep.mubr.bf16.mxu0 %v7607_v33  ;;  %9219 = vst [vmem:[#allocation67_spill] sm:$0xff] %v7645_v16  ;;  %v578_v27 = vsel %vm7098_vm8, %v4733_v9, %v577_v10  ;;  %9221 = vst [vmem:[#allocation69_spill] sm:$0xff] %v7661_v41  ;;  %v7670_v61 = vcombine.low %v7661_v41, %v7666_v42  ;;  %v5214_v51 = vpop.f32.mrb[16].mxu1  ;;  %v579_v25 = vrot.slane %v577_v10, 4 }
 0x12e   :  { %v5215_v0 = vpop.f32.mrb[17].mxu1  ;;  %v7686_v37 = vcombine.low %v7645_v16, %v578_v27  ;;  %v9227_v27 = vshrl.u32 %v6815_v46, 16  ;;  %v9228_v16 = vld [vmem:[#allocation30_spill] sm:$0xff] }
 0x12f   :  { %v5132_v26 = vpop.f32.mrb[20].mxu0  ;;  %v5217_v58 = vpop.f32.mrb[18].mxu1 }
 0x130   :  { %v5133_v32 = vpop.f32.mrb[21].mxu0  ;;  %v5218_v10 = vpop.f32.mrb[19].mxu1 }
 0x131   :  { %v7656_v24 = vadd.f32 %v5133_v32, %v5132_v26  ;;  %v5135_v39 = vpop.f32.mrb[22].mxu0  ;;  %v9222_v26 = vrot.slane %v6937_v21, 7  ;;  %v5216_v21 = vadd.f32 %v5215_v0, %v5214_v51  ;;  %v608_v0 = vor.u32 %v607_v55, %v9228_v16 }
 0x132   :  { %v5136_v32 = vpop.f32.mrb[23].mxu0  ;;  %v610_v51 = vrot.slane %v607_v55, 4  ;;  %3701 = vmatmul.mubr.bf16.gmra.mrb[124].mxu1 %v7686_v37 }
 0x133   :  { %v7679_v9 = vsel %vm7098_vm8, %v599_v31, %v9222_v26  ;;  %v7683_v3 = vadd.f32 %v5136_v32, %v5135_v39  ;;  %v7696_v26 = vld [vmem:[%s8971_s0 + $0x70] sm:$0xf]  ;;  %v4736_v32 = vrot.slane %v9227_v27, 11  ;;  %v7706_v18 = vadd.f32 %v5216_v21, %v7598_v52  ;;  %v7723_v52 = vld [vmem:[%s8971_s0 + $0x34] sm:$0xf] }
 0x134   :  { %9223 = vst [vmem:[#allocation70_spill] sm:$0xff] %v7679_v9  ;;  %3580 = vmatmul.mubr.bf16.gmra.mrb[128].mxu0 %v7499_v14  ;;  %v7691_v31 = vcombine.low %v7679_v9, %v7319_v36  ;;  %9226 = vst [vmem:[#allocation71_spill] sm:$0xff] %v7696_v26  ;;  %v9087_v36 = vshrl.u32 %v7622_v8, 16  ;;  %v5219_v9 = vadd.f32 %v5218_v10, %v5217_v58  ;;  %v9231_v55 = vrot.slane %v7696_v26, 7 }
 0x135   :  { %3587 = vmatprep.mubr.bf16.mxu0 %v7670_v61  ;;  %v7711_v39 = vsel %vm7098_vm8, %v579_v25, %v580_v43  ;;  %9233 = vst [vmem:[#allocation74_spill] sm:$0xff] %v7723_v52  ;;  %v7728_v43 = vld [vmem:[%s8971_s0 + $0x40] sm:$0xf]  ;;  %v5220_v16 = vpop.f32.mrb[20].mxu1 }
 0x136   :  { %9230 = vst [vmem:[#allocation72_spill] sm:$0xff] %v7711_v39  ;;  %3708 = vmatprep.mubr.bf16.mxu1 %v7691_v31  ;;  %v7718_v27 = vsel %vm7098_vm8, %v582_v5, %v9231_v55  ;;  %9234 = vst [vmem:[#allocation75_spill] sm:$0xff] %v7728_v43  ;;  %v7732_v25 = vcombine.low %v7723_v52, %v7728_v43  ;;  %v7735_v21 = vadd.f32 %v5219_v9, %v7613_v63  ;;  %v5221_v41 = vpop.f32.mrb[21].mxu1 }
 0x137   :  { %v5138_v59 = vpop.f32.mrb[24].mxu0  ;;  %9232 = vst [vmem:[#allocation73_spill] sm:$0xff] %v7718_v27  ;;  %v617_v55 = vrot.slane %v9087_v36, 7  ;;  %v7746_v43 = vcombine.low %v7711_v39, %v7718_v27  ;;  %v5222_v63 = vadd.f32 %v5221_v41, %v5220_v16  ;;  %v5223_v9 = vpop.f32.mrb[22].mxu1  ;;  %v9099_v27 = vshrl.u32 %v7696_v26, 16 }
 0x138   :  { %v5139_v46 = vpop.f32.mrb[25].mxu0 }
 0x139   :  { %v5140_v58 = vadd.f32 %v5139_v46, %v5138_v59  ;;  %v5141_v10 = vpop.f32.mrb[26].mxu0  ;;  %v609_v59 = vsel %vm7282_vm11, %v4736_v32, %v608_v0  ;;  %v613_v46 = vsel %vm7282_vm11, %v610_v51, %v612_v2  ;;  %v614_v2 = vrot.slane %v611_v48, 4  ;;  %v5224_v0 = vpop.f32.mrb[23].mxu1  ;;  %v9235_v51 = vld [vmem:[#allocation43_spill] sm:$0xff] }
 0x13a   :  { %v5142_v5 = vpop.f32.mrb[27].mxu0  ;;  %v7749_v32 = vcombine.low %v609_v59, %v613_v46  ;;  %v618_v36 = vor.u32 %v617_v55, %v9235_v51  ;;  %v5225_v39 = vadd.f32 %v5224_v0, %v5223_v9  ;;  %v7758_v16 = vadd.f32 %v5222_v63, %v7656_v24  ;;  %3709 = vmatmul.mubr.bf16.gmra.mrb[128].mxu1 %v7746_v43  ;;  %v9241_v9 = vld [vmem:[#allocation47_spill] sm:$0xff] }
 0x13b   :  { %v5143_v60 = vadd.f32 %v5142_v5, %v5141_v10  ;;  %v4737_v10 = vrot.slane %v9236_v45, 11  ;;  %v9237_v5 = vld [vmem:[#allocation44_spill] sm:$0xff]  ;;  %v7770_v45 = vld [vmem:[%s8971_s0 + $0x48] sm:$0xf]  ;;  %v626_v0 = vrot.slane %v9241_v9, 7 }
 0x13c   :  { %3588 = vmatmul.mubr.bf16.gmra.mrb[132].mxu0 %v7540_v6  ;;  %v623_v52 = vor.u32 %v622_v17, %v9237_v5  ;;  %3716 = vmatprep.mubr.bf16.mxu1 %v7749_v32  ;;  %9239 = vst [vmem:[#allocation77_spill] sm:$0xff] %v7770_v45  ;;  %v7774_v24 = vcombine.low %v7765_v35, %v7770_v45  ;;  %v9242_v35 = vld [vmem:[#allocation46_spill] sm:$0xff] }
 0x13d   :  { %3595 = vmatprep.mubr.bf16.mxu0 %v7732_v25  ;;  %v7777_v46 = vadd.f32 %v5225_v39, %v7683_v3  ;;  %v5226_v51 = vpop.f32.mrb[24].mxu1 }
 0x13e   :  { %v624_v63 = vsel %vm7282_vm11, %v4737_v10, %v623_v52  ;;  %v5227_v57 = vpop.f32.mrb[25].mxu1  ;;  %v627_v52 = vor.u32 %v626_v0, %v9242_v35  ;;  %v629_v10 = vrot.slane %v626_v0, 4 }
 0x13f   :  { %v5144_v8 = vpop.f32.mrb[28].mxu0  ;;  %9240 = vst [vmem:[#allocation78_spill] sm:$0xff] %v7777_v46  ;;  %v5228_v45 = vadd.f32 %v5227_v57, %v5226_v51  ;;  %v5229_v3 = vpop.f32.mrb[26].mxu1 }
 0x140   :  { %v5145_v41 = vpop.f32.mrb[29].mxu0 }
 0x141   :  { %v5146_v48 = vadd.f32 %v5145_v41, %v5144_v8  ;;  %v5147_v59 = vpop.f32.mrb[30].mxu0  ;;  %v619_v8 = vsel %vm7282_vm11, %v614_v2, %v618_v36  ;;  %v632_v41 = vrot.slane %v9099_v27, 7  ;;  %v5230_v36 = vpop.f32.mrb[27].mxu1  ;;  %v625_v2 = vrot.slane %v622_v17, 4 }
 0x142   :  { %v5148_v55 = vpop.f32.mrb[31].mxu0  ;;  %v7787_v39 = vcombine.low %v619_v8, %v624_v63  ;;  %v5231_v26 = vadd.f32 %v5230_v36, %v5229_v3  ;;  %v7792_v46 = vadd.f32 %v5228_v45, %v5140_v58  ;;  %3717 = vmatmul.mubr.bf16.gmra.mrb[132].mxu1 %v7577_v13 }
 0x143   :  { %v5149_v5 = vadd.f32 %v5148_v55, %v5147_v59  ;;  %v633_v9 = vor.u32 %v632_v41, %v7042_v38  ;;  %v628_v17 = vsel %vm7282_vm11, %v625_v2, %v627_v52 }
 0x144   :  { %3596 = vmatmul.mubr.bf16.gmra.mrb[136].mxu0 %v7562_v1  ;;  %3724 = vmatprep.mubr.bf16.mxu1 %v7787_v39  ;;  %v7796_v55 = vadd.f32 %v5231_v26, %v5143_v60 }
 0x145   :  { %3603 = vmatprep.mubr.bf16.mxu0 %v7774_v24  ;;  %v634_v63 = vsel %vm7282_vm11, %v629_v10, %v633_v9  ;;  %v5232_v0 = vpop.f32.mrb[28].mxu1  ;;  %v6368_v10 = vld [vmem:[#allocation2 + $0x400] sm:$0xff]  }
 0x146   :  { %v5233_v58 = vpop.f32.mrb[29].mxu1  ;;  %v7803_v36 = vcombine.low %v628_v17, %v634_v63  ;;  %v6371_v17 = vld [vmem:[#allocation2 + $0x448] sm:$0xff]  }
 0x147   :  { %v5150_v27 = vpop.f32.mrb[32].mxu0  ;;  %v5234_v45 = vadd.f32 %v5233_v58, %v5232_v0  ;;  %v5235_v3 = vpop.f32.mrb[30].mxu1 }
 0x148   :  { %v5151_v59 = vpop.f32.mrb[33].mxu0  ;;  %v5236_v60 = vpop.f32.mrb[31].mxu1 }
 0x149   :  { %v5152_v57 = vadd.f32 %v5151_v59, %v5150_v27  ;;  %v5153_v51 = vpop.f32.mrb[34].mxu0  ;;  %v5237_v26 = vadd.f32 %v5236_v60, %v5235_v3  ;;  %v7806_v59 = vadd.f32 %v5234_v45, %v5146_v48  ;;  %v6372_v45 = vld [vmem:[#allocation2 + $0x408] sm:$0xff]  }
 0x14a   :  { %v5154_v8 = vpop.f32.mrb[35].mxu0  ;;  %3725 = vmatmul.mubr.bf16.gmra.mrb[136].mxu1 %v7626_v15 }
 0x14b   :  { %v5155_v41 = vadd.f32 %v5154_v8, %v5153_v51  ;;  %3732 = vmatprep.mubr.bf16.mxu1 %v7803_v36  ;;  %v7810_v51 = vadd.f32 %v5237_v26, %v5149_v5 }
 0x14c   :  { %3604 = vmatmul.mubr.bf16.gmra.mrb[140].mxu0 %v7607_v33 }
 0x14d   :  { %3773 = vmatprep.mubr.bf16.mxu0 %v7458_v49  ;;  %v5238_v63 = vpop.f32.mrb[32].mxu1 }
 0x14e   :  { %v5239_v58 = vpop.f32.mrb[33].mxu1 }
 0x14f   :  { %v5156_v27 = vpop.f32.mrb[36].mxu0  ;;  %v5240_v3 = vadd.f32 %v5239_v58, %v5238_v63  ;;  %v5241_v48 = vpop.f32.mrb[34].mxu1  ;;  %v6379_v58 = vld [vmem:[#allocation2 + $0x458] sm:$0xff]  }
 0x150   :  { %v5157_v2 = vpop.f32.mrb[37].mxu0  ;;  %v5242_v60 = vpop.f32.mrb[35].mxu1 }
 0x151   :  { %v5158_v9 = vadd.f32 %v5157_v2, %v5156_v27  ;;  %v5159_v52 = vpop.f32.mrb[38].mxu0  ;;  %v6375_v27 = vld [vmem:[#allocation2 + $0x450] sm:$0xff]   ;;  %v5243_v2 = vadd.f32 %v5242_v60, %v5241_v48  ;;  %v7814_v5 = vadd.f32 %v5240_v3, %v5152_v57  ;;  %v6370_v60 = vld [vmem:[#allocation2 + $0x480] sm:$0xff]  }
 0x152   :  { %v5160_v8 = vpop.f32.mrb[39].mxu0  ;;  %3733 = vmatmul.mubr.bf16.gmra.mrb[140].mxu1 %v7691_v31 }
 0x153   :  { %v5161_v0 = vadd.f32 %v5160_v8, %v5159_v52  ;;  %3902 = vmatprep.mubr.bf16.mxu1 %v7616_v47  ;;  %v6376_v8 = vld [vmem:[#allocation2 + $0x410] sm:$0xff]   ;;  %v6373_v47 = vld [vmem:[#allocation2 + $0x4c8] sm:$0xff]  }
 0x154   :  { %3774 = vmatmul.mubr.bf16.vlgmr.msra.gmra.mrb[144].mxu0 %v7328_v20 }
 0x155   :  { %5791 = vmatpush3.bf16.msra.mxu0 %v6368_v10  ;;  %3781 = vmatprep.mubr.bf16.mxu0 %v7481_v40  ;;  %v7818_v10 = vadd.f32 %v5243_v2, %v5155_v41 }
 0x156   :  { %5792 = vmatprep.subr.bf16.mxu0 %v6371_v17  ;;  %v5244_v17 = vpop.f32.mrb[36].mxu1 }
 0x157   :  { %v5162_v38 = vpop.f32.mrb[40].mxu0  ;;  %v5245_v48 = vpop.f32.mrb[37].mxu1 }
 0x158   :  { %v5163_v26 = vpop.f32.mrb[41].mxu0  ;;  %v5246_v57 = vadd.f32 %v5245_v48, %v5244_v17  ;;  %v5247_v3 = vpop.f32.mrb[38].mxu1  ;;  %v6374_v17 = vld [vmem:[#allocation2 + $0x488] sm:$0xff]  }
 0x159   :  { %v5164_v52 = vadd.f32 %v5163_v26, %v5162_v38  ;;  %v5165_v20 = vpop.f32.mrb[42].mxu0  ;;  %5793 = vmatpush3.bf16.msra.mxu0 %v6372_v45  ;;  %v5248_v38 = vpop.f32.mrb[39].mxu1  ;;  %v6380_v45 = vld [vmem:[#allocation2 + $0x418] sm:$0xff]   ;;  %v6384_v26 = vld [vmem:[#allocation2 + $0x460] sm:$0xff]  }
 0x15a   :  { %v5166_v63 = vpop.f32.mrb[43].mxu0  ;;  %5794 = vmatprep.subr.bf16.mxu0 %v6375_v27  ;;  %v5249_v41 = vadd.f32 %v5248_v38, %v5247_v3  ;;  %v7822_v27 = vadd.f32 %v5246_v57, %v5158_v9  ;;  %3903 = vmatmul.mubr.bf16.vlgmr.msra.gmra.mrb[144].mxu1 %v7540_v6  ;;  %v6385_v3 = vld [vmem:[#allocation2 + $0x420] sm:$0xff]   ;;  %v6389_v57 = vld [vmem:[#allocation2 + $0x468] sm:$0xff]  }
 0x15b   :  { %v5167_v35 = vadd.f32 %v5166_v63, %v5165_v20  ;;  %5879 = vmatpush3.bf16.msra.mxu1 %v6370_v60  ;;  %3910 = vmatprep.mubr.bf16.mxu1 %v7686_v37 }
 0x15c   :  { %3782 = vmatmul.mubr.bf16.gmra.mrb[148].mxu0 %v7361_v50  ;;  %9243 = vst [vmem:[#allocation79_spill] sm:$0xff] %v7822_v27  ;;  %5880 = vmatprep.subr.bf16.mxu1 %v6373_v47  ;;  %v6390_v47 = vld [vmem:[#allocation2 + $0x428] sm:$0xff]  }
 0x15d   :  { %3789 = vmatprep.mubr.bf16.mxu0 %v7499_v14  ;;  %5795 = vmatpush3.bf16.msra.mxu0 %v6376_v8  ;;  %v7828_v8 = vadd.f32 %v5249_v41, %v5161_v0  ;;  %v5250_v38 = vpop.f32.mrb[40].mxu1  ;;  %v6381_v41 = vld [vmem:[#allocation2 + $0x4d8] sm:$0xff]  }
 0x15e   :  { %5796 = vmatprep.subr.bf16.mxu0 %v6379_v58  ;;  %v6377_v58 = vld [vmem:[#allocation2 + $0x4d0] sm:$0xff]   ;;  %v5251_v27 = vpop.f32.mrb[41].mxu1 }
 0x15f   :  { %v5168_v2 = vpop.f32.mrb[44].mxu0  ;;  %v5252_v60 = vadd.f32 %v5251_v27, %v5250_v38  ;;  %v5253_v37 = vpop.f32.mrb[42].mxu1  ;;  %5881 = vmatpush3.bf16.msra.mxu1 %v6374_v17  ;;  %v6396_v38 = vld [vmem:[#allocation2 + $0x430] sm:$0xff]  }
 0x160   :  { %v5169_v20 = vpop.f32.mrb[45].mxu0  ;;  %v5254_v0 = vpop.f32.mrb[43].mxu1  ;;  %5882 = vmatprep.subr.bf16.mxu1 %v6377_v58 }
 0x161   :  { %v7826_v50 = vadd.f32 %v5169_v20, %v5168_v2  ;;  %v5171_v63 = vpop.f32.mrb[46].mxu0  ;;  %5797 = vmatpush3.bf16.msra.mxu0 %v6380_v45  ;;  %v6378_v2 = vld [vmem:[#allocation2 + $0x490] sm:$0xff]   ;;  %v5255_v45 = vadd.f32 %v5254_v0, %v5253_v37  ;;  %v6400_v37 = vld [vmem:[#allocation2 + $0x478] sm:$0xff]  }
 0x162   :  { %v5172_v48 = vpop.f32.mrb[47].mxu0  ;;  %5798 = vmatprep.subr.bf16.mxu0 %v6384_v26  ;;  %v7832_v26 = vadd.f32 %v5252_v60, %v5164_v52  ;;  %3911 = vmatmul.mubr.bf16.gmra.mrb[148].mxu1 %v7562_v1 }
 0x163   :  { %v5173_v9 = vadd.f32 %v5172_v48, %v5171_v63  ;;  %v6395_v63 = vld [vmem:[#allocation2 + $0x470] sm:$0xff]   ;;  %3918 = vmatprep.mubr.bf16.mxu1 %v7746_v43  ;;  %5883 = vmatpush3.bf16.msra.mxu1 %v6378_v2  ;;  %v7836_v48 = vadd.f32 %v5255_v45, %v5167_v35  ;;  %v6387_v35 = vld [vmem:[#allocation2 + $0x4a0] sm:$0xff]  }
 0x164   :  { %3790 = vmatmul.mubr.bf16.gmra.mrb[152].mxu0 %v7400_v7  ;;  %5884 = vmatprep.subr.bf16.mxu1 %v6381_v41 }
 0x165   :  { %3797 = vmatprep.mubr.bf16.mxu0 %v7540_v6  ;;  %5799 = vmatpush3.bf16.msra.mxu0 %v6385_v3  ;;  %v6382_v6 = vld [vmem:[#allocation2 + $0x498] sm:$0xff]   ;;  %9244 = vst [vmem:[#allocation80_spill] sm:$0xff] %v7836_v48  ;;  %v6386_v3 = vld [vmem:[#allocation2 + $0x4e0] sm:$0xff]  }
 0x166   :  { %5800 = vmatprep.subr.bf16.mxu0 %v6389_v57  ;;  %v5256_v57 = vpop.f32.mrb[44].mxu1 }
 0x167   :  { %v5278_v20 = vpop.f32.mrb[48].mxu0  ;;  %v5257_v0 = vpop.f32.mrb[45].mxu1  ;;  %5885 = vmatpush3.bf16.msra.mxu1 %v6382_v6 }
 0x168   :  { %v5279_v7 = vpop.f32.mrb[49].mxu0  ;;  %v5258_v43 = vadd.f32 %v5257_v0, %v5256_v57  ;;  %5886 = vmatprep.subr.bf16.mxu1 %v6386_v3  ;;  %v9247_v3 = vld [vmem:[#allocation27_spill] sm:$0xff]  ;;  %v6393_v0 = vld [vmem:[#allocation2 + $0x4a8] sm:$0xff]  }
 0x169   :  { %v5280_v27 = vadd.f32 %v5279_v7, %v5278_v20  ;;  %v5281_v17 = vpop.f32.mrb[50].mxu0  ;;  %5801 = vmatpush3.bf16.msra.mxu0 %v6390_v47  ;;  %v5259_v20 = vpop.f32.mrb[46].mxu1  ;;  %v9245_v47 = vld [vmem:[#allocation29_spill] sm:$0xff] }
 0x16a   :  { %v5282_v58 = vpop.f32.mrb[51].mxu0  ;;  %5802 = vmatprep.subr.bf16.mxu0 %v6395_v63  ;;  %v5260_v41 = vpop.f32.mrb[47].mxu1  ;;  %v637_v45 = vrot.slane %v9245_v47, 7  ;;  %v9246_v7 = vld [vmem:[#allocation33_spill] sm:$0xff]  ;;  %v6401_v63 = vld [vmem:[#allocation2 + $0x438] sm:$0xff]   ;;  %3919 = vmatmul.mubr.bf16.gmra.mrb[152].mxu1 %v7607_v33 }
 0x16b   :  { %v3260_v52 = vadd.f32 %v5280_v27, %v7522_v22  ;;  %v5283_v60 = vadd.f32 %v5282_v58, %v5281_v17  ;;  %v641_v48 = vrot.slane %v9246_v7, 7  ;;  %v6392_v22 = vld [vmem:[#allocation2 + $0x4e8] sm:$0xff]   ;;  %v7845_v27 = vadd.f32 %v5258_v43, %v7826_v50  ;;  %3926 = vmatprep.mubr.bf16.mxu1 %v7577_v13  ;;  %5887 = vmatpush3.bf16.msra.mxu1 %v6387_v35  ;;  %v9249_v43 = vld [vmem:[#allocation28_spill] sm:$0xff] }
 0x16c   :  { %3798 = vmatmul.mubr.bf16.gmra.mrb[156].mxu0 %v7458_v49  ;;  %v5261_v49 = vadd.f32 %v5260_v41, %v5259_v20  ;;  %v638_v20 = vor.u32 %v637_v45, %v9249_v43  ;;  %v640_v41 = vrot.slane %v637_v45, 4  ;;  %5888 = vmatprep.subr.bf16.mxu1 %v6392_v22  ;;  %v6398_v22 = vld [vmem:[#allocation2 + $0x4b0] sm:$0xff]  }
 0x16d   :  { %v3263_v2 = vadd.f32 %v5283_v60, %v7524_v12  ;;  %3805 = vmatprep.mubr.bf16.mxu0 %v7562_v1  ;;  %5803 = vmatpush3.bf16.msra.mxu0 %v6396_v38  ;;  %v6405_v12 = vld [vmem:[#allocation2 + $0x540] sm:$0xff]   ;;  %v9248_v60 = vshrl.u32 %v9247_v3, 16 }
 0x16e   :  { %5804 = vmatprep.subr.bf16.mxu0 %v6400_v37  ;;  %v7848_v6 = vadd.f32 %v5261_v49, %v5173_v9  ;;  %v9250_v37 = vld [vmem:[#allocation32_spill] sm:$0xff]  ;;  %v7858_v9 = vld [vmem:[%s8971_s0 + $0x84] sm:$0xf] }
 0x16f   :  { %v5284_v17 = vpop.f32.mrb[52].mxu0  ;;  %v4738_v38 = vrot.slane %v9248_v60, 11  ;;  %v642_v7 = vor.u32 %v641_v48, %v9250_v37  ;;  %9251 = vst [vmem:[#allocation27_spill] sm:$0xff] %v7858_v9  ;;  %5889 = vmatpush3.bf16.msra.mxu1 %v6393_v0 }
 0x170   :  { %v5285_v1 = vpop.f32.mrb[53].mxu0 }
 0x171   :  { %v5286_v58 = vadd.f32 %v5285_v1, %v5284_v17  ;;  %v5287_v57 = vpop.f32.mrb[54].mxu0  ;;  %v6397_v17 = vld [vmem:[#allocation2 + $0x4f0] sm:$0xff]   ;;  %5805 = vmatpush3.bf16.msra.mxu0 %v6401_v63  ;;  %v5366_v1 = vpop.f32.mrb[48].mxu1  ;;  %v639_v63 = vsel %vm7282_vm11, %v4738_v38, %v638_v20  ;;  %v672_v38 = vrot.slane %v7536_v44, 6  ;;  %v7892_v44 = vld [vmem:[%s8971_s0 + $0x98] sm:$0xf] }
 0x172   :  { %v5288_v50 = vpop.f32.mrb[55].mxu0  ;;  %5966 = vmatprep.subr.bf16.mxu0 %v6405_v12  ;;  %v5367_v60 = vpop.f32.mrb[49].mxu1  ;;  %v9252_v12 = vshrl.u32 %v7858_v9, 16  ;;  %5890 = vmatprep.subr.bf16.mxu1 %v6397_v17  ;;  %v644_v17 = vrot.slane %v641_v48, 4 }
 0x173   :  { %v7862_v35 = vadd.f32 %v5286_v58, %v7545_v29  ;;  %v5289_v3 = vadd.f32 %v5288_v50, %v5287_v57  ;;  %v5368_v45 = vadd.f32 %v5367_v60, %v5366_v1  ;;  %v5369_v37 = vpop.f32.mrb[50].mxu1  ;;  %v643_v29 = vsel %vm7282_vm11, %v640_v41, %v642_v7  ;;  %v6403_v50 = vld [vmem:[#allocation2 + $0x4f8] sm:$0xff]   ;;  %3927 = vmatmul.mubr.bf16.gmra.mrb[156].mxu1 %v7670_v61  ;;  %v9255_v61 = vld [vmem:[#allocation34_spill] sm:$0xff] }
 0x174   :  { %3806 = vmatmul.mubr.bf16.gmra.mrb[160].mxu0 %v7481_v40  ;;  %v5370_v49 = vpop.f32.mrb[51].mxu1  ;;  %v647_v58 = vrot.slane %v9252_v12, 7  ;;  %v9253_v40 = vld [vmem:[#allocation40_spill] sm:$0xff]  ;;  %3934 = vmatprep.mubr.bf16.mxu1 %v7626_v15  ;;  %9258 = vst [vmem:[#allocation34_spill] sm:$0xff] %v7892_v44 }
 0x175   :  { %v7866_v43 = vadd.f32 %v5289_v3, %v7564_v56  ;;  %3813 = vmatprep.mubr.bf16.mxu0 %v7607_v33  ;;  %v652_v57 = vrot.slane %v9253_v40, 7  ;;  %v7876_v56 = vadd.f32 %v5368_v45, %v3260_v52  ;;  %v5371_v1 = vadd.f32 %v5370_v49, %v5369_v37  ;;  %5891 = vmatpush3.bf16.msra.mxu1 %v6398_v22  ;;  %v6404_v52 = vld [vmem:[#allocation2 + $0x4b8] sm:$0xff]   ;;  %v9254_v49 = vld [vmem:[#allocation37_spill] sm:$0xff]  ;;  %v9257_v40 = vld [vmem:[#allocation38_spill] sm:$0xff]  ;;  %v5372_v48 = vpop.f32.mrb[52].mxu1 }
 0x176   :  { %v7883_v3 = vcombine.low %v639_v63, %v643_v29  ;;  %v648_v60 = vor.u32 %v647_v58, %v9254_v49  ;;  %v9256_v45 = vshrl.u32 %v9255_v61, 16  ;;  %5892 = vmatprep.subr.bf16.mxu1 %v6403_v50  ;;  %v6407_v63 = vld [vmem:[#allocation2 + $0x5c0] sm:$0xff]   ;;  %v4740_v58 = vrot.slane %v7531_v62, 10 }
 0x177   :  { %v5290_v33 = vpop.f32.mrb[56].mxu0  ;;  %v7880_v20 = vadd.f32 %v5371_v1, %v3263_v2  ;;  %v653_v47 = vor.u32 %v652_v57, %v9257_v40  ;;  %v9102_v2 = vshrl.u32 %v7892_v44, 16  ;;  %v5373_v1 = vpop.f32.mrb[53].mxu1  ;;  %v9259_v50 = vmov 0 }
 0x178   :  { %v5291_v0 = vpop.f32.mrb[57].mxu0  ;;  %v4739_v12 = vrot.slane %v9256_v45, 11  ;;  %v9260_v50 = vsel %vm7902_vm14, 4294967295, %v9259_v50  ;;  %v674_v45 = vrot.slane %v672_v38, 4 }
 0x179   :  { %v5292_v7 = vadd.f32 %v5291_v0, %v5290_v33  ;;  %v5293_v41 = vpop.f32.mrb[58].mxu0  ;;  %v5374_v33 = vadd.f32 %v5373_v1, %v5372_v48  ;;  %v5375_v0 = vpop.f32.mrb[54].mxu1  ;;  %9261 = vst [vmem:[#allocation81_spill] sm:$0xff] %v9260_v50  ;;  %5893 = vmatpush3.bf16.msra.mxu1 %v6404_v52  ;;  %v662_v48 = vrot.slane %v9102_v2, 7  ;;  %v9264_v2 = vld [vmem:[#allocation48_spill] sm:$0xff] }
 0x17a   :  { %v5294_v37 = vpop.f32.mrb[59].mxu0  ;;  %v5376_v62 = vpop.f32.mrb[55].mxu1  ;;  %6054 = vmatprep.subr.bf16.mxu1 %v6407_v63 }
 0x17b   :  { %v3276_v22 = vadd.f32 %v5292_v7, %v7588_v4  ;;  %v5295_v29 = vadd.f32 %v5294_v37, %v5293_v41  ;;  %v6485_v4 = vld [vmem:[%s8971_s0 + $0xc] sm:$0xf]  ;;  %v649_v7 = vsel %vm7282_vm11, %v644_v17, %v648_v60  ;;  %v5377_v1 = vadd.f32 %v5376_v62, %v5375_v0  ;;  %3935 = vmatmul.mubr.bf16.gmra.mrb[160].mxu1 %v7732_v25 }
 0x17c   :  { %3814 = vmatmul.mubr.bf16.gmra.mrb[164].mxu0 %v7499_v14  ;;  %v675_v14 = vrot.slane %v6485_v4, 6  ;;  %v9262_v41 = vld [vmem:[#allocation42_spill] sm:$0xff]  ;;  %v673_v17 = vsel %vm7902_vm14, %v4740_v58, %v672_v38  ;;  %3942 = vmatprep.mubr.bf16.mxu1 %v7691_v31  ;;  %v655_v0 = vrot.slane %v652_v57, 4  ;;  %v9263_v4 = vld [vmem:[#allocation41_spill] sm:$0xff] }
 0x17d   :  { %v3279_v61 = vadd.f32 %v5295_v29, %v7609_v19  ;;  %3821 = vmatprep.mubr.bf16.mxu0 %v7883_v3  ;;  %v654_v19 = vsel %vm7282_vm11, %v4739_v12, %v653_v47  ;;  %v656_v37 = vrot.slane %v9262_v41, 7  ;;  %v7917_v29 = vadd.f32 %v5374_v33, %v7862_v35  ;;  %v5378_v38 = vpop.f32.mrb[56].mxu1 }
 0x17e   :  { %v7923_v60 = vadd.f32 %v5377_v1, %v7866_v43  ;;  %v676_v63 = vsel %vm7902_vm14, %v674_v45, %v675_v14  ;;  %v7928_v35 = vcombine.low %v649_v7, %v654_v19  ;;  %v663_v41 = vor.u32 %v662_v48, %v9264_v2  ;;  %v5379_v1 = vpop.f32.mrb[57].mxu1  ;;  %v7941_v19 = vld [vmem:[%s8971_s0 + $0x10] sm:$0xf] }
 0x17f   :  { %v5296_v40 = vpop.f32.mrb[60].mxu0  ;;  %v657_v25 = vor.u32 %v656_v37, %v9263_v4  ;;  %v659_v62 = vrot.slane %v656_v37, 4  ;;  %v7933_v49 = vcombine.low %v673_v17, %v676_v63  ;;  %v5381_v45 = vpop.f32.mrb[58].mxu1  ;;  %v677_v57 = vrot.slane %v675_v14, 4 }
 0x180   :  { %v5297_v52 = vpop.f32.mrb[61].mxu0  ;;  %v5382_v37 = vpop.f32.mrb[59].mxu1  ;;  %v4741_v48 = vrot.slane %v7558_v11, 10 }
 0x181   :  { %v5298_v47 = vadd.f32 %v5297_v52, %v5296_v40  ;;  %v5299_v12 = vpop.f32.mrb[62].mxu0  ;;  %9265 = vst [vmem:[#allocation82_spill] sm:$0xff] %v7933_v49  ;;  %v5380_v40 = vadd.f32 %v5379_v1, %v5378_v38  ;;  %v682_v52 = vrot.slane %v7603_v53, 6  ;;  %v658_v17 = vsel %vm7282_vm11, %v655_v0, %v657_v25 }
 0x182   :  { %v5300_v33 = vpop.f32.mrb[63].mxu0  ;;  %v5383_v14 = vadd.f32 %v5382_v37, %v5381_v45  ;;  %v7968_v1 = vcombine.low %v7552_v30, %v7582_v28 }
 0x183   :  { %v3284_v43 = vadd.f32 %v5298_v47, %v7638_v34  ;;  %v5301_v58 = vadd.f32 %v5300_v33, %v5299_v12  ;;  %v678_v34 = vrot.slane %v7941_v19, 6  ;;  %v7950_v47 = vadd.f32 %v5380_v40, %v3276_v22  ;;  %3943 = vmatmul.mubr.bf16.gmra.mrb[164].mxu1 %v7774_v24  ;;  %v6487_v24 = vld [vmem:[%s8971_s0 + $0x20] sm:$0xf] }
 0x184   :  { %3822 = vmatmul.mubr.bf16.gmra.mrb[168].mxu0 %v7749_v32  ;;  %v7953_v33 = vadd.f32 %v5383_v14, %v3279_v61  ;;  %3950 = vmatprep.mubr.bf16.mxu1 %v7933_v49  ;;  %v683_v22 = vsel %vm7902_vm14, %v4741_v48, %v682_v52  ;;  %v684_v48 = vrot.slane %v682_v52, 4 }
 0x185   :  { %v3287_v7 = vadd.f32 %v5301_v58, %v7673_v54  ;;  %3829 = vmatprep.mubr.bf16.mxu0 %v7928_v35  ;;  %v664_v54 = vsel %vm7282_vm11, %v659_v62, %v663_v41  ;;  %v679_v23 = vsel %vm7902_vm14, %v677_v57, %v678_v34  ;;  %v685_v41 = vrot.slane %v6487_v24, 6  ;;  %v5384_v61 = vpop.f32.mrb[60].mxu1 }
 0x186   :  { %v7956_v53 = vcombine.low %v658_v17, %v664_v54  ;;  %v5385_v62 = vpop.f32.mrb[61].mxu1  ;;  %v7972_v34 = vcombine.low %v679_v23, %v683_v22 }
 0x187   :  { %v5302_v12 = vpop.f32.mrb[64].mxu0  ;;  %v5386_v40 = vadd.f32 %v5385_v62, %v5384_v61  ;;  %v5387_v45 = vpop.f32.mrb[62].mxu1  ;;  %v687_v17 = vrot.slane %v685_v41, 4 }
 0x188   :  { %v5303_v63 = vpop.f32.mrb[65].mxu0  ;;  %9266 = vst [vmem:[#allocation83_spill] sm:$0xff] %v7972_v34  ;;  %v5388_v37 = vpop.f32.mrb[63].mxu1 }
 0x189   :  { %v5304_v11 = vadd.f32 %v5303_v63, %v5302_v12  ;;  %v5305_v38 = vpop.f32.mrb[66].mxu0  ;;  %v7981_v28 = vadd.f32 %v5386_v40, %v3284_v43  ;;  %v5389_v54 = vadd.f32 %v5388_v37, %v5387_v45  ;;  %v694_v43 = vrot.slane %v7666_v42, 6  ;;  %v9269_v37 = vld [vmem:[#allocation78_spill] sm:$0xff] }
 0x18a   :  { %v5306_v58 = vpop.f32.mrb[67].mxu0 }
 0x18b   :  { %v3292_v0 = vadd.f32 %v5304_v11, %v7706_v18  ;;  %v5307_v25 = vadd.f32 %v5306_v58, %v5305_v38  ;;  %v7978_v18 = vld [vmem:[%s8971_s0 + $0x24] sm:$0xf]  ;;  %3951 = vmatmul.mubr.bf16.gmra.mrb[168].mxu1 %v7968_v1  ;;  %v7984_v12 = vadd.f32 %v5389_v54, %v3287_v7  ;;  %v686_v38 = vsel %vm7902_vm14, %v684_v48, %v685_v41  ;;  %v9267_v7 = vld [vmem:[#allocation66_spill] sm:$0xff] }
 0x18c   :  { %3830 = vmatmul.mubr.bf16.gmra.mrb[172].mxu0 %v7787_v39  ;;  %v688_v30 = vrot.slane %v7978_v18, 6  ;;  %3958 = vmatprep.mubr.bf16.mxu1 %v7972_v34  ;;  %v9272_v54 = vld [vmem:[#allocation74_spill] sm:$0xff] }
 0x18d   :  { %v3295_v57 = vadd.f32 %v5307_v25, %v7735_v21  ;;  %3837 = vmatprep.mubr.bf16.mxu0 %v7956_v53  ;;  %v5390_v23 = vpop.f32.mrb[64].mxu1  ;;  %v9268_v25 = vld [vmem:[#allocation65_spill] sm:$0xff] }
 0x18e   :  { %v689_v58 = vsel %vm7902_vm14, %v687_v17, %v688_v30  ;;  %v5391_v61 = vpop.f32.mrb[65].mxu1  ;;  %v7995_v62 = vcombine.low %v9268_v25, %v9267_v7  ;;  %v9271_v17 = vld [vmem:[#allocation69_spill] sm:$0xff] }
 0x18f   :  { %v5308_v14 = vpop.f32.mrb[68].mxu0  ;;  %v5392_v40 = vadd.f32 %v5391_v61, %v5390_v23  ;;  %v5393_v45 = vpop.f32.mrb[66].mxu1  ;;  %v7999_v48 = vcombine.low %v686_v38, %v689_v58  ;;  %v4742_v30 = vrot.slane %v9271_v17, 10  ;;  %v9274_v17 = vld [vmem:[#allocation68_spill] sm:$0xff] }
 0x190   :  { %v5309_v21 = vpop.f32.mrb[69].mxu0  ;;  %v5394_v42 = vpop.f32.mrb[67].mxu1 }
 0x191   :  { %v5310_v52 = vadd.f32 %v5309_v21, %v5308_v14  ;;  %v5311_v63 = vpop.f32.mrb[70].mxu0  ;;  %9270 = vst [vmem:[#allocation66_spill] sm:$0xff] %v7999_v48  ;;  %v697_v14 = vrot.slane %v9272_v54, 6  ;;  %v8004_v21 = vadd.f32 %v5392_v40, %v3292_v0  ;;  %v695_v61 = vsel %vm7902_vm14, %v4742_v30, %v694_v43 }
 0x192   :  { %v5312_v11 = vpop.f32.mrb[71].mxu0 }
 0x193   :  { %v3300_v22 = vadd.f32 %v5310_v52, %v7758_v16  ;;  %v5313_v24 = vadd.f32 %v5312_v11, %v5311_v63  ;;  %v696_v16 = vrot.slane %v694_v43, 4  ;;  %v5395_v52 = vadd.f32 %v5394_v42, %v5393_v45  ;;  %3959 = vmatmul.mubr.bf16.gmra.mrb[172].mxu1 %v7995_v62  ;;  %v9273_v42 = vld [vmem:[#allocation71_spill] sm:$0xff] }
 0x194   :  { %3838 = vmatmul.mubr.bf16.gmra.mrb[176].mxu0 %v7803_v36  ;;  %3966 = vmatprep.mubr.bf16.mxu1 %v7999_v48  ;;  %v8022_v54 = vcombine.low %v9274_v17, %v9273_v42 }
 0x195   :  { %v3303_v41 = vadd.f32 %v5313_v24, %v9269_v37  ;;  %3845 = vmatprep.mubr.bf16.mxu0 %v7968_v1  ;;  %v8007_v23 = vadd.f32 %v5395_v52, %v3295_v57  ;;  %v698_v7 = vsel %vm7902_vm14, %v696_v16, %v697_v14  ;;  %v5396_v0 = vpop.f32.mrb[68].mxu1  ;;  %v8018_v57 = vld [vmem:[%s8971_s0 + $0x38] sm:$0xf] }
 0x196   :  { %v5397_v37 = vpop.f32.mrb[69].mxu1  ;;  %v8026_v52 = vcombine.low %v695_v61, %v698_v7 }
 0x197   :  { %v5314_v63 = vpop.f32.mrb[72].mxu0  ;;  %v5398_v43 = vadd.f32 %v5397_v37, %v5396_v0  ;;  %v5399_v30 = vpop.f32.mrb[70].mxu1 }
 0x198   :  { %v5315_v11 = vpop.f32.mrb[73].mxu0 }
 0x199   :  { %v5316_v38 = vadd.f32 %v5315_v11, %v5314_v63  ;;  %v5317_v58 = vpop.f32.mrb[74].mxu0  ;;  %v699_v63 = vrot.slane %v697_v14, 4  ;;  %v700_v11 = vrot.slane %v8018_v57, 6  ;;  %v8032_v17 = vadd.f32 %v5398_v43, %v3300_v22  ;;  %v9277_v22 = vld [vmem:[#allocation77_spill] sm:$0xff] }
 0x19a   :  { %v5318_v24 = vpop.f32.mrb[75].mxu0  ;;  %v707_v43 = vrot.slane %v9277_v22, 6 }
 0x19b   :  { %v3308_v40 = vadd.f32 %v5316_v38, %v7792_v46  ;;  %v5319_v45 = vadd.f32 %v5318_v24, %v5317_v58  ;;  %v5400_v46 = vpop.f32.mrb[71].mxu1  ;;  %v9275_v38 = vld [vmem:[#allocation75_spill] sm:$0xff]  ;;  %v9276_v24 = vld [vmem:[#allocation76_spill] sm:$0xff]  ;;  %3967 = vmatmul.mubr.bf16.gmra.mrb[176].mxu1 %v8022_v54 }
 0x19c   :  { %3846 = vmatmul.mubr.bf16.gmra.mrb[180].mxu0 %v7883_v3  ;;  %v4743_v58 = vrot.slane %v9275_v38, 10  ;;  %v704_v2 = vrot.slane %v9276_v24, 6  ;;  %v5401_v42 = vadd.f32 %v5400_v46, %v5399_v30  ;;  %3974 = vmatprep.mubr.bf16.mxu1 %v8026_v52 }
 0x19d   :  { %v3311_v16 = vadd.f32 %v5319_v45, %v7796_v55  ;;  %3853 = vmatprep.mubr.bf16.mxu0 %v7995_v62  ;;  %v701_v45 = vsel %vm7902_vm14, %v699_v63, %v700_v11  ;;  %v5402_v30 = vpop.f32.mrb[72].mxu1  ;;  %v6490_v63 = vld [vmem:[%s8971_s0 + $0x80] sm:$0xf] }
 0x19e   :  { %v8035_v55 = vadd.f32 %v5401_v42, %v3303_v41  ;;  %v705_v37 = vsel %vm7902_vm14, %v4743_v58, %v704_v2  ;;  %v8047_v41 = vld [vmem:[%s8971_s0 + $0x4c] sm:$0xf]  ;;  %v6489_v42 = vld [vmem:[%s8971_s0 + $0x7c] sm:$0xf] }
 0x19f   :  { %v5320_v4 = vpop.f32.mrb[76].mxu0  ;;  %v8055_v11 = vcombine.low %v6489_v42, %v6490_v63  ;;  %v710_v22 = vrot.slane %v8047_v41, 6 }
 0x1a0   :  { %v5321_v0 = vpop.f32.mrb[77].mxu0 }
 0x1a1   :  { %v5322_v61 = vadd.f32 %v5321_v0, %v5320_v4  ;;  %v5323_v7 = vpop.f32.mrb[78].mxu0  ;;  %v5403_v4 = vpop.f32.mrb[73].mxu1  ;;  %v8059_v0 = vcombine.low %v701_v45, %v705_v37 }
 0x1a2   :  { %v5324_v14 = vpop.f32.mrb[79].mxu0  ;;  %v5405_v58 = vpop.f32.mrb[74].mxu1 }
 0x1a3   :  { %v3316_v46 = vadd.f32 %v5322_v61, %v7806_v59  ;;  %v5325_v38 = vadd.f32 %v5324_v14, %v5323_v7  ;;  %v5404_v59 = vadd.f32 %v5403_v4, %v5402_v30  ;;  %v5406_v61 = vpop.f32.mrb[75].mxu1  ;;  %v706_v7 = vrot.slane %v704_v2, 4  ;;  %3975 = vmatmul.mubr.bf16.gmra.mrb[180].mxu1 %v8055_v11 }
 0x1a4   :  { %3854 = vmatmul.mubr.bf16.gmra.mrb[184].mxu0 %v7928_v35  ;;  %v709_v14 = vrot.slane %v707_v43, 4  ;;  %v5407_v48 = vadd.f32 %v5406_v61, %v5405_v58  ;;  %3982 = vmatprep.mubr.bf16.mxu1 %v8059_v0 }
 0x1a5   :  { %v3319_v24 = vadd.f32 %v5325_v38, %v7810_v51  ;;  %3861 = vmatprep.mubr.bf16.mxu0 %v8022_v54  ;;  %v8063_v25 = vadd.f32 %v5404_v59, %v3308_v40  ;;  %v708_v2 = vsel %vm7902_vm14, %v706_v7, %v707_v43  ;;  %v5408_v40 = vpop.f32.mrb[76].mxu1 }
 0x1a6   :  { %v8066_v30 = vadd.f32 %v5407_v48, %v3311_v16  ;;  %v711_v38 = vsel %vm7902_vm14, %v709_v14, %v710_v22  ;;  %v5409_v58 = vpop.f32.mrb[77].mxu1  ;;  %v6491_v48 = vld [vmem:[%s8971_s0 + $0x90] sm:$0xf] }
 0x1a7   :  { %v5326_v42 = vpop.f32.mrb[80].mxu0  ;;  %v8078_v16 = vcombine.low %v7858_v9, %v6491_v48  ;;  %v5410_v61 = vadd.f32 %v5409_v58, %v5408_v40  ;;  %v8082_v7 = vcombine.low %v708_v2, %v711_v38  ;;  %v6406_v58 = vld [vmem:[#allocation2 + $0x500] sm:$0xff]   ;;  %v6409_v2 = vld [vmem:[#allocation2 + $0x548] sm:$0xff]  }
 0x1a8   :  { %v5327_v63 = vpop.f32.mrb[81].mxu0 }
 0x1a9   :  { %v5328_v51 = vadd.f32 %v5327_v63, %v5326_v42  ;;  %v5329_v45 = vpop.f32.mrb[82].mxu0  ;;  %v5411_v42 = vpop.f32.mrb[78].mxu1  ;;  %v8085_v14 = vadd.f32 %v5410_v61, %v3316_v46  ;;  %v6492_v61 = vld [vmem:[%s8971_s0 + $0x94] sm:$0xf] }
 0x1aa   :  { %v5330_v37 = vpop.f32.mrb[83].mxu0 }
 0x1ab   :  { %v3324_v4 = vadd.f32 %v5328_v51, %v7814_v5  ;;  %v5331_v59 = vadd.f32 %v5330_v37, %v5329_v45  ;;  %v5412_v5 = vpop.f32.mrb[79].mxu1  ;;  %3983 = vmatmul.mubr.bf16.gmra.mrb[184].mxu1 %v8078_v16 }
 0x1ac   :  { %3862 = vmatmul.mubr.bf16.gmra.mrb[188].mxu0 %v7956_v53  ;;  %v5413_v22 = vadd.f32 %v5412_v5, %v5411_v42  ;;  %3990 = vmatprep.mubr.bf16.mxu1 %v8082_v7  ;;  %v8096_v42 = vcombine.low %v6492_v61, %v7892_v44 }
 0x1ad   :  { %v3327_v43 = vadd.f32 %v5331_v59, %v7818_v10  ;;  %4031 = vmatprep.mubr.bf16.mxu0 %v7749_v32  ;;  %v5414_v38 = vpop.f32.mrb[80].mxu1  ;;  %v9278_v59 = vld [vmem:[#allocation79_spill] sm:$0xff] }
 0x1ae   :  { %v8088_v45 = vadd.f32 %v5413_v22, %v3319_v24  ;;  %v5415_v46 = vpop.f32.mrb[81].mxu1 }
 0x1af   :  { %v5332_v63 = vpop.f32.mrb[84].mxu0  ;;  %v5416_v24 = vadd.f32 %v5415_v46, %v5414_v38  ;;  %v5417_v5 = vpop.f32.mrb[82].mxu1  ;;  %v6417_v38 = vld [vmem:[#allocation2 + $0x558] sm:$0xff]  }
 0x1b0   :  { %v5333_v51 = vpop.f32.mrb[85].mxu0 }
 0x1b1   :  { %v5334_v37 = vadd.f32 %v5333_v51, %v5332_v63  ;;  %v5335_v40 = vpop.f32.mrb[86].mxu0  ;;  %v6410_v63 = vld [vmem:[#allocation2 + $0x508] sm:$0xff]   ;;  %v5418_v51 = vpop.f32.mrb[83].mxu1 }
 0x1b2   :  { %v5336_v10 = vpop.f32.mrb[87].mxu0 }
 0x1b3   :  { %v3332_v48 = vadd.f32 %v5334_v37, %v9278_v59  ;;  %v5337_v50 = vadd.f32 %v5336_v10, %v5335_v40  ;;  %v6413_v37 = vld [vmem:[#allocation2 + $0x550] sm:$0xff]   ;;  %v8101_v40 = vadd.f32 %v5416_v24, %v3324_v4  ;;  %v5419_v10 = vadd.f32 %v5418_v51, %v5417_v5  ;;  %3991 = vmatmul.mubr.bf16.gmra.mrb[188].mxu1 %v8096_v42 }
 0x1b4   :  { %4032 = vmatmul.mubr.bf16.vlgmr.msra.gmra.mrb[192].mxu0 %v7577_v13  ;;  %4160 = vmatprep.mubr.bf16.mxu1 %v7968_v1 }
 0x1b5   :  { %v3335_v22 = vadd.f32 %v5337_v50, %v7828_v8  ;;  %5967 = vmatpush3.bf16.msra.mxu0 %v6406_v58  ;;  %4039 = vmatprep.mubr.bf16.mxu0 %v7787_v39  ;;  %v8104_v44 = vadd.f32 %v5419_v10, %v3327_v43  ;;  %v6414_v50 = vld [vmem:[#allocation2 + $0x510] sm:$0xff]   ;;  %v6408_v43 = vld [vmem:[#allocation2 + $0x580] sm:$0xff]   ;;  %v9279_v10 = vld [vmem:[#allocation80_spill] sm:$0xff] }
 0x1b6   :  { %5968 = vmatprep.subr.bf16.mxu0 %v6409_v2  ;;  %v5420_v2 = vpop.f32.mrb[84].mxu1 }
 0x1b7   :  { %v5338_v59 = vpop.f32.mrb[88].mxu0  ;;  %v5421_v24 = vpop.f32.mrb[85].mxu1 }
 0x1b8   :  { %v5339_v61 = vpop.f32.mrb[89].mxu0  ;;  %v5422_v5 = vadd.f32 %v5421_v24, %v5420_v2  ;;  %v5423_v51 = vpop.f32.mrb[86].mxu1 }
 0x1b9   :  { %v5340_v13 = vadd.f32 %v5339_v61, %v5338_v59  ;;  %v5341_v8 = vpop.f32.mrb[90].mxu0  ;;  %5969 = vmatpush3.bf16.msra.mxu0 %v6410_v63  ;;  %v5424_v63 = vpop.f32.mrb[87].mxu1  ;;  %v6411_v59 = vld [vmem:[#allocation2 + $0x5c8] sm:$0xff]  }
 0x1ba   :  { %v5342_v58 = vpop.f32.mrb[91].mxu0  ;;  %5970 = vmatprep.subr.bf16.mxu0 %v6413_v37  ;;  %v6418_v37 = vld [vmem:[#allocation2 + $0x518] sm:$0xff]   ;;  %v8111_v61 = vadd.f32 %v5422_v5, %v3332_v48  ;;  %v5425_v34 = vadd.f32 %v5424_v63, %v5423_v51  ;;  %v6422_v48 = vld [vmem:[#allocation2 + $0x520] sm:$0xff]  }
 0x1bb   :  { %v3340_v4 = vadd.f32 %v5340_v13, %v7832_v26  ;;  %v5343_v46 = vadd.f32 %v5342_v58, %v5341_v8  ;;  %v6421_v13 = vld [vmem:[#allocation2 + $0x560] sm:$0xff]   ;;  %4161 = vmatmul.mubr.bf16.vlgmr.msra.gmra.mrb[192].mxu1 %v7883_v3 }
 0x1bc   :  { %4040 = vmatmul.mubr.bf16.gmra.mrb[196].mxu0 %v7626_v15  ;;  %9280 = vst [vmem:[#allocation78_spill] sm:$0xff] %v8111_v61  ;;  %v8114_v8 = vadd.f32 %v5425_v34, %v3335_v22  ;;  %6055 = vmatpush3.bf16.msra.mxu1 %v6408_v43 }
 0x1bd   :  { %v3343_v9 = vadd.f32 %v5343_v46, %v9279_v10  ;;  %4047 = vmatprep.mubr.bf16.mxu0 %v7803_v36  ;;  %5971 = vmatpush3.bf16.msra.mxu0 %v6414_v50  ;;  %v6412_v50 = vld [vmem:[#allocation2 + $0x588] sm:$0xff]   ;;  %v5426_v24 = vpop.f32.mrb[88].mxu1 }
 0x1be   :  { %5972 = vmatprep.subr.bf16.mxu0 %v6417_v38  ;;  %9281 = vst [vmem:[#allocation69_spill] sm:$0xff] %v8114_v8  ;;  %4168 = vmatprep.mubr.bf16.mxu1 %v7995_v62  ;;  %v6415_v38 = vld [vmem:[#allocation2 + $0x5d0] sm:$0xff]   ;;  %v6425_v10 = vld [vmem:[#allocation2 + $0x568] sm:$0xff]   ;;  %v5427_v34 = vpop.f32.mrb[89].mxu1 }
 0x1bf   :  { %v5344_v26 = vpop.f32.mrb[92].mxu0  ;;  %6056 = vmatprep.subr.bf16.mxu1 %v6411_v59  ;;  %v5428_v22 = vadd.f32 %v5427_v34, %v5426_v24  ;;  %v5429_v43 = vpop.f32.mrb[90].mxu1  ;;  %v6416_v59 = vld [vmem:[#allocation2 + $0x590] sm:$0xff]   ;;  %v9286_v34 = vld [vmem:[#allocation12_spill] sm:$0xff] }
 0x1c0   :  { %v5345_v15 = vpop.f32.mrb[93].mxu0  ;;  %6057 = vmatpush3.bf16.msra.mxu1 %v6412_v50 }
 0x1c1   :  { %v5346_v58 = vadd.f32 %v5345_v15, %v5344_v26  ;;  %v5347_v2 = vpop.f32.mrb[94].mxu0  ;;  %5973 = vmatpush3.bf16.msra.mxu0 %v6418_v37  ;;  %v5430_v37 = vpop.f32.mrb[91].mxu1  ;;  %6058 = vmatprep.subr.bf16.mxu1 %v6415_v38  ;;  %v6419_v26 = vld [vmem:[#allocation2 + $0x5d8] sm:$0xff]   ;;  %v8125_v15 = vadd.f32 %v5428_v22, %v3340_v4  ;;  %v720_v38 = vrot.slane %v9286_v34, 7 }
 0x1c2   :  { %v5348_v46 = vpop.f32.mrb[95].mxu0  ;;  %5974 = vmatprep.subr.bf16.mxu0 %v6421_v13  ;;  %v5431_v13 = vadd.f32 %v5430_v37, %v5429_v43  ;;  %v6420_v22 = vld [vmem:[#allocation2 + $0x598] sm:$0xff]   ;;  %v6423_v37 = vld [vmem:[#allocation2 + $0x5e0] sm:$0xff]  }
 0x1c3   :  { %v8118_v5 = vadd.f32 %v5346_v58, %v7845_v27  ;;  %v5349_v51 = vadd.f32 %v5348_v46, %v5347_v2  ;;  %v6426_v27 = vld [vmem:[#allocation2 + $0x528] sm:$0xff]   ;;  %9282 = vst [vmem:[#allocation74_spill] sm:$0xff] %v8125_v15  ;;  %v9283_v2 = vld [vmem:[#allocation11_spill] sm:$0xff]  ;;  %4169 = vmatmul.mubr.bf16.gmra.mrb[196].mxu1 %v7928_v35 }
 0x1c4   :  { %4048 = vmatmul.mubr.bf16.gmra.mrb[200].mxu0 %v7691_v31  ;;  %v715_v31 = vrot.slane %v9283_v2, 6  ;;  %v9284_v46 = vld [vmem:[#allocation10_spill] sm:$0xff]  ;;  %v8132_v8 = vadd.f32 %v5431_v13, %v3343_v9  ;;  %4176 = vmatprep.mubr.bf16.mxu1 %v8022_v54  ;;  %v6433_v9 = vld [vmem:[#allocation2 + $0x578] sm:$0xff]  }
 0x1c5   :  { %v8122_v63 = vadd.f32 %v5349_v51, %v7848_v6  ;;  %4055 = vmatprep.mubr.bf16.mxu0 %v7883_v3  ;;  %5975 = vmatpush3.bf16.msra.mxu0 %v6422_v48  ;;  %v716_v24 = vrot.slane %v9284_v46, 7  ;;  %v6429_v6 = vld [vmem:[#allocation2 + $0x570] sm:$0xff]   ;;  %v9285_v3 = vld [vmem:[#allocation16_spill] sm:$0xff]  ;;  %v5432_v2 = vpop.f32.mrb[92].mxu1 }
 0x1c6   :  { %5976 = vmatprep.subr.bf16.mxu0 %v6425_v10  ;;  %v719_v51 = vrot.slane %v9285_v3, 6  ;;  %9287 = vst [vmem:[#allocation68_spill] sm:$0xff] %v8132_v8  ;;  %6059 = vmatpush3.bf16.msra.mxu1 %v6416_v59  ;;  %v6430_v10 = vld [vmem:[#allocation2 + $0x530] sm:$0xff]   ;;  %v5433_v13 = vpop.f32.mrb[93].mxu1  ;;  %v9290_v8 = vld [vmem:[#allocation17_spill] sm:$0xff] }
 0x1c7   :  { %v5454_v58 = vpop.f32.mrb[96].mxu0  ;;  %6060 = vmatprep.subr.bf16.mxu1 %v6419_v26  ;;  %v717_v15 = vor.u32 %v716_v24, %v715_v31  ;;  %v725_v26 = vrot.slane %v9290_v8, 7  ;;  %v5434_v49 = vadd.f32 %v5433_v13, %v5432_v2  ;;  %v6434_v24 = vld [vmem:[#allocation2 + $0x538] sm:$0xff]   ;;  %v6428_v13 = vld [vmem:[#allocation2 + $0x5a8] sm:$0xff]  }
 0x1c8   :  { %v5455_v50 = vpop.f32.mrb[97].mxu0 }
 0x1c9   :  { %v5456_v4 = vadd.f32 %v5455_v50, %v5454_v58  ;;  %v5457_v48 = vpop.f32.mrb[98].mxu0  ;;  %5977 = vmatpush3.bf16.msra.mxu0 %v6426_v27  ;;  %v721_v58 = vor.u32 %v720_v38, %v719_v51  ;;  %v9288_v50 = vld [vmem:[#allocation58_spill] sm:$0xff]  ;;  %v5435_v27 = vpop.f32.mrb[94].mxu1  ;;  %v718_v38 = vrot.slane %v717_v15, 4 }
 0x1ca   :  { %v5458_v43 = vpop.f32.mrb[99].mxu0  ;;  %5978 = vmatprep.subr.bf16.mxu0 %v6429_v6  ;;  %v9289_v59 = vshrl.u32 %v9288_v50, 16  ;;  %6061 = vmatpush3.bf16.msra.mxu1 %v6420_v22  ;;  %v5436_v31 = vpop.f32.mrb[95].mxu1  ;;  %v8147_v6 = vadd.f32 %v5434_v49, %v8118_v5  ;;  %v730_v49 = vshrl.u32 %v7941_v19, 16  ;;  %v733_v5 = vshll.u32 %v7941_v19, 16 }
 0x1cb   :  { %v8136_v46 = vadd.f32 %v5456_v4, %v7876_v56  ;;  %v5459_v3 = vadd.f32 %v5458_v43, %v5457_v48  ;;  %v6424_v56 = vld [vmem:[#allocation2 + $0x5a0] sm:$0xff]   ;;  %6062 = vmatprep.subr.bf16.mxu1 %v6423_v37  ;;  %v5437_v8 = vadd.f32 %v5436_v31, %v5435_v27  ;;  %4177 = vmatmul.mubr.bf16.gmra.mrb[200].mxu1 %v7956_v53  ;;  %v723_v48 = vrot.slane %v721_v58, 4 }
 0x1cc   :  { %4056 = vmatmul.mubr.bf16.gmra.mrb[204].mxu0 %v7749_v32  ;;  %v724_v34 = vrot.slane %v9289_v59, 6  ;;  %v6427_v32 = vld [vmem:[#allocation2 + $0x5e8] sm:$0xff]   ;;  %4184 = vmatprep.mubr.bf16.mxu1 %v8055_v11  ;;  %v6431_v59 = vld [vmem:[#allocation2 + $0x5f0] sm:$0xff]   ;;  %v722_v11 = vsel %vm8154_vm1, %v718_v38, %v721_v58  ;;  %v735_v31 = vrot.slane %v733_v5, 7  ;;  %v9296_v38 = vld [vmem:[#allocation24_spill] sm:$0xff] }
 0x1cd   :  { %v8143_v61 = vadd.f32 %v5459_v3, %v7880_v20  ;;  %4063 = vmatprep.mubr.bf16.mxu0 %v7928_v35  ;;  %5979 = vmatpush3.bf16.msra.mxu0 %v6430_v10  ;;  %v8149_v20 = vld [vmem:[#allocation2 + $0x600] sm:$0xff]   ;;  %v8163_v15 = vadd.f32 %v5437_v8, %v8122_v63  ;;  %v9293_v10 = vld [vmem:[#allocation23_spill] sm:$0xff]  ;;  %v9294_v3 = vld [vmem:[#allocation18_spill] sm:$0xff] }
 0x1ce   :  { %5980 = vmatprep.subr.bf16.mxu0 %v6433_v9  ;;  %v8158_v22 = vor.u32 %v725_v26, %v724_v34  ;;  %6063 = vmatpush3.bf16.msra.mxu1 %v6424_v56  ;;  %v738_v2 = vrot.slane %v9293_v10, 6  ;;  %v739_v9 = vrot.slane %v9294_v3, 7  ;;  %v5542_v34 = vpop.f32.mrb[96].mxu1  ;;  %v732_v56 = vrot.slane %v730_v49, 6 }
 0x1cf   :  { %v5460_v51 = vpop.f32.mrb[100].mxu0  ;;  %6064 = vmatprep.subr.bf16.mxu1 %v6427_v32  ;;  %v5543_v26 = vpop.f32.mrb[97].mxu1  ;;  %v9295_v32 = vld [vmem:[#allocation25_spill] sm:$0xff] }
 0x1d0   :  { %v5461_v35 = vpop.f32.mrb[101].mxu0  ;;  %v727_v27 = vsel %vm8154_vm1, %v723_v48, %v8158_v22  ;;  %v5544_v8 = vadd.f32 %v5543_v26, %v5542_v34  ;;  %v740_v58 = vor.u32 %v739_v9, %v738_v2  ;;  %v6435_v48 = vld [vmem:[#allocation2 + $0x5f8] sm:$0xff]   ;;  %v728_v26 = vrot.slane %v8158_v22, 4 }
 0x1d1   :  { %v5462_v43 = vadd.f32 %v5461_v35, %v5460_v51  ;;  %v5463_v37 = vpop.f32.mrb[102].mxu0  ;;  %5981 = vmatpush3.bf16.msra.mxu0 %v6434_v24  ;;  %v742_v24 = vrot.slane %v9295_v32, 6  ;;  %v743_v35 = vrot.slane %v9296_v38, 7  ;;  %v8189_v2 = vcombine.low %v722_v11, %v727_v27  ;;  %v9300_v9 = vld [vmem:[#allocation8_spill] sm:$0xff]  ;;  %v9301_v11 = vld [vmem:[#allocation59_spill] sm:$0xff] }
 0x1d2   :  { %v5464_v50 = vpop.f32.mrb[103].mxu0  ;;  %6162 = vmatprep.subr.bf16.mxu0 %v8149_v20  ;;  %6065 = vmatpush3.bf16.msra.mxu1 %v6428_v13  ;;  %v8184_v49 = vadd.f32 %v5544_v8, %v8136_v46  ;;  %v766_v13 = vrot.slane %v9300_v9, 7  ;;  %v9302_v27 = vshrl.u32 %v9301_v11, 16  ;;  %v753_v22 = vshrl.u32 %v7978_v18, 16 }
 0x1d3   :  { %v8169_v19 = vadd.f32 %v5462_v43, %v7917_v29  ;;  %v5465_v63 = vadd.f32 %v5464_v50, %v5463_v37  ;;  %v5545_v29 = vpop.f32.mrb[98].mxu1  ;;  %v6432_v43 = vld [vmem:[#allocation2 + $0x5b0] sm:$0xff]   ;;  %6066 = vmatprep.subr.bf16.mxu1 %v6431_v59  ;;  %v9298_v50 = vld [vmem:[#allocation6_spill] sm:$0xff]  ;;  %4185 = vmatmul.mubr.bf16.gmra.mrb[204].mxu1 %v7968_v1  ;;  %v736_v59 = vor.u32 %v735_v31, %v732_v56  ;;  %v6436_v1 = vld [vmem:[#allocation2 + $0x5b8] sm:$0xff]  }
 0x1d4   :  { %4064 = vmatmul.mubr.bf16.gmra.mrb[208].mxu0 %v7787_v39  ;;  %v5546_v39 = vpop.f32.mrb[99].mxu1  ;;  %v9297_v37 = vld [vmem:[#allocation7_spill] sm:$0xff]  ;;  %v762_v34 = vrot.slane %v9298_v50, 7  ;;  %4192 = vmatprep.mubr.bf16.mxu1 %v8078_v16  ;;  %v8197_v38 = vor.u32 %v743_v35, %v742_v24  ;;  %v9303_v50 = vld [vmem:[#allocation26_spill] sm:$0xff] }
 0x1d5   :  { %v3529_v51 = vadd.f32 %v5465_v63, %v7923_v60  ;;  %4071 = vmatprep.mubr.bf16.mxu0 %v7956_v53  ;;  %v761_v10 = vrot.slane %v9297_v37, 6  ;;  %v5547_v5 = vadd.f32 %v5546_v39, %v5545_v29  ;;  %v9299_v60 = vld [vmem:[#allocation9_spill] sm:$0xff]  ;;  %v741_v29 = vrot.slane %v740_v58, 4  ;;  %v5548_v56 = vpop.f32.mrb[100].mxu1 }
 0x1d6   :  { %v765_v63 = vrot.slane %v9299_v60, 6  ;;  %6067 = vmatpush3.bf16.msra.mxu1 %v6432_v43  ;;  %v747_v37 = vrot.slane %v9302_v27, 6  ;;  %v748_v60 = vrot.slane %v9303_v50, 7  ;;  %v5549_v58 = vpop.f32.mrb[101].mxu1  ;;  %v9304_v43 = vld [vmem:[#allocation54_spill] sm:$0xff] }
 0x1d7   :  { %v5466_v3 = vpop.f32.mrb[104].mxu0  ;;  %v8194_v32 = vadd.f32 %v5547_v5, %v8143_v61  ;;  %v756_v61 = vshll.u32 %v7978_v18, 16  ;;  %6068 = vmatprep.subr.bf16.mxu1 %v6435_v48  ;;  %v763_v24 = vor.u32 %v762_v34, %v761_v10  ;;  %v9305_v5 = vshrl.u32 %v9304_v43, 16  ;;  %v5551_v9 = vpop.f32.mrb[102].mxu1  ;;  %v9306_v18 = vld [vmem:[#allocation14_spill] sm:$0xff] }
 0x1d8   :  { %v5467_v53 = vpop.f32.mrb[105].mxu0  ;;  %v767_v35 = vor.u32 %v766_v13, %v765_v63  ;;  %v771_v48 = vrot.slane %v9306_v18, 7  ;;  %v749_v10 = vor.u32 %v748_v60, %v747_v37  ;;  %v755_v34 = vrot.slane %v753_v22, 6 }
 0x1d9   :  { %v5468_v46 = vadd.f32 %v5467_v53, %v5466_v3  ;;  %v5469_v8 = vpop.f32.mrb[106].mxu0  ;;  %v770_v3 = vrot.slane %v9305_v5, 6  ;;  %v5550_v53 = vadd.f32 %v5549_v58, %v5548_v56  ;;  %v758_v63 = vrot.slane %v756_v61, 7 }
 0x1da   :  { %v5470_v39 = vpop.f32.mrb[107].mxu0  ;;  %6069 = vmatpush3.bf16.msra.mxu1 %v6436_v1  ;;  %v769_v60 = vrot.slane %v767_v35, 4  ;;  %v751_v22 = vrot.slane %v749_v10, 4 }
 0x1db   :  { %v3534_v16 = vadd.f32 %v5468_v46, %v7950_v47  ;;  %v5471_v31 = vadd.f32 %v5470_v39, %v5469_v8  ;;  %v737_v47 = vsel %vm8154_vm1, %v728_v26, %v736_v59  ;;  %v5552_v46 = vpop.f32.mrb[103].mxu1  ;;  %6202 = vmatprep.subr.bf16.mxu1 %v8149_v20  ;;  %4193 = vmatmul.mubr.bf16.gmra.mrb[208].mxu1 %v7995_v62  ;;  %v764_v26 = vrot.slane %v763_v24, 4  ;;  %v9307_v24 = vld [vmem:[#allocation19_spill] sm:$0xff] }
 0x1dc   :  { %4072 = vmatmul.mubr.bf16.gmra.mrb[212].mxu0 %v7803_v36  ;;  %v745_v36 = vsel %vm8154_vm1, %v741_v29, %v8197_v38  ;;  %v5553_v13 = vadd.f32 %v5552_v46, %v5551_v9  ;;  %4200 = vmatprep.mubr.bf16.mxu1 %v8096_v42  ;;  %v8224_v27 = vor.u32 %v771_v48, %v770_v3  ;;  %v779_v42 = vshll.u32 %v8018_v57, 16  ;;  %v9308_v3 = vld [vmem:[#allocation15_spill] sm:$0xff] }
 0x1dd   :  { %v3537_v11 = vadd.f32 %v5471_v31, %v7953_v33  ;;  %4079 = vmatprep.mubr.bf16.mxu0 %v8189_v2  ;;  %v8218_v33 = vadd.f32 %v5550_v53, %v8169_v19  ;;  %v8226_v37 = vcombine.low %v737_v47, %v745_v36  ;;  %v746_v19 = vrot.slane %v8197_v38, 4  ;;  %v5554_v56 = vpop.f32.mrb[104].mxu1 }
 0x1de   :  { %v8221_v59 = vadd.f32 %v5553_v13, %v3529_v51  ;;  %v759_v61 = vor.u32 %v758_v63, %v755_v34  ;;  %v776_v51 = vshrl.u32 %v8018_v57, 16  ;;  %v5555_v58 = vpop.f32.mrb[105].mxu1  ;;  %v784_v5 = vrot.slane %v9307_v24, 6 }
 0x1df   :  { %v5472_v8 = vpop.f32.mrb[108].mxu0  ;;  %v785_v53 = vrot.slane %v9308_v3, 7  ;;  %v5556_v9 = vadd.f32 %v5555_v58, %v5554_v56  ;;  %v5557_v18 = vpop.f32.mrb[106].mxu1  ;;  %v773_v47 = vsel %vm8154_vm1, %v769_v60, %v8224_v27  ;;  %v750_v46 = vsel %vm8154_vm1, %v746_v19, %v749_v10  ;;  %v9311_v10 = vld [vmem:[#allocation51_spill] sm:$0xff] }
 0x1e0   :  { %v5473_v39 = vpop.f32.mrb[109].mxu0  ;;  %v5558_v48 = vpop.f32.mrb[107].mxu1  ;;  %v760_v36 = vsel %vm8154_vm1, %v751_v22, %v759_v61  ;;  %v778_v13 = vrot.slane %v776_v51, 6  ;;  %v9312_v3 = vld [vmem:[#allocation55_spill] sm:$0xff] }
 0x1e1   :  { %v5474_v1 = vadd.f32 %v5473_v39, %v5472_v8  ;;  %v5475_v29 = vpop.f32.mrb[110].mxu0  ;;  %v8246_v34 = vadd.f32 %v5556_v9, %v3534_v16  ;;  %v5559_v63 = vadd.f32 %v5558_v48, %v5557_v18  ;;  %v781_v8 = vrot.slane %v779_v42, 7  ;;  %v9314_v18 = vld [vmem:[#allocation22_spill] sm:$0xff] }
 0x1e2   :  { %v5476_v50 = vpop.f32.mrb[111].mxu0  ;;  %v8254_v16 = vcombine.low %v750_v46, %v760_v36  ;;  %v774_v42 = vrot.slane %v8224_v27, 4  ;;  %v794_v48 = vrot.slane %v9314_v18, 7  ;;  %v802_v27 = vshll.u32 %v8047_v41, 16 }
 0x1e3   :  { %v3542_v62 = vadd.f32 %v5474_v1, %v7981_v28  ;;  %v5477_v31 = vadd.f32 %v5476_v50, %v5475_v29  ;;  %v768_v28 = vsel %vm8154_vm1, %v764_v26, %v767_v35  ;;  %4201 = vmatmul.mubr.bf16.gmra.mrb[212].mxu1 %v8022_v54  ;;  %v786_v35 = vor.u32 %v785_v53, %v784_v5  ;;  %v9309_v26 = vld [vmem:[#allocation21_spill] sm:$0xff]  ;;  %v9310_v29 = vld [vmem:[#allocation20_spill] sm:$0xff] }
 0x1e4   :  { %4080 = vmatmul.mubr.bf16.gmra.mrb[216].mxu0 %v8026_v52  ;;  %v788_v1 = vrot.slane %v9309_v26, 6  ;;  %v789_v50 = vrot.slane %v9310_v29, 7  ;;  %v8251_v60 = vadd.f32 %v5559_v63, %v3537_v11  ;;  %4208 = vmatprep.mubr.bf16.mxu1 %v9311_v10  ;;  %v8256_v61 = vcombine.low %v768_v28, %v773_v47 }
 0x1e5   :  { %v3545_v38 = vadd.f32 %v5477_v31, %v7984_v12  ;;  %4087 = vmatprep.mubr.bf16.mxu0 %v8226_v37  ;;  %v5560_v31 = vpop.f32.mrb[108].mxu1  ;;  %v782_v58 = vor.u32 %v781_v8, %v778_v13  ;;  %v787_v11 = vrot.slane %v786_v35, 4  ;;  %v9313_v53 = vshrl.u32 %v9312_v3, 16 }
 0x1e6   :  { %v5561_v24 = vpop.f32.mrb[109].mxu1  ;;  %v790_v5 = vor.u32 %v789_v50, %v788_v1  ;;  %v9315_v1 = vld [vmem:[#allocation52_spill] sm:$0xff] }
 0x1e7   :  { %v5478_v12 = vpop.f32.mrb[112].mxu0  ;;  %v793_v9 = vrot.slane %v9313_v53, 6  ;;  %v5562_v28 = vadd.f32 %v5561_v24, %v5560_v31  ;;  %v5563_v47 = vpop.f32.mrb[110].mxu1  ;;  %v783_v8 = vsel %vm8154_vm1, %v774_v42, %v782_v58 }
 0x1e8   :  { %v5479_v39 = vpop.f32.mrb[113].mxu0  ;;  %v5564_v36 = vpop.f32.mrb[111].mxu1  ;;  %v792_v58 = vrot.slane %v790_v5, 4 }
 0x1e9   :  { %v5480_v19 = vadd.f32 %v5479_v39, %v5478_v12  ;;  %v5481_v22 = vpop.f32.mrb[114].mxu0  ;;  %v8268_v63 = vadd.f32 %v5562_v28, %v3542_v62  ;;  %v5565_v12 = vadd.f32 %v5564_v36, %v5563_v47  ;;  %v791_v39 = vsel %vm8154_vm1, %v787_v11, %v790_v5  ;;  %v9316_v36 = vld [vmem:[#allocation53_spill] sm:$0xff] }
 0x1ea   :  { %v5482_v56 = vpop.f32.mrb[115].mxu0  ;;  %v795_v35 = vor.u32 %v794_v48, %v793_v9  ;;  %v8279_v42 = vcombine.low %v783_v8, %v791_v39 }
 0x1eb   :  { %v3550_v54 = vadd.f32 %v5480_v19, %v8004_v21  ;;  %v5483_v51 = vadd.f32 %v5482_v56, %v5481_v22  ;;  %v799_v21 = vshrl.u32 %v8047_v41, 16  ;;  %4209 = vmatmul.mubr.bf16.gmra.mrb[216].mxu1 %v8256_v61  ;;  %v8275_v26 = vadd.f32 %v5565_v12, %v3545_v38 }
 0x1ec   :  { %4088 = vmatmul.mubr.bf16.gmra.mrb[220].mxu0 %v8059_v0  ;;  %4216 = vmatprep.mubr.bf16.mxu1 %v9315_v1  ;;  %v804_v19 = vrot.slane %v802_v27, 7  ;;  %v797_v9 = vrot.slane %v795_v35, 4  ;;  %v796_v5 = vsel %vm8154_vm1, %v792_v58, %v795_v35  ;;  %v9317_v35 = vld [vmem:[#allocation5_spill] sm:$0xff]  ;;  %v814_v58 = vrot.slane %v8018_v57, 7 }
 0x1ed   :  { %v3553_v46 = vadd.f32 %v5483_v51, %v8007_v23  ;;  %4095 = vmatprep.mubr.bf16.mxu0 %v8254_v16  ;;  %v801_v62 = vrot.slane %v799_v21, 6  ;;  %v5566_v56 = vpop.f32.mrb[112].mxu1 }
 0x1ee   :  { %v5567_v24 = vpop.f32.mrb[113].mxu1 }
 0x1ef   :  { %v5484_v13 = vpop.f32.mrb[116].mxu0  ;;  %v5568_v11 = vadd.f32 %v5567_v24, %v5566_v56  ;;  %v5569_v38 = vpop.f32.mrb[114].mxu1  ;;  %v805_v18 = vor.u32 %v804_v19, %v801_v62  ;;  %v9320_v24 = vrot.slane %v9304_v43, 7 }
 0x1f0   :  { %v5485_v23 = vpop.f32.mrb[117].mxu0  ;;  %v5570_v48 = vpop.f32.mrb[115].mxu1 }
 0x1f1   :  { %v5486_v29 = vadd.f32 %v5485_v23, %v5484_v13  ;;  %v5487_v50 = vpop.f32.mrb[118].mxu0  ;;  %v8284_v28 = vadd.f32 %v5568_v11, %v3550_v54  ;;  %v5571_v47 = vadd.f32 %v5570_v48, %v5569_v38 }
 0x1f2   :  { %v5488_v22 = vpop.f32.mrb[119].mxu0 }
 0x1f3   :  { %v3558_v31 = vadd.f32 %v5486_v29, %v8032_v17  ;;  %v5489_v51 = vadd.f32 %v5488_v22, %v5487_v50  ;;  %4217 = vmatmul.mubr.bf16.gmra.mrb[220].mxu1 %v8279_v42  ;;  %v8287_v27 = vadd.f32 %v5571_v47, %v3553_v46  ;;  %v9318_v22 = vld [vmem:[#allocation62_spill] sm:$0xff] }
 0x1f4   :  { %4096 = vmatmul.mubr.bf16.gmra.mrb[224].mxu0 %v8082_v7  ;;  %4224 = vmatprep.mubr.bf16.mxu1 %v9316_v36  ;;  %v8301_v56 = vcombine.low %v9318_v22, %v9317_v35 }
 0x1f5   :  { %v3561_v53 = vadd.f32 %v5489_v51, %v8035_v55  ;;  %4103 = vmatprep.mubr.bf16.mxu0 %v8256_v61  ;;  %v806_v55 = vsel %vm8154_vm1, %v797_v9, %v805_v18  ;;  %v5572_v54 = vpop.f32.mrb[116].mxu1 }
 0x1f6   :  { %v5573_v29 = vpop.f32.mrb[117].mxu1  ;;  %v8295_v50 = vcombine.low %v796_v5, %v806_v55  ;;  %9319 = vst [vmem:[#allocation75_spill] sm:$0xff] %v8301_v56 }
 0x1f7   :  { %v5490_v17 = vpop.f32.mrb[120].mxu0  ;;  %v5574_v46 = vadd.f32 %v5573_v29, %v5572_v54  ;;  %v5575_v62 = vpop.f32.mrb[118].mxu1  ;;  %v9324_v29 = vrot.slane %v9312_v3, 7 }
 0x1f8   :  { %v5491_v21 = vpop.f32.mrb[121].mxu0  ;;  %v5576_v51 = vpop.f32.mrb[119].mxu1 }
 0x1f9   :  { %v5492_v12 = vadd.f32 %v5491_v21, %v5490_v17  ;;  %v5493_v13 = vpop.f32.mrb[122].mxu0  ;;  %v8307_v11 = vadd.f32 %v5574_v46, %v3558_v31  ;;  %v5577_v38 = vadd.f32 %v5576_v51, %v5575_v62  ;;  %v816_v46 = vrot.slane %v9324_v29, 4  ;;  %v9399_v21 = vld [vmem:[#allocation56_spill] sm:$0xff] }
 0x1fa   :  { %v5494_v8 = vpop.f32.mrb[123].mxu0  ;;  %v817_v62 = vrot.slane %v8047_v41, 7 }
 0x1fb   :  { %v3566_v39 = vadd.f32 %v5492_v12, %v8063_v25  ;;  %v5495_v23 = vadd.f32 %v5494_v8, %v5493_v13  ;;  %v813_v25 = vrot.slane %v9320_v24, 4  ;;  %4225 = vmatmul.mubr.bf16.gmra.mrb[224].mxu1 %v8295_v50  ;;  %v9322_v8 = vld [vmem:[#allocation13_spill] sm:$0xff] }
 0x1fc   :  { %4104 = vmatmul.mubr.bf16.gmra.mrb[228].mxu0 %v8189_v2  ;;  %4232 = vmatprep.mubr.bf16.mxu1 %v8301_v56  ;;  %v818_v3 = vsel %vm7098_vm8, %v816_v46, %v817_v62  ;;  %v9327_v46 = vld [vmem:[#allocation78_spill] sm:$0xff] }
 0x1fd   :  { %v3569_v19 = vadd.f32 %v5495_v23, %v8066_v30  ;;  %4111 = vmatprep.mubr.bf16.mxu0 %v8279_v42  ;;  %v8310_v30 = vadd.f32 %v5577_v38, %v3561_v53  ;;  %v815_v43 = vsel %vm7098_vm8, %v813_v25, %v814_v58  ;;  %v5578_v5 = vpop.f32.mrb[120].mxu1 }
 0x1fe   :  { %v5579_v55 = vpop.f32.mrb[121].mxu1  ;;  %v8319_v54 = vcombine.low %v815_v43, %v9322_v8 }
 0x1ff   :  { %v5496_v9 = vpop.f32.mrb[124].mxu0  ;;  %v5580_v12 = vadd.f32 %v5579_v55, %v5578_v5  ;;  %v5581_v13 = vpop.f32.mrb[122].mxu1 }
 0x200   :  { %v5497_v18 = vpop.f32.mrb[125].mxu0  ;;  %9323 = vst [vmem:[#allocation76_spill] sm:$0xff] %v8319_v54  ;;  %v5582_v23 = vpop.f32.mrb[123].mxu1 }
 0x201   :  { %v5498_v48 = vadd.f32 %v5497_v18, %v5496_v9  ;;  %v5499_v47 = vpop.f32.mrb[126].mxu0  ;;  %v5583_v35 = vadd.f32 %v5582_v23, %v5581_v13  ;;  %v8346_v23 = vld [vmem:[#allocation2 + $0x608] sm:$0xff]  }
 0x202   :  { %v5500_v17 = vpop.f32.mrb[127].mxu0 }
 0x203   :  { %v3574_v57 = vadd.f32 %v5498_v48, %v8085_v14  ;;  %v5501_v31 = vadd.f32 %v5500_v17, %v5499_v47  ;;  %v8325_v14 = vadd.f32 %v5580_v12, %v3566_v39  ;;  %4233 = vmatmul.mubr.bf16.gmra.mrb[228].mxu1 %v9311_v10  ;;  %v8328_v24 = vadd.f32 %v5583_v35, %v3569_v19  ;;  %v9325_v47 = vld [vmem:[#allocation63_spill] sm:$0xff] }
 0x204   :  { %4112 = vmatmul.mubr.bf16.gmra.mrb[232].mxu0 %v8226_v37  ;;  %4240 = vmatprep.mubr.bf16.mxu1 %v8319_v54  ;;  %v8337_v17 = vcombine.low %v9325_v47, %v818_v3  ;;  %v8354_v3 = vld [vmem:[#allocation2 + $0x610] sm:$0xff]  }
 0x205   :  { %v3577_v53 = vadd.f32 %v5501_v31, %v8088_v45  ;;  %4119 = vmatprep.mubr.bf16.mxu0 %v8295_v50  ;;  %v5584_v38 = vpop.f32.mrb[124].mxu1 }
 0x206   :  { %v5585_v9 = vpop.f32.mrb[125].mxu1  ;;  %9326 = vst [vmem:[#allocation77_spill] sm:$0xff] %v8337_v17 }
 0x207   :  { %v5502_v22 = vpop.f32.mrb[128].mxu0  ;;  %v5586_v18 = vadd.f32 %v5585_v9, %v5584_v38  ;;  %v5587_v48 = vpop.f32.mrb[126].mxu1 }
 0x208   :  { %v5503_v51 = vpop.f32.mrb[129].mxu0  ;;  %v5588_v43 = vpop.f32.mrb[127].mxu1 }
 0x209   :  { %v5504_v45 = vadd.f32 %v5503_v51, %v5502_v22  ;;  %v5505_v25 = vpop.f32.mrb[130].mxu0  ;;  %v8340_v5 = vadd.f32 %v5586_v18, %v3574_v57  ;;  %v5589_v31 = vadd.f32 %v5588_v43, %v5587_v48  ;;  %v9328_v22 = vld [vmem:[#allocation82_spill] sm:$0xff] }
 0x20a   :  { %v5506_v58 = vpop.f32.mrb[131].mxu0 }
 0x20b   :  { %v3582_v41 = vadd.f32 %v5504_v45, %v8101_v40  ;;  %v5507_v39 = vadd.f32 %v5506_v58, %v5505_v25  ;;  %4241 = vmatmul.mubr.bf16.gmra.mrb[232].mxu1 %v9315_v1  ;;  %v8343_v12 = vadd.f32 %v5589_v31, %v3577_v53  ;;  %v9329_v25 = vld [vmem:[#allocation69_spill] sm:$0xff] }
 0x20c   :  { %4120 = vmatmul.mubr.bf16.gmra.mrb[236].mxu0 %v8254_v16  ;;  %4248 = vmatprep.mubr.bf16.mxu1 %v8337_v17 }
 0x20d   :  { %v3585_v19 = vadd.f32 %v5507_v39, %v8104_v44  ;;  %4289 = vmatprep.mubr.bf16.mxu0 %v8026_v52  ;;  %v5590_v29 = vpop.f32.mrb[128].mxu1 }
 0x20e   :  { %v5591_v57 = vpop.f32.mrb[129].mxu1 }
 0x20f   :  { %v5508_v55 = vpop.f32.mrb[132].mxu0  ;;  %v5592_v51 = vadd.f32 %v5591_v57, %v5590_v29  ;;  %v5593_v45 = vpop.f32.mrb[130].mxu1  ;;  %v9331_v29 = vld [vmem:[#allocation83_spill] sm:$0xff] }
 0x210   :  { %v5509_v40 = vpop.f32.mrb[133].mxu0  ;;  %v5594_v53 = vpop.f32.mrb[131].mxu1 }
 0x211   :  { %v5510_v13 = vadd.f32 %v5509_v40, %v5508_v55  ;;  %v5511_v8 = vpop.f32.mrb[134].mxu0  ;;  %v8356_v38 = vadd.f32 %v5592_v51, %v3582_v41  ;;  %v5595_v39 = vadd.f32 %v5594_v53, %v5593_v45  ;;  %v8364_v55 = vld [vmem:[#allocation2 + $0x618] sm:$0xff]   ;;  %v9330_v40 = vld [vmem:[#allocation74_spill] sm:$0xff]  ;;  %v8374_v53 = vld [vmem:[#allocation2 + $0x620] sm:$0xff]  }
 0x212   :  { %v5512_v44 = vpop.f32.mrb[135].mxu0 }
 0x213   :  { %v3590_v62 = vadd.f32 %v5510_v13, %v9327_v46  ;;  %v5513_v35 = vadd.f32 %v5512_v44, %v5511_v8  ;;  %4249 = vmatmul.mubr.bf16.gmra.mrb[236].mxu1 %v9316_v36  ;;  %v8359_v48 = vadd.f32 %v5595_v39, %v3585_v19 }
 0x214   :  { %4290 = vmatmul.mubr.bf16.vlgmr.msra.gmra.mrb[240].mxu0 %v9328_v22  ;;  %4418 = vmatprep.mubr.bf16.mxu1 %v8256_v61 }
 0x215   :  { %v3593_v58 = vadd.f32 %v5513_v35, %v9329_v25  ;;  %6163 = vmatpush3.bf16.msra.mxu0 %v8149_v20  ;;  %4297 = vmatprep.mubr.bf16.mxu0 %v8059_v0  ;;  %v5596_v41 = vpop.f32.mrb[132].mxu1  ;;  %v9332_v35 = vld [vmem:[#allocation68_spill] sm:$0xff] }
 0x216   :  { %6164 = vmatprep.subr.bf16.mxu0 %v8346_v23  ;;  %v5597_v44 = vpop.f32.mrb[133].mxu1 }
 0x217   :  { %v5514_v9 = vpop.f32.mrb[136].mxu0  ;;  %v5598_v19 = vadd.f32 %v5597_v44, %v5596_v41  ;;  %v5599_v46 = vpop.f32.mrb[134].mxu1 }
 0x218   :  { %v5515_v18 = vpop.f32.mrb[137].mxu0  ;;  %v5600_v22 = vpop.f32.mrb[135].mxu1 }
 0x219   :  { %v5516_v47 = vadd.f32 %v5515_v18, %v5514_v9  ;;  %v5517_v43 = vpop.f32.mrb[138].mxu0  ;;  %6165 = vmatpush3.bf16.msra.mxu0 %v8346_v23  ;;  %v8372_v51 = vadd.f32 %v5598_v19, %v3590_v62  ;;  %v5601_v45 = vadd.f32 %v5600_v22, %v5599_v46 }
 0x21a   :  { %v5518_v31 = vpop.f32.mrb[139].mxu0  ;;  %6166 = vmatprep.subr.bf16.mxu0 %v8354_v3 }
 0x21b   :  { %v3598_v13 = vadd.f32 %v5516_v47, %v9330_v40  ;;  %v5519_v8 = vadd.f32 %v5518_v31, %v5517_v43  ;;  %9333 = vst [vmem:[#allocation79_spill] sm:$0xff] %v8372_v51  ;;  %4419 = vmatmul.mubr.bf16.vlgmr.msra.gmra.mrb[240].mxu1 %v8189_v2  ;;  %v8377_v9 = vadd.f32 %v5601_v45, %v3593_v58  ;;  %v8387_v58 = vld [vmem:[#allocation2 + $0x628] sm:$0xff]  }
 0x21c   :  { %4298 = vmatmul.mubr.bf16.gmra.mrb[244].mxu0 %v9331_v29  ;;  %6210 = vmatpush3.bf16.msra.mxu1 %v8149_v20  ;;  %v9335_v20 = vld [vmem:[#allocation66_spill] sm:$0xff] }
 0x21d   :  { %v3601_v57 = vadd.f32 %v5519_v8, %v9332_v35  ;;  %4305 = vmatprep.mubr.bf16.mxu0 %v8082_v7  ;;  %6167 = vmatpush3.bf16.msra.mxu0 %v8354_v3  ;;  %9334 = vst [vmem:[#allocation80_spill] sm:$0xff] %v8377_v9  ;;  %v5602_v62 = vpop.f32.mrb[136].mxu1  ;;  %v9336_v8 = vld [vmem:[#allocation31_spill] sm:$0xff]  ;;  %v9337_v29 = vld [vmem:[#allocation30_spill] sm:$0xff] }
 0x21e   :  { %6168 = vmatprep.subr.bf16.mxu0 %v8364_v55  ;;  %4426 = vmatprep.mubr.bf16.mxu1 %v8279_v42  ;;  %v5603_v40 = vpop.f32.mrb[137].mxu1  ;;  %v863_v44 = vrot.slane %v9336_v8, 6  ;;  %v864_v19 = vrot.slane %v9337_v29, 7 }
 0x21f   :  { %v5520_v25 = vpop.f32.mrb[140].mxu0  ;;  %6203 = vmatprep.subr.bf16.mxu1 %v8346_v23  ;;  %v5604_v46 = vadd.f32 %v5603_v40, %v5602_v62  ;;  %v5605_v35 = vpop.f32.mrb[138].mxu1 }
 0x220   :  { %v5521_v39 = vpop.f32.mrb[141].mxu0  ;;  %6211 = vmatpush3.bf16.msra.mxu1 %v8346_v23  ;;  %v8407_v23 = vor.u32 %v864_v19, %v863_v44 }
 0x221   :  { %v5522_v18 = vadd.f32 %v5521_v39, %v5520_v25  ;;  %v5523_v47 = vpop.f32.mrb[142].mxu0  ;;  %6169 = vmatpush3.bf16.msra.mxu0 %v8364_v55  ;;  %v9339_v25 = vld [vmem:[#allocation39_spill] sm:$0xff]  ;;  %6204 = vmatprep.subr.bf16.mxu1 %v8354_v3 }
 0x222   :  { %v5524_v43 = vpop.f32.mrb[143].mxu0  ;;  %6170 = vmatprep.subr.bf16.mxu0 %v8374_v53  ;;  %v867_v39 = vrot.slane %v9339_v25, 6  ;;  %v8423_v25 = vld [vmem:[#allocation2 + $0x638] sm:$0xff]  }
 0x223   :  { %v8384_v31 = vadd.f32 %v5522_v18, %v8147_v6  ;;  %v5525_v41 = vadd.f32 %v5524_v43, %v5523_v47  ;;  %v9338_v6 = vld [vmem:[#allocation36_spill] sm:$0xff]  ;;  %v5606_v18 = vpop.f32.mrb[139].mxu1  ;;  %v8401_v47 = vadd.f32 %v5604_v46, %v3598_v13  ;;  %4427 = vmatmul.mubr.bf16.gmra.mrb[244].mxu1 %v8226_v37 }
 0x224   :  { %4306 = vmatmul.mubr.bf16.gmra.mrb[248].mxu0 %v9335_v20  ;;  %v868_v45 = vrot.slane %v9338_v6, 7  ;;  %v5607_v43 = vadd.f32 %v5606_v18, %v5605_v35  ;;  %4434 = vmatprep.mubr.bf16.mxu1 %v8295_v50  ;;  %v9343_v35 = vld [vmem:[#allocation28_spill] sm:$0xff] }
 0x225   :  { %v8393_v22 = vadd.f32 %v5525_v41, %v8163_v15  ;;  %4313 = vmatprep.mubr.bf16.mxu0 %v8189_v2  ;;  %6171 = vmatpush3.bf16.msra.mxu0 %v8374_v53  ;;  %9340 = vst [vmem:[#allocation11_spill] sm:$0xff] %v8401_v47  ;;  %v8404_v15 = vld [vmem:[#allocation2 + $0x630] sm:$0xff]   ;;  %v5608_v29 = vpop.f32.mrb[140].mxu1  ;;  %v910_v6 = vrot.slane %v9343_v35, 7 }
 0x226   :  { %6172 = vmatprep.subr.bf16.mxu0 %v8387_v58  ;;  %v8409_v41 = vadd.f32 %v5607_v43, %v3601_v57  ;;  %6212 = vmatpush3.bf16.msra.mxu1 %v8354_v3  ;;  %v8413_v13 = vor.u32 %v868_v45, %v867_v39  ;;  %v9342_v57 = vld [vmem:[#allocation29_spill] sm:$0xff]  ;;  %v8428_v3 = vld [vmem:[%s8971_s0 + $0x54] sm:$0xf]  ;;  %v9344_v39 = vld [vmem:[#allocation44_spill] sm:$0xff] }
 0x227   :  { %v5630_v62 = vpop.f32.mrb[144].mxu0  ;;  %6205 = vmatprep.subr.bf16.mxu1 %v8364_v55  ;;  %v909_v19 = vrot.slane %v9342_v57, 6  ;;  %v887_v18 = vrot.slane %v9344_v39, 7  ;;  %v6494_v57 = vld [vmem:[%s8971_s0 + $0x80] sm:$0xf]  ;;  %v9351_v39 = vld [vmem:[#allocation46_spill] sm:$0xff] }
 0x228   :  { %v5631_v2 = vpop.f32.mrb[145].mxu0  ;;  %9341 = vst [vmem:[#allocation10_spill] sm:$0xff] %v8409_v41  ;;  %v845_v35 = vrot.slane %v6494_v57, 6  ;;  %v9352_v41 = vld [vmem:[#allocation65_spill] sm:$0xff] }
 0x229   :  { %v5632_v40 = vadd.f32 %v5631_v2, %v5630_v62  ;;  %v5633_v20 = vpop.f32.mrb[146].mxu0  ;;  %6173 = vmatpush3.bf16.msra.mxu0 %v8387_v58  ;;  %v5609_v62 = vpop.f32.mrb[141].mxu1  ;;  %v9347_v2 = vld [vmem:[#allocation33_spill] sm:$0xff]  ;;  %v911_v54 = vor.u32 %v910_v6, %v909_v19 }
 0x22a   :  { %v5634_v8 = vpop.f32.mrb[147].mxu0  ;;  %6174 = vmatprep.subr.bf16.mxu0 %v8404_v15  ;;  %6213 = vmatpush3.bf16.msra.mxu1 %v8364_v55 }
 0x22b   :  { %v8418_v46 = vadd.f32 %v5632_v40, %v8184_v49  ;;  %v5635_v44 = vadd.f32 %v5634_v8, %v5633_v20  ;;  %v9345_v49 = vld [vmem:[#allocation45_spill] sm:$0xff]  ;;  %v5610_v40 = vadd.f32 %v5609_v62, %v5608_v29  ;;  %v5611_v20 = vpop.f32.mrb[142].mxu1  ;;  %v913_v29 = vrot.slane %v9347_v2, 6  ;;  %v9348_v62 = vld [vmem:[#allocation32_spill] sm:$0xff]  ;;  %6206 = vmatprep.subr.bf16.mxu1 %v8374_v53  ;;  %4435 = vmatmul.mubr.bf16.gmra.mrb[248].mxu1 %v8254_v16 }
 0x22c   :  { %v886_v43 = vrot.slane %v9345_v49, 6  ;;  %4314 = vmatmul.mubr.bf16.gmra.mrb[252].mxu0 %v8026_v52  ;;  %v9346_v49 = vld [vmem:[#allocation43_spill] sm:$0xff]  ;;  %v5612_v45 = vpop.f32.mrb[143].mxu1  ;;  %v914_v17 = vrot.slane %v9348_v62, 7  ;;  %v891_v2 = vrot.slane %v9351_v39, 7  ;;  %v9353_v62 = vshrl.u32 %v9352_v41, 16  ;;  %4442 = vmatprep.mubr.bf16.mxu1 %v9311_v10 }
 0x22d   :  { %v8436_v8 = vadd.f32 %v5635_v44, %v8194_v32  ;;  %4321 = vmatprep.mubr.bf16.mxu0 %v8226_v37  ;;  %v873_v52 = vrot.slane %v9346_v49, 7  ;;  %6175 = vmatpush3.bf16.msra.mxu0 %v8404_v15  ;;  %v9349_v32 = vld [vmem:[#allocation47_spill] sm:$0xff]  ;;  %v8451_v55 = vadd.f32 %v5610_v40, %v8384_v31  ;;  %v5613_v44 = vadd.f32 %v5612_v45, %v5611_v20  ;;  %v6495_v31 = vld [vmem:[%s8971_s0 + $0x7c] sm:$0xf]  ;;  %v8474_v39 = vld [vmem:[%s8971_s0 + $0x6c] sm:$0xf] }
 0x22e   :  { %v890_v37 = vrot.slane %v9349_v32, 6  ;;  %6176 = vmatprep.subr.bf16.mxu0 %v8423_v25  ;;  %v8454_v49 = vor.u32 %v887_v18, %v886_v43  ;;  %v872_v56 = vrot.slane %v9353_v62, 6  ;;  %v4746_v40 = vrot.slane %v6495_v31, 10  ;;  %v6496_v43 = vld [vmem:[%s8971_s0 + $0x84] sm:$0xf]  ;;  %6214 = vmatpush3.bf16.msra.mxu1 %v8374_v53  ;;  %v5718_v53 = vpop.f32.mrb[144].mxu1 }
 0x22f   :  { %9350 = vst [vmem:[#allocation16_spill] sm:$0xff] %v8451_v55  ;;  %v5636_v57 = vpop.f32.mrb[148].mxu0  ;;  %v8464_v45 = vadd.f32 %v5613_v44, %v8393_v22  ;;  %v847_v18 = vrot.slane %v845_v35, 4  ;;  %v848_v20 = vrot.slane %v6496_v43, 6  ;;  %v8477_v44 = vor.u32 %v914_v17, %v913_v29  ;;  %v9357_v31 = vld [vmem:[#allocation37_spill] sm:$0xff]  ;;  %6207 = vmatprep.subr.bf16.mxu1 %v8387_v58 }
 0x230   :  { %v5637_v47 = vpop.f32.mrb[149].mxu0  ;;  %v912_v9 = vrot.slane %v911_v54, 4  ;;  %v6498_v17 = vld [vmem:[%s8971_s0 + $0x58] sm:$0xf]  ;;  %v8498_v51 = vor.u32 %v873_v52, %v872_v56 }
 0x231   :  { %9354 = vst [vmem:[#allocation12_spill] sm:$0xff] %v8464_v45  ;;  %v5638_v19 = vadd.f32 %v5637_v47, %v5636_v57  ;;  %v5639_v6 = vpop.f32.mrb[150].mxu0  ;;  %v9355_v47 = vld [vmem:[#allocation27_spill] sm:$0xff]  ;;  %v919_v45 = vrot.slane %v9357_v31, 7  ;;  %6177 = vmatpush3.bf16.msra.mxu0 %v8423_v25  ;;  %v823_v29 = vrot.slane %v6498_v17, 6  ;;  %v9358_v31 = vld [vmem:[#allocation49_spill] sm:$0xff] }
 0x232   :  { %v5640_v32 = vpop.f32.mrb[151].mxu0  ;;  %v9356_v57 = vshrl.u32 %v9355_v47, 16  ;;  %v8493_v47 = vld [vmem:[%s8971_s0 + $0x88] sm:$0xf]  ;;  %6215 = vmatpush3.bf16.msra.mxu1 %v8387_v58  ;;  %v8523_v58 = vsel %vm8154_vm1, %v912_v9, %v8477_v44 }
 0x233   :  { %v8485_v43 = vadd.f32 %v5638_v19, %v8218_v33  ;;  %v5641_v55 = vadd.f32 %v5640_v32, %v5639_v6  ;;  %v5719_v33 = vpop.f32.mrb[145].mxu1  ;;  %v846_v19 = vsel %vm7902_vm14, %v4746_v40, %v845_v35  ;;  %v924_v35 = vshrl.u32 %v8493_v47, 16  ;;  %6208 = vmatprep.subr.bf16.mxu1 %v8404_v15  ;;  %4443 = vmatmul.mubr.bf16.gmra.mrb[252].mxu1 %v8256_v61  ;;  %v6500_v61 = vld [vmem:[%s8971_s0 + $0x90] sm:$0xf]  ;;  %v9361_v6 = vld [vmem:[#allocation38_spill] sm:$0xff] }
 0x234   :  { %v918_v62 = vrot.slane %v9356_v57, 6  ;;  %v8495_v57 = vor.u32 %v891_v2, %v890_v37  ;;  %4322 = vmatmul.mubr.bf16.gmra.mrb[0].mxu0 %v8059_v0  ;;  %v5720_v32 = vadd.f32 %v5719_v33, %v5718_v53  ;;  %v5721_v17 = vpop.f32.mrb[146].mxu1  ;;  %v849_v37 = vsel %vm7902_vm14, %v847_v18, %v848_v20  ;;  %4450 = vmatprep.mubr.bf16.mxu1 %v9315_v1 }
 0x235   :  { %v8505_v10 = vadd.f32 %v5641_v55, %v8221_v59  ;;  %4329 = vmatprep.mubr.bf16.mxu0 %v8254_v16  ;;  %v5722_v56 = vpop.f32.mrb[147].mxu1  ;;  %v917_v0 = vrot.slane %v8477_v44, 4  ;;  %v927_v2 = vshll.u32 %v8493_v47, 16  ;;  %v825_v40 = vrot.slane %v823_v29, 4 }
 0x236   :  { %v8512_v52 = vor.u32 %v919_v45, %v918_v62  ;;  %v8518_v59 = vadd.f32 %v5720_v32, %v8418_v46  ;;  %v5723_v16 = vadd.f32 %v5722_v56, %v5721_v17  ;;  %v8526_v18 = vcombine.low %v846_v19, %v849_v37  ;;  %v6499_v62 = vld [vmem:[%s8971_s0 + $0x5c] sm:$0xf]  ;;  %v6501_v17 = vld [vmem:[%s8971_s0 + $0x94] sm:$0xf]  ;;  %6216 = vmatpush3.bf16.msra.mxu1 %v8404_v15 }
 0x237   :  { %v5642_v55 = vpop.f32.mrb[152].mxu0  ;;  %v826_v53 = vrot.slane %v6499_v62, 6  ;;  %v850_v46 = vrot.slane %v848_v20, 4  ;;  %v851_v33 = vrot.slane %v8493_v47, 6  ;;  %v4747_v19 = vrot.slane %v6500_v61, 10  ;;  %6209 = vmatprep.subr.bf16.mxu1 %v8423_v25 }
 0x238   :  { %v5643_v45 = vpop.f32.mrb[153].mxu0  ;;  %v8533_v32 = vadd.f32 %v5723_v16, %v8436_v8  ;;  %v855_v37 = vrot.slane %v6501_v17, 6  ;;  %v926_v56 = vrot.slane %v924_v35, 6  ;;  %v929_v8 = vrot.slane %v927_v2, 7  ;;  %v9360_v16 = vld [vmem:[#allocation40_spill] sm:$0xff] }
 0x239   :  { %v5644_v9 = vadd.f32 %v5643_v45, %v5642_v55  ;;  %v5645_v44 = vpop.f32.mrb[154].mxu0  ;;  %v932_v62 = vrot.slane %v9360_v16, 6  ;;  %v933_v55 = vrot.slane %v9361_v6, 7  ;;  %v5724_v45 = vpop.f32.mrb[148].mxu1  ;;  %v921_v17 = vsel %vm8154_vm1, %v917_v0, %v8512_v52  ;;  %v9364_v16 = vld [vmem:[#allocation42_spill] sm:$0xff] }
 0x23a   :  { %v5646_v20 = vpop.f32.mrb[155].mxu0  ;;  %v9362_v15 = vrot.slane %v8428_v3, 10  ;;  %v5725_v2 = vpop.f32.mrb[149].mxu1  ;;  %v827_v6 = vsel %vm7902_vm14, %v825_v40, %v826_v53  ;;  %v852_v0 = vsel %vm7902_vm14, %v850_v46, %v851_v33  ;;  %v922_v3 = vrot.slane %v8512_v52, 4  ;;  %6217 = vmatpush3.bf16.msra.mxu1 %v8423_v25 }
 0x23b   :  { %v8547_v22 = vadd.f32 %v5644_v9, %v8246_v34  ;;  %v5647_v61 = vadd.f32 %v5646_v20, %v5645_v44  ;;  %v9363_v34 = vrot.slane %v8407_v23, 4  ;;  %v5726_v44 = vadd.f32 %v5725_v2, %v5724_v45  ;;  %v6502_v23 = vld [vmem:[%s8971_s0 + $0x98] sm:$0xf]  ;;  %4451 = vmatmul.mubr.bf16.gmra.mrb[0].mxu1 %v8279_v42  ;;  %v6504_v42 = vld [vmem:[%s8971_s0 + $0x9c] sm:$0xf] }
 0x23c   :  { %v824_v35 = vsel %vm7902_vm14, %v9362_v15, %v823_v29  ;;  %4330 = vmatmul.mubr.bf16.gmra.mrb[4].mxu0 %v8082_v7  ;;  %v5727_v29 = vpop.f32.mrb[150].mxu1  ;;  %v856_v7 = vsel %vm7902_vm14, %v4747_v19, %v855_v37  ;;  %v858_v40 = vrot.slane %v6502_v23, 6  ;;  %v930_v33 = vor.u32 %v929_v8, %v926_v56  ;;  %v9365_v15 = vld [vmem:[#allocation41_spill] sm:$0xff]  ;;  %4458 = vmatprep.mubr.bf16.mxu1 %v9316_v36 }
 0x23d   :  { %v8564_v9 = vsel %vm8154_vm1, %v9363_v34, %v8413_v13  ;;  %v8570_v20 = vadd.f32 %v5647_v61, %v8251_v60  ;;  %4337 = vmatprep.mubr.bf16.mxu0 %v8526_v18  ;;  %v5728_v46 = vpop.f32.mrb[151].mxu1  ;;  %v934_v52 = vor.u32 %v933_v55, %v932_v62  ;;  %v936_v45 = vrot.slane %v9364_v16, 6  ;;  %v8584_v61 = vld [vmem:[%s8971_s0 + $0x60] sm:$0xf]  ;;  %v6503_v55 = vld [vmem:[%s8971_s0 + $0x68] sm:$0xf] }
 0x23e   :  { %v937_v60 = vrot.slane %v9365_v15, 7  ;;  %v8587_v19 = vadd.f32 %v5726_v44, %v8485_v43  ;;  %v5729_v2 = vadd.f32 %v5728_v46, %v5727_v29  ;;  %v828_v23 = vrot.slane %v826_v53, 4 }
 0x23f   :  { %v5648_v34 = vpop.f32.mrb[156].mxu0  ;;  %v829_v25 = vrot.slane %v8584_v61, 6  ;;  %v4838_v8 = vcombine.low %v824_v35, %v827_v6  ;;  %v8591_v62 = vcombine.low %v852_v0, %v856_v7  ;;  %v4745_v16 = vrot.slane %v6503_v55, 10 }
 0x240   :  { %9366 = vst [vmem:[#allocation58_spill] sm:$0xff] %v8587_v19  ;;  %v5649_v56 = vpop.f32.mrb[157].mxu0  ;;  %v857_v15 = vrot.slane %v855_v37, 4  ;;  %v8597_v43 = vadd.f32 %v5729_v2, %v8505_v10  ;;  %v860_v29 = vrot.slane %v858_v40, 4  ;;  %v861_v35 = vrot.slane %v6504_v42, 6  ;;  %v5730_v2 = vpop.f32.mrb[152].mxu1 }
 0x241   :  { %v5650_v53 = vadd.f32 %v5649_v56, %v5648_v34  ;;  %v5651_v44 = vpop.f32.mrb[158].mxu0  ;;  %v8604_v0 = vcombine.low %v8523_v58, %v921_v17  ;;  %v9368_v37 = vrot.slane %v8413_v13, 4  ;;  %v931_v7 = vsel %vm8154_vm1, %v922_v3, %v930_v33  ;;  %v5731_v17 = vpop.f32.mrb[153].mxu1 }
 0x242   :  { %9367 = vst [vmem:[#allocation17_spill] sm:$0xff] %v8597_v43  ;;  %v5652_v6 = vpop.f32.mrb[159].mxu0  ;;  %v8613_v46 = vor.u32 %v937_v60, %v936_v45  ;;  %v935_v55 = vrot.slane %v934_v52, 4  ;;  %v830_v58 = vsel %vm7902_vm14, %v828_v23, %v829_v25  ;;  %v9369_v13 = vrot.slane %v8474_v39, 6  ;;  %v5733_v60 = vpop.f32.mrb[154].mxu1 }
 0x243   :  { %v875_v10 = vsel %vm8154_vm1, %v9368_v37, %v8498_v51  ;;  %v8616_v34 = vadd.f32 %v5650_v53, %v8268_v63  ;;  %v5653_v56 = vadd.f32 %v5652_v6, %v5651_v44  ;;  %v878_v3 = vshrl.u32 %v8584_v61, 16  ;;  %v6505_v25 = vld [vmem:[%s8971_s0 + $0x70] sm:$0xf]  ;;  %v9370_v53 = vld [vmem:[#allocation34_spill] sm:$0xff]  ;;  %4459 = vmatmul.mubr.bf16.gmra.mrb[4].mxu1 %v8295_v50 }
 0x244   :  { %4338 = vmatmul.mubr.bf16.gmra.mrb[8].mxu0 %v4838_v8  ;;  %v834_v37 = vsel %vm7902_vm14, %v4745_v16, %v9369_v13  ;;  %v881_v33 = vshll.u32 %v8584_v61, 16  ;;  %v859_v63 = vsel %vm7902_vm14, %v857_v15, %v858_v40  ;;  %v5732_v45 = vadd.f32 %v5731_v17, %v5730_v2  ;;  %v5734_v16 = vpop.f32.mrb[155].mxu1  ;;  %v9372_v40 = vld [vmem:[#allocation48_spill] sm:$0xff]  ;;  %4466 = vmatprep.mubr.bf16.mxu1 %v8604_v0 }
 0x245   :  { %v8629_v52 = vadd.f32 %v5653_v56, %v8275_v26  ;;  %4345 = vmatprep.mubr.bf16.mxu0 %v8591_v62  ;;  %v862_v23 = vsel %vm7902_vm14, %v860_v29, %v861_v35  ;;  %v836_v8 = vrot.slane %v6505_v25, 6  ;;  %v9371_v44 = vshrl.u32 %v9370_v53, 16 }
 0x246   :  { %v942_v15 = vrot.slane %v9372_v40, 7  ;;  %v947_v2 = vshrl.u32 %v6504_v42, 16  ;;  %v950_v17 = vshll.u32 %v6504_v42, 16  ;;  %v8641_v26 = vadd.f32 %v5732_v45, %v8547_v22  ;;  %v8652_v42 = vld [vmem:[%s8971_s0 + $0x74] sm:$0xf] }
 0x247   :  { %v941_v6 = vrot.slane %v9371_v44, 6  ;;  %v5735_v56 = vadd.f32 %v5734_v16, %v5733_v60  ;;  %v5654_v13 = vpop.f32.mrb[160].mxu0  ;;  %v939_v29 = vsel %vm8154_vm1, %v935_v55, %v8613_v46  ;;  %v4839_v35 = vcombine.low %v830_v58, %v834_v37  ;;  %v9376_v40 = vld [vmem:[#allocation71_spill] sm:$0xff] }
 0x248   :  { %9373 = vst [vmem:[#allocation23_spill] sm:$0xff] %v8641_v26  ;;  %v5655_v25 = vpop.f32.mrb[161].mxu0  ;;  %v880_v43 = vrot.slane %v878_v3, 6  ;;  %v883_v53 = vrot.slane %v881_v33, 7  ;;  %v8647_v44 = vcombine.low %v859_v63, %v862_v23  ;;  %v9374_v22 = vrot.slane %v8474_v39, 6 }
 0x249   :  { %v8657_v60 = vadd.f32 %v5735_v56, %v8570_v20  ;;  %v5656_v55 = vadd.f32 %v5655_v25, %v5654_v13  ;;  %v5657_v50 = vpop.f32.mrb[162].mxu0  ;;  %v838_v58 = vrot.slane %v836_v8, 4  ;;  %v839_v37 = vrot.slane %v8652_v42, 6 }
 0x24a   :  { %v835_v45 = vrot.slane %v9374_v22, 4  ;;  %v876_v3 = vrot.slane %v8498_v51, 4  ;;  %v5658_v33 = vpop.f32.mrb[163].mxu0  ;;  %v943_v63 = vor.u32 %v942_v15, %v941_v6  ;;  %v949_v23 = vrot.slane %v947_v2, 6  ;;  %v5736_v22 = vpop.f32.mrb[156].mxu1 }
 0x24b   :  { %9375 = vst [vmem:[#allocation18_spill] sm:$0xff] %v8657_v60  ;;  %v952_v16 = vrot.slane %v950_v17, 7  ;;  %v9377_v26 = vshrl.u32 %v9376_v40, 16  ;;  %v4844_v20 = vcombine.low %v8564_v9, %v875_v10  ;;  %v3808_v56 = vadd.f32 %v5656_v55, %v8284_v28  ;;  %v5737_v13 = vpop.f32.mrb[157].mxu1 }
 0x24c   :  { %v5659_v60 = vadd.f32 %v5658_v33, %v5657_v50  ;;  %v8666_v25 = vcombine.low %v931_v7, %v939_v29  ;;  %4346 = vmatmul.mubr.bf16.gmra.mrb[12].mxu0 %v4839_v35  ;;  %v884_v19 = vor.u32 %v883_v53, %v880_v43  ;;  %v837_v51 = vsel %vm7902_vm14, %v835_v45, %v836_v8  ;;  %v5739_v2 = vpop.f32.mrb[158].mxu1 }
 0x24d   :  { %v895_v39 = vrot.slane %v9377_v26, 6  ;;  %v901_v6 = vshrl.u32 %v8652_v42, 16  ;;  %v5738_v15 = vadd.f32 %v5737_v13, %v5736_v22  ;;  %4353 = vmatprep.mubr.bf16.mxu0 %v8647_v44  ;;  %v840_v28 = vsel %vm7902_vm14, %v838_v58, %v839_v37  ;;  %v5740_v10 = vpop.f32.mrb[159].mxu1  ;;  %4467 = vmatmul.mubr.bf16.gmra.mrb[8].mxu1 %v4844_v20 }
 0x24e   :  { %v3811_v17 = vadd.f32 %v5659_v60, %v8287_v27  ;;  %v904_v9 = vshll.u32 %v8652_v42, 16  ;;  %v940_v7 = vrot.slane %v8613_v46, 4  ;;  %v945_v43 = vrot.slane %v943_v63, 4  ;;  %4474 = vmatprep.mubr.bf16.mxu1 %v8666_v25 }
 0x24f   :  { %v953_v26 = vor.u32 %v952_v16, %v949_v23  ;;  %v8678_v8 = vadd.f32 %v5738_v15, %v8616_v34  ;;  %v5741_v29 = vadd.f32 %v5740_v10, %v5739_v2  ;;  %v5660_v35 = vpop.f32.mrb[164].mxu0  ;;  %v9378_v53 = vrot.slane %v9358_v31, 7 }
 0x250   :  { %v885_v54 = vsel %vm8154_vm1, %v876_v3, %v884_v19  ;;  %v9379_v45 = vrot.slane %v8454_v49, 4  ;;  %v5661_v60 = vpop.f32.mrb[165].mxu0  ;;  %v4840_v55 = vcombine.low %v837_v51, %v840_v28  ;;  %v903_v58 = vrot.slane %v901_v6, 6  ;;  %v5742_v3 = vpop.f32.mrb[160].mxu1 }
 0x251   :  { %v897_v27 = vor.u32 %v9378_v53, %v895_v39  ;;  %v8690_v34 = vadd.f32 %v5741_v29, %v8629_v52  ;;  %v5662_v50 = vadd.f32 %v5661_v60, %v5660_v35  ;;  %v5663_v31 = vpop.f32.mrb[166].mxu0  ;;  %v906_v37 = vrot.slane %v904_v9, 7  ;;  %v5743_v22 = vpop.f32.mrb[161].mxu1 }
 0x252   :  { %v893_v46 = vsel %vm8154_vm1, %v9379_v45, %v8495_v57  ;;  %v5664_v33 = vpop.f32.mrb[167].mxu0  ;;  %v944_v19 = vsel %vm8154_vm1, %v940_v7, %v943_v63  ;;  %v954_v49 = vsel %vm8154_vm1, %v945_v43, %v953_v26  ;;  %v894_v52 = vrot.slane %v8495_v57, 4  ;;  %v5745_v6 = vpop.f32.mrb[162].mxu1 }
 0x253   :  { %v3816_v23 = vadd.f32 %v5662_v50, %v8307_v11  ;;  %v5665_v16 = vadd.f32 %v5664_v33, %v5663_v31  ;;  %v899_v39 = vrot.slane %v897_v27, 4  ;;  %v4845_v13 = vcombine.low %v885_v54, %v893_v46  ;;  %v5746_v28 = vpop.f32.mrb[163].mxu1 }
 0x254   :  { %4354 = vmatmul.mubr.bf16.gmra.mrb[16].mxu0 %v4840_v55  ;;  %v5744_v51 = vadd.f32 %v5743_v22, %v5742_v3  ;;  %v8700_v2 = vcombine.low %v944_v19, %v954_v49  ;;  %v907_v63 = vor.u32 %v906_v37, %v903_v58  ;;  %v5747_v10 = vadd.f32 %v5746_v28, %v5745_v6  ;;  %v9380_v55 = vld [vmem:[#allocation67_spill] sm:$0xff]  ;;  %v9383_v6 = vld [vmem:[#allocation72_spill] sm:$0xff] }
 0x255   :  { %v3819_v15 = vadd.f32 %v5665_v16, %v8310_v30  ;;  %4361 = vmatprep.mubr.bf16.mxu0 %v4844_v20  ;;  %4475 = vmatmul.mubr.bf16.gmra.mrb[12].mxu1 %v4845_v13  ;;  %v898_v43 = vsel %vm8154_vm1, %v894_v52, %v897_v27  ;;  %v9381_v27 = vld [vmem:[#allocation64_spill] sm:$0xff]  ;;  %v9382_v31 = vrot.slane %v9352_v41, 7  ;;  %v9384_v28 = vrot.slane %v9376_v40, 7 }
 0x256   :  { %v8702_v9 = vadd.f32 %v5744_v51, %v3808_v56  ;;  %v8704_v57 = vadd.f32 %v5747_v10, %v3811_v17  ;;  %4482 = vmatprep.mubr.bf16.mxu1 %v8700_v2  ;;  %v908_v30 = vsel %vm8154_vm1, %v899_v39, %v907_v63  ;;  %v5748_v35 = vpop.f32.mrb[164].mxu1  ;;  %v8716_v50 = vcombine.low %v9381_v27, %v9380_v55 }
 0x257   :  { %v5666_v11 = vpop.f32.mrb[168].mxu0  ;;  %v5749_v54 = vpop.f32.mrb[165].mxu1  ;;  %v4846_v45 = vcombine.low %v898_v43, %v908_v30  ;;  %v955_v58 = vrot.slane %v9382_v31, 4  ;;  %v958_v10 = vrot.slane %v9384_v28, 4  ;;  %v9389_v28 = vld [vmem:[#allocation11_spill] sm:$0xff] }
 0x258   :  { %v5667_v7 = vpop.f32.mrb[169].mxu0  ;;  %v5750_v17 = vadd.f32 %v5749_v54, %v5748_v35  ;;  %v5751_v46 = vpop.f32.mrb[166].mxu1 }
 0x259   :  { %v5668_v26 = vadd.f32 %v5667_v7, %v5666_v11  ;;  %v5669_v29 = vpop.f32.mrb[170].mxu0  ;;  %v5752_v4 = vpop.f32.mrb[167].mxu1  ;;  %v959_v11 = vrot.slane %v8652_v42, 7 }
 0x25a   :  { %v5670_v20 = vpop.f32.mrb[171].mxu0  ;;  %v8721_v37 = vadd.f32 %v5750_v17, %v3816_v23  ;;  %v5753_v33 = vadd.f32 %v5752_v4, %v5751_v46  ;;  %v9386_v46 = vld [vmem:[#allocation51_spill] sm:$0xff] }
 0x25b   :  { %v3824_v56 = vadd.f32 %v5668_v26, %v8325_v14  ;;  %v5671_v53 = vadd.f32 %v5670_v20, %v5669_v29  ;;  %v956_v14 = vrot.slane %v8584_v61, 7  ;;  %v960_v40 = vsel %vm7098_vm8, %v958_v10, %v959_v11 }
 0x25c   :  { %4362 = vmatmul.mubr.bf16.gmra.mrb[20].mxu0 %v8526_v18  ;;  %v8723_v49 = vadd.f32 %v5753_v33, %v3819_v15 }
 0x25d   :  { %v3827_v60 = vadd.f32 %v5671_v53, %v8328_v24  ;;  %4369 = vmatprep.mubr.bf16.mxu0 %v4845_v13  ;;  %4483 = vmatmul.mubr.bf16.gmra.mrb[16].mxu1 %v4846_v45  ;;  %v957_v52 = vsel %vm7098_vm8, %v955_v58, %v956_v14 }
 0x25e   :  { %4490 = vmatprep.mubr.bf16.mxu1 %v8716_v50  ;;  %v5754_v41 = vpop.f32.mrb[168].mxu1  ;;  %v8732_v15 = vcombine.low %v957_v52, %v9383_v6  ;;  %v9388_v52 = vld [vmem:[#allocation80_spill] sm:$0xff] }
 0x25f   :  { %v5672_v19 = vpop.f32.mrb[172].mxu0  ;;  %v5755_v23 = vpop.f32.mrb[169].mxu1 }
 0x260   :  { %v5673_v18 = vpop.f32.mrb[173].mxu0  ;;  %v5756_v22 = vadd.f32 %v5755_v23, %v5754_v41  ;;  %v5757_v13 = vpop.f32.mrb[170].mxu1 }
 0x261   :  { %v5674_v24 = vadd.f32 %v5673_v18, %v5672_v19  ;;  %v5675_v3 = vpop.f32.mrb[174].mxu0  ;;  %v5758_v63 = vpop.f32.mrb[171].mxu1 }
 0x262   :  { %v5676_v16 = vpop.f32.mrb[175].mxu0  ;;  %v8737_v7 = vadd.f32 %v5756_v22, %v3824_v56 }
 0x263   :  { %v3832_v39 = vadd.f32 %v5674_v24, %v8340_v5  ;;  %v5677_v61 = vadd.f32 %v5676_v16, %v5675_v3  ;;  %v5759_v5 = vadd.f32 %v5758_v63, %v5757_v13 }
 0x264   :  { %4370 = vmatmul.mubr.bf16.gmra.mrb[24].mxu0 %v8591_v62 }
 0x265   :  { %v3835_v51 = vadd.f32 %v5677_v61, %v8343_v12  ;;  %4377 = vmatprep.mubr.bf16.mxu0 %v4846_v45  ;;  %4491 = vmatmul.mubr.bf16.gmra.mrb[20].mxu1 %v8604_v0  ;;  %v8740_v30 = vadd.f32 %v5759_v5, %v3827_v60  ;;  %v9385_v45 = vld [vmem:[#allocation73_spill] sm:$0xff]  ;;  %v9390_v5 = vld [vmem:[#allocation75_spill] sm:$0xff] }
 0x266   :  { %4498 = vmatprep.mubr.bf16.mxu1 %v8732_v15  ;;  %v5760_v20 = vpop.f32.mrb[172].mxu1  ;;  %v4852_v17 = vcombine.low %v9385_v45, %v960_v40  ;;  %v9393_v40 = vld [vmem:[#allocation35_spill] sm:$0xff] }
 0x267   :  { %v5678_v43 = vpop.f32.mrb[176].mxu0  ;;  %v5761_v56 = vpop.f32.mrb[173].mxu1 }
 0x268   :  { %v5679_v62 = vpop.f32.mrb[177].mxu0  ;;  %v5762_v53 = vadd.f32 %v5761_v56, %v5760_v20  ;;  %v5763_v0 = vpop.f32.mrb[174].mxu1  ;;  %v9394_v20 = vrot.slane %v9393_v40, 7 }
 0x269   :  { %v5680_v12 = vadd.f32 %v5679_v62, %v5678_v43  ;;  %v5681_v26 = vpop.f32.mrb[178].mxu0  ;;  %v5764_v60 = vpop.f32.mrb[175].mxu1 }
 0x26a   :  { %v5682_v29 = vpop.f32.mrb[179].mxu0  ;;  %v8750_v55 = vadd.f32 %v5762_v53, %v3832_v39  ;;  %v5765_v27 = vadd.f32 %v5764_v60, %v5763_v0 }
 0x26b   :  { %v3840_v42 = vadd.f32 %v5680_v12, %v8356_v38  ;;  %v5683_v35 = vadd.f32 %v5682_v29, %v5681_v26  ;;  %v9391_v12 = vld [vmem:[#allocation10_spill] sm:$0xff] }
 0x26c   :  { %4378 = vmatmul.mubr.bf16.gmra.mrb[28].mxu0 %v8647_v44  ;;  %v8753_v31 = vadd.f32 %v5765_v27, %v3835_v51 }
 0x26d   :  { %v3843_v54 = vadd.f32 %v5683_v35, %v8359_v48  ;;  %6178 = vmatprep.mubr.bf16.mxu0 %v9386_v46  ;;  %4499 = vmatmul.mubr.bf16.gmra.mrb[24].mxu1 %v8666_v25  ;;  %v9387_v48 = vld [vmem:[#allocation79_spill] sm:$0xff] }
 0x26e   :  { %4506 = vmatprep.mubr.bf16.mxu1 %v4852_v17  ;;  %v5766_v33 = vpop.f32.mrb[176].mxu1 }
 0x26f   :  { %v5684_v4 = vpop.f32.mrb[180].mxu0  ;;  %v5767_v24 = vpop.f32.mrb[177].mxu1 }
 0x270   :  { %v5685_v38 = vpop.f32.mrb[181].mxu0  ;;  %v5768_v3 = vadd.f32 %v5767_v24, %v5766_v33  ;;  %v5769_v16 = vpop.f32.mrb[178].mxu1 }
 0x271   :  { %v5686_v44 = vadd.f32 %v5685_v38, %v5684_v4  ;;  %v5687_v58 = vpop.f32.mrb[182].mxu0  ;;  %v5770_v25 = vpop.f32.mrb[179].mxu1  ;;  %v9395_v38 = vld [vmem:[#allocation16_spill] sm:$0xff] }
 0x272   :  { %v5688_v14 = vpop.f32.mrb[183].mxu0  ;;  %v8759_v39 = vadd.f32 %v5768_v3, %v3840_v42  ;;  %v5771_v61 = vadd.f32 %v5770_v25, %v5769_v16  ;;  %v962_v42 = vrot.slane %v8493_v47, 7 }
 0x273   :  { %v3848_v19 = vadd.f32 %v5686_v44, %v9387_v48  ;;  %v5689_v18 = vadd.f32 %v5688_v14, %v5687_v58  ;;  %v9396_v14 = vld [vmem:[#allocation77_spill] sm:$0xff] }
 0x274   :  { %6179 = vmatmul.mubr.bf16.vlgmr.msra.gmra.mrb[32].mxu0 %v9315_v1  ;;  %v8762_v13 = vadd.f32 %v5771_v61, %v3843_v54 }
 0x275   :  { %v3851_v41 = vadd.f32 %v5689_v18, %v9388_v52  ;;  %6182 = vmatprep.mubr.bf16.mxu0 %v9316_v36  ;;  %4507 = vmatmul.mubr.bf16.gmra.mrb[28].mxu1 %v8700_v2  ;;  %v9392_v2 = vld [vmem:[#allocation76_spill] sm:$0xff]  ;;  %v9398_v18 = vld [vmem:[#allocation70_spill] sm:$0xff] }
 0x276   :  { %6190 = vmatprep.mubr.bf16.mxu1 %v8716_v50  ;;  %v5772_v63 = vpop.f32.mrb[180].mxu1  ;;  %v961_v50 = vrot.slane %v9394_v20, 4 }
 0x277   :  { %v5690_v23 = vpop.f32.mrb[184].mxu0  ;;  %v5773_v36 = vpop.f32.mrb[181].mxu1 }
 0x278   :  { %v5691_v22 = vpop.f32.mrb[185].mxu0  ;;  %v5774_v43 = vadd.f32 %v5773_v36, %v5772_v63  ;;  %v5775_v62 = vpop.f32.mrb[182].mxu1  ;;  %v963_v27 = vsel %vm7098_vm8, %v961_v50, %v962_v42 }
 0x279   :  { %v5692_v51 = vadd.f32 %v5691_v22, %v5690_v23  ;;  %v5693_v1 = vpop.f32.mrb[186].mxu0  ;;  %v5776_v29 = vpop.f32.mrb[183].mxu1  ;;  %v4854_v24 = vcombine.low %v963_v27, %v9398_v18 }
 0x27a   :  { %v5694_v6 = vpop.f32.mrb[187].mxu0  ;;  %v8772_v35 = vadd.f32 %v5774_v43, %v3848_v19  ;;  %v5777_v56 = vadd.f32 %v5776_v29, %v5775_v62  ;;  %v9403_v29 = vld [vmem:[#allocation61_spill] sm:$0xff] }
 0x27b   :  { %v3856_v10 = vadd.f32 %v5692_v51, %v9389_v28  ;;  %v5695_v11 = vadd.f32 %v5694_v6, %v5693_v1 }
 0x27c   :  { %6183 = vmatmul.mubr.bf16.gmra.mrb[36].mxu0 %v9390_v5  ;;  %v8775_v54 = vadd.f32 %v5777_v56, %v3851_v41  ;;  %v9400_v41 = vld [vmem:[#allocation57_spill] sm:$0xff] }
 0x27d   :  { %v3859_v26 = vadd.f32 %v5695_v11, %v9391_v12  ;;  %6186 = vmatprep.mubr.bf16.mxu0 %v9392_v2  ;;  %6191 = vmatmul.mubr.bf16.vlgmr.msra.gmra.mrb[32].mxu1 %v8732_v15  ;;  %v9397_v15 = vld [vmem:[#allocation12_spill] sm:$0xff]  ;;  %v9401_v25 = vcombine.low %v9399_v21, %v9400_v41 }
 0x27e   :  { %6194 = vmatprep.mubr.bf16.mxu1 %v4852_v17  ;;  %v5778_v4 = vpop.f32.mrb[184].mxu1 }
 0x27f   :  { %v5696_v53 = vpop.f32.mrb[188].mxu0  ;;  %v5779_v58 = vpop.f32.mrb[185].mxu1 }
 0x280   :  { %v5697_v0 = vpop.f32.mrb[189].mxu0  ;;  %v5780_v33 = vadd.f32 %v5779_v58, %v5778_v4  ;;  %v5781_v48 = vpop.f32.mrb[186].mxu1  ;;  %v9406_v4 = vld [vmem:[#allocation17_spill] sm:$0xff] }
 0x281   :  { %v5698_v45 = vadd.f32 %v5697_v0, %v5696_v53  ;;  %v5699_v46 = vpop.f32.mrb[190].mxu0  ;;  %v5782_v17 = vpop.f32.mrb[187].mxu1  ;;  %v9405_v0 = vld [vmem:[#allocation58_spill] sm:$0xff] }
 0x282   :  { %v5700_v60 = vpop.f32.mrb[191].mxu0  ;;  %v8783_v3 = vadd.f32 %v5780_v33, %v3856_v10  ;;  %v5783_v16 = vadd.f32 %v5782_v17, %v5781_v48  ;;  %v9407_v17 = vld [vmem:[#allocation23_spill] sm:$0xff] }
 0x283   :  { %v3864_v44 = vadd.f32 %v5698_v45, %v9395_v38  ;;  %v5701_v47 = vadd.f32 %v5700_v60, %v5699_v46 }
 0x284   :  { %6187 = vmatmul.mubr.bf16.gmra.mrb[40].mxu0 %v9396_v14  ;;  %v8788_v23 = vadd.f32 %v5783_v16, %v3859_v26  ;;  %v9402_v26 = vld [vmem:[#allocation60_spill] sm:$0xff] }
 0x285   :  { %v3867_v19 = vadd.f32 %v5701_v47, %v9397_v15  ;;  %6195 = vmatmul.mubr.bf16.gmra.mrb[36].mxu1 %v9401_v25  ;;  %v9404_v40 = vcombine.low %v9402_v26, %v9403_v29 }
 0x286   :  { %6198 = vmatprep.mubr.bf16.mxu1 %v4854_v24  ;;  %v5784_v6 = vpop.f32.mrb[188].mxu1 }
 0x287   :  { %v5806_v52 = vpop.f32.mrb[192].mxu0  ;;  %v5785_v11 = vpop.f32.mrb[189].mxu1 }
 0x288   :  { %v5807_v61 = vpop.f32.mrb[193].mxu0  ;;  %v5786_v10 = vadd.f32 %v5785_v11, %v5784_v6  ;;  %v5787_v36 = vpop.f32.mrb[190].mxu1 }
 0x289   :  { %v5808_v22 = vadd.f32 %v5807_v61, %v5806_v52  ;;  %v5809_v51 = vpop.f32.mrb[194].mxu0  ;;  %v5788_v43 = vpop.f32.mrb[191].mxu1  ;;  %v9408_v61 = vld [vmem:[#allocation18_spill] sm:$0xff] }
 0x28a   :  { %v5810_v1 = vpop.f32.mrb[195].mxu0  ;;  %v8792_v62 = vadd.f32 %v5786_v10, %v3864_v44  ;;  %v5789_v12 = vadd.f32 %v5788_v43, %v5787_v36 }
 0x28b   :  { %v4034_v63 = vadd.f32 %v5808_v22, %v8518_v59  ;;  %v5811_v28 = vadd.f32 %v5810_v1, %v5809_v51 }
 0x28c   :  { %v8797_v50 = vadd.f32 %v5789_v12, %v3867_v19 }
 0x28d   :  { %v4037_v5 = vadd.f32 %v5811_v28, %v8533_v32  ;;  %6199 = vmatmul.mubr.bf16.gmra.mrb[40].mxu1 %v9404_v40 }
 0x28e   :  { %v5894_v53 = vpop.f32.mrb[192].mxu1 }
 0x28f   :  { %v5812_v2 = vpop.f32.mrb[196].mxu0  ;;  %v5895_v32 = vpop.f32.mrb[193].mxu1 }
 0x290   :  { %v5813_v20 = vpop.f32.mrb[197].mxu0  ;;  %v5896_v60 = vadd.f32 %v5895_v32, %v5894_v53  ;;  %v5897_v27 = vpop.f32.mrb[194].mxu1 }
 0x291   :  { %v5814_v42 = vadd.f32 %v5813_v20, %v5812_v2  ;;  %v5815_v59 = vpop.f32.mrb[198].mxu0  ;;  %v5898_v44 = vpop.f32.mrb[195].mxu1 }
 0x292   :  { %v5816_v56 = vpop.f32.mrb[199].mxu0  ;;  %v8801_v47 = vadd.f32 %v5896_v60, %v4034_v63  ;;  %v5899_v58 = vadd.f32 %v5898_v44, %v5897_v27 }
 0x293   :  { %v4042_v45 = vadd.f32 %v5814_v42, %v9405_v0  ;;  %v5817_v46 = vadd.f32 %v5816_v56, %v5815_v59 }
 0x294   :  { %v8803_v48 = vadd.f32 %v5899_v58, %v4037_v5 }
 0x295   :  { %v4045_v38 = vadd.f32 %v5817_v46, %v9406_v4 }
 0x296   :  { %v5900_v24 = vpop.f32.mrb[196].mxu1 }
 0x297   :  { %v5818_v14 = vpop.f32.mrb[200].mxu0  ;;  %v5901_v21 = vpop.f32.mrb[197].mxu1 }
 0x298   :  { %v5819_v33 = vpop.f32.mrb[201].mxu0  ;;  %v5902_v41 = vadd.f32 %v5901_v21, %v5900_v24  ;;  %v5903_v25 = vpop.f32.mrb[198].mxu1 }
 0x299   :  { %v5820_v15 = vadd.f32 %v5819_v33, %v5818_v14  ;;  %v5821_v19 = vpop.f32.mrb[202].mxu0  ;;  %v5904_v51 = vpop.f32.mrb[199].mxu1 }
 0x29a   :  { %v5822_v18 = vpop.f32.mrb[203].mxu0  ;;  %v8807_v1 = vadd.f32 %v5902_v41, %v4042_v45  ;;  %v5905_v6 = vadd.f32 %v5904_v51, %v5903_v25 }
 0x29b   :  { %v4050_v16 = vadd.f32 %v5820_v15, %v9407_v17  ;;  %v5823_v52 = vadd.f32 %v5822_v18, %v5821_v19 }
 0x29c   :  { %v8809_v11 = vadd.f32 %v5905_v6, %v4045_v38 }
 0x29d   :  { %v4053_v22 = vadd.f32 %v5823_v52, %v9408_v61 }
 0x29e   :  { %v5906_v43 = vpop.f32.mrb[200].mxu1 }
 0x29f   :  { %v5824_v63 = vpop.f32.mrb[204].mxu0  ;;  %v5907_v26 = vpop.f32.mrb[201].mxu1 }
 0x2a0   :  { %v5825_v28 = vpop.f32.mrb[205].mxu0  ;;  %v5908_v29 = vadd.f32 %v5907_v26, %v5906_v43  ;;  %v5909_v40 = vpop.f32.mrb[202].mxu1 }
 0x2a1   :  { %v5826_v10 = vadd.f32 %v5825_v28, %v5824_v63  ;;  %v5827_v36 = vpop.f32.mrb[206].mxu0  ;;  %v5910_v42 = vpop.f32.mrb[203].mxu1 }
 0x2a2   :  { %v5828_v5 = vpop.f32.mrb[207].mxu0  ;;  %v8813_v59 = vadd.f32 %v5908_v29, %v4050_v16  ;;  %v5911_v56 = vadd.f32 %v5910_v42, %v5909_v40 }
 0x2a3   :  { %v4058_v12 = vadd.f32 %v5826_v10, %v8678_v8  ;;  %v5829_v2 = vadd.f32 %v5828_v5, %v5827_v36 }
 0x2a4   :  { %v8815_v45 = vadd.f32 %v5911_v56, %v4053_v22 }
 0x2a5   :  { %v4061_v20 = vadd.f32 %v5829_v2, %v8690_v34 }
 0x2a6   :  { %v5912_v27 = vpop.f32.mrb[204].mxu1 }
 0x2a7   :  { %v5830_v53 = vpop.f32.mrb[208].mxu0  ;;  %v5913_v38 = vpop.f32.mrb[205].mxu1 }
 0x2a8   :  { %v5831_v0 = vpop.f32.mrb[209].mxu0  ;;  %v5914_v44 = vadd.f32 %v5913_v38, %v5912_v27  ;;  %v5915_v58 = vpop.f32.mrb[206].mxu1 }
 0x2a9   :  { %v5832_v46 = vadd.f32 %v5831_v0, %v5830_v53  ;;  %v5833_v32 = vpop.f32.mrb[210].mxu0  ;;  %v5916_v14 = vpop.f32.mrb[207].mxu1 }
 0x2aa   :  { %v5834_v60 = vpop.f32.mrb[211].mxu0  ;;  %v8819_v33 = vadd.f32 %v5914_v44, %v4058_v12  ;;  %v5917_v15 = vadd.f32 %v5916_v14, %v5915_v58 }
 0x2ab   :  { %v4066_v8 = vadd.f32 %v5832_v46, %v8702_v9  ;;  %v5835_v4 = vadd.f32 %v5834_v60, %v5833_v32 }
 0x2ac   :  { %v8821_v24 = vadd.f32 %v5917_v15, %v4061_v20 }
 0x2ad   :  { %v4069_v34 = vadd.f32 %v5835_v4, %v8704_v57 }
 0x2ae   :  { %v5918_v21 = vpop.f32.mrb[208].mxu1 }
 0x2af   :  { %v5836_v19 = vpop.f32.mrb[212].mxu0  ;;  %v5919_v25 = vpop.f32.mrb[209].mxu1 }
 0x2b0   :  { %v5837_v18 = vpop.f32.mrb[213].mxu0  ;;  %v5920_v61 = vadd.f32 %v5919_v25, %v5918_v21  ;;  %v5921_v22 = vpop.f32.mrb[210].mxu1 }
 0x2b1   :  { %v5838_v17 = vadd.f32 %v5837_v18, %v5836_v19  ;;  %v5839_v16 = vpop.f32.mrb[214].mxu0  ;;  %v5922_v51 = vpop.f32.mrb[211].mxu1 }
 0x2b2   :  { %v5840_v52 = vpop.f32.mrb[215].mxu0  ;;  %v8825_v6 = vadd.f32 %v5920_v61, %v4066_v8  ;;  %v5923_v63 = vadd.f32 %v5922_v51, %v5921_v22 }
 0x2b3   :  { %v4074_v9 = vadd.f32 %v5838_v17, %v8721_v37  ;;  %v5841_v41 = vadd.f32 %v5840_v52, %v5839_v16 }
 0x2b4   :  { %v8827_v36 = vadd.f32 %v5923_v63, %v4069_v34 }
 0x2b5   :  { %v4077_v57 = vadd.f32 %v5841_v41, %v8723_v49 }
 0x2b6   :  { %v5924_v2 = vpop.f32.mrb[212].mxu1 }
 0x2b7   :  { %v5842_v28 = vpop.f32.mrb[216].mxu0  ;;  %v5925_v29 = vpop.f32.mrb[213].mxu1 }
 0x2b8   :  { %v5843_v10 = vpop.f32.mrb[217].mxu0  ;;  %v5926_v40 = vadd.f32 %v5925_v29, %v5924_v2  ;;  %v5927_v20 = vpop.f32.mrb[214].mxu1 }
 0x2b9   :  { %v5844_v5 = vadd.f32 %v5843_v10, %v5842_v28  ;;  %v5845_v43 = vpop.f32.mrb[218].mxu0  ;;  %v5928_v42 = vpop.f32.mrb[215].mxu1 }
 0x2ba   :  { %v5846_v12 = vpop.f32.mrb[219].mxu0  ;;  %v8831_v56 = vadd.f32 %v5926_v40, %v4074_v9  ;;  %v5929_v53 = vadd.f32 %v5928_v42, %v5927_v20 }
 0x2bb   :  { %v4082_v37 = vadd.f32 %v5844_v5, %v8737_v7  ;;  %v5847_v26 = vadd.f32 %v5846_v12, %v5845_v43 }
 0x2bc   :  { %v8833_v32 = vadd.f32 %v5929_v53, %v4077_v57 }
 0x2bd   :  { %v4085_v49 = vadd.f32 %v5847_v26, %v8740_v30 }
 0x2be   :  { %v5930_v4 = vpop.f32.mrb[216].mxu1 }
 0x2bf   :  { %v5848_v0 = vpop.f32.mrb[220].mxu0  ;;  %v5931_v44 = vpop.f32.mrb[217].mxu1 }
 0x2c0   :  { %v5849_v46 = vpop.f32.mrb[221].mxu0  ;;  %v5932_v58 = vadd.f32 %v5931_v44, %v5930_v4  ;;  %v5933_v34 = vpop.f32.mrb[218].mxu1 }
 0x2c1   :  { %v5850_v60 = vadd.f32 %v5849_v46, %v5848_v0  ;;  %v5851_v27 = vpop.f32.mrb[222].mxu0  ;;  %v5934_v14 = vpop.f32.mrb[219].mxu1 }
 0x2c2   :  { %v5852_v8 = vpop.f32.mrb[223].mxu0  ;;  %v8837_v15 = vadd.f32 %v5932_v58, %v4082_v37  ;;  %v5935_v19 = vadd.f32 %v5934_v14, %v5933_v34 }
 0x2c3   :  { %v4090_v7 = vadd.f32 %v5850_v60, %v8750_v55  ;;  %v5853_v38 = vadd.f32 %v5852_v8, %v5851_v27 }
 0x2c4   :  { %v8839_v16 = vadd.f32 %v5935_v19, %v4085_v49 }
 0x2c5   :  { %v4093_v30 = vadd.f32 %v5853_v38, %v8753_v31 }
 0x2c6   :  { %v5936_v41 = vpop.f32.mrb[220].mxu1 }
 0x2c7   :  { %v5854_v18 = vpop.f32.mrb[224].mxu0  ;;  %v5937_v61 = vpop.f32.mrb[221].mxu1 }
 0x2c8   :  { %v5855_v17 = vpop.f32.mrb[225].mxu0  ;;  %v5938_v22 = vadd.f32 %v5937_v61, %v5936_v41  ;;  %v5939_v57 = vpop.f32.mrb[222].mxu1 }
 0x2c9   :  { %v5856_v52 = vadd.f32 %v5855_v17, %v5854_v18  ;;  %v5857_v21 = vpop.f32.mrb[226].mxu0  ;;  %v5940_v51 = vpop.f32.mrb[223].mxu1 }
 0x2ca   :  { %v5858_v9 = vpop.f32.mrb[227].mxu0  ;;  %v8843_v63 = vadd.f32 %v5938_v22, %v4090_v7  ;;  %v5941_v28 = vadd.f32 %v5940_v51, %v5939_v57 }
 0x2cb   :  { %v4098_v55 = vadd.f32 %v5856_v52, %v8759_v39  ;;  %v5859_v25 = vadd.f32 %v5858_v9, %v5857_v21 }
 0x2cc   :  { %v8845_v43 = vadd.f32 %v5941_v28, %v4093_v30 }
 0x2cd   :  { %v4101_v31 = vadd.f32 %v5859_v25, %v8762_v13 }
 0x2ce   :  { %v5942_v26 = vpop.f32.mrb[224].mxu1 }
 0x2cf   :  { %v5860_v10 = vpop.f32.mrb[228].mxu0  ;;  %v5943_v40 = vpop.f32.mrb[225].mxu1 }
 0x2d0   :  { %v5861_v5 = vpop.f32.mrb[229].mxu0  ;;  %v5944_v20 = vadd.f32 %v5943_v40, %v5942_v26  ;;  %v5945_v49 = vpop.f32.mrb[226].mxu1 }
 0x2d1   :  { %v5862_v12 = vadd.f32 %v5861_v5, %v5860_v10  ;;  %v5863_v2 = vpop.f32.mrb[230].mxu0  ;;  %v5946_v42 = vpop.f32.mrb[227].mxu1 }
 0x2d2   :  { %v5864_v37 = vpop.f32.mrb[231].mxu0  ;;  %v8849_v53 = vadd.f32 %v5944_v20, %v4098_v55  ;;  %v5947_v0 = vadd.f32 %v5946_v42, %v5945_v49 }
 0x2d3   :  { %v4106_v39 = vadd.f32 %v5862_v12, %v8772_v35  ;;  %v5865_v29 = vadd.f32 %v5864_v37, %v5863_v2 }
 0x2d4   :  { %v8851_v27 = vadd.f32 %v5947_v0, %v4101_v31 }
 0x2d5   :  { %v4109_v13 = vadd.f32 %v5865_v29, %v8775_v54 }
 0x2d6   :  { %v5948_v38 = vpop.f32.mrb[228].mxu1 }
 0x2d7   :  { %v5866_v46 = vpop.f32.mrb[232].mxu0  ;;  %v5949_v58 = vpop.f32.mrb[229].mxu1 }
 0x2d8   :  { %v5867_v60 = vpop.f32.mrb[233].mxu0  ;;  %v5950_v34 = vadd.f32 %v5949_v58, %v5948_v38  ;;  %v5951_v30 = vpop.f32.mrb[230].mxu1 }
 0x2d9   :  { %v5868_v8 = vadd.f32 %v5867_v60, %v5866_v46  ;;  %v5869_v4 = vpop.f32.mrb[234].mxu0  ;;  %v5952_v14 = vpop.f32.mrb[231].mxu1 }
 0x2da   :  { %v5870_v7 = vpop.f32.mrb[235].mxu0  ;;  %v8855_v19 = vadd.f32 %v5950_v34, %v4106_v39  ;;  %v5953_v18 = vadd.f32 %v5952_v14, %v5951_v30 }
 0x2db   :  { %v4114_v35 = vadd.f32 %v5868_v8, %v8783_v3  ;;  %v5871_v44 = vadd.f32 %v5870_v7, %v5869_v4 }
 0x2dc   :  { %v8857_v21 = vadd.f32 %v5953_v18, %v4109_v13 }
 0x2dd   :  { %v4117_v54 = vadd.f32 %v5871_v44, %v8788_v23 }
 0x2de   :  { %v5954_v25 = vpop.f32.mrb[232].mxu1 }
 0x2df   :  { %v5872_v17 = vpop.f32.mrb[236].mxu0  ;;  %v5955_v22 = vpop.f32.mrb[233].mxu1 }
 0x2e0   :  { %v5873_v52 = vpop.f32.mrb[237].mxu0  ;;  %v5956_v57 = vadd.f32 %v5955_v22, %v5954_v25  ;;  %v5957_v31 = vpop.f32.mrb[234].mxu1 }
 0x2e1   :  { %v5874_v9 = vadd.f32 %v5873_v52, %v5872_v17  ;;  %v5875_v41 = vpop.f32.mrb[238].mxu0  ;;  %v5958_v51 = vpop.f32.mrb[235].mxu1 }
 0x2e2   :  { %v5876_v55 = vpop.f32.mrb[239].mxu0  ;;  %v8861_v28 = vadd.f32 %v5956_v57, %v4114_v35  ;;  %v5959_v10 = vadd.f32 %v5958_v51, %v5957_v31 }
 0x2e3   :  { %v4122_v3 = vadd.f32 %v5874_v9, %v8792_v62  ;;  %v5877_v61 = vadd.f32 %v5876_v55, %v5875_v41 }
 0x2e4   :  { %v8863_v2 = vadd.f32 %v5959_v10, %v4117_v54 }
 0x2e5   :  { %v4125_v23 = vadd.f32 %v5877_v61, %v8797_v50 }
 0x2e6   :  { %v5960_v29 = vpop.f32.mrb[236].mxu1 }
 0x2e7   :  { %v5982_v5 = vpop.f32.mrb[240].mxu0  ;;  %v5961_v20 = vpop.f32.mrb[237].mxu1 }
 0x2e8   :  { %v5983_v12 = vpop.f32.mrb[241].mxu0  ;;  %v5962_v49 = vadd.f32 %v5961_v20, %v5960_v29  ;;  %v5963_v13 = vpop.f32.mrb[238].mxu1 }
 0x2e9   :  { %v5984_v37 = vadd.f32 %v5983_v12, %v5982_v5  ;;  %v5985_v26 = vpop.f32.mrb[242].mxu0  ;;  %v5964_v42 = vpop.f32.mrb[239].mxu1 }
 0x2ea   :  { %v5986_v39 = vpop.f32.mrb[243].mxu0  ;;  %v8867_v0 = vadd.f32 %v5962_v49, %v4122_v3  ;;  %v5965_v46 = vadd.f32 %v5964_v42, %v5963_v13 }
 0x2eb   :  { %v4292_v62 = vadd.f32 %v5984_v37, %v8801_v47  ;;  %v5987_v40 = vadd.f32 %v5986_v39, %v5985_v26 }
 0x2ec   :  { %v8869_v4 = vadd.f32 %v5965_v46, %v4125_v23 }
 0x2ed   :  { %v4295_v50 = vadd.f32 %v5987_v40, %v8803_v48 }
 0x2ee   :  { %v6070_v44 = vpop.f32.mrb[240].mxu1 }
 0x2ef   :  { %v5988_v60 = vpop.f32.mrb[244].mxu0  ;;  %v6071_v34 = vpop.f32.mrb[241].mxu1 }
 0x2f0   :  { %v5989_v8 = vpop.f32.mrb[245].mxu0  ;;  %v6072_v30 = vadd.f32 %v6071_v34, %v6070_v44  ;;  %v6073_v54 = vpop.f32.mrb[242].mxu1 }
 0x2f1   :  { %v5990_v7 = vadd.f32 %v5989_v8, %v5988_v60  ;;  %v5991_v38 = vpop.f32.mrb[246].mxu0  ;;  %v6074_v14 = vpop.f32.mrb[243].mxu1 }
 0x2f2   :  { %v5992_v35 = vpop.f32.mrb[247].mxu0  ;;  %v6075_v18 = vadd.f32 %v6074_v14, %v6073_v54  ;;  %v8873_v52 = vadd.f32 %v6072_v30, %v4292_v62 }
 0x2f3   :  { %v4300_v47 = vadd.f32 %v5990_v7, %v8807_v1  ;;  %v5993_v58 = vadd.f32 %v5992_v35, %v5991_v38 }
 0x2f4   :  { %v8875_v25 = vadd.f32 %v6075_v18, %v4295_v50 }
 0x2f5   :  { %v4303_v48 = vadd.f32 %v5993_v58, %v8809_v11 }
 0x2f6   :  { %v6076_v61 = vpop.f32.mrb[244].mxu1 }
 0x2f7   :  { %v5994_v17 = vpop.f32.mrb[248].mxu0  ;;  %v6077_v57 = vpop.f32.mrb[245].mxu1 }
 0x2f8   :  { %v5995_v9 = vpop.f32.mrb[249].mxu0  ;;  %v6078_v31 = vadd.f32 %v6077_v57, %v6076_v61  ;;  %v6079_v23 = vpop.f32.mrb[246].mxu1 }
 0x2f9   :  { %v5996_v41 = vadd.f32 %v5995_v9, %v5994_v17  ;;  %v5997_v55 = vpop.f32.mrb[250].mxu0  ;;  %v6080_v51 = vpop.f32.mrb[247].mxu1 }
 0x2fa   :  { %v5998_v3 = vpop.f32.mrb[251].mxu0  ;;  %v6081_v10 = vadd.f32 %v6080_v51, %v6079_v23  ;;  %v8879_v12 = vadd.f32 %v6078_v31, %v4300_v47 }
 0x2fb   :  { %v4308_v1 = vadd.f32 %v5996_v41, %v8813_v59  ;;  %v5999_v22 = vadd.f32 %v5998_v3, %v5997_v55 }
 0x2fc   :  { %v8881_v29 = vadd.f32 %v6081_v10, %v4303_v48 }
 0x2fd   :  { %v4311_v11 = vadd.f32 %v5999_v22, %v8815_v45 }
 0x2fe   :  { %v6082_v40 = vpop.f32.mrb[248].mxu1 }
 0x2ff   :  { %v6000_v5 = vpop.f32.mrb[252].mxu0  ;;  %v6083_v49 = vpop.f32.mrb[249].mxu1 }
 0x300   :  { %v6001_v37 = vpop.f32.mrb[253].mxu0  ;;  %v6084_v13 = vadd.f32 %v6083_v49, %v6082_v40  ;;  %v6085_v50 = vpop.f32.mrb[250].mxu1 }
 0x301   :  { %v6002_v26 = vadd.f32 %v6001_v37, %v6000_v5  ;;  %v6003_v39 = vpop.f32.mrb[254].mxu0  ;;  %v6086_v42 = vpop.f32.mrb[251].mxu1 }
 0x302   :  { %v6004_v62 = vpop.f32.mrb[255].mxu0  ;;  %v6087_v46 = vadd.f32 %v6086_v42, %v6085_v50  ;;  %v8885_v8 = vadd.f32 %v6084_v13, %v4308_v1 }
 0x303   :  { %v4316_v59 = vadd.f32 %v6002_v26, %v8819_v33  ;;  %v6005_v20 = vadd.f32 %v6004_v62, %v6003_v39 }
 0x304   :  { %v8887_v44 = vadd.f32 %v6087_v46, %v4311_v11 }
 0x305   :  { %v4319_v45 = vadd.f32 %v6005_v20, %v8821_v24 }
 0x306   :  { %v6088_v58 = vpop.f32.mrb[252].mxu1 }
 0x307   :  { %v6006_v60 = vpop.f32.mrb[0].mxu0  ;;  %v6089_v30 = vpop.f32.mrb[253].mxu1 }
 0x308   :  { %v6007_v7 = vpop.f32.mrb[1].mxu0  ;;  %v6090_v54 = vadd.f32 %v6089_v30, %v6088_v58  ;;  %v6091_v48 = vpop.f32.mrb[254].mxu1 }
 0x309   :  { %v6008_v38 = vadd.f32 %v6007_v7, %v6006_v60  ;;  %v6009_v35 = vpop.f32.mrb[2].mxu0  ;;  %v6092_v14 = vpop.f32.mrb[255].mxu1 }
 0x30a   :  { %v6010_v47 = vpop.f32.mrb[3].mxu0  ;;  %v6093_v18 = vadd.f32 %v6092_v14, %v6091_v48  ;;  %v8891_v9 = vadd.f32 %v6090_v54, %v4316_v59 }
 0x30b   :  { %v4324_v33 = vadd.f32 %v6008_v38, %v8825_v6  ;;  %v6011_v34 = vadd.f32 %v6010_v47, %v6009_v35 }
 0x30c   :  { %v8893_v61 = vadd.f32 %v6093_v18, %v4319_v45 }
 0x30d   :  { %v4327_v24 = vadd.f32 %v6011_v34, %v8827_v36 }
 0x30e   :  { %v6094_v22 = vpop.f32.mrb[0].mxu1 }
 0x30f   :  { %v6012_v17 = vpop.f32.mrb[4].mxu0  ;;  %v6095_v31 = vpop.f32.mrb[1].mxu1 }
 0x310   :  { %v6013_v41 = vpop.f32.mrb[5].mxu0  ;;  %v6096_v23 = vadd.f32 %v6095_v31, %v6094_v22  ;;  %v6097_v11 = vpop.f32.mrb[2].mxu1 }
 0x311   :  { %v6014_v55 = vadd.f32 %v6013_v41, %v6012_v17  ;;  %v6015_v3 = vpop.f32.mrb[6].mxu0  ;;  %v6098_v51 = vpop.f32.mrb[3].mxu1 }
 0x312   :  { %v6016_v1 = vpop.f32.mrb[7].mxu0  ;;  %v6099_v10 = vadd.f32 %v6098_v51, %v6097_v11  ;;  %v8897_v37 = vadd.f32 %v6096_v23, %v4324_v33 }
 0x313   :  { %v4332_v6 = vadd.f32 %v6014_v55, %v8831_v56  ;;  %v6017_v57 = vadd.f32 %v6016_v1, %v6015_v3 }
 0x314   :  { %v8899_v40 = vadd.f32 %v6099_v10, %v4327_v24 }
 0x315   :  { %v4335_v36 = vadd.f32 %v6017_v57, %v8833_v32 }
 0x316   :  { %v6100_v20 = vpop.f32.mrb[4].mxu1 }
 0x317   :  { %v6018_v5 = vpop.f32.mrb[8].mxu0  ;;  %v6101_v13 = vpop.f32.mrb[5].mxu1 }
 0x318   :  { %v6019_v26 = vpop.f32.mrb[9].mxu0  ;;  %v6102_v50 = vadd.f32 %v6101_v13, %v6100_v20  ;;  %v6103_v45 = vpop.f32.mrb[6].mxu1 }
 0x319   :  { %v6020_v39 = vadd.f32 %v6019_v26, %v6018_v5  ;;  %v6021_v62 = vpop.f32.mrb[10].mxu0  ;;  %v6104_v42 = vpop.f32.mrb[7].mxu1 }
 0x31a   :  { %v6022_v59 = vpop.f32.mrb[11].mxu0  ;;  %v6105_v46 = vadd.f32 %v6104_v42, %v6103_v45  ;;  %v8903_v7 = vadd.f32 %v6102_v50, %v4332_v6 }
 0x31b   :  { %v4340_v56 = vadd.f32 %v6020_v39, %v8837_v15  ;;  %v6023_v49 = vadd.f32 %v6022_v59, %v6021_v62 }
 0x31c   :  { %v8905_v58 = vadd.f32 %v6105_v46, %v4335_v36 }
 0x31d   :  { %v4343_v32 = vadd.f32 %v6023_v49, %v8839_v16 }
 0x31f   :  { %v6024_v60 = vpop.f32.mrb[12].mxu0 }
 0x320   :  { %v6025_v38 = vpop.f32.mrb[13].mxu0  ;;  %v6106_v34 = vpop.f32.mrb[8].mxu1 }
 0x321   :  { %v6026_v35 = vadd.f32 %v6025_v38, %v6024_v60  ;;  %v6027_v47 = vpop.f32.mrb[14].mxu0  ;;  %v6107_v54 = vpop.f32.mrb[9].mxu1 }
 0x322   :  { %v6028_v33 = vpop.f32.mrb[15].mxu0  ;;  %v6108_v48 = vadd.f32 %v6107_v54, %v6106_v34  ;;  %v6109_v24 = vpop.f32.mrb[10].mxu1 }
 0x323   :  { %v4348_v15 = vadd.f32 %v6026_v35, %v8843_v63  ;;  %v6029_v30 = vadd.f32 %v6028_v33, %v6027_v47  ;;  %v6110_v14 = vpop.f32.mrb[11].mxu1 }
 0x324   :  { %v6111_v18 = vadd.f32 %v6110_v14, %v6109_v24  ;;  %v8909_v41 = vadd.f32 %v6108_v48, %v4340_v56 }
 0x325   :  { %v4351_v16 = vadd.f32 %v6029_v30, %v8845_v43 }
 0x326   :  { %v8911_v22 = vadd.f32 %v6111_v18, %v4343_v32 }
 0x327   :  { %v6030_v17 = vpop.f32.mrb[16].mxu0 }
 0x328   :  { %v6031_v55 = vpop.f32.mrb[17].mxu0  ;;  %v6112_v57 = vpop.f32.mrb[12].mxu1 }
 0x329   :  { %v6032_v3 = vadd.f32 %v6031_v55, %v6030_v17  ;;  %v6033_v1 = vpop.f32.mrb[18].mxu0  ;;  %v6113_v23 = vpop.f32.mrb[13].mxu1 }
 0x32a   :  { %v6034_v6 = vpop.f32.mrb[19].mxu0  ;;  %v6114_v11 = vadd.f32 %v6113_v23, %v6112_v57  ;;  %v6115_v36 = vpop.f32.mrb[14].mxu1 }
 0x32b   :  { %v4356_v63 = vadd.f32 %v6032_v3, %v8849_v53  ;;  %v6035_v31 = vadd.f32 %v6034_v6, %v6033_v1  ;;  %v6116_v51 = vpop.f32.mrb[15].mxu1 }
 0x32c   :  { %v6117_v10 = vadd.f32 %v6116_v51, %v6115_v36  ;;  %v8915_v26 = vadd.f32 %v6114_v11, %v4348_v15 }
 0x32d   :  { %v4359_v43 = vadd.f32 %v6035_v31, %v8851_v27 }
 0x32e   :  { %v8917_v20 = vadd.f32 %v6117_v10, %v4351_v16 }
 0x32f   :  { %v6036_v5 = vpop.f32.mrb[20].mxu0 }
 0x330   :  { %v6037_v39 = vpop.f32.mrb[21].mxu0  ;;  %v6118_v49 = vpop.f32.mrb[16].mxu1 }
 0x331   :  { %v6038_v62 = vadd.f32 %v6037_v39, %v6036_v5  ;;  %v6039_v59 = vpop.f32.mrb[22].mxu0  ;;  %v6119_v50 = vpop.f32.mrb[17].mxu1 }
 0x332   :  { %v6040_v56 = vpop.f32.mrb[23].mxu0  ;;  %v6120_v45 = vadd.f32 %v6119_v50, %v6118_v49  ;;  %v6121_v32 = vpop.f32.mrb[18].mxu1 }
 0x333   :  { %v4364_v53 = vadd.f32 %v6038_v62, %v8855_v19  ;;  %v6041_v13 = vadd.f32 %v6040_v56, %v6039_v59  ;;  %v6122_v42 = vpop.f32.mrb[19].mxu1 }
 0x334   :  { %v6123_v46 = vadd.f32 %v6122_v42, %v6121_v32  ;;  %v8921_v38 = vadd.f32 %v6120_v45, %v4356_v63 }
 0x335   :  { %v4367_v27 = vadd.f32 %v6041_v13, %v8857_v21 }
 0x336   :  { %v8923_v34 = vadd.f32 %v6123_v46, %v4359_v43 }
 0x337   :  { %v6042_v60 = vpop.f32.mrb[24].mxu0 }
 0x338   :  { %v6043_v35 = vpop.f32.mrb[25].mxu0  ;;  %v6124_v30 = vpop.f32.mrb[20].mxu1 }
 0x339   :  { %v6044_v47 = vadd.f32 %v6043_v35, %v6042_v60  ;;  %v6045_v33 = vpop.f32.mrb[26].mxu0  ;;  %v6125_v48 = vpop.f32.mrb[21].mxu1 }
 0x33a   :  { %v6046_v15 = vpop.f32.mrb[27].mxu0  ;;  %v6126_v24 = vadd.f32 %v6125_v48, %v6124_v30  ;;  %v6127_v16 = vpop.f32.mrb[22].mxu1 }
 0x33b   :  { %v4372_v19 = vadd.f32 %v6044_v47, %v8861_v28  ;;  %v6047_v54 = vadd.f32 %v6046_v15, %v6045_v33  ;;  %v6128_v14 = vpop.f32.mrb[23].mxu1 }
 0x33c   :  { %v6129_v18 = vadd.f32 %v6128_v14, %v6127_v16  ;;  %v8927_v55 = vadd.f32 %v6126_v24, %v4364_v53 }
 0x33d   :  { %v4375_v21 = vadd.f32 %v6047_v54, %v8863_v2 }
 0x33e   :  { %v8929_v57 = vadd.f32 %v6129_v18, %v4367_v27 }
 0x33f   :  { %v6048_v17 = vpop.f32.mrb[28].mxu0 }
 0x340   :  { %v6049_v3 = vpop.f32.mrb[29].mxu0  ;;  %v6130_v31 = vpop.f32.mrb[24].mxu1 }
 0x341   :  { %v6050_v1 = vadd.f32 %v6049_v3, %v6048_v17  ;;  %v6051_v6 = vpop.f32.mrb[30].mxu0  ;;  %v6131_v11 = vpop.f32.mrb[25].mxu1 }
 0x342   :  { %v6052_v63 = vpop.f32.mrb[31].mxu0  ;;  %v6132_v36 = vadd.f32 %v6131_v11, %v6130_v31  ;;  %v6133_v43 = vpop.f32.mrb[26].mxu1 }
 0x343   :  { %v4380_v28 = vadd.f32 %v6050_v1, %v8867_v0  ;;  %v6053_v23 = vadd.f32 %v6052_v63, %v6051_v6  ;;  %v6134_v51 = vpop.f32.mrb[27].mxu1 }
 0x344   :  { %v6135_v10 = vadd.f32 %v6134_v51, %v6133_v43  ;;  %v8933_v39 = vadd.f32 %v6132_v36, %v4372_v19 }
 0x345   :  { %v4383_v2 = vadd.f32 %v6053_v23, %v8869_v4 }
 0x346   :  { %v8937_v53 = vadd.f32 %v6135_v10, %v4375_v21 }
 0x347   :  { %v6180_v5 = vpop.f32.mrb[32].mxu0 }
 0x348   :  { %v4558_v62 = vadd.f32 %v6180_v5, %v8879_v12  ;;  %v4549_v59 = vpop.f32.mrb[33].mxu0  ;;  %v6136_v50 = vpop.f32.mrb[28].mxu1 }
 0x349   :  { %v4550_v56 = vadd.f32 %v4549_v59, %v8873_v52  ;;  %v6181_v49 = vpop.f32.mrb[34].mxu0  ;;  %v6137_v4 = vpop.f32.mrb[29].mxu1 }
 0x34a   :  { %v4561_v0 = vadd.f32 %v6181_v49, %v8881_v29  ;;  %v4552_v13 = vpop.f32.mrb[35].mxu0  ;;  %v6138_v32 = vadd.f32 %v6137_v4, %v6136_v50  ;;  %v6139_v27 = vpop.f32.mrb[30].mxu1 }
 0x34b   :  { %v4553_v45 = vadd.f32 %v4552_v13, %v8875_v25  ;;  %v6140_v42 = vpop.f32.mrb[31].mxu1 }
 0x34c   :  { %v6141_v46 = vadd.f32 %v6140_v42, %v6139_v27  ;;  %v4509_v35 = vadd.f32 %v6138_v32, %v4380_v28 }
 0x34e   :  { %v4512_v15 = vadd.f32 %v6141_v46, %v4383_v2 }
 0x34f   :  { %v6184_v60 = vpop.f32.mrb[36].mxu0 }
 0x350   :  { %v4574_v12 = vadd.f32 %v6184_v60, %v8891_v9  ;;  %v4565_v47 = vpop.f32.mrb[37].mxu0  ;;  %v6192_v54 = vpop.f32.mrb[32].mxu1 }
 0x351   :  { %v4566_v52 = vadd.f32 %v4565_v47, %v8885_v8  ;;  %v6185_v33 = vpop.f32.mrb[38].mxu0  ;;  %v4606_v48 = vadd.f32 %v6192_v54, %v8915_v26  ;;  %v4597_v24 = vpop.f32.mrb[33].mxu1 }
 0x352   :  { %v4644_v30 = vmax.f32 %v4550_v56, %v4574_v12  ;;  %v4577_v29 = vadd.f32 %v6185_v33, %v8893_v61  ;;  %v4568_v19 = vpop.f32.mrb[39].mxu0  ;;  %v4598_v21 = vadd.f32 %v4597_v24, %v8909_v41  ;;  %v6193_v14 = vpop.f32.mrb[34].mxu1 }
 0x353   :  { %v4569_v25 = vadd.f32 %v4568_v19, %v8887_v44  ;;  %v4609_v9 = vadd.f32 %v6193_v14, %v8917_v20  ;;  %v4600_v18 = vpop.f32.mrb[35].mxu1 }
 0x354   :  { %v4647_v16 = vmax.f32 %v4553_v45, %v4577_v29  ;;  %v4601_v8 = vadd.f32 %v4600_v18, %v8911_v22  ;;  %v4645_v17 = vmax.f32 %v4644_v30, %v4598_v21 }
 0x356   :  { %v4648_v6 = vmax.f32 %v4647_v16, %v4601_v8 }
 0x357   :  { %v6188_v3 = vpop.f32.mrb[40].mxu0 }
 0x358   :  { %v4590_v61 = vadd.f32 %v6188_v3, %v8903_v7  ;;  %v4581_v1 = vpop.f32.mrb[41].mxu0  ;;  %v6196_v41 = vpop.f32.mrb[36].mxu1  ;;  %v5056_v7 = vld [vmem:[%s8973_s2] ss:$0 sm:$0xff] }
 0x359   :  { %v4582_v44 = vadd.f32 %v4581_v1, %v8897_v37  ;;  %v6189_v63 = vpop.f32.mrb[42].mxu0  ;;  %v4622_v11 = vadd.f32 %v6196_v41, %v8927_v55  ;;  %v4613_v22 = vpop.f32.mrb[37].mxu1 }
 0x35a   :  { %v4656_v26 = vmax.f32 %v4566_v52, %v4590_v61  ;;  %v4593_v31 = vadd.f32 %v6189_v63, %v8905_v58  ;;  %v4584_v28 = vpop.f32.mrb[43].mxu0  ;;  %v4614_v43 = vadd.f32 %v4613_v22, %v8921_v38  ;;  %v6197_v37 = vpop.f32.mrb[38].mxu1 }
 0x35b   :  { %v4650_v23 = vmax.f32 %v4558_v62, %v4582_v44  ;;  %v4585_v20 = vadd.f32 %v4584_v28, %v8899_v40  ;;  %v4646_v10 = vmax.f32 %v4645_v17, %v4622_v11  ;;  %v4625_v58 = vadd.f32 %v6197_v37, %v8929_v57  ;;  %v4616_v5 = vpop.f32.mrb[39].mxu1 }
 0x35c   :  { %v4659_v36 = vmax.f32 %v4569_v25, %v4593_v31  ;;  %v4617_v62 = vadd.f32 %v4616_v5, %v8923_v34  ;;  %v4657_v40 = vmax.f32 %v4656_v26, %v4614_v43 }
 0x35d   :  { %v4651_v2 = vmax.f32 %v4650_v23, %v4606_v48  ;;  %v4653_v51 = vmax.f32 %v4561_v0, %v4585_v20  ;;  %v4669_v55 = vadd.f32 %v5056_v7, %v4646_v10  ;;  %v4649_v56 = vmax.f32 %v4648_v6, %v4625_v58 }
 0x35e   :  { %v4660_v49 = vmax.f32 %v4659_v36, %v4617_v62 }
 0x35f   :  { %v4654_v59 = vmax.f32 %v4653_v51, %v4609_v9  ;;  %v4670_v13 = vadd.f32 %v5056_v7, %v4649_v56  ;;  %v4675_v45 = vmax.f32 %v4669_v55, 0.0 }
 0x360   :  { %v6200_v50 = vpop.f32.mrb[40].mxu1 }
 0x361   :  { %v4676_v4 = vmax.f32 %v4670_v13, 0.0  ;;  %v4638_v32 = vadd.f32 %v6200_v50, %v4509_v35  ;;  %v4629_v38 = vpop.f32.mrb[41].mxu1 }
 0x362   :  { %v4630_v27 = vadd.f32 %v4629_v38, %v8933_v39  ;;  %v6201_v0 = vpop.f32.mrb[42].mxu1 }
 0x363   :  { %v5072_v42 = vpack.c.bf16 %v4676_v4, %v4675_v45  ;;  %v4658_v46 = vmax.f32 %v4657_v40, %v4638_v32  ;;  %v4641_v57 = vadd.f32 %v6201_v0, %v4512_v15  ;;  %v4632_v60 = vpop.f32.mrb[43].mxu1 }
 0x364   :  { %v4652_v12 = vmax.f32 %v4651_v2, %v4630_v27  ;;  %v4633_v34 = vadd.f32 %v4632_v60, %v8937_v53 }
 0x365   :  { %5073 = vst [vmem:[%s8974_s3] sm:$0xff] %v5072_v42   ;;  %v4673_v47 = vadd.f32 %v5056_v7, %v4658_v46  ;;  %v4661_v52 = vmax.f32 %v4660_v49, %v4641_v57 }
 0x366   :  { %v4671_v33 = vadd.f32 %v5056_v7, %v4652_v12  ;;  %v4655_v30 = vmax.f32 %v4654_v59, %v4633_v34 }
 0x367   :  { %v4674_v35 = vadd.f32 %v5056_v7, %v4661_v52  ;;  %v4679_v19 = vmax.f32 %v4673_v47, 0.0 }
 0x368   :  { %v4672_v29 = vadd.f32 %v5056_v7, %v4655_v30  ;;  %v4677_v54 = vmax.f32 %v4671_v33, 0.0 }
 0x369   :  { %v4680_v39 = vmax.f32 %v4674_v35, 0.0 }
 0x36a   :  { %v4678_v25 = vmax.f32 %v4672_v29, 0.0 }
 0x36b   :  { %v5082_v48 = vpack.c.bf16 %v4680_v39, %v4679_v19 }
 0x36c   :  { %v5077_v15 = vpack.c.bf16 %v4678_v25, %v4677_v54 }
 0x36d   :  { %5085 = vst [vmem:[%s8974_s3 + $0x10] sm:$0xff] %v5082_v48  }
 0x36e   :  { %5084 = vst [vmem:[%s8974_s3 + $0x8] sm:$0xff] %v5077_v15  }
 0x36f   :  { %4715 = vsyncpa [#allocation3], 1 }

// kernel: net_forward.5
= control target key start
LH: loop header
LB: loop body
LE: loop exit
PB: predicated region body
PF: predicated region fallthrough
CT: control target
= control target key end

     0   :  { %v795_v36 = vlaneseq  ;;  %v8348_v37 = vmov 1966171168   ;;  %s10937_s0 = inlined_call_operand.vmem [shape: bf16[2,3072], index: 0, kind: input, shape index: {}]   ;;  %s10938_s1 = inlined_call_operand.vmem [shape: bf16[3072,512], index: 1, kind: input, shape index: {}]   ;;  %s10939_s2 = inlined_call_operand.vmem [shape: f32[1,512], index: 2, kind: input, shape index: {}]   ;;  %s10940_s3 = inlined_call_operand.vmem [shape: bf16[512,128], index: 3, kind: input, shape index: {}]   ;;  %s10941_s4 = inlined_call_operand.vmem [shape: f32[1,128], index: 4, kind: input, shape index: {}]   ;;  %s10942_s5 = inlined_call_operand.hbm [shape: f32[2,128], index: 5, kind: output, shape index: {}]  }
   0x1   :  { %v7131_v0 = vld [vmem:[%s10938_s1 + $0x4] ss:$16 sps:$4 sm:$0xff]   ;;  %v7133_v1 = vld [vmem:[%s10938_s1 + $0xc] ss:$16 sps:$4 sm:$0xff]   ;;  %v7135_v2 = vld [vmem:[%s10938_s1] ss:$16 sps:$4 sm:$0xff]   ;;  %v820_v38 = vunpack.c.l.s4 %v8348_v37 }
   0x2   :  { %4829 = vmatprep.subr.bf16.mxu0 %v7131_v0  ;;  %v7136_v3 = vld [vmem:[%s10938_s1 + $0x8] ss:$16 sps:$4 sm:$0xff]   ;;  %5321 = vmatprep.subr.bf16.mxu1 %v7133_v1  ;;  %v7137_v4 = vld [vmem:[%s10938_s1 + $0x24] ss:$16 sps:$4 sm:$0xff]   ;;  %v7139_v5 = vld [vmem:[%s10938_s1 + $0x2c] ss:$16 sps:$4 sm:$0xff]  }
   0x3   :  { %4830 = vmatpush1.bf16.msra.mxu0 %v7135_v2  ;;  %5322 = vmatpush1.bf16.msra.mxu1 %v7136_v3  ;;  %v7141_v6 = vld [vmem:[%s10938_s1 + $0x20] ss:$16 sps:$4 sm:$0xff]   ;;  %v7142_v7 = vld [vmem:[%s10938_s1 + $0x28] ss:$16 sps:$4 sm:$0xff]   ;;  %v7143_v8 = vld [vmem:[%s10938_s1 + $0x44] ss:$16 sps:$4 sm:$0xff]   ;;  %v821_v43 = vunpack.c.0.s8 %v820_v38 }
   0x4   :  { %4831 = vmatprep.subr.bf16.mxu0 %v7137_v4  ;;  %5323 = vmatprep.subr.bf16.mxu1 %v7139_v5  ;;  %v7145_v9 = vld [vmem:[%s10938_s1 + $0x4c] ss:$16 sps:$4 sm:$0xff]   ;;  %v7147_v10 = vld [vmem:[%s10938_s1 + $0x40] ss:$16 sps:$4 sm:$0xff]   ;;  %v7148_v11 = vld [vmem:[%s10938_s1 + $0x48] ss:$16 sps:$4 sm:$0xff]  }
   0x5   :  { %v7149_v12 = vld [vmem:[%s10938_s1 + $0x64] ss:$16 sps:$4 sm:$0xff]   ;;  %v7151_v13 = vld [vmem:[%s10938_s1 + $0x6c] ss:$16 sps:$4 sm:$0xff]   ;;  %v7153_v14 = vld [vmem:[%s10938_s1 + $0x60] ss:$16 sps:$4 sm:$0xff]  }
   0x6   :  { %v7154_v15 = vld [vmem:[%s10938_s1 + $0x68] ss:$16 sps:$4 sm:$0xff]   ;;  %v7155_v16 = vld [vmem:[%s10938_s1 + $0x84] ss:$16 sps:$4 sm:$0xff]   ;;  %v7157_v17 = vld [vmem:[%s10938_s1 + $0x8c] ss:$16 sps:$4 sm:$0xff]  }
   0x7   :  { %4832 = vmatpush1.bf16.msra.mxu0 %v7141_v6  ;;  %5324 = vmatpush1.bf16.msra.mxu1 %v7142_v7  ;;  %v7159_v18 = vld [vmem:[%s10938_s1 + $0x80] ss:$16 sps:$4 sm:$0xff]   ;;  %v7160_v19 = vld [vmem:[%s10938_s1 + $0x88] ss:$16 sps:$4 sm:$0xff]   ;;  %v7161_v20 = vld [vmem:[%s10938_s1 + $0xa4] ss:$16 sps:$4 sm:$0xff]  }
   0x8   :  { %4833 = vmatprep.subr.bf16.mxu0 %v7143_v8  ;;  %5325 = vmatprep.subr.bf16.mxu1 %v7145_v9  ;;  %v7163_v21 = vld [vmem:[%s10938_s1 + $0xac] ss:$16 sps:$4 sm:$0xff]   ;;  %v7165_v22 = vld [vmem:[%s10938_s1 + $0xa0] ss:$16 sps:$4 sm:$0xff]   ;;  %v7166_v23 = vld [vmem:[%s10938_s1 + $0xa8] ss:$16 sps:$4 sm:$0xff]  }
   0x9   :  { %v7167_v24 = vld [vmem:[%s10938_s1 + $0xc4] ss:$16 sps:$4 sm:$0xff]   ;;  %v7169_v25 = vld [vmem:[%s10938_s1 + $0xcc] ss:$16 sps:$4 sm:$0xff]   ;;  %v7171_v26 = vld [vmem:[%s10938_s1 + $0xc0] ss:$16 sps:$4 sm:$0xff]  }
   0xa   :  { %v7172_v27 = vld [vmem:[%s10938_s1 + $0xc8] ss:$16 sps:$4 sm:$0xff]   ;;  %v7173_v28 = vld [vmem:[%s10938_s1 + $0xe4] ss:$16 sps:$4 sm:$0xff]   ;;  %v7175_v29 = vld [vmem:[%s10938_s1 + $0xec] ss:$16 sps:$4 sm:$0xff]  }
   0xb   :  { %4834 = vmatpush1.bf16.msra.mxu0 %v7147_v10  ;;  %5326 = vmatpush1.bf16.msra.mxu1 %v7148_v11  ;;  %v7177_v30 = vld [vmem:[%s10938_s1 + $0xe0] ss:$16 sps:$4 sm:$0xff]   ;;  %v7178_v31 = vld [vmem:[%s10938_s1 + $0xe8] ss:$16 sps:$4 sm:$0xff]   ;;  %v7179_v32 = vld [vmem:[%s10938_s1 + $0x104] ss:$16 sps:$4 sm:$0xff]  }
   0xc   :  { %4835 = vmatprep.subr.bf16.mxu0 %v7149_v12  ;;  %5327 = vmatprep.subr.bf16.mxu1 %v7151_v13  ;;  %v7181_v33 = vld [vmem:[%s10938_s1 + $0x10c] ss:$16 sps:$4 sm:$0xff]   ;;  %v7183_v34 = vld [vmem:[%s10938_s1 + $0x100] ss:$16 sps:$4 sm:$0xff]   ;;  %v7184_v35 = vld [vmem:[%s10938_s1 + $0x108] ss:$16 sps:$4 sm:$0xff]  }
   0xd   :  { %v7185_v39 = vld [vmem:[%s10938_s1 + $0x124] ss:$16 sps:$4 sm:$0xff]   ;;  %v7187_v40 = vld [vmem:[%s10938_s1 + $0x12c] ss:$16 sps:$4 sm:$0xff]   ;;  %v7189_v41 = vld [vmem:[%s10938_s1 + $0x120] ss:$16 sps:$4 sm:$0xff]  }
   0xe   :  { %v8497_v42 = vshrl.u32 %v795_v36, 7  ;;  %v7190_v44 = vld [vmem:[%s10938_s1 + $0x128] ss:$16 sps:$4 sm:$0xff]   ;;  %v7191_v45 = vld [vmem:[%s10938_s1 + $0x144] ss:$16 sps:$4 sm:$0xff]  }
   0xf   :  { %4836 = vmatpush1.bf16.msra.mxu0 %v7153_v14  ;;  %5328 = vmatpush1.bf16.msra.mxu1 %v7154_v15  ;;  %v7193_v46 = vld [vmem:[%s10938_s1 + $0x14c] ss:$16 sps:$4 sm:$0xff]   ;;  %v7195_v47 = vld [vmem:[%s10938_s1 + $0x140] ss:$16 sps:$4 sm:$0xff]   ;;  %v7196_v48 = vld [vmem:[%s10938_s1 + $0x148] ss:$16 sps:$4 sm:$0xff]  }
  0x10   :  { %4837 = vmatprep.subr.bf16.mxu0 %v7155_v16  ;;  %5329 = vmatprep.subr.bf16.mxu1 %v7157_v17  ;;  %v8515_v49 = vsub.s32 %v821_v43, %v8497_v42  ;;  %v7197_v50 = vld [vmem:[%s10938_s1 + $0x164] ss:$16 sps:$4 sm:$0xff]   ;;  %v7199_v51 = vld [vmem:[%s10938_s1 + $0x16c] ss:$16 sps:$4 sm:$0xff]   ;;  %v7201_v53 = vld [vmem:[%s10938_s1 + $0x160] ss:$16 sps:$4 sm:$0xff]  }
  0x11   :  { %v8526_v52 = vld [vmem:[%s10937_s0] sm:$0xff]  ;;  %v7202_v55 = vld [vmem:[%s10938_s1 + $0x168] ss:$16 sps:$4 sm:$0xff]   ;;  %v7205_v57 = vld [vmem:[%s10938_s1 + $0x18c] ss:$16 sps:$4 sm:$0xff]  }
  0x12   :  { %v825_v54 = vrot.slane %v8526_v52, %v8515_v49  ;;  %v7203_v56 = vld [vmem:[%s10938_s1 + $0x184] ss:$16 sps:$4 sm:$0xff]   ;;  %v7207_v59 = vld [vmem:[%s10938_s1 + $0x180] ss:$16 sps:$4 sm:$0xff]   ;;  %v7208_v61 = vld [vmem:[%s10938_s1 + $0x188] ss:$16 sps:$4 sm:$0xff]  }
  0x13   :  { %4838 = vmatpush1.bf16.msra.mxu0 %v7159_v18  ;;  %5330 = vmatpush1.bf16.msra.mxu1 %v7160_v19  ;;  %v7209_v62 = vld [vmem:[%s10938_s1 + $0x1a4] ss:$16 sps:$4 sm:$0xff]   ;;  %v7211_v63 = vld [vmem:[%s10938_s1 + $0x1ac] ss:$16 sps:$4 sm:$0xff]   ;;  %v7213_v0 = vld [vmem:[%s10938_s1 + $0x1a0] ss:$16 sps:$4 sm:$0xff]  }
  0x14   :  { %4839 = vmatprep.subr.bf16.mxu0 %v7161_v20  ;;  %5331 = vmatprep.subr.bf16.mxu1 %v7163_v21  ;;  %v833_v58 = vcombine.high %v825_v54, %v825_v54  ;;  %v7214_v1 = vld [vmem:[%s10938_s1 + $0x1a8] ss:$16 sps:$4 sm:$0xff]   ;;  %v7215_v2 = vld [vmem:[%s10938_s1 + $0x1c4] ss:$16 sps:$4 sm:$0xff]   ;;  %v7217_v3 = vld [vmem:[%s10938_s1 + $0x1cc] ss:$16 sps:$4 sm:$0xff]   ;;  %v8595_v13 = vrot.slane %v825_v54, %v8515_v49 }
  0x15   :  { %v7219_v4 = vld [vmem:[%s10938_s1 + $0x1c0] ss:$16 sps:$4 sm:$0xff]   ;;  %v7220_v5 = vld [vmem:[%s10938_s1 + $0x1c8] ss:$16 sps:$4 sm:$0xff]   ;;  %v7221_v6 = vld [vmem:[%s10938_s1 + $0x1e4] ss:$16 sps:$4 sm:$0xff]  }
  0x16   :  { %v855_v60 = vrot.slane %v833_v58, %v8515_v49  ;;  %v7223_v7 = vld [vmem:[%s10938_s1 + $0x1ec] ss:$16 sps:$4 sm:$0xff]   ;;  %v7225_v8 = vld [vmem:[%s10938_s1 + $0x1e0] ss:$16 sps:$4 sm:$0xff]   ;;  %v7226_v9 = vld [vmem:[%s10938_s1 + $0x1e8] ss:$16 sps:$4 sm:$0xff]  }
  0x17   :  { %4840 = vmatpush1.bf16.msra.mxu0 %v7165_v22  ;;  %5332 = vmatpush1.bf16.msra.mxu1 %v7166_v23  ;;  %v7229_v10 = vld [vmem:[%s10938_s1 + $0x204] ss:$16 sps:$4 sm:$0xff]   ;;  %v7232_v11 = vld [vmem:[%s10938_s1 + $0x20c] ss:$16 sps:$4 sm:$0xff]   ;;  %v7227_v12 = vld [vmem:[%s10938_s1 + $0x200] ss:$16 sps:$4 sm:$0xff]  }
  0x18   :  { %4841 = vmatprep.subr.bf16.mxu0 %v7167_v24  ;;  %5333 = vmatprep.subr.bf16.mxu1 %v7169_v25  ;;  %v7230_v14 = vld [vmem:[%s10938_s1 + $0x208] ss:$16 sps:$4 sm:$0xff]   ;;  %v7235_v15 = vld [vmem:[%s10938_s1 + $0x224] ss:$16 sps:$4 sm:$0xff]   ;;  %v7238_v16 = vld [vmem:[%s10938_s1 + $0x22c] ss:$16 sps:$4 sm:$0xff]   ;;  %v865_v17 = vcombine.high %v855_v60, %v855_v60 }
  0x19   :  { %4861 = vmatprep.mubr.bf16.mxu0 %v855_v60  ;;  %5353 = vmatprep.mubr.bf16.mxu1 %v855_v60  ;;  %v7233_v18 = vld [vmem:[%s10938_s1 + $0x220] ss:$16 sps:$4 sm:$0xff]   ;;  %v7236_v19 = vld [vmem:[%s10938_s1 + $0x228] ss:$16 sps:$4 sm:$0xff]   ;;  %v7241_v20 = vld [vmem:[%s10938_s1 + $0x244] ss:$16 sps:$4 sm:$0xff]  }
  0x1a   :  { %v7244_v21 = vld [vmem:[%s10938_s1 + $0x24c] ss:$16 sps:$4 sm:$0xff]   ;;  %v7239_v22 = vld [vmem:[%s10938_s1 + $0x240] ss:$16 sps:$4 sm:$0xff]   ;;  %v7242_v23 = vld [vmem:[%s10938_s1 + $0x248] ss:$16 sps:$4 sm:$0xff]  }
  0x1b   :  { %4842 = vmatpush1.bf16.msra.mxu0 %v7171_v26  ;;  %5334 = vmatpush1.bf16.msra.mxu1 %v7172_v27  ;;  %v7247_v24 = vld [vmem:[%s10938_s1 + $0x264] ss:$16 sps:$4 sm:$0xff]   ;;  %v7250_v25 = vld [vmem:[%s10938_s1 + $0x26c] ss:$16 sps:$4 sm:$0xff]   ;;  %v7245_v26 = vld [vmem:[%s10938_s1 + $0x260] ss:$16 sps:$4 sm:$0xff]  }
  0x1c   :  { %4843 = vmatprep.subr.bf16.mxu0 %v7173_v28  ;;  %5335 = vmatprep.subr.bf16.mxu1 %v7175_v29  ;;  %v7248_v27 = vld [vmem:[%s10938_s1 + $0x268] ss:$16 sps:$4 sm:$0xff]   ;;  %v7253_v28 = vld [vmem:[%s10938_s1 + $0x284] ss:$16 sps:$4 sm:$0xff]   ;;  %v7256_v29 = vld [vmem:[%s10938_s1 + $0x28c] ss:$16 sps:$4 sm:$0xff]  }
  0x1d   :  { %v7265_v36 = vld [vmem:[%s10938_s1 + $0x2c4] ss:$16 sps:$4 sm:$0xff]   ;;  %v7268_v37 = vld [vmem:[%s10938_s1 + $0x2cc] ss:$16 sps:$4 sm:$0xff]   ;;  %v7263_v38 = vld [vmem:[%s10938_s1 + $0x2c0] ss:$16 sps:$4 sm:$0xff]  }
  0x1e   :  { %v7269_v43 = vld [vmem:[%s10938_s1 + $0x2e0] ss:$16 sps:$4 sm:$0xff]   ;;  %v7284_v54 = vld [vmem:[%s10938_s1 + $0x328] ss:$16 sps:$4 sm:$0xff]   ;;  %v7298_v60 = vld [vmem:[%s10938_s1 + $0x36c] ss:$16 sps:$4 sm:$0xff]  }
  0x1f   :  { %4844 = vmatpush1.bf16.msra.mxu0 %v7177_v30  ;;  %5336 = vmatpush1.bf16.msra.mxu1 %v7178_v31  ;;  %v7251_v30 = vld [vmem:[%s10938_s1 + $0x280] ss:$16 sps:$4 sm:$0xff]   ;;  %v7254_v31 = vld [vmem:[%s10938_s1 + $0x288] ss:$16 sps:$4 sm:$0xff]  }
  0x20   :  { %4845 = vmatprep.subr.bf16.mxu0 %v7179_v32  ;;  %5337 = vmatprep.subr.bf16.mxu1 %v7181_v33  ;;  %v7259_v32 = vld [vmem:[%s10938_s1 + $0x2a4] ss:$16 sps:$4 sm:$0xff]   ;;  %v7262_v33 = vld [vmem:[%s10938_s1 + $0x2ac] ss:$16 sps:$4 sm:$0xff]   ;;  %v7290_v58 = vld [vmem:[%s10938_s1 + $0x348] ss:$16 sps:$4 sm:$0xff]  }
  0x23   :  { %4846 = vmatpush1.bf16.msra.mxu0 %v7183_v34  ;;  %5338 = vmatpush1.bf16.msra.mxu1 %v7184_v35  ;;  %v7257_v34 = vld [vmem:[%s10938_s1 + $0x2a0] ss:$16 sps:$4 sm:$0xff]   ;;  %v7260_v35 = vld [vmem:[%s10938_s1 + $0x2a8] ss:$16 sps:$4 sm:$0xff]  }
  0x24   :  { %4847 = vmatprep.subr.bf16.mxu0 %v7185_v39  ;;  %5339 = vmatprep.subr.bf16.mxu1 %v7187_v40  ;;  %v7266_v39 = vld [vmem:[%s10938_s1 + $0x2c8] ss:$16 sps:$4 sm:$0xff]   ;;  %v7271_v40 = vld [vmem:[%s10938_s1 + $0x2e4] ss:$16 sps:$4 sm:$0xff]  }
  0x27   :  { %4848 = vmatpush1.bf16.msra.mxu0 %v7189_v41  ;;  %5340 = vmatpush1.bf16.msra.mxu1 %v7190_v44  ;;  %v7274_v41 = vld [vmem:[%s10938_s1 + $0x2ec] ss:$16 sps:$4 sm:$0xff]   ;;  %v7272_v44 = vld [vmem:[%s10938_s1 + $0x2e8] ss:$16 sps:$4 sm:$0xff]  }
  0x28   :  { %4849 = vmatprep.subr.bf16.mxu0 %v7191_v45  ;;  %5341 = vmatprep.subr.bf16.mxu1 %v7193_v46  ;;  %v7277_v45 = vld [vmem:[%s10938_s1 + $0x304] ss:$16 sps:$4 sm:$0xff]   ;;  %v7280_v46 = vld [vmem:[%s10938_s1 + $0x30c] ss:$16 sps:$4 sm:$0xff]  }
  0x2b   :  { %4850 = vmatpush1.bf16.msra.mxu0 %v7195_v47  ;;  %5342 = vmatpush1.bf16.msra.mxu1 %v7196_v48  ;;  %v7275_v47 = vld [vmem:[%s10938_s1 + $0x300] ss:$16 sps:$4 sm:$0xff]   ;;  %v7278_v48 = vld [vmem:[%s10938_s1 + $0x308] ss:$16 sps:$4 sm:$0xff]  }
  0x2c   :  { %4851 = vmatprep.subr.bf16.mxu0 %v7197_v50  ;;  %5343 = vmatprep.subr.bf16.mxu1 %v7199_v51  ;;  %v7283_v50 = vld [vmem:[%s10938_s1 + $0x324] ss:$16 sps:$4 sm:$0xff]   ;;  %v7286_v51 = vld [vmem:[%s10938_s1 + $0x32c] ss:$16 sps:$4 sm:$0xff]  }
  0x2f   :  { %4852 = vmatpush1.bf16.msra.mxu0 %v7201_v53  ;;  %5344 = vmatpush1.bf16.msra.mxu1 %v7202_v55  ;;  %v7281_v53 = vld [vmem:[%s10938_s1 + $0x320] ss:$16 sps:$4 sm:$0xff]   ;;  %v7289_v55 = vld [vmem:[%s10938_s1 + $0x344] ss:$16 sps:$4 sm:$0xff]  }
  0x30   :  { %4853 = vmatprep.subr.bf16.mxu0 %v7203_v56  ;;  %5345 = vmatprep.subr.bf16.mxu1 %v7205_v57  ;;  %v7292_v56 = vld [vmem:[%s10938_s1 + $0x34c] ss:$16 sps:$4 sm:$0xff]   ;;  %v7287_v57 = vld [vmem:[%s10938_s1 + $0x340] ss:$16 sps:$4 sm:$0xff]  }
  0x33   :  { %4854 = vmatpush1.bf16.msra.mxu0 %v7207_v59  ;;  %5346 = vmatpush1.bf16.msra.mxu1 %v7208_v61  ;;  %v7295_v59 = vld [vmem:[%s10938_s1 + $0x364] ss:$16 sps:$4 sm:$0xff]   ;;  %v7293_v61 = vld [vmem:[%s10938_s1 + $0x360] ss:$16 sps:$4 sm:$0xff]  }
  0x34   :  { %4855 = vmatprep.subr.bf16.mxu0 %v7209_v62  ;;  %5347 = vmatprep.subr.bf16.mxu1 %v7211_v63  ;;  %v7296_v62 = vld [vmem:[%s10938_s1 + $0x368] ss:$16 sps:$4 sm:$0xff]   ;;  %v7301_v63 = vld [vmem:[%s10938_s1 + $0x384] ss:$16 sps:$4 sm:$0xff]  }
  0x37   :  { %4856 = vmatpush1.bf16.msra.mxu0 %v7213_v0  ;;  %5348 = vmatpush1.bf16.msra.mxu1 %v7214_v1  ;;  %v7304_v0 = vld [vmem:[%s10938_s1 + $0x38c] ss:$16 sps:$4 sm:$0xff]   ;;  %v7299_v1 = vld [vmem:[%s10938_s1 + $0x380] ss:$16 sps:$4 sm:$0xff]  }
  0x38   :  { %4857 = vmatprep.subr.bf16.mxu0 %v7215_v2  ;;  %5349 = vmatprep.subr.bf16.mxu1 %v7217_v3  ;;  %v7302_v2 = vld [vmem:[%s10938_s1 + $0x388] ss:$16 sps:$4 sm:$0xff]   ;;  %v7307_v3 = vld [vmem:[%s10938_s1 + $0x3a4] ss:$16 sps:$4 sm:$0xff]  }
  0x3b   :  { %4858 = vmatpush1.bf16.msra.mxu0 %v7219_v4  ;;  %5350 = vmatpush1.bf16.msra.mxu1 %v7220_v5  ;;  %v7310_v4 = vld [vmem:[%s10938_s1 + $0x3ac] ss:$16 sps:$4 sm:$0xff]   ;;  %v7305_v5 = vld [vmem:[%s10938_s1 + $0x3a0] ss:$16 sps:$4 sm:$0xff]  }
  0x3c   :  { %4859 = vmatprep.subr.bf16.mxu0 %v7221_v6  ;;  %5351 = vmatprep.subr.bf16.mxu1 %v7223_v7  ;;  %v7308_v6 = vld [vmem:[%s10938_s1 + $0x3a8] ss:$16 sps:$4 sm:$0xff]   ;;  %v7313_v7 = vld [vmem:[%s10938_s1 + $0x3c4] ss:$16 sps:$4 sm:$0xff]  }
  0x3f   :  { %4860 = vmatpush1.bf16.msra.mxu0 %v7225_v8  ;;  %5352 = vmatpush1.bf16.msra.mxu1 %v7226_v9  ;;  %v7316_v8 = vld [vmem:[%s10938_s1 + $0x3cc] ss:$16 sps:$4 sm:$0xff]   ;;  %v818_v9 = vcombine.high %v8526_v52, %v8526_v52 }
  0x40   :  { %4870 = vmatprep.subr.bf16.mxu0 %v7229_v10  ;;  %5362 = vmatprep.subr.bf16.mxu1 %v7232_v11  ;;  %v7311_v10 = vld [vmem:[%s10938_s1 + $0x3c0] ss:$16 sps:$4 sm:$0xff]   ;;  %v7314_v11 = vld [vmem:[%s10938_s1 + $0x3c8] ss:$16 sps:$4 sm:$0xff]   ;;  %v7322_v52 = vld [vmem:[%s10938_s1 + $0x3ec] ss:$16 sps:$4 sm:$0xff]  }
  0x42   :  { %4862 = vmatmul.mubr.bf16.vlgmr.msra.gmra.mrb[0].mxu0 %v8595_v13  ;;  %5354 = vmatmul.mubr.bf16.vlgmr.msra.gmra.mrb[0].mxu1 %v8595_v13 }
  0x43   :  { %4871 = vmatpush1.bf16.msra.mxu0 %v7227_v12  ;;  %5363 = vmatpush1.bf16.msra.mxu1 %v7230_v14  ;;  %v7319_v12 = vld [vmem:[%s10938_s1 + $0x3e4] ss:$16 sps:$4 sm:$0xff]   ;;  %v8779_v14 = vrot.slane %v818_v9, %v8515_v49  ;;  %v7398_v9 = vld [vmem:[%s10938_s1 + $0x588] ss:$16 sps:$4 sm:$0xff]  }
  0x44   :  { %4872 = vmatprep.subr.bf16.mxu0 %v7235_v15  ;;  %5364 = vmatprep.subr.bf16.mxu1 %v7238_v16  ;;  %v7317_v15 = vld [vmem:[%s10938_s1 + $0x3e0] ss:$16 sps:$4 sm:$0xff]   ;;  %v7320_v16 = vld [vmem:[%s10938_s1 + $0x3e8] ss:$16 sps:$4 sm:$0xff]  }
  0x45   :  { %4902 = vmatprep.mubr.bf16.mxu0 %v865_v17  ;;  %5394 = vmatprep.mubr.bf16.mxu1 %v865_v17  ;;  %v7325_v17 = vld [vmem:[%s10938_s1 + $0x404] ss:$16 sps:$4 sm:$0xff]  }
  0x47   :  { %4873 = vmatpush1.bf16.msra.mxu0 %v7233_v18  ;;  %5365 = vmatpush1.bf16.msra.mxu1 %v7236_v19  ;;  %v7328_v18 = vld [vmem:[%s10938_s1 + $0x40c] ss:$16 sps:$4 sm:$0xff]   ;;  %v834_v19 = vcombine.high %v8779_v14, %v8779_v14 }
  0x48   :  { %4874 = vmatprep.subr.bf16.mxu0 %v7241_v20  ;;  %5366 = vmatprep.subr.bf16.mxu1 %v7244_v21  ;;  %v7323_v20 = vld [vmem:[%s10938_s1 + $0x400] ss:$16 sps:$4 sm:$0xff]   ;;  %v863_v21 = vcombine.high %v8595_v13, %v8595_v13 }
  0x49   :  { %v7329_v13 = vld [vmem:[%s10938_s1 + $0x420] ss:$16 sps:$4 sm:$0xff]  }
  0x4b   :  { %4875 = vmatpush1.bf16.msra.mxu0 %v7239_v22  ;;  %5367 = vmatpush1.bf16.msra.mxu1 %v7242_v23  ;;  %v7326_v22 = vld [vmem:[%s10938_s1 + $0x408] ss:$16 sps:$4 sm:$0xff]   ;;  %v7331_v23 = vld [vmem:[%s10938_s1 + $0x424] ss:$16 sps:$4 sm:$0xff]  }
  0x4c   :  { %4876 = vmatprep.subr.bf16.mxu0 %v7247_v24  ;;  %5368 = vmatprep.subr.bf16.mxu1 %v7250_v25  ;;  %v7334_v24 = vld [vmem:[%s10938_s1 + $0x42c] ss:$16 sps:$4 sm:$0xff]   ;;  %v8810_v25 = vrot.slane %v834_v19, %v8515_v49  ;;  %v7415_v19 = vld [vmem:[%s10938_s1 + $0x5e4] ss:$16 sps:$4 sm:$0xff]  }
  0x4f   :  { %4877 = vmatpush1.bf16.msra.mxu0 %v7245_v26  ;;  %5369 = vmatpush1.bf16.msra.mxu1 %v7248_v27  ;;  %v7332_v26 = vld [vmem:[%s10938_s1 + $0x428] ss:$16 sps:$4 sm:$0xff]   ;;  %v7337_v27 = vld [vmem:[%s10938_s1 + $0x444] ss:$16 sps:$4 sm:$0xff]  }
  0x50   :  { %4878 = vmatprep.subr.bf16.mxu0 %v7253_v28  ;;  %5370 = vmatprep.subr.bf16.mxu1 %v7256_v29  ;;  %v7340_v28 = vld [vmem:[%s10938_s1 + $0x44c] ss:$16 sps:$4 sm:$0xff]   ;;  %v7335_v29 = vld [vmem:[%s10938_s1 + $0x440] ss:$16 sps:$4 sm:$0xff]  }
  0x53   :  { %4879 = vmatpush1.bf16.msra.mxu0 %v7251_v30  ;;  %5371 = vmatpush1.bf16.msra.mxu1 %v7254_v31  ;;  %v7338_v30 = vld [vmem:[%s10938_s1 + $0x448] ss:$16 sps:$4 sm:$0xff]   ;;  %v7343_v31 = vld [vmem:[%s10938_s1 + $0x464] ss:$16 sps:$4 sm:$0xff]  }
  0x54   :  { %4880 = vmatprep.subr.bf16.mxu0 %v7259_v32  ;;  %5372 = vmatprep.subr.bf16.mxu1 %v7262_v33  ;;  %v7346_v32 = vld [vmem:[%s10938_s1 + $0x46c] ss:$16 sps:$4 sm:$0xff]   ;;  %v7341_v33 = vld [vmem:[%s10938_s1 + $0x460] ss:$16 sps:$4 sm:$0xff]  }
  0x57   :  { %4881 = vmatpush1.bf16.msra.mxu0 %v7257_v34  ;;  %5373 = vmatpush1.bf16.msra.mxu1 %v7260_v35  ;;  %v7344_v34 = vld [vmem:[%s10938_s1 + $0x468] ss:$16 sps:$4 sm:$0xff]   ;;  %v7349_v35 = vld [vmem:[%s10938_s1 + $0x484] ss:$16 sps:$4 sm:$0xff]  }
  0x58   :  { %4882 = vmatprep.subr.bf16.mxu0 %v7265_v36  ;;  %5374 = vmatprep.subr.bf16.mxu1 %v7268_v37  ;;  %v7352_v36 = vld [vmem:[%s10938_s1 + $0x48c] ss:$16 sps:$4 sm:$0xff]   ;;  %v7347_v37 = vld [vmem:[%s10938_s1 + $0x480] ss:$16 sps:$4 sm:$0xff]  }
  0x5b   :  { %4883 = vmatpush1.bf16.msra.mxu0 %v7263_v38  ;;  %5375 = vmatpush1.bf16.msra.mxu1 %v7266_v39  ;;  %v7350_v38 = vld [vmem:[%s10938_s1 + $0x488] ss:$16 sps:$4 sm:$0xff]   ;;  %v7355_v39 = vld [vmem:[%s10938_s1 + $0x4a4] ss:$16 sps:$4 sm:$0xff]  }
  0x5c   :  { %4884 = vmatprep.subr.bf16.mxu0 %v7271_v40  ;;  %5376 = vmatprep.subr.bf16.mxu1 %v7274_v41  ;;  %v7358_v40 = vld [vmem:[%s10938_s1 + $0x4ac] ss:$16 sps:$4 sm:$0xff]   ;;  %v7353_v41 = vld [vmem:[%s10938_s1 + $0x4a0] ss:$16 sps:$4 sm:$0xff]  }
  0x5f   :  { %4885 = vmatpush1.bf16.msra.mxu0 %v7269_v43  ;;  %5377 = vmatpush1.bf16.msra.mxu1 %v7272_v44  ;;  %v7356_v43 = vld [vmem:[%s10938_s1 + $0x4a8] ss:$16 sps:$4 sm:$0xff]   ;;  %v7361_v44 = vld [vmem:[%s10938_s1 + $0x4c4] ss:$16 sps:$4 sm:$0xff]  }
  0x60   :  { %4886 = vmatprep.subr.bf16.mxu0 %v7277_v45  ;;  %5378 = vmatprep.subr.bf16.mxu1 %v7280_v46  ;;  %v7364_v45 = vld [vmem:[%s10938_s1 + $0x4cc] ss:$16 sps:$4 sm:$0xff]   ;;  %v7359_v46 = vld [vmem:[%s10938_s1 + $0x4c0] ss:$16 sps:$4 sm:$0xff]  }
  0x63   :  { %4887 = vmatpush1.bf16.msra.mxu0 %v7275_v47  ;;  %5379 = vmatpush1.bf16.msra.mxu1 %v7278_v48  ;;  %v7362_v47 = vld [vmem:[%s10938_s1 + $0x4c8] ss:$16 sps:$4 sm:$0xff]   ;;  %v7367_v48 = vld [vmem:[%s10938_s1 + $0x4e4] ss:$16 sps:$4 sm:$0xff]  }
  0x64   :  { %4888 = vmatprep.subr.bf16.mxu0 %v7283_v50  ;;  %5380 = vmatprep.subr.bf16.mxu1 %v7286_v51  ;;  %v7370_v50 = vld [vmem:[%s10938_s1 + $0x4ec] ss:$16 sps:$4 sm:$0xff]   ;;  %v7365_v51 = vld [vmem:[%s10938_s1 + $0x4e0] ss:$16 sps:$4 sm:$0xff]  }
  0x67   :  { %4889 = vmatpush1.bf16.msra.mxu0 %v7281_v53  ;;  %5381 = vmatpush1.bf16.msra.mxu1 %v7284_v54  ;;  %v7368_v53 = vld [vmem:[%s10938_s1 + $0x4e8] ss:$16 sps:$4 sm:$0xff]   ;;  %v7373_v54 = vld [vmem:[%s10938_s1 + $0x504] ss:$16 sps:$4 sm:$0xff]  }
  0x68   :  { %4890 = vmatprep.subr.bf16.mxu0 %v7289_v55  ;;  %5382 = vmatprep.subr.bf16.mxu1 %v7292_v56  ;;  %v7376_v55 = vld [vmem:[%s10938_s1 + $0x50c] ss:$16 sps:$4 sm:$0xff]   ;;  %v7371_v56 = vld [vmem:[%s10938_s1 + $0x500] ss:$16 sps:$4 sm:$0xff]  }
  0x6b   :  { %4891 = vmatpush1.bf16.msra.mxu0 %v7287_v57  ;;  %5383 = vmatpush1.bf16.msra.mxu1 %v7290_v58  ;;  %v7374_v57 = vld [vmem:[%s10938_s1 + $0x508] ss:$16 sps:$4 sm:$0xff]   ;;  %v7379_v58 = vld [vmem:[%s10938_s1 + $0x524] ss:$16 sps:$4 sm:$0xff]  }
  0x6c   :  { %4892 = vmatprep.subr.bf16.mxu0 %v7295_v59  ;;  %5384 = vmatprep.subr.bf16.mxu1 %v7298_v60  ;;  %v7382_v59 = vld [vmem:[%s10938_s1 + $0x52c] ss:$16 sps:$4 sm:$0xff]   ;;  %v7377_v60 = vld [vmem:[%s10938_s1 + $0x520] ss:$16 sps:$4 sm:$0xff]  }
  0x6f   :  { %4893 = vmatpush1.bf16.msra.mxu0 %v7293_v61  ;;  %5385 = vmatpush1.bf16.msra.mxu1 %v7296_v62  ;;  %v7380_v61 = vld [vmem:[%s10938_s1 + $0x528] ss:$16 sps:$4 sm:$0xff]   ;;  %v7385_v62 = vld [vmem:[%s10938_s1 + $0x544] ss:$16 sps:$4 sm:$0xff]  }
  0x70   :  { %4894 = vmatprep.subr.bf16.mxu0 %v7301_v63  ;;  %5386 = vmatprep.subr.bf16.mxu1 %v7304_v0  ;;  %v7388_v63 = vld [vmem:[%s10938_s1 + $0x54c] ss:$16 sps:$4 sm:$0xff]   ;;  %v7383_v0 = vld [vmem:[%s10938_s1 + $0x540] ss:$16 sps:$4 sm:$0xff]  }
  0x73   :  { %4895 = vmatpush1.bf16.msra.mxu0 %v7299_v1  ;;  %5387 = vmatpush1.bf16.msra.mxu1 %v7302_v2  ;;  %v7386_v1 = vld [vmem:[%s10938_s1 + $0x548] ss:$16 sps:$4 sm:$0xff]   ;;  %v7391_v2 = vld [vmem:[%s10938_s1 + $0x564] ss:$16 sps:$4 sm:$0xff]  }
  0x74   :  { %4896 = vmatprep.subr.bf16.mxu0 %v7307_v3  ;;  %5388 = vmatprep.subr.bf16.mxu1 %v7310_v4  ;;  %v7394_v3 = vld [vmem:[%s10938_s1 + $0x56c] ss:$16 sps:$4 sm:$0xff]   ;;  %v7389_v4 = vld [vmem:[%s10938_s1 + $0x560] ss:$16 sps:$4 sm:$0xff]  }
  0x77   :  { %4897 = vmatpush1.bf16.msra.mxu0 %v7305_v5  ;;  %5389 = vmatpush1.bf16.msra.mxu1 %v7308_v6  ;;  %v7392_v5 = vld [vmem:[%s10938_s1 + $0x568] ss:$16 sps:$4 sm:$0xff]   ;;  %v7397_v6 = vld [vmem:[%s10938_s1 + $0x584] ss:$16 sps:$4 sm:$0xff]  }
  0x78   :  { %4898 = vmatprep.subr.bf16.mxu0 %v7313_v7  ;;  %5390 = vmatprep.subr.bf16.mxu1 %v7316_v8  ;;  %v7400_v7 = vld [vmem:[%s10938_s1 + $0x58c] ss:$16 sps:$4 sm:$0xff]   ;;  %v7395_v8 = vld [vmem:[%s10938_s1 + $0x580] ss:$16 sps:$4 sm:$0xff]  }
  0x7b   :  { %4899 = vmatpush1.bf16.msra.mxu0 %v7311_v10  ;;  %5391 = vmatpush1.bf16.msra.mxu1 %v7314_v11  ;;  %v7403_v10 = vld [vmem:[%s10938_s1 + $0x5a4] ss:$16 sps:$4 sm:$0xff]   ;;  %v7406_v11 = vld [vmem:[%s10938_s1 + $0x5ac] ss:$16 sps:$4 sm:$0xff]  }
  0x7c   :  { %4900 = vmatprep.subr.bf16.mxu0 %v7319_v12  ;;  %5392 = vmatprep.subr.bf16.mxu1 %v7322_v52  ;;  %v7401_v12 = vld [vmem:[%s10938_s1 + $0x5a0] ss:$16 sps:$4 sm:$0xff]   ;;  %v7404_v52 = vld [vmem:[%s10938_s1 + $0x5a8] ss:$16 sps:$4 sm:$0xff]  }
  0x7f   :  { %4901 = vmatpush1.bf16.msra.mxu0 %v7317_v15  ;;  %5393 = vmatpush1.bf16.msra.mxu1 %v7320_v16  ;;  %v7409_v15 = vld [vmem:[%s10938_s1 + $0x5c4] ss:$16 sps:$4 sm:$0xff]   ;;  %v7412_v16 = vld [vmem:[%s10938_s1 + $0x5cc] ss:$16 sps:$4 sm:$0xff]  }
  0x80   :  { %4911 = vmatprep.subr.bf16.mxu0 %v7325_v17  ;;  %5403 = vmatprep.subr.bf16.mxu1 %v7328_v18  ;;  %v7407_v17 = vld [vmem:[%s10938_s1 + $0x5c0] ss:$16 sps:$4 sm:$0xff]   ;;  %v7410_v18 = vld [vmem:[%s10938_s1 + $0x5c8] ss:$16 sps:$4 sm:$0xff]  }
  0x82   :  { %4903 = vmatmul.mubr.bf16.vlgmr.msra.gmra.mrb[0].mxu0 %v863_v21  ;;  %5395 = vmatmul.mubr.bf16.vlgmr.msra.gmra.mrb[0].mxu1 %v863_v21  ;;  %v7413_v21 = vld [vmem:[%s10938_s1 + $0x5e0] ss:$16 sps:$4 sm:$0xff]  }
  0x83   :  { %4912 = vmatpush1.bf16.msra.mxu0 %v7323_v20  ;;  %5404 = vmatpush1.bf16.msra.mxu1 %v7326_v22  ;;  %v7418_v20 = vld [vmem:[%s10938_s1 + $0x5ec] ss:$16 sps:$4 sm:$0xff]   ;;  %v7416_v22 = vld [vmem:[%s10938_s1 + $0x5e8] ss:$16 sps:$4 sm:$0xff]  }
  0x84   :  { %4913 = vmatprep.subr.bf16.mxu0 %v7331_v23  ;;  %5405 = vmatprep.subr.bf16.mxu1 %v7334_v24  ;;  %v7422_v23 = vld [vmem:[%s10938_s1 + $0x604] ss:$16 sps:$4 sm:$0xff]   ;;  %v7425_v24 = vld [vmem:[%s10938_s1 + $0x60c] ss:$16 sps:$4 sm:$0xff]  }
  0x85   :  { %4943 = vmatprep.mubr.bf16.mxu0 %v8810_v25  ;;  %5435 = vmatprep.mubr.bf16.mxu1 %v8810_v25 }
  0x87   :  { %4914 = vmatpush1.bf16.msra.mxu0 %v7329_v13  ;;  %5406 = vmatpush1.bf16.msra.mxu1 %v7332_v26  ;;  %v7420_v13 = vld [vmem:[%s10938_s1 + $0x600] ss:$16 sps:$4 sm:$0xff]   ;;  %v8999_v26 = vrot.slane %v8779_v14, %v8515_v49  ;;  %v866_v14 = vcombine.high %v8810_v25, %v8810_v25  ;;  %v7434_v25 = vld [vmem:[%s10938_s1 + $0x644] ss:$16 sps:$4 sm:$0xff]  }
  0x88   :  { %4915 = vmatprep.subr.bf16.mxu0 %v7337_v27  ;;  %5407 = vmatprep.subr.bf16.mxu1 %v7340_v28  ;;  %v7423_v27 = vld [vmem:[%s10938_s1 + $0x608] ss:$16 sps:$4 sm:$0xff]   ;;  %v7428_v28 = vld [vmem:[%s10938_s1 + $0x624] ss:$16 sps:$4 sm:$0xff]  }
  0x8b   :  { %4916 = vmatpush1.bf16.msra.mxu0 %v7335_v29  ;;  %5408 = vmatpush1.bf16.msra.mxu1 %v7338_v30  ;;  %v7431_v29 = vld [vmem:[%s10938_s1 + $0x62c] ss:$16 sps:$4 sm:$0xff]   ;;  %v7426_v30 = vld [vmem:[%s10938_s1 + $0x620] ss:$16 sps:$4 sm:$0xff]  }
  0x8c   :  { %4917 = vmatprep.subr.bf16.mxu0 %v7343_v31  ;;  %5409 = vmatprep.subr.bf16.mxu1 %v7346_v32  ;;  %v7429_v31 = vld [vmem:[%s10938_s1 + $0x628] ss:$16 sps:$4 sm:$0xff]   ;;  %v7437_v32 = vld [vmem:[%s10938_s1 + $0x64c] ss:$16 sps:$4 sm:$0xff]  }
  0x8f   :  { %4918 = vmatpush1.bf16.msra.mxu0 %v7341_v33  ;;  %5410 = vmatpush1.bf16.msra.mxu1 %v7344_v34  ;;  %v7432_v33 = vld [vmem:[%s10938_s1 + $0x640] ss:$16 sps:$4 sm:$0xff]   ;;  %v7435_v34 = vld [vmem:[%s10938_s1 + $0x648] ss:$16 sps:$4 sm:$0xff]  }
  0x90   :  { %4919 = vmatprep.subr.bf16.mxu0 %v7349_v35  ;;  %5411 = vmatprep.subr.bf16.mxu1 %v7352_v36  ;;  %v7440_v35 = vld [vmem:[%s10938_s1 + $0x664] ss:$16 sps:$4 sm:$0xff]   ;;  %v7443_v36 = vld [vmem:[%s10938_s1 + $0x66c] ss:$16 sps:$4 sm:$0xff]  }
  0x93   :  { %4920 = vmatpush1.bf16.msra.mxu0 %v7347_v37  ;;  %5412 = vmatpush1.bf16.msra.mxu1 %v7350_v38  ;;  %v7438_v37 = vld [vmem:[%s10938_s1 + $0x660] ss:$16 sps:$4 sm:$0xff]   ;;  %v7441_v38 = vld [vmem:[%s10938_s1 + $0x668] ss:$16 sps:$4 sm:$0xff]  }
  0x94   :  { %4921 = vmatprep.subr.bf16.mxu0 %v7355_v39  ;;  %5413 = vmatprep.subr.bf16.mxu1 %v7358_v40  ;;  %v7446_v39 = vld [vmem:[%s10938_s1 + $0x684] ss:$16 sps:$4 sm:$0xff]   ;;  %v7449_v40 = vld [vmem:[%s10938_s1 + $0x68c] ss:$16 sps:$4 sm:$0xff]  }
  0x97   :  { %4922 = vmatpush1.bf16.msra.mxu0 %v7353_v41  ;;  %5414 = vmatpush1.bf16.msra.mxu1 %v7356_v43  ;;  %v7444_v41 = vld [vmem:[%s10938_s1 + $0x680] ss:$16 sps:$4 sm:$0xff]   ;;  %v7447_v43 = vld [vmem:[%s10938_s1 + $0x688] ss:$16 sps:$4 sm:$0xff]  }
  0x98   :  { %4923 = vmatprep.subr.bf16.mxu0 %v7361_v44  ;;  %5415 = vmatprep.subr.bf16.mxu1 %v7364_v45  ;;  %v7452_v44 = vld [vmem:[%s10938_s1 + $0x6a4] ss:$16 sps:$4 sm:$0xff]   ;;  %v7455_v45 = vld [vmem:[%s10938_s1 + $0x6ac] ss:$16 sps:$4 sm:$0xff]  }
  0x9b   :  { %4924 = vmatpush1.bf16.msra.mxu0 %v7359_v46  ;;  %5416 = vmatpush1.bf16.msra.mxu1 %v7362_v47  ;;  %v7450_v46 = vld [vmem:[%s10938_s1 + $0x6a0] ss:$16 sps:$4 sm:$0xff]   ;;  %v7453_v47 = vld [vmem:[%s10938_s1 + $0x6a8] ss:$16 sps:$4 sm:$0xff]  }
  0x9c   :  { %4925 = vmatprep.subr.bf16.mxu0 %v7367_v48  ;;  %5417 = vmatprep.subr.bf16.mxu1 %v7370_v50  ;;  %v7458_v48 = vld [vmem:[%s10938_s1 + $0x6c4] ss:$16 sps:$4 sm:$0xff]   ;;  %v7461_v50 = vld [vmem:[%s10938_s1 + $0x6cc] ss:$16 sps:$4 sm:$0xff]  }
  0x9f   :  { %4926 = vmatpush1.bf16.msra.mxu0 %v7365_v51  ;;  %5418 = vmatpush1.bf16.msra.mxu1 %v7368_v53  ;;  %v7456_v51 = vld [vmem:[%s10938_s1 + $0x6c0] ss:$16 sps:$4 sm:$0xff]   ;;  %v7459_v53 = vld [vmem:[%s10938_s1 + $0x6c8] ss:$16 sps:$4 sm:$0xff]  }
  0xa0   :  { %4927 = vmatprep.subr.bf16.mxu0 %v7373_v54  ;;  %5419 = vmatprep.subr.bf16.mxu1 %v7376_v55  ;;  %v7464_v54 = vld [vmem:[%s10938_s1 + $0x6e4] ss:$16 sps:$4 sm:$0xff]   ;;  %v7467_v55 = vld [vmem:[%s10938_s1 + $0x6ec] ss:$16 sps:$4 sm:$0xff]  }
  0xa3   :  { %4928 = vmatpush1.bf16.msra.mxu0 %v7371_v56  ;;  %5420 = vmatpush1.bf16.msra.mxu1 %v7374_v57  ;;  %v7462_v56 = vld [vmem:[%s10938_s1 + $0x6e0] ss:$16 sps:$4 sm:$0xff]   ;;  %v7465_v57 = vld [vmem:[%s10938_s1 + $0x6e8] ss:$16 sps:$4 sm:$0xff]  }
  0xa4   :  { %4929 = vmatprep.subr.bf16.mxu0 %v7379_v58  ;;  %5421 = vmatprep.subr.bf16.mxu1 %v7382_v59  ;;  %v7470_v58 = vld [vmem:[%s10938_s1 + $0x704] ss:$16 sps:$4 sm:$0xff]   ;;  %v7473_v59 = vld [vmem:[%s10938_s1 + $0x70c] ss:$16 sps:$4 sm:$0xff]  }
  0xa7   :  { %4930 = vmatpush1.bf16.msra.mxu0 %v7377_v60  ;;  %5422 = vmatpush1.bf16.msra.mxu1 %v7380_v61  ;;  %v7468_v60 = vld [vmem:[%s10938_s1 + $0x700] ss:$16 sps:$4 sm:$0xff]   ;;  %v7471_v61 = vld [vmem:[%s10938_s1 + $0x708] ss:$16 sps:$4 sm:$0xff]  }
  0xa8   :  { %4931 = vmatprep.subr.bf16.mxu0 %v7385_v62  ;;  %5423 = vmatprep.subr.bf16.mxu1 %v7388_v63  ;;  %v7476_v62 = vld [vmem:[%s10938_s1 + $0x724] ss:$16 sps:$4 sm:$0xff]   ;;  %v7479_v63 = vld [vmem:[%s10938_s1 + $0x72c] ss:$16 sps:$4 sm:$0xff]  }
  0xab   :  { %4932 = vmatpush1.bf16.msra.mxu0 %v7383_v0  ;;  %5424 = vmatpush1.bf16.msra.mxu1 %v7386_v1  ;;  %v7474_v0 = vld [vmem:[%s10938_s1 + $0x720] ss:$16 sps:$4 sm:$0xff]   ;;  %v7477_v1 = vld [vmem:[%s10938_s1 + $0x728] ss:$16 sps:$4 sm:$0xff]  }
  0xac   :  { %4933 = vmatprep.subr.bf16.mxu0 %v7391_v2  ;;  %5425 = vmatprep.subr.bf16.mxu1 %v7394_v3  ;;  %v7482_v2 = vld [vmem:[%s10938_s1 + $0x744] ss:$16 sps:$4 sm:$0xff]   ;;  %v7485_v3 = vld [vmem:[%s10938_s1 + $0x74c] ss:$16 sps:$4 sm:$0xff]  }
  0xaf   :  { %4934 = vmatpush1.bf16.msra.mxu0 %v7389_v4  ;;  %5426 = vmatpush1.bf16.msra.mxu1 %v7392_v5  ;;  %v7480_v4 = vld [vmem:[%s10938_s1 + $0x740] ss:$16 sps:$4 sm:$0xff]   ;;  %v7483_v5 = vld [vmem:[%s10938_s1 + $0x748] ss:$16 sps:$4 sm:$0xff]  }
  0xb0   :  { %4935 = vmatprep.subr.bf16.mxu0 %v7397_v6  ;;  %5427 = vmatprep.subr.bf16.mxu1 %v7400_v7  ;;  %v7488_v6 = vld [vmem:[%s10938_s1 + $0x764] ss:$16 sps:$4 sm:$0xff]   ;;  %v7491_v7 = vld [vmem:[%s10938_s1 + $0x76c] ss:$16 sps:$4 sm:$0xff]  }
  0xb3   :  { %4936 = vmatpush1.bf16.msra.mxu0 %v7395_v8  ;;  %5428 = vmatpush1.bf16.msra.mxu1 %v7398_v9  ;;  %v7486_v8 = vld [vmem:[%s10938_s1 + $0x760] ss:$16 sps:$4 sm:$0xff]   ;;  %v7489_v9 = vld [vmem:[%s10938_s1 + $0x768] ss:$16 sps:$4 sm:$0xff]  }
  0xb4   :  { %4937 = vmatprep.subr.bf16.mxu0 %v7403_v10  ;;  %5429 = vmatprep.subr.bf16.mxu1 %v7406_v11  ;;  %v7494_v10 = vld [vmem:[%s10938_s1 + $0x784] ss:$16 sps:$4 sm:$0xff]   ;;  %v7497_v11 = vld [vmem:[%s10938_s1 + $0x78c] ss:$16 sps:$4 sm:$0xff]  }
  0xb7   :  { %4938 = vmatpush1.bf16.msra.mxu0 %v7401_v12  ;;  %5430 = vmatpush1.bf16.msra.mxu1 %v7404_v52  ;;  %v7492_v12 = vld [vmem:[%s10938_s1 + $0x780] ss:$16 sps:$4 sm:$0xff]   ;;  %v7495_v52 = vld [vmem:[%s10938_s1 + $0x788] ss:$16 sps:$4 sm:$0xff]  }
  0xb8   :  { %4939 = vmatprep.subr.bf16.mxu0 %v7409_v15  ;;  %5431 = vmatprep.subr.bf16.mxu1 %v7412_v16  ;;  %v7500_v15 = vld [vmem:[%s10938_s1 + $0x7a4] ss:$16 sps:$4 sm:$0xff]   ;;  %v7503_v16 = vld [vmem:[%s10938_s1 + $0x7ac] ss:$16 sps:$4 sm:$0xff]  }
  0xbb   :  { %4940 = vmatpush1.bf16.msra.mxu0 %v7407_v17  ;;  %5432 = vmatpush1.bf16.msra.mxu1 %v7410_v18  ;;  %v7498_v17 = vld [vmem:[%s10938_s1 + $0x7a0] ss:$16 sps:$4 sm:$0xff]   ;;  %v7501_v18 = vld [vmem:[%s10938_s1 + $0x7a8] ss:$16 sps:$4 sm:$0xff]  }
  0xbc   :  { %4941 = vmatprep.subr.bf16.mxu0 %v7415_v19  ;;  %5433 = vmatprep.subr.bf16.mxu1 %v7418_v20  ;;  %v7506_v19 = vld [vmem:[%s10938_s1 + $0x7c4] ss:$16 sps:$4 sm:$0xff]   ;;  %v7509_v20 = vld [vmem:[%s10938_s1 + $0x7cc] ss:$16 sps:$4 sm:$0xff]  }
  0xbf   :  { %4942 = vmatpush1.bf16.msra.mxu0 %v7413_v21  ;;  %5434 = vmatpush1.bf16.msra.mxu1 %v7416_v22  ;;  %v9173_v21 = vld.sshfl [vmem:[%s10937_s0 + $0x8] sm:$0xff pattern:$0x75316420]  ;;  %v7504_v22 = vld [vmem:[%s10938_s1 + $0x7c0] ss:$16 sps:$4 sm:$0xff]  }
  0xc0   :  { %4952 = vmatprep.subr.bf16.mxu0 %v7422_v23  ;;  %5444 = vmatprep.subr.bf16.mxu1 %v7425_v24  ;;  %v7507_v23 = vld [vmem:[%s10938_s1 + $0x7c8] ss:$16 sps:$4 sm:$0xff]   ;;  %v7512_v24 = vld [vmem:[%s10938_s1 + $0x7e4] ss:$16 sps:$4 sm:$0xff]  }
  0xc2   :  { %4944 = vmatmul.mubr.bf16.vlgmr.msra.gmra.mrb[0].mxu0 %v8999_v26  ;;  %5436 = vmatmul.mubr.bf16.vlgmr.msra.gmra.mrb[0].mxu1 %v8999_v26 }
  0xc3   :  { %4953 = vmatpush1.bf16.msra.mxu0 %v7420_v13  ;;  %5445 = vmatpush1.bf16.msra.mxu1 %v7423_v27  ;;  %v7515_v13 = vld [vmem:[%s10938_s1 + $0x7ec] ss:$16 sps:$4 sm:$0xff]   ;;  %v7510_v27 = vld [vmem:[%s10938_s1 + $0x7e0] ss:$16 sps:$4 sm:$0xff]  }
  0xc4   :  { %4954 = vmatprep.subr.bf16.mxu0 %v7428_v28  ;;  %5446 = vmatprep.subr.bf16.mxu1 %v7431_v29  ;;  %v7513_v28 = vld [vmem:[%s10938_s1 + $0x7e8] ss:$16 sps:$4 sm:$0xff]   ;;  %v7518_v29 = vld [vmem:[%s10938_s1 + $0x804] ss:$16 sps:$4 sm:$0xff]  }
  0xc5   :  { %4984 = vmatprep.mubr.bf16.mxu0 %v866_v14  ;;  %5476 = vmatprep.mubr.bf16.mxu1 %v866_v14  ;;  %v7521_v14 = vld [vmem:[%s10938_s1 + $0x80c] ss:$16 sps:$4 sm:$0xff]  }
  0xc7   :  { %4955 = vmatpush1.bf16.msra.mxu0 %v7426_v30  ;;  %5447 = vmatpush1.bf16.msra.mxu1 %v7429_v31  ;;  %v882_v30 = vcombine.high %v9173_v21, %v9173_v21  ;;  %v864_v31 = vcombine.high %v8999_v26, %v8999_v26  ;;  %v7527_v26 = vld [vmem:[%s10938_s1 + $0x82c] ss:$16 sps:$4 sm:$0xff]  }
  0xc8   :  { %4956 = vmatprep.subr.bf16.mxu0 %v7434_v25  ;;  %5448 = vmatprep.subr.bf16.mxu1 %v7437_v32  ;;  %v7516_v25 = vld [vmem:[%s10938_s1 + $0x800] ss:$16 sps:$4 sm:$0xff]   ;;  %v7519_v32 = vld [vmem:[%s10938_s1 + $0x808] ss:$16 sps:$4 sm:$0xff]  }
  0xcb   :  { %4957 = vmatpush1.bf16.msra.mxu0 %v7432_v33  ;;  %5449 = vmatpush1.bf16.msra.mxu1 %v7435_v34  ;;  %v7524_v33 = vld [vmem:[%s10938_s1 + $0x824] ss:$16 sps:$4 sm:$0xff]   ;;  %v9216_v34 = vrot.slane %v882_v30, %v8515_v49 }
  0xcc   :  { %4958 = vmatprep.subr.bf16.mxu0 %v7440_v35  ;;  %5450 = vmatprep.subr.bf16.mxu1 %v7443_v36  ;;  %v7522_v35 = vld [vmem:[%s10938_s1 + $0x820] ss:$16 sps:$4 sm:$0xff]   ;;  %v7525_v36 = vld [vmem:[%s10938_s1 + $0x828] ss:$16 sps:$4 sm:$0xff]   ;;  %v7608_v30 = vld [vmem:[%s10938_s1 + $0x9e4] ss:$16 sps:$4 sm:$0xff]  }
  0xcf   :  { %4959 = vmatpush1.bf16.msra.mxu0 %v7438_v37  ;;  %5451 = vmatpush1.bf16.msra.mxu1 %v7441_v38  ;;  %v7530_v37 = vld [vmem:[%s10938_s1 + $0x844] ss:$16 sps:$4 sm:$0xff]   ;;  %v7533_v38 = vld [vmem:[%s10938_s1 + $0x84c] ss:$16 sps:$4 sm:$0xff]  }
  0xd0   :  { %4960 = vmatprep.subr.bf16.mxu0 %v7446_v39  ;;  %5452 = vmatprep.subr.bf16.mxu1 %v7449_v40  ;;  %v7528_v39 = vld [vmem:[%s10938_s1 + $0x840] ss:$16 sps:$4 sm:$0xff]   ;;  %v7531_v40 = vld [vmem:[%s10938_s1 + $0x848] ss:$16 sps:$4 sm:$0xff]  }
  0xd3   :  { %4961 = vmatpush1.bf16.msra.mxu0 %v7444_v41  ;;  %5453 = vmatpush1.bf16.msra.mxu1 %v7447_v43  ;;  %v7536_v41 = vld [vmem:[%s10938_s1 + $0x864] ss:$16 sps:$4 sm:$0xff]   ;;  %v7539_v43 = vld [vmem:[%s10938_s1 + $0x86c] ss:$16 sps:$4 sm:$0xff]  }
  0xd4   :  { %4962 = vmatprep.subr.bf16.mxu0 %v7452_v44  ;;  %5454 = vmatprep.subr.bf16.mxu1 %v7455_v45  ;;  %v7534_v44 = vld [vmem:[%s10938_s1 + $0x860] ss:$16 sps:$4 sm:$0xff]   ;;  %v7537_v45 = vld [vmem:[%s10938_s1 + $0x868] ss:$16 sps:$4 sm:$0xff]  }
  0xd7   :  { %4963 = vmatpush1.bf16.msra.mxu0 %v7450_v46  ;;  %5455 = vmatpush1.bf16.msra.mxu1 %v7453_v47  ;;  %v7542_v46 = vld [vmem:[%s10938_s1 + $0x884] ss:$16 sps:$4 sm:$0xff]   ;;  %v7545_v47 = vld [vmem:[%s10938_s1 + $0x88c] ss:$16 sps:$4 sm:$0xff]  }
  0xd8   :  { %4964 = vmatprep.subr.bf16.mxu0 %v7458_v48  ;;  %5456 = vmatprep.subr.bf16.mxu1 %v7461_v50  ;;  %v7540_v48 = vld [vmem:[%s10938_s1 + $0x880] ss:$16 sps:$4 sm:$0xff]   ;;  %v7543_v50 = vld [vmem:[%s10938_s1 + $0x888] ss:$16 sps:$4 sm:$0xff]  }
  0xdb   :  { %4965 = vmatpush1.bf16.msra.mxu0 %v7456_v51  ;;  %5457 = vmatpush1.bf16.msra.mxu1 %v7459_v53  ;;  %v7548_v51 = vld [vmem:[%s10938_s1 + $0x8a4] ss:$16 sps:$4 sm:$0xff]   ;;  %v7551_v53 = vld [vmem:[%s10938_s1 + $0x8ac] ss:$16 sps:$4 sm:$0xff]  }
  0xdc   :  { %4966 = vmatprep.subr.bf16.mxu0 %v7464_v54  ;;  %5458 = vmatprep.subr.bf16.mxu1 %v7467_v55  ;;  %v7546_v54 = vld [vmem:[%s10938_s1 + $0x8a0] ss:$16 sps:$4 sm:$0xff]   ;;  %v7549_v55 = vld [vmem:[%s10938_s1 + $0x8a8] ss:$16 sps:$4 sm:$0xff]  }
  0xdf   :  { %4967 = vmatpush1.bf16.msra.mxu0 %v7462_v56  ;;  %5459 = vmatpush1.bf16.msra.mxu1 %v7465_v57  ;;  %v7554_v56 = vld [vmem:[%s10938_s1 + $0x8c4] ss:$16 sps:$4 sm:$0xff]   ;;  %v7557_v57 = vld [vmem:[%s10938_s1 + $0x8cc] ss:$16 sps:$4 sm:$0xff]  }
  0xe0   :  { %4968 = vmatprep.subr.bf16.mxu0 %v7470_v58  ;;  %5460 = vmatprep.subr.bf16.mxu1 %v7473_v59  ;;  %v7552_v58 = vld [vmem:[%s10938_s1 + $0x8c0] ss:$16 sps:$4 sm:$0xff]   ;;  %v7555_v59 = vld [vmem:[%s10938_s1 + $0x8c8] ss:$16 sps:$4 sm:$0xff]  }
  0xe3   :  { %4969 = vmatpush1.bf16.msra.mxu0 %v7468_v60  ;;  %5461 = vmatpush1.bf16.msra.mxu1 %v7471_v61  ;;  %v7560_v60 = vld [vmem:[%s10938_s1 + $0x8e4] ss:$16 sps:$4 sm:$0xff]   ;;  %v7563_v61 = vld [vmem:[%s10938_s1 + $0x8ec] ss:$16 sps:$4 sm:$0xff]  }
  0xe4   :  { %4970 = vmatprep.subr.bf16.mxu0 %v7476_v62  ;;  %5462 = vmatprep.subr.bf16.mxu1 %v7479_v63  ;;  %v7558_v62 = vld [vmem:[%s10938_s1 + $0x8e0] ss:$16 sps:$4 sm:$0xff]   ;;  %v7561_v63 = vld [vmem:[%s10938_s1 + $0x8e8] ss:$16 sps:$4 sm:$0xff]  }
  0xe7   :  { %4971 = vmatpush1.bf16.msra.mxu0 %v7474_v0  ;;  %5463 = vmatpush1.bf16.msra.mxu1 %v7477_v1  ;;  %v7566_v0 = vld [vmem:[%s10938_s1 + $0x904] ss:$16 sps:$4 sm:$0xff]   ;;  %v7569_v1 = vld [vmem:[%s10938_s1 + $0x90c] ss:$16 sps:$4 sm:$0xff]  }
  0xe8   :  { %4972 = vmatprep.subr.bf16.mxu0 %v7482_v2  ;;  %5464 = vmatprep.subr.bf16.mxu1 %v7485_v3  ;;  %v7564_v2 = vld [vmem:[%s10938_s1 + $0x900] ss:$16 sps:$4 sm:$0xff]   ;;  %v7567_v3 = vld [vmem:[%s10938_s1 + $0x908] ss:$16 sps:$4 sm:$0xff]  }
  0xeb   :  { %4973 = vmatpush1.bf16.msra.mxu0 %v7480_v4  ;;  %5465 = vmatpush1.bf16.msra.mxu1 %v7483_v5  ;;  %v7572_v4 = vld [vmem:[%s10938_s1 + $0x924] ss:$16 sps:$4 sm:$0xff]   ;;  %v7575_v5 = vld [vmem:[%s10938_s1 + $0x92c] ss:$16 sps:$4 sm:$0xff]  }
  0xec   :  { %4974 = vmatprep.subr.bf16.mxu0 %v7488_v6  ;;  %5466 = vmatprep.subr.bf16.mxu1 %v7491_v7  ;;  %v7570_v6 = vld [vmem:[%s10938_s1 + $0x920] ss:$16 sps:$4 sm:$0xff]   ;;  %v7573_v7 = vld [vmem:[%s10938_s1 + $0x928] ss:$16 sps:$4 sm:$0xff]  }
  0xef   :  { %4975 = vmatpush1.bf16.msra.mxu0 %v7486_v8  ;;  %5467 = vmatpush1.bf16.msra.mxu1 %v7489_v9  ;;  %v7578_v8 = vld [vmem:[%s10938_s1 + $0x944] ss:$16 sps:$4 sm:$0xff]   ;;  %v7581_v9 = vld [vmem:[%s10938_s1 + $0x94c] ss:$16 sps:$4 sm:$0xff]  }
  0xf0   :  { %4976 = vmatprep.subr.bf16.mxu0 %v7494_v10  ;;  %5468 = vmatprep.subr.bf16.mxu1 %v7497_v11  ;;  %v7576_v10 = vld [vmem:[%s10938_s1 + $0x940] ss:$16 sps:$4 sm:$0xff]   ;;  %v7579_v11 = vld [vmem:[%s10938_s1 + $0x948] ss:$16 sps:$4 sm:$0xff]  }
  0xf3   :  { %4977 = vmatpush1.bf16.msra.mxu0 %v7492_v12  ;;  %5469 = vmatpush1.bf16.msra.mxu1 %v7495_v52  ;;  %v7584_v12 = vld [vmem:[%s10938_s1 + $0x964] ss:$16 sps:$4 sm:$0xff]   ;;  %v7587_v52 = vld [vmem:[%s10938_s1 + $0x96c] ss:$16 sps:$4 sm:$0xff]  }
  0xf4   :  { %4978 = vmatprep.subr.bf16.mxu0 %v7500_v15  ;;  %5470 = vmatprep.subr.bf16.mxu1 %v7503_v16  ;;  %v7582_v15 = vld [vmem:[%s10938_s1 + $0x960] ss:$16 sps:$4 sm:$0xff]   ;;  %v7585_v16 = vld [vmem:[%s10938_s1 + $0x968] ss:$16 sps:$4 sm:$0xff]  }
  0xf7   :  { %4979 = vmatpush1.bf16.msra.mxu0 %v7498_v17  ;;  %5471 = vmatpush1.bf16.msra.mxu1 %v7501_v18  ;;  %v7590_v17 = vld [vmem:[%s10938_s1 + $0x984] ss:$16 sps:$4 sm:$0xff]   ;;  %v7593_v18 = vld [vmem:[%s10938_s1 + $0x98c] ss:$16 sps:$4 sm:$0xff]  }
  0xf8   :  { %4980 = vmatprep.subr.bf16.mxu0 %v7506_v19  ;;  %5472 = vmatprep.subr.bf16.mxu1 %v7509_v20  ;;  %v7588_v19 = vld [vmem:[%s10938_s1 + $0x980] ss:$16 sps:$4 sm:$0xff]   ;;  %v7591_v20 = vld [vmem:[%s10938_s1 + $0x988] ss:$16 sps:$4 sm:$0xff]  }
  0xfb   :  { %4981 = vmatpush1.bf16.msra.mxu0 %v7504_v22  ;;  %5473 = vmatpush1.bf16.msra.mxu1 %v7507_v23  ;;  %v7596_v22 = vld [vmem:[%s10938_s1 + $0x9a4] ss:$16 sps:$4 sm:$0xff]   ;;  %v7599_v23 = vld [vmem:[%s10938_s1 + $0x9ac] ss:$16 sps:$4 sm:$0xff]  }
  0xfc   :  { %4982 = vmatprep.subr.bf16.mxu0 %v7512_v24  ;;  %5474 = vmatprep.subr.bf16.mxu1 %v7515_v13  ;;  %v7594_v24 = vld [vmem:[%s10938_s1 + $0x9a0] ss:$16 sps:$4 sm:$0xff]   ;;  %v7597_v13 = vld [vmem:[%s10938_s1 + $0x9a8] ss:$16 sps:$4 sm:$0xff]  }
  0xff   :  { %4983 = vmatpush1.bf16.msra.mxu0 %v7510_v27  ;;  %5475 = vmatpush1.bf16.msra.mxu1 %v7513_v28  ;;  %v7602_v27 = vld [vmem:[%s10938_s1 + $0x9c4] ss:$16 sps:$4 sm:$0xff]   ;;  %v7605_v28 = vld [vmem:[%s10938_s1 + $0x9cc] ss:$16 sps:$4 sm:$0xff]  }
 0x100   :  { %4993 = vmatprep.subr.bf16.mxu0 %v7518_v29  ;;  %5485 = vmatprep.subr.bf16.mxu1 %v7521_v14  ;;  %v7600_v29 = vld [vmem:[%s10938_s1 + $0x9c0] ss:$16 sps:$4 sm:$0xff]   ;;  %v7603_v14 = vld [vmem:[%s10938_s1 + $0x9c8] ss:$16 sps:$4 sm:$0xff]  }
 0x102   :  { %4985 = vmatmul.mubr.bf16.vlgmr.msra.gmra.mrb[0].mxu0 %v864_v31  ;;  %5477 = vmatmul.mubr.bf16.vlgmr.msra.gmra.mrb[0].mxu1 %v864_v31  ;;  %v7611_v31 = vld [vmem:[%s10938_s1 + $0x9ec] ss:$16 sps:$4 sm:$0xff]  }
 0x103   :  { %4994 = vmatpush1.bf16.msra.mxu0 %v7516_v25  ;;  %5486 = vmatpush1.bf16.msra.mxu1 %v7519_v32  ;;  %v7606_v25 = vld [vmem:[%s10938_s1 + $0x9e0] ss:$16 sps:$4 sm:$0xff]   ;;  %v7609_v32 = vld [vmem:[%s10938_s1 + $0x9e8] ss:$16 sps:$4 sm:$0xff]  }
 0x104   :  { %4995 = vmatprep.subr.bf16.mxu0 %v7524_v33  ;;  %5487 = vmatprep.subr.bf16.mxu1 %v7527_v26  ;;  %v7614_v33 = vld [vmem:[%s10938_s1 + $0xa04] ss:$16 sps:$4 sm:$0xff]   ;;  %v7617_v26 = vld [vmem:[%s10938_s1 + $0xa0c] ss:$16 sps:$4 sm:$0xff]  }
 0x105   :  { %5025 = vmatprep.mubr.bf16.mxu0 %v9216_v34  ;;  %5517 = vmatprep.mubr.bf16.mxu1 %v9216_v34 }
 0x107   :  { %4996 = vmatpush1.bf16.msra.mxu0 %v7522_v35  ;;  %5488 = vmatpush1.bf16.msra.mxu1 %v7525_v36  ;;  %v9402_v35 = vrot.slane %v9173_v21, %v8515_v49  ;;  %v7612_v36 = vld [vmem:[%s10938_s1 + $0xa00] ss:$16 sps:$4 sm:$0xff]   ;;  %v7623_v21 = vld [vmem:[%s10938_s1 + $0xa2c] ss:$16 sps:$4 sm:$0xff]  }
 0x108   :  { %4997 = vmatprep.subr.bf16.mxu0 %v7530_v37  ;;  %5489 = vmatprep.subr.bf16.mxu1 %v7533_v38  ;;  %v7615_v37 = vld [vmem:[%s10938_s1 + $0xa08] ss:$16 sps:$4 sm:$0xff]   ;;  %v7620_v38 = vld [vmem:[%s10938_s1 + $0xa24] ss:$16 sps:$4 sm:$0xff]  }
 0x10b   :  { %4998 = vmatpush1.bf16.msra.mxu0 %v7528_v39  ;;  %5490 = vmatpush1.bf16.msra.mxu1 %v7531_v40  ;;  %v914_v39 = vcombine.high %v9216_v34, %v9216_v34  ;;  %v7618_v40 = vld [vmem:[%s10938_s1 + $0xa20] ss:$16 sps:$4 sm:$0xff]   ;;  %v7626_v34 = vld [vmem:[%s10938_s1 + $0xa44] ss:$16 sps:$4 sm:$0xff]  }
 0x10c   :  { %4999 = vmatprep.subr.bf16.mxu0 %v7536_v41  ;;  %5491 = vmatprep.subr.bf16.mxu1 %v7539_v43  ;;  %v7621_v41 = vld [vmem:[%s10938_s1 + $0xa28] ss:$16 sps:$4 sm:$0xff]   ;;  %v7629_v43 = vld [vmem:[%s10938_s1 + $0xa4c] ss:$16 sps:$4 sm:$0xff]  }
 0x10f   :  { %5000 = vmatpush1.bf16.msra.mxu0 %v7534_v44  ;;  %5492 = vmatpush1.bf16.msra.mxu1 %v7537_v45  ;;  %v7624_v44 = vld [vmem:[%s10938_s1 + $0xa40] ss:$16 sps:$4 sm:$0xff]   ;;  %v7627_v45 = vld [vmem:[%s10938_s1 + $0xa48] ss:$16 sps:$4 sm:$0xff]  }
 0x110   :  { %5001 = vmatprep.subr.bf16.mxu0 %v7542_v46  ;;  %5493 = vmatprep.subr.bf16.mxu1 %v7545_v47  ;;  %v7632_v46 = vld [vmem:[%s10938_s1 + $0xa64] ss:$16 sps:$4 sm:$0xff]   ;;  %v7635_v47 = vld [vmem:[%s10938_s1 + $0xa6c] ss:$16 sps:$4 sm:$0xff]  }
 0x113   :  { %5002 = vmatpush1.bf16.msra.mxu0 %v7540_v48  ;;  %5494 = vmatpush1.bf16.msra.mxu1 %v7543_v50  ;;  %v7630_v48 = vld [vmem:[%s10938_s1 + $0xa60] ss:$16 sps:$4 sm:$0xff]   ;;  %v7633_v50 = vld [vmem:[%s10938_s1 + $0xa68] ss:$16 sps:$4 sm:$0xff]  }
 0x114   :  { %5003 = vmatprep.subr.bf16.mxu0 %v7548_v51  ;;  %5495 = vmatprep.subr.bf16.mxu1 %v7551_v53  ;;  %v7638_v51 = vld [vmem:[%s10938_s1 + $0xa84] ss:$16 sps:$4 sm:$0xff]   ;;  %v7641_v53 = vld [vmem:[%s10938_s1 + $0xa8c] ss:$16 sps:$4 sm:$0xff]  }
 0x117   :  { %5004 = vmatpush1.bf16.msra.mxu0 %v7546_v54  ;;  %5496 = vmatpush1.bf16.msra.mxu1 %v7549_v55  ;;  %v7636_v54 = vld [vmem:[%s10938_s1 + $0xa80] ss:$16 sps:$4 sm:$0xff]   ;;  %v7639_v55 = vld [vmem:[%s10938_s1 + $0xa88] ss:$16 sps:$4 sm:$0xff]  }
 0x118   :  { %5005 = vmatprep.subr.bf16.mxu0 %v7554_v56  ;;  %5497 = vmatprep.subr.bf16.mxu1 %v7557_v57  ;;  %v7644_v56 = vld [vmem:[%s10938_s1 + $0xaa4] ss:$16 sps:$4 sm:$0xff]   ;;  %v7647_v57 = vld [vmem:[%s10938_s1 + $0xaac] ss:$16 sps:$4 sm:$0xff]  }
 0x11b   :  { %5006 = vmatpush1.bf16.msra.mxu0 %v7552_v58  ;;  %5498 = vmatpush1.bf16.msra.mxu1 %v7555_v59  ;;  %v7642_v58 = vld [vmem:[%s10938_s1 + $0xaa0] ss:$16 sps:$4 sm:$0xff]   ;;  %v7645_v59 = vld [vmem:[%s10938_s1 + $0xaa8] ss:$16 sps:$4 sm:$0xff]  }
 0x11c   :  { %5007 = vmatprep.subr.bf16.mxu0 %v7560_v60  ;;  %5499 = vmatprep.subr.bf16.mxu1 %v7563_v61  ;;  %v7650_v60 = vld [vmem:[%s10938_s1 + $0xac4] ss:$16 sps:$4 sm:$0xff]   ;;  %v7653_v61 = vld [vmem:[%s10938_s1 + $0xacc] ss:$16 sps:$4 sm:$0xff]  }
 0x11f   :  { %5008 = vmatpush1.bf16.msra.mxu0 %v7558_v62  ;;  %5500 = vmatpush1.bf16.msra.mxu1 %v7561_v63  ;;  %v7648_v62 = vld [vmem:[%s10938_s1 + $0xac0] ss:$16 sps:$4 sm:$0xff]   ;;  %v7651_v63 = vld [vmem:[%s10938_s1 + $0xac8] ss:$16 sps:$4 sm:$0xff]  }
 0x120   :  { %5009 = vmatprep.subr.bf16.mxu0 %v7566_v0  ;;  %5501 = vmatprep.subr.bf16.mxu1 %v7569_v1  ;;  %v7656_v0 = vld [vmem:[%s10938_s1 + $0xae4] ss:$16 sps:$4 sm:$0xff]   ;;  %v7659_v1 = vld [vmem:[%s10938_s1 + $0xaec] ss:$16 sps:$4 sm:$0xff]  }
 0x123   :  { %5010 = vmatpush1.bf16.msra.mxu0 %v7564_v2  ;;  %5502 = vmatpush1.bf16.msra.mxu1 %v7567_v3  ;;  %v7654_v2 = vld [vmem:[%s10938_s1 + $0xae0] ss:$16 sps:$4 sm:$0xff]   ;;  %v7657_v3 = vld [vmem:[%s10938_s1 + $0xae8] ss:$16 sps:$4 sm:$0xff]  }
 0x124   :  { %5011 = vmatprep.subr.bf16.mxu0 %v7572_v4  ;;  %5503 = vmatprep.subr.bf16.mxu1 %v7575_v5  ;;  %v7662_v4 = vld [vmem:[%s10938_s1 + $0xb04] ss:$16 sps:$4 sm:$0xff]   ;;  %v7665_v5 = vld [vmem:[%s10938_s1 + $0xb0c] ss:$16 sps:$4 sm:$0xff]  }
 0x127   :  { %5012 = vmatpush1.bf16.msra.mxu0 %v7570_v6  ;;  %5504 = vmatpush1.bf16.msra.mxu1 %v7573_v7  ;;  %v7660_v6 = vld [vmem:[%s10938_s1 + $0xb00] ss:$16 sps:$4 sm:$0xff]   ;;  %v7663_v7 = vld [vmem:[%s10938_s1 + $0xb08] ss:$16 sps:$4 sm:$0xff]  }
 0x128   :  { %5013 = vmatprep.subr.bf16.mxu0 %v7578_v8  ;;  %5505 = vmatprep.subr.bf16.mxu1 %v7581_v9  ;;  %v7668_v8 = vld [vmem:[%s10938_s1 + $0xb24] ss:$16 sps:$4 sm:$0xff]   ;;  %v7671_v9 = vld [vmem:[%s10938_s1 + $0xb2c] ss:$16 sps:$4 sm:$0xff]  }
 0x12b   :  { %5014 = vmatpush1.bf16.msra.mxu0 %v7576_v10  ;;  %5506 = vmatpush1.bf16.msra.mxu1 %v7579_v11  ;;  %v7666_v10 = vld [vmem:[%s10938_s1 + $0xb20] ss:$16 sps:$4 sm:$0xff]   ;;  %v7669_v11 = vld [vmem:[%s10938_s1 + $0xb28] ss:$16 sps:$4 sm:$0xff]  }
 0x12c   :  { %5015 = vmatprep.subr.bf16.mxu0 %v7584_v12  ;;  %5507 = vmatprep.subr.bf16.mxu1 %v7587_v52  ;;  %v7674_v12 = vld [vmem:[%s10938_s1 + $0xb44] ss:$16 sps:$4 sm:$0xff]   ;;  %v7677_v52 = vld [vmem:[%s10938_s1 + $0xb4c] ss:$16 sps:$4 sm:$0xff]  }
 0x12f   :  { %5016 = vmatpush1.bf16.msra.mxu0 %v7582_v15  ;;  %5508 = vmatpush1.bf16.msra.mxu1 %v7585_v16  ;;  %v7672_v15 = vld [vmem:[%s10938_s1 + $0xb40] ss:$16 sps:$4 sm:$0xff]   ;;  %v7675_v16 = vld [vmem:[%s10938_s1 + $0xb48] ss:$16 sps:$4 sm:$0xff]  }
 0x130   :  { %5017 = vmatprep.subr.bf16.mxu0 %v7590_v17  ;;  %5509 = vmatprep.subr.bf16.mxu1 %v7593_v18  ;;  %v7680_v17 = vld [vmem:[%s10938_s1 + $0xb64] ss:$16 sps:$4 sm:$0xff]   ;;  %v7683_v18 = vld [vmem:[%s10938_s1 + $0xb6c] ss:$16 sps:$4 sm:$0xff]  }
 0x133   :  { %5018 = vmatpush1.bf16.msra.mxu0 %v7588_v19  ;;  %5510 = vmatpush1.bf16.msra.mxu1 %v7591_v20  ;;  %v7678_v19 = vld [vmem:[%s10938_s1 + $0xb60] ss:$16 sps:$4 sm:$0xff]   ;;  %v7681_v20 = vld [vmem:[%s10938_s1 + $0xb68] ss:$16 sps:$4 sm:$0xff]  }
 0x134   :  { %5019 = vmatprep.subr.bf16.mxu0 %v7596_v22  ;;  %5511 = vmatprep.subr.bf16.mxu1 %v7599_v23  ;;  %v7686_v22 = vld [vmem:[%s10938_s1 + $0xb84] ss:$16 sps:$4 sm:$0xff]   ;;  %v7689_v23 = vld [vmem:[%s10938_s1 + $0xb8c] ss:$16 sps:$4 sm:$0xff]  }
 0x137   :  { %5020 = vmatpush1.bf16.msra.mxu0 %v7594_v24  ;;  %5512 = vmatpush1.bf16.msra.mxu1 %v7597_v13  ;;  %v7684_v24 = vld [vmem:[%s10938_s1 + $0xb80] ss:$16 sps:$4 sm:$0xff]   ;;  %v7687_v13 = vld [vmem:[%s10938_s1 + $0xb88] ss:$16 sps:$4 sm:$0xff]  }
 0x138   :  { %5021 = vmatprep.subr.bf16.mxu0 %v7602_v27  ;;  %5513 = vmatprep.subr.bf16.mxu1 %v7605_v28  ;;  %v7692_v27 = vld [vmem:[%s10938_s1 + $0xba4] ss:$16 sps:$4 sm:$0xff]   ;;  %v7695_v28 = vld [vmem:[%s10938_s1 + $0xbac] ss:$16 sps:$4 sm:$0xff]  }
 0x13b   :  { %5022 = vmatpush1.bf16.msra.mxu0 %v7600_v29  ;;  %5514 = vmatpush1.bf16.msra.mxu1 %v7603_v14  ;;  %v7690_v29 = vld [vmem:[%s10938_s1 + $0xba0] ss:$16 sps:$4 sm:$0xff]   ;;  %v7693_v14 = vld [vmem:[%s10938_s1 + $0xba8] ss:$16 sps:$4 sm:$0xff]  }
 0x13c   :  { %5023 = vmatprep.subr.bf16.mxu0 %v7608_v30  ;;  %5515 = vmatprep.subr.bf16.mxu1 %v7611_v31  ;;  %v7698_v30 = vld [vmem:[%s10938_s1 + $0xbc4] ss:$16 sps:$4 sm:$0xff]   ;;  %v7701_v31 = vld [vmem:[%s10938_s1 + $0xbcc] ss:$16 sps:$4 sm:$0xff]  }
 0x13f   :  { %5024 = vmatpush1.bf16.msra.mxu0 %v7606_v25  ;;  %5516 = vmatpush1.bf16.msra.mxu1 %v7609_v32  ;;  %v8322_v25 = vld [vmem:[%s10937_s0 + $0x8] sm:$0xff] }
 0x140   :  { %5034 = vmatprep.subr.bf16.mxu0 %v7614_v33  ;;  %5526 = vmatprep.subr.bf16.mxu1 %v7617_v26  ;;  %v867_v32 = vcombine.high %v8322_v25, %v8322_v25  ;;  %v7696_v33 = vld [vmem:[%s10938_s1 + $0xbc0] ss:$16 sps:$4 sm:$0xff]   ;;  %v7699_v26 = vld [vmem:[%s10938_s1 + $0xbc8] ss:$16 sps:$4 sm:$0xff]  }
 0x141   :  { %v7780_v25 = vld [vmem:[%s10938_s1 + $0xd80] ss:$16 sps:$4 sm:$0xff]  }
 0x142   :  { %5026 = vmatmul.mubr.bf16.vlgmr.msra.gmra.mrb[0].mxu0 %v9402_v35  ;;  %5518 = vmatmul.mubr.bf16.vlgmr.msra.gmra.mrb[0].mxu1 %v9402_v35 }
 0x143   :  { %5035 = vmatpush1.bf16.msra.mxu0 %v7612_v36  ;;  %5527 = vmatpush1.bf16.msra.mxu1 %v7615_v37  ;;  %v7704_v36 = vld [vmem:[%s10938_s1 + $0xbe4] ss:$16 sps:$4 sm:$0xff]   ;;  %v7707_v37 = vld [vmem:[%s10938_s1 + $0xbec] ss:$16 sps:$4 sm:$0xff]  }
 0x144   :  { %5036 = vmatprep.subr.bf16.mxu0 %v7620_v38  ;;  %5528 = vmatprep.subr.bf16.mxu1 %v7623_v21  ;;  %v9592_v38 = vrot.slane %v867_v32, %v8515_v49  ;;  %v7702_v21 = vld [vmem:[%s10938_s1 + $0xbe0] ss:$16 sps:$4 sm:$0xff]   ;;  %v7783_v32 = vld [vmem:[%s10938_s1 + $0xd88] ss:$16 sps:$4 sm:$0xff]  }
 0x145   :  { %5066 = vmatprep.mubr.bf16.mxu0 %v914_v39  ;;  %5558 = vmatprep.mubr.bf16.mxu1 %v914_v39  ;;  %v7705_v39 = vld [vmem:[%s10938_s1 + $0xbe8] ss:$16 sps:$4 sm:$0xff]  }
 0x147   :  { %5037 = vmatpush1.bf16.msra.mxu0 %v7618_v40  ;;  %5529 = vmatpush1.bf16.msra.mxu1 %v7621_v41  ;;  %v7710_v40 = vld [vmem:[%s10938_s1 + $0xc04] ss:$16 sps:$4 sm:$0xff]   ;;  %v7713_v41 = vld [vmem:[%s10938_s1 + $0xc0c] ss:$16 sps:$4 sm:$0xff]  }
 0x148   :  { %5038 = vmatprep.subr.bf16.mxu0 %v7626_v34  ;;  %5530 = vmatprep.subr.bf16.mxu1 %v7629_v43  ;;  %v883_v34 = vcombine.high %v9592_v38, %v9592_v38  ;;  %v912_v43 = vcombine.high %v9402_v35, %v9402_v35  ;;  %v7719_v35 = vld [vmem:[%s10938_s1 + $0xc2c] ss:$16 sps:$4 sm:$0xff]  }
 0x14b   :  { %5039 = vmatpush1.bf16.msra.mxu0 %v7624_v44  ;;  %5531 = vmatpush1.bf16.msra.mxu1 %v7627_v45  ;;  %v7708_v44 = vld [vmem:[%s10938_s1 + $0xc00] ss:$16 sps:$4 sm:$0xff]   ;;  %v7711_v45 = vld [vmem:[%s10938_s1 + $0xc08] ss:$16 sps:$4 sm:$0xff]  }
 0x14c   :  { %5040 = vmatprep.subr.bf16.mxu0 %v7632_v46  ;;  %5532 = vmatprep.subr.bf16.mxu1 %v7635_v47  ;;  %v7716_v46 = vld [vmem:[%s10938_s1 + $0xc24] ss:$16 sps:$4 sm:$0xff]   ;;  %v9623_v47 = vrot.slane %v883_v34, %v8515_v49 }
 0x14d   :  { %v7800_v34 = vld [vmem:[%s10938_s1 + $0xde4] ss:$16 sps:$4 sm:$0xff]  }
 0x14f   :  { %5041 = vmatpush1.bf16.msra.mxu0 %v7630_v48  ;;  %5533 = vmatpush1.bf16.msra.mxu1 %v7633_v50  ;;  %v7714_v48 = vld [vmem:[%s10938_s1 + $0xc20] ss:$16 sps:$4 sm:$0xff]   ;;  %v7717_v50 = vld [vmem:[%s10938_s1 + $0xc28] ss:$16 sps:$4 sm:$0xff]  }
 0x150   :  { %5042 = vmatprep.subr.bf16.mxu0 %v7638_v51  ;;  %5534 = vmatprep.subr.bf16.mxu1 %v7641_v53  ;;  %v7722_v51 = vld [vmem:[%s10938_s1 + $0xc44] ss:$16 sps:$4 sm:$0xff]   ;;  %v7725_v53 = vld [vmem:[%s10938_s1 + $0xc4c] ss:$16 sps:$4 sm:$0xff]  }
 0x153   :  { %5043 = vmatpush1.bf16.msra.mxu0 %v7636_v54  ;;  %5535 = vmatpush1.bf16.msra.mxu1 %v7639_v55  ;;  %v7720_v54 = vld [vmem:[%s10938_s1 + $0xc40] ss:$16 sps:$4 sm:$0xff]   ;;  %v7723_v55 = vld [vmem:[%s10938_s1 + $0xc48] ss:$16 sps:$4 sm:$0xff]  }
 0x154   :  { %5044 = vmatprep.subr.bf16.mxu0 %v7644_v56  ;;  %5536 = vmatprep.subr.bf16.mxu1 %v7647_v57  ;;  %v7728_v56 = vld [vmem:[%s10938_s1 + $0xc64] ss:$16 sps:$4 sm:$0xff]   ;;  %v7731_v57 = vld [vmem:[%s10938_s1 + $0xc6c] ss:$16 sps:$4 sm:$0xff]  }
 0x157   :  { %5045 = vmatpush1.bf16.msra.mxu0 %v7642_v58  ;;  %5537 = vmatpush1.bf16.msra.mxu1 %v7645_v59  ;;  %v7726_v58 = vld [vmem:[%s10938_s1 + $0xc60] ss:$16 sps:$4 sm:$0xff]   ;;  %v7729_v59 = vld [vmem:[%s10938_s1 + $0xc68] ss:$16 sps:$4 sm:$0xff]  }
 0x158   :  { %5046 = vmatprep.subr.bf16.mxu0 %v7650_v60  ;;  %5538 = vmatprep.subr.bf16.mxu1 %v7653_v61  ;;  %v7734_v60 = vld [vmem:[%s10938_s1 + $0xc84] ss:$16 sps:$4 sm:$0xff]   ;;  %v7737_v61 = vld [vmem:[%s10938_s1 + $0xc8c] ss:$16 sps:$4 sm:$0xff]  }
 0x15b   :  { %5047 = vmatpush1.bf16.msra.mxu0 %v7648_v62  ;;  %5539 = vmatpush1.bf16.msra.mxu1 %v7651_v63  ;;  %v7732_v62 = vld [vmem:[%s10938_s1 + $0xc80] ss:$16 sps:$4 sm:$0xff]   ;;  %v7735_v63 = vld [vmem:[%s10938_s1 + $0xc88] ss:$16 sps:$4 sm:$0xff]  }
 0x15c   :  { %5048 = vmatprep.subr.bf16.mxu0 %v7656_v0  ;;  %5540 = vmatprep.subr.bf16.mxu1 %v7659_v1  ;;  %v7740_v0 = vld [vmem:[%s10938_s1 + $0xca4] ss:$16 sps:$4 sm:$0xff]   ;;  %v7743_v1 = vld [vmem:[%s10938_s1 + $0xcac] ss:$16 sps:$4 sm:$0xff]  }
 0x15f   :  { %5049 = vmatpush1.bf16.msra.mxu0 %v7654_v2  ;;  %5541 = vmatpush1.bf16.msra.mxu1 %v7657_v3  ;;  %v7738_v2 = vld [vmem:[%s10938_s1 + $0xca0] ss:$16 sps:$4 sm:$0xff]   ;;  %v7741_v3 = vld [vmem:[%s10938_s1 + $0xca8] ss:$16 sps:$4 sm:$0xff]  }
 0x160   :  { %5050 = vmatprep.subr.bf16.mxu0 %v7662_v4  ;;  %5542 = vmatprep.subr.bf16.mxu1 %v7665_v5  ;;  %v7746_v4 = vld [vmem:[%s10938_s1 + $0xcc4] ss:$16 sps:$4 sm:$0xff]   ;;  %v7749_v5 = vld [vmem:[%s10938_s1 + $0xccc] ss:$16 sps:$4 sm:$0xff]  }
 0x163   :  { %5051 = vmatpush1.bf16.msra.mxu0 %v7660_v6  ;;  %5543 = vmatpush1.bf16.msra.mxu1 %v7663_v7  ;;  %v7744_v6 = vld [vmem:[%s10938_s1 + $0xcc0] ss:$16 sps:$4 sm:$0xff]   ;;  %v7747_v7 = vld [vmem:[%s10938_s1 + $0xcc8] ss:$16 sps:$4 sm:$0xff]  }
 0x164   :  { %5052 = vmatprep.subr.bf16.mxu0 %v7668_v8  ;;  %5544 = vmatprep.subr.bf16.mxu1 %v7671_v9  ;;  %v7752_v8 = vld [vmem:[%s10938_s1 + $0xce4] ss:$16 sps:$4 sm:$0xff]   ;;  %v7755_v9 = vld [vmem:[%s10938_s1 + $0xcec] ss:$16 sps:$4 sm:$0xff]  }
 0x167   :  { %5053 = vmatpush1.bf16.msra.mxu0 %v7666_v10  ;;  %5545 = vmatpush1.bf16.msra.mxu1 %v7669_v11  ;;  %v7750_v10 = vld [vmem:[%s10938_s1 + $0xce0] ss:$16 sps:$4 sm:$0xff]   ;;  %v7753_v11 = vld [vmem:[%s10938_s1 + $0xce8] ss:$16 sps:$4 sm:$0xff]  }
 0x168   :  { %5054 = vmatprep.subr.bf16.mxu0 %v7674_v12  ;;  %5546 = vmatprep.subr.bf16.mxu1 %v7677_v52  ;;  %v7758_v12 = vld [vmem:[%s10938_s1 + $0xd04] ss:$16 sps:$4 sm:$0xff]   ;;  %v7761_v52 = vld [vmem:[%s10938_s1 + $0xd0c] ss:$16 sps:$4 sm:$0xff]  }
 0x16b   :  { %5055 = vmatpush1.bf16.msra.mxu0 %v7672_v15  ;;  %5547 = vmatpush1.bf16.msra.mxu1 %v7675_v16  ;;  %v7756_v15 = vld [vmem:[%s10938_s1 + $0xd00] ss:$16 sps:$4 sm:$0xff]   ;;  %v7759_v16 = vld [vmem:[%s10938_s1 + $0xd08] ss:$16 sps:$4 sm:$0xff]  }
 0x16c   :  { %5056 = vmatprep.subr.bf16.mxu0 %v7680_v17  ;;  %5548 = vmatprep.subr.bf16.mxu1 %v7683_v18  ;;  %v7764_v17 = vld [vmem:[%s10938_s1 + $0xd24] ss:$16 sps:$4 sm:$0xff]   ;;  %v7767_v18 = vld [vmem:[%s10938_s1 + $0xd2c] ss:$16 sps:$4 sm:$0xff]  }
 0x16f   :  { %5057 = vmatpush1.bf16.msra.mxu0 %v7678_v19  ;;  %5549 = vmatpush1.bf16.msra.mxu1 %v7681_v20  ;;  %v7762_v19 = vld [vmem:[%s10938_s1 + $0xd20] ss:$16 sps:$4 sm:$0xff]   ;;  %v7765_v20 = vld [vmem:[%s10938_s1 + $0xd28] ss:$16 sps:$4 sm:$0xff]  }
 0x170   :  { %5058 = vmatprep.subr.bf16.mxu0 %v7686_v22  ;;  %5550 = vmatprep.subr.bf16.mxu1 %v7689_v23  ;;  %v7770_v22 = vld [vmem:[%s10938_s1 + $0xd44] ss:$16 sps:$4 sm:$0xff]   ;;  %v7773_v23 = vld [vmem:[%s10938_s1 + $0xd4c] ss:$16 sps:$4 sm:$0xff]  }
 0x173   :  { %5059 = vmatpush1.bf16.msra.mxu0 %v7684_v24  ;;  %5551 = vmatpush1.bf16.msra.mxu1 %v7687_v13  ;;  %v7768_v24 = vld [vmem:[%s10938_s1 + $0xd40] ss:$16 sps:$4 sm:$0xff]   ;;  %v7771_v13 = vld [vmem:[%s10938_s1 + $0xd48] ss:$16 sps:$4 sm:$0xff]  }
 0x174   :  { %5060 = vmatprep.subr.bf16.mxu0 %v7692_v27  ;;  %5552 = vmatprep.subr.bf16.mxu1 %v7695_v28  ;;  %v7776_v27 = vld [vmem:[%s10938_s1 + $0xd64] ss:$16 sps:$4 sm:$0xff]   ;;  %v7779_v28 = vld [vmem:[%s10938_s1 + $0xd6c] ss:$16 sps:$4 sm:$0xff]  }
 0x177   :  { %5061 = vmatpush1.bf16.msra.mxu0 %v7690_v29  ;;  %5553 = vmatpush1.bf16.msra.mxu1 %v7693_v14  ;;  %v7774_v29 = vld [vmem:[%s10938_s1 + $0xd60] ss:$16 sps:$4 sm:$0xff]   ;;  %v7777_v14 = vld [vmem:[%s10938_s1 + $0xd68] ss:$16 sps:$4 sm:$0xff]  }
 0x178   :  { %5062 = vmatprep.subr.bf16.mxu0 %v7698_v30  ;;  %5554 = vmatprep.subr.bf16.mxu1 %v7701_v31  ;;  %v7782_v30 = vld [vmem:[%s10938_s1 + $0xd84] ss:$16 sps:$4 sm:$0xff]   ;;  %v7785_v31 = vld [vmem:[%s10938_s1 + $0xd8c] ss:$16 sps:$4 sm:$0xff]  }
 0x17b   :  { %5063 = vmatpush1.bf16.msra.mxu0 %v7696_v33  ;;  %5555 = vmatpush1.bf16.msra.mxu1 %v7699_v26  ;;  %v7788_v33 = vld [vmem:[%s10938_s1 + $0xda4] ss:$16 sps:$4 sm:$0xff]   ;;  %v7791_v26 = vld [vmem:[%s10938_s1 + $0xdac] ss:$16 sps:$4 sm:$0xff]  }
 0x17c   :  { %5064 = vmatprep.subr.bf16.mxu0 %v7704_v36  ;;  %5556 = vmatprep.subr.bf16.mxu1 %v7707_v37  ;;  %v7786_v36 = vld [vmem:[%s10938_s1 + $0xda0] ss:$16 sps:$4 sm:$0xff]   ;;  %v7789_v37 = vld [vmem:[%s10938_s1 + $0xda8] ss:$16 sps:$4 sm:$0xff]  }
 0x17f   :  { %5065 = vmatpush1.bf16.msra.mxu0 %v7702_v21  ;;  %5557 = vmatpush1.bf16.msra.mxu1 %v7705_v39  ;;  %v7794_v21 = vld [vmem:[%s10938_s1 + $0xdc4] ss:$16 sps:$4 sm:$0xff]   ;;  %v7797_v39 = vld [vmem:[%s10938_s1 + $0xdcc] ss:$16 sps:$4 sm:$0xff]  }
 0x180   :  { %5075 = vmatprep.subr.bf16.mxu0 %v7710_v40  ;;  %5567 = vmatprep.subr.bf16.mxu1 %v7713_v41  ;;  %v7792_v40 = vld [vmem:[%s10938_s1 + $0xdc0] ss:$16 sps:$4 sm:$0xff]   ;;  %v7795_v41 = vld [vmem:[%s10938_s1 + $0xdc8] ss:$16 sps:$4 sm:$0xff]  }
 0x182   :  { %5067 = vmatmul.mubr.bf16.vlgmr.msra.gmra.mrb[0].mxu0 %v912_v43  ;;  %5559 = vmatmul.mubr.bf16.vlgmr.msra.gmra.mrb[0].mxu1 %v912_v43  ;;  %v7803_v43 = vld [vmem:[%s10938_s1 + $0xdec] ss:$16 sps:$4 sm:$0xff]  }
 0x183   :  { %5076 = vmatpush1.bf16.msra.mxu0 %v7708_v44  ;;  %5568 = vmatpush1.bf16.msra.mxu1 %v7711_v45  ;;  %v7798_v44 = vld [vmem:[%s10938_s1 + $0xde0] ss:$16 sps:$4 sm:$0xff]   ;;  %v7801_v45 = vld [vmem:[%s10938_s1 + $0xde8] ss:$16 sps:$4 sm:$0xff]  }
 0x184   :  { %5077 = vmatprep.subr.bf16.mxu0 %v7716_v46  ;;  %5569 = vmatprep.subr.bf16.mxu1 %v7719_v35  ;;  %v7807_v46 = vld [vmem:[%s10938_s1 + $0xe04] ss:$16 sps:$4 sm:$0xff]   ;;  %v7810_v35 = vld [vmem:[%s10938_s1 + $0xe0c] ss:$16 sps:$4 sm:$0xff]  }
 0x185   :  { %5107 = vmatprep.mubr.bf16.mxu0 %v9623_v47  ;;  %5599 = vmatprep.mubr.bf16.mxu1 %v9623_v47 }
 0x187   :  { %5078 = vmatpush1.bf16.msra.mxu0 %v7714_v48  ;;  %5570 = vmatpush1.bf16.msra.mxu1 %v7717_v50  ;;  %v9809_v48 = vrot.slane %v9592_v38, %v8515_v49  ;;  %v7805_v50 = vld [vmem:[%s10938_s1 + $0xe00] ss:$16 sps:$4 sm:$0xff]   ;;  %v7816_v38 = vld [vmem:[%s10938_s1 + $0xe2c] ss:$16 sps:$4 sm:$0xff]  }
 0x188   :  { %5079 = vmatprep.subr.bf16.mxu0 %v7722_v51  ;;  %5571 = vmatprep.subr.bf16.mxu1 %v7725_v53  ;;  %v7808_v51 = vld [vmem:[%s10938_s1 + $0xe08] ss:$16 sps:$4 sm:$0xff]   ;;  %v7813_v53 = vld [vmem:[%s10938_s1 + $0xe24] ss:$16 sps:$4 sm:$0xff]  }
 0x18b   :  { %5080 = vmatpush1.bf16.msra.mxu0 %v7720_v54  ;;  %5572 = vmatpush1.bf16.msra.mxu1 %v7723_v55  ;;  %v915_v54 = vcombine.high %v9623_v47, %v9623_v47  ;;  %v7811_v55 = vld [vmem:[%s10938_s1 + $0xe20] ss:$16 sps:$4 sm:$0xff]   ;;  %v7819_v47 = vld [vmem:[%s10938_s1 + $0xe44] ss:$16 sps:$4 sm:$0xff]  }
 0x18c   :  { %5081 = vmatprep.subr.bf16.mxu0 %v7728_v56  ;;  %5573 = vmatprep.subr.bf16.mxu1 %v7731_v57  ;;  %v7814_v56 = vld [vmem:[%s10938_s1 + $0xe28] ss:$16 sps:$4 sm:$0xff]   ;;  %v7822_v57 = vld [vmem:[%s10938_s1 + $0xe4c] ss:$16 sps:$4 sm:$0xff]  }
 0x18f   :  { %5082 = vmatpush1.bf16.msra.mxu0 %v7726_v58  ;;  %5574 = vmatpush1.bf16.msra.mxu1 %v7729_v59  ;;  %v7817_v58 = vld [vmem:[%s10938_s1 + $0xe40] ss:$16 sps:$4 sm:$0xff]   ;;  %v7820_v59 = vld [vmem:[%s10938_s1 + $0xe48] ss:$16 sps:$4 sm:$0xff]  }
 0x190   :  { %5083 = vmatprep.subr.bf16.mxu0 %v7734_v60  ;;  %5575 = vmatprep.subr.bf16.mxu1 %v7737_v61  ;;  %v7825_v60 = vld [vmem:[%s10938_s1 + $0xe64] ss:$16 sps:$4 sm:$0xff]   ;;  %v7828_v61 = vld [vmem:[%s10938_s1 + $0xe6c] ss:$16 sps:$4 sm:$0xff]  }
 0x193   :  { %5084 = vmatpush1.bf16.msra.mxu0 %v7732_v62  ;;  %5576 = vmatpush1.bf16.msra.mxu1 %v7735_v63  ;;  %v7823_v62 = vld [vmem:[%s10938_s1 + $0xe60] ss:$16 sps:$4 sm:$0xff]   ;;  %v7826_v63 = vld [vmem:[%s10938_s1 + $0xe68] ss:$16 sps:$4 sm:$0xff]  }
 0x194   :  { %5085 = vmatprep.subr.bf16.mxu0 %v7740_v0  ;;  %5577 = vmatprep.subr.bf16.mxu1 %v7743_v1  ;;  %v7831_v0 = vld [vmem:[%s10938_s1 + $0xe84] ss:$16 sps:$4 sm:$0xff]   ;;  %v7834_v1 = vld [vmem:[%s10938_s1 + $0xe8c] ss:$16 sps:$4 sm:$0xff]  }
 0x197   :  { %5086 = vmatpush1.bf16.msra.mxu0 %v7738_v2  ;;  %5578 = vmatpush1.bf16.msra.mxu1 %v7741_v3  ;;  %v7829_v2 = vld [vmem:[%s10938_s1 + $0xe80] ss:$16 sps:$4 sm:$0xff]   ;;  %v7832_v3 = vld [vmem:[%s10938_s1 + $0xe88] ss:$16 sps:$4 sm:$0xff]  }
 0x198   :  { %5087 = vmatprep.subr.bf16.mxu0 %v7746_v4  ;;  %5579 = vmatprep.subr.bf16.mxu1 %v7749_v5  ;;  %v7837_v4 = vld [vmem:[%s10938_s1 + $0xea4] ss:$16 sps:$4 sm:$0xff]   ;;  %v7840_v5 = vld [vmem:[%s10938_s1 + $0xeac] ss:$16 sps:$4 sm:$0xff]  }
 0x19b   :  { %5088 = vmatpush1.bf16.msra.mxu0 %v7744_v6  ;;  %5580 = vmatpush1.bf16.msra.mxu1 %v7747_v7  ;;  %v7835_v6 = vld [vmem:[%s10938_s1 + $0xea0] ss:$16 sps:$4 sm:$0xff]   ;;  %v7838_v7 = vld [vmem:[%s10938_s1 + $0xea8] ss:$16 sps:$4 sm:$0xff]  }
 0x19c   :  { %5089 = vmatprep.subr.bf16.mxu0 %v7752_v8  ;;  %5581 = vmatprep.subr.bf16.mxu1 %v7755_v9  ;;  %v7843_v8 = vld [vmem:[%s10938_s1 + $0xec4] ss:$16 sps:$4 sm:$0xff]   ;;  %v7846_v9 = vld [vmem:[%s10938_s1 + $0xecc] ss:$16 sps:$4 sm:$0xff]  }
 0x19f   :  { %5090 = vmatpush1.bf16.msra.mxu0 %v7750_v10  ;;  %5582 = vmatpush1.bf16.msra.mxu1 %v7753_v11  ;;  %v7841_v10 = vld [vmem:[%s10938_s1 + $0xec0] ss:$16 sps:$4 sm:$0xff]   ;;  %v7844_v11 = vld [vmem:[%s10938_s1 + $0xec8] ss:$16 sps:$4 sm:$0xff]  }
 0x1a0   :  { %5091 = vmatprep.subr.bf16.mxu0 %v7758_v12  ;;  %5583 = vmatprep.subr.bf16.mxu1 %v7761_v52  ;;  %v7849_v12 = vld [vmem:[%s10938_s1 + $0xee4] ss:$16 sps:$4 sm:$0xff]   ;;  %v7852_v52 = vld [vmem:[%s10938_s1 + $0xeec] ss:$16 sps:$4 sm:$0xff]  }
 0x1a3   :  { %5092 = vmatpush1.bf16.msra.mxu0 %v7756_v15  ;;  %5584 = vmatpush1.bf16.msra.mxu1 %v7759_v16  ;;  %v7847_v15 = vld [vmem:[%s10938_s1 + $0xee0] ss:$16 sps:$4 sm:$0xff]   ;;  %v7850_v16 = vld [vmem:[%s10938_s1 + $0xee8] ss:$16 sps:$4 sm:$0xff]  }
 0x1a4   :  { %5093 = vmatprep.subr.bf16.mxu0 %v7764_v17  ;;  %5585 = vmatprep.subr.bf16.mxu1 %v7767_v18  ;;  %v7855_v17 = vld [vmem:[%s10938_s1 + $0xf04] ss:$16 sps:$4 sm:$0xff]   ;;  %v7858_v18 = vld [vmem:[%s10938_s1 + $0xf0c] ss:$16 sps:$4 sm:$0xff]  }
 0x1a7   :  { %5094 = vmatpush1.bf16.msra.mxu0 %v7762_v19  ;;  %5586 = vmatpush1.bf16.msra.mxu1 %v7765_v20  ;;  %v7853_v19 = vld [vmem:[%s10938_s1 + $0xf00] ss:$16 sps:$4 sm:$0xff]   ;;  %v7856_v20 = vld [vmem:[%s10938_s1 + $0xf08] ss:$16 sps:$4 sm:$0xff]  }
 0x1a8   :  { %5095 = vmatprep.subr.bf16.mxu0 %v7770_v22  ;;  %5587 = vmatprep.subr.bf16.mxu1 %v7773_v23  ;;  %v7861_v22 = vld [vmem:[%s10938_s1 + $0xf24] ss:$16 sps:$4 sm:$0xff]   ;;  %v7864_v23 = vld [vmem:[%s10938_s1 + $0xf2c] ss:$16 sps:$4 sm:$0xff]  }
 0x1ab   :  { %5096 = vmatpush1.bf16.msra.mxu0 %v7768_v24  ;;  %5588 = vmatpush1.bf16.msra.mxu1 %v7771_v13 }
 0x1ac   :  { %5097 = vmatprep.subr.bf16.mxu0 %v7776_v27  ;;  %5589 = vmatprep.subr.bf16.mxu1 %v7779_v28 }
 0x1af   :  { %5098 = vmatpush1.bf16.msra.mxu0 %v7774_v29  ;;  %5590 = vmatpush1.bf16.msra.mxu1 %v7777_v14 }
 0x1b0   :  { %5099 = vmatprep.subr.bf16.mxu0 %v7782_v30  ;;  %5591 = vmatprep.subr.bf16.mxu1 %v7785_v31 }
 0x1b3   :  { %5100 = vmatpush1.bf16.msra.mxu0 %v7780_v25  ;;  %5592 = vmatpush1.bf16.msra.mxu1 %v7783_v32 }
 0x1b4   :  { %5101 = vmatprep.subr.bf16.mxu0 %v7788_v33  ;;  %5593 = vmatprep.subr.bf16.mxu1 %v7791_v26 }
 0x1b7   :  { %5102 = vmatpush1.bf16.msra.mxu0 %v7786_v36  ;;  %5594 = vmatpush1.bf16.msra.mxu1 %v7789_v37 }
 0x1b8   :  { %5103 = vmatprep.subr.bf16.mxu0 %v7794_v21  ;;  %5595 = vmatprep.subr.bf16.mxu1 %v7797_v39 }
 0x1bb   :  { %5104 = vmatpush1.bf16.msra.mxu0 %v7792_v40  ;;  %5596 = vmatpush1.bf16.msra.mxu1 %v7795_v41 }
 0x1bc   :  { %5105 = vmatprep.subr.bf16.mxu0 %v7800_v34  ;;  %5597 = vmatprep.subr.bf16.mxu1 %v7803_v43 }
 0x1bf   :  { %5106 = vmatpush1.bf16.msra.mxu0 %v7798_v44  ;;  %5598 = vmatpush1.bf16.msra.mxu1 %v7801_v45 }
 0x1c0   :  { %5116 = vmatprep.subr.bf16.mxu0 %v7807_v46  ;;  %5608 = vmatprep.subr.bf16.mxu1 %v7810_v35 }
 0x1c2   :  { %5108 = vmatmul.mubr.bf16.vlgmr.msra.gmra.mrb[0].mxu0 %v9809_v48  ;;  %5600 = vmatmul.mubr.bf16.vlgmr.msra.gmra.mrb[0].mxu1 %v9809_v48 }
 0x1c3   :  { %5117 = vmatpush1.bf16.msra.mxu0 %v7805_v50  ;;  %5609 = vmatpush1.bf16.msra.mxu1 %v7808_v51 }
 0x1c4   :  { %5118 = vmatprep.subr.bf16.mxu0 %v7813_v53  ;;  %5610 = vmatprep.subr.bf16.mxu1 %v7816_v38 }
 0x1c5   :  { %5148 = vmatprep.mubr.bf16.mxu0 %v915_v54  ;;  %5640 = vmatprep.mubr.bf16.mxu1 %v915_v54 }
 0x1c7   :  { %5119 = vmatpush1.bf16.msra.mxu0 %v7811_v55  ;;  %5611 = vmatpush1.bf16.msra.mxu1 %v7814_v56 }
 0x1c8   :  { %5120 = vmatprep.subr.bf16.mxu0 %v7819_v47  ;;  %5612 = vmatprep.subr.bf16.mxu1 %v7822_v57 }
 0x1cb   :  { %5121 = vmatpush1.bf16.msra.mxu0 %v7817_v58  ;;  %5613 = vmatpush1.bf16.msra.mxu1 %v7820_v59 }
 0x1cc   :  { %5122 = vmatprep.subr.bf16.mxu0 %v7825_v60  ;;  %5614 = vmatprep.subr.bf16.mxu1 %v7828_v61 }
 0x1cf   :  { %5123 = vmatpush1.bf16.msra.mxu0 %v7823_v62  ;;  %5615 = vmatpush1.bf16.msra.mxu1 %v7826_v63 }
 0x1d0   :  { %5124 = vmatprep.subr.bf16.mxu0 %v7831_v0  ;;  %5616 = vmatprep.subr.bf16.mxu1 %v7834_v1 }
 0x1d3   :  { %5125 = vmatpush1.bf16.msra.mxu0 %v7829_v2  ;;  %5617 = vmatpush1.bf16.msra.mxu1 %v7832_v3 }
 0x1d4   :  { %5126 = vmatprep.subr.bf16.mxu0 %v7837_v4  ;;  %5618 = vmatprep.subr.bf16.mxu1 %v7840_v5 }
 0x1d7   :  { %5127 = vmatpush1.bf16.msra.mxu0 %v7835_v6  ;;  %5619 = vmatpush1.bf16.msra.mxu1 %v7838_v7 }
 0x1d8   :  { %5128 = vmatprep.subr.bf16.mxu0 %v7843_v8  ;;  %5620 = vmatprep.subr.bf16.mxu1 %v7846_v9 }
 0x1db   :  { %5129 = vmatpush1.bf16.msra.mxu0 %v7841_v10  ;;  %5621 = vmatpush1.bf16.msra.mxu1 %v7844_v11 }
 0x1dc   :  { %5130 = vmatprep.subr.bf16.mxu0 %v7849_v12  ;;  %5622 = vmatprep.subr.bf16.mxu1 %v7852_v52 }
 0x1df   :  { %5131 = vmatpush1.bf16.msra.mxu0 %v7847_v15  ;;  %5623 = vmatpush1.bf16.msra.mxu1 %v7850_v16 }
 0x1e0   :  { %5132 = vmatprep.subr.bf16.mxu0 %v7855_v17  ;;  %5624 = vmatprep.subr.bf16.mxu1 %v7858_v18 }
 0x1e1   :  { %10 = vsyncpa [#allocation3], 0  ;;  %v7859_v24 = vld [vmem:[%s10938_s1 + $0xf20] ss:$16 sps:$4 sm:$0xff]   ;;  %v7862_v13 = vld [vmem:[%s10938_s1 + $0xf28] ss:$16 sps:$4 sm:$0xff]   ;;  %v913_v47 = vcombine.high %v9809_v48, %v9809_v48 }
 0x1e2   :  { %v7867_v27 = vld [vmem:[%s10938_s1 + $0xf44] ss:$16 sps:$4 sm:$0xff]   ;;  %v7870_v28 = vld [vmem:[%s10938_s1 + $0xf4c] ss:$16 sps:$4 sm:$0xff]   ;;  %v7865_v29 = vld [vmem:[%s10938_s1 + $0xf40] ss:$16 sps:$4 sm:$0xff]  }
 0x1e3   :  { %5133 = vmatpush1.bf16.msra.mxu0 %v7853_v19  ;;  %5625 = vmatpush1.bf16.msra.mxu1 %v7856_v20  ;;  %v7868_v14 = vld [vmem:[%s10938_s1 + $0xf48] ss:$16 sps:$4 sm:$0xff]   ;;  %v7873_v30 = vld [vmem:[%s10938_s1 + $0xf64] ss:$16 sps:$4 sm:$0xff]   ;;  %v7876_v31 = vld [vmem:[%s10938_s1 + $0xf6c] ss:$16 sps:$4 sm:$0xff]  }
 0x1e4   :  { %5134 = vmatprep.subr.bf16.mxu0 %v7861_v22  ;;  %5626 = vmatprep.subr.bf16.mxu1 %v7864_v23  ;;  %v7871_v25 = vld [vmem:[%s10938_s1 + $0xf60] ss:$16 sps:$4 sm:$0xff]   ;;  %v7874_v32 = vld [vmem:[%s10938_s1 + $0xf68] ss:$16 sps:$4 sm:$0xff]   ;;  %v7879_v33 = vld [vmem:[%s10938_s1 + $0xf84] ss:$16 sps:$4 sm:$0xff]  }
 0x1e5   :  { %v7882_v26 = vld [vmem:[%s10938_s1 + $0xf8c] ss:$16 sps:$4 sm:$0xff]   ;;  %v7877_v36 = vld [vmem:[%s10938_s1 + $0xf80] ss:$16 sps:$4 sm:$0xff]   ;;  %v7880_v37 = vld [vmem:[%s10938_s1 + $0xf88] ss:$16 sps:$4 sm:$0xff]  }
 0x1e6   :  { %v7885_v21 = vld [vmem:[%s10938_s1 + $0xfa4] ss:$16 sps:$4 sm:$0xff]   ;;  %v7888_v39 = vld [vmem:[%s10938_s1 + $0xfac] ss:$16 sps:$4 sm:$0xff]   ;;  %v7883_v40 = vld [vmem:[%s10938_s1 + $0xfa0] ss:$16 sps:$4 sm:$0xff]  }
 0x1e7   :  { %5135 = vmatpush1.bf16.msra.mxu0 %v7859_v24  ;;  %5627 = vmatpush1.bf16.msra.mxu1 %v7862_v13  ;;  %v7886_v41 = vld [vmem:[%s10938_s1 + $0xfa8] ss:$16 sps:$4 sm:$0xff]   ;;  %v7891_v34 = vld [vmem:[%s10938_s1 + $0xfc4] ss:$16 sps:$4 sm:$0xff]   ;;  %v7894_v43 = vld [vmem:[%s10938_s1 + $0xfcc] ss:$16 sps:$4 sm:$0xff]  }
 0x1e8   :  { %5136 = vmatprep.subr.bf16.mxu0 %v7867_v27  ;;  %5628 = vmatprep.subr.bf16.mxu1 %v7870_v28  ;;  %v9986_v44 = vld [vmem:[%s10937_s0 + $0x10] sm:$0xff]  ;;  %v7892_v46 = vld [vmem:[%s10938_s1 + $0xfc8] ss:$16 sps:$4 sm:$0xff]   ;;  %v7900_v50 = vld [vmem:[%s10938_s1 + $0xfec] ss:$16 sps:$4 sm:$0xff]   ;;  %vm6164_vm0 = vcmask 1041408  }
 0x1e9   :  { %v7889_v45 = vld [vmem:[%s10938_s1 + $0xfc0] ss:$16 sps:$4 sm:$0xff]   ;;  %v7897_v35 = vld [vmem:[%s10938_s1 + $0xfe4] ss:$16 sps:$4 sm:$0xff]   ;;  %v10002_v51 = vrot.slane %v9986_v44, %v8515_v49  ;;  %v7898_v38 = vld [vmem:[%s10938_s1 + $0xfe8] ss:$16 sps:$4 sm:$0xff]  }
 0x1ea   :  { %v7895_v53 = vld [vmem:[%s10938_s1 + $0xfe0] ss:$16 sps:$4 sm:$0xff]   ;;  %v7903_v54 = vld [vmem:[%s10938_s1 + $0x1004] ss:$16 sps:$4 sm:$0xff]   ;;  %v7906_v55 = vld [vmem:[%s10938_s1 + $0x100c] ss:$16 sps:$4 sm:$0xff]  }
 0x1eb   :  { %5137 = vmatpush1.bf16.msra.mxu0 %v7865_v29  ;;  %5629 = vmatpush1.bf16.msra.mxu1 %v7868_v14  ;;  %v931_v56 = vcombine.high %v10002_v51, %v10002_v51  ;;  %v7901_v57 = vld [vmem:[%s10938_s1 + $0x1000] ss:$16 sps:$4 sm:$0xff]   ;;  %v7904_v58 = vld [vmem:[%s10938_s1 + $0x1008] ss:$16 sps:$4 sm:$0xff]   ;;  %v7909_v59 = vld [vmem:[%s10938_s1 + $0x1024] ss:$16 sps:$4 sm:$0xff]  }
 0x1ec   :  { %5138 = vmatprep.subr.bf16.mxu0 %v7873_v30  ;;  %5630 = vmatprep.subr.bf16.mxu1 %v7876_v31  ;;  %v7912_v48 = vld [vmem:[%s10938_s1 + $0x102c] ss:$16 sps:$4 sm:$0xff]   ;;  %v7907_v61 = vld [vmem:[%s10938_s1 + $0x1020] ss:$16 sps:$4 sm:$0xff]   ;;  %v7910_v62 = vld [vmem:[%s10938_s1 + $0x1028] ss:$16 sps:$4 sm:$0xff]  }
 0x1ed   :  { %v10033_v60 = vrot.slane %v931_v56, %v8515_v49  ;;  %v7915_v63 = vld [vmem:[%s10938_s1 + $0x1044] ss:$16 sps:$4 sm:$0xff]   ;;  %v7918_v0 = vld [vmem:[%s10938_s1 + $0x104c] ss:$16 sps:$4 sm:$0xff]   ;;  %v7913_v1 = vld [vmem:[%s10938_s1 + $0x1040] ss:$16 sps:$4 sm:$0xff]  }
 0x1ee   :  { %v7916_v2 = vld [vmem:[%s10938_s1 + $0x1048] ss:$16 sps:$4 sm:$0xff]   ;;  %v7921_v3 = vld [vmem:[%s10938_s1 + $0x1064] ss:$16 sps:$4 sm:$0xff]   ;;  %v7924_v4 = vld [vmem:[%s10938_s1 + $0x106c] ss:$16 sps:$4 sm:$0xff]  }
 0x1ef   :  { %5139 = vmatpush1.bf16.msra.mxu0 %v7871_v25  ;;  %5631 = vmatpush1.bf16.msra.mxu1 %v7874_v32  ;;  %v7919_v5 = vld [vmem:[%s10938_s1 + $0x1060] ss:$16 sps:$4 sm:$0xff]   ;;  %v7922_v6 = vld [vmem:[%s10938_s1 + $0x1068] ss:$16 sps:$4 sm:$0xff]   ;;  %v7927_v7 = vld [vmem:[%s10938_s1 + $0x1084] ss:$16 sps:$4 sm:$0xff]  }
 0x1f0   :  { %5140 = vmatprep.subr.bf16.mxu0 %v7879_v33  ;;  %5632 = vmatprep.subr.bf16.mxu1 %v7882_v26  ;;  %v7930_v8 = vld [vmem:[%s10938_s1 + $0x108c] ss:$16 sps:$4 sm:$0xff]   ;;  %v7925_v9 = vld [vmem:[%s10938_s1 + $0x1080] ss:$16 sps:$4 sm:$0xff]   ;;  %v7928_v10 = vld [vmem:[%s10938_s1 + $0x1088] ss:$16 sps:$4 sm:$0xff]  }
 0x1f1   :  { %v7933_v11 = vld [vmem:[%s10938_s1 + $0x10a4] ss:$16 sps:$4 sm:$0xff]   ;;  %v7936_v12 = vld [vmem:[%s10938_s1 + $0x10ac] ss:$16 sps:$4 sm:$0xff]   ;;  %v7931_v52 = vld [vmem:[%s10938_s1 + $0x10a0] ss:$16 sps:$4 sm:$0xff]  }
 0x1f2   :  { %v7934_v15 = vld [vmem:[%s10938_s1 + $0x10a8] ss:$16 sps:$4 sm:$0xff]   ;;  %v7939_v16 = vld [vmem:[%s10938_s1 + $0x10c4] ss:$16 sps:$4 sm:$0xff]   ;;  %v7942_v17 = vld [vmem:[%s10938_s1 + $0x10cc] ss:$16 sps:$4 sm:$0xff]  }
 0x1f3   :  { %5141 = vmatpush1.bf16.msra.mxu0 %v7877_v36  ;;  %5633 = vmatpush1.bf16.msra.mxu1 %v7880_v37  ;;  %v7937_v18 = vld [vmem:[%s10938_s1 + $0x10c0] ss:$16 sps:$4 sm:$0xff]   ;;  %v7940_v19 = vld [vmem:[%s10938_s1 + $0x10c8] ss:$16 sps:$4 sm:$0xff]   ;;  %v7945_v20 = vld [vmem:[%s10938_s1 + $0x10e4] ss:$16 sps:$4 sm:$0xff]  }
 0x1f4   :  { %5142 = vmatprep.subr.bf16.mxu0 %v7885_v21  ;;  %5634 = vmatprep.subr.bf16.mxu1 %v7888_v39  ;;  %v7948_v22 = vld [vmem:[%s10938_s1 + $0x10ec] ss:$16 sps:$4 sm:$0xff]   ;;  %v7943_v23 = vld [vmem:[%s10938_s1 + $0x10e0] ss:$16 sps:$4 sm:$0xff]   ;;  %v7946_v24 = vld [vmem:[%s10938_s1 + $0x10e8] ss:$16 sps:$4 sm:$0xff]  }
 0x1f5   :  { %v7951_v13 = vld [vmem:[%s10938_s1 + $0x1104] ss:$16 sps:$4 sm:$0xff]   ;;  %v7954_v27 = vld [vmem:[%s10938_s1 + $0x110c] ss:$16 sps:$4 sm:$0xff]   ;;  %v7949_v28 = vld [vmem:[%s10938_s1 + $0x1100] ss:$16 sps:$4 sm:$0xff]  }
 0x1f6   :  { %v7952_v29 = vld [vmem:[%s10938_s1 + $0x1108] ss:$16 sps:$4 sm:$0xff]   ;;  %v7957_v14 = vld [vmem:[%s10938_s1 + $0x1124] ss:$16 sps:$4 sm:$0xff]   ;;  %v7960_v30 = vld [vmem:[%s10938_s1 + $0x112c] ss:$16 sps:$4 sm:$0xff]  }
 0x1f7   :  { %5143 = vmatpush1.bf16.msra.mxu0 %v7883_v40  ;;  %5635 = vmatpush1.bf16.msra.mxu1 %v7886_v41  ;;  %v7955_v31 = vld [vmem:[%s10938_s1 + $0x1120] ss:$16 sps:$4 sm:$0xff]   ;;  %v7958_v25 = vld [vmem:[%s10938_s1 + $0x1128] ss:$16 sps:$4 sm:$0xff]   ;;  %v7963_v32 = vld [vmem:[%s10938_s1 + $0x1144] ss:$16 sps:$4 sm:$0xff]  }
 0x1f8   :  { %5144 = vmatprep.subr.bf16.mxu0 %v7891_v34  ;;  %5636 = vmatprep.subr.bf16.mxu1 %v7894_v43  ;;  %v7966_v33 = vld [vmem:[%s10938_s1 + $0x114c] ss:$16 sps:$4 sm:$0xff]   ;;  %v7961_v26 = vld [vmem:[%s10938_s1 + $0x1140] ss:$16 sps:$4 sm:$0xff]   ;;  %v7964_v36 = vld [vmem:[%s10938_s1 + $0x1148] ss:$16 sps:$4 sm:$0xff]  }
 0x1f9   :  { %v7969_v37 = vld [vmem:[%s10938_s1 + $0x1164] ss:$16 sps:$4 sm:$0xff]   ;;  %v7972_v21 = vld [vmem:[%s10938_s1 + $0x116c] ss:$16 sps:$4 sm:$0xff]   ;;  %v7967_v39 = vld [vmem:[%s10938_s1 + $0x1160] ss:$16 sps:$4 sm:$0xff]  }
 0x1fa   :  { %v7970_v40 = vld [vmem:[%s10938_s1 + $0x1168] ss:$16 sps:$4 sm:$0xff]   ;;  %v7975_v41 = vld [vmem:[%s10938_s1 + $0x1184] ss:$16 sps:$4 sm:$0xff]   ;;  %v7978_v34 = vld [vmem:[%s10938_s1 + $0x118c] ss:$16 sps:$4 sm:$0xff]  }
 0x1fb   :  { %5145 = vmatpush1.bf16.msra.mxu0 %v7889_v45  ;;  %5637 = vmatpush1.bf16.msra.mxu1 %v7892_v46  ;;  %v7973_v43 = vld [vmem:[%s10938_s1 + $0x1180] ss:$16 sps:$4 sm:$0xff]   ;;  %v7976_v45 = vld [vmem:[%s10938_s1 + $0x1188] ss:$16 sps:$4 sm:$0xff]   ;;  %v7981_v46 = vld [vmem:[%s10938_s1 + $0x11a4] ss:$16 sps:$4 sm:$0xff]  }
 0x1fc   :  { %5146 = vmatprep.subr.bf16.mxu0 %v7897_v35  ;;  %5638 = vmatprep.subr.bf16.mxu1 %v7900_v50  ;;  %v7984_v35 = vld [vmem:[%s10938_s1 + $0x11ac] ss:$16 sps:$4 sm:$0xff]   ;;  %v7979_v50 = vld [vmem:[%s10938_s1 + $0x11a0] ss:$16 sps:$4 sm:$0xff]   ;;  %v7988_v56 = vld [vmem:[%s10938_s1 + $0x11c8] ss:$16 sps:$4 sm:$0xff]  }
 0x1ff   :  { %5147 = vmatpush1.bf16.msra.mxu0 %v7895_v53  ;;  %5639 = vmatpush1.bf16.msra.mxu1 %v7898_v38  ;;  %v7982_v53 = vld [vmem:[%s10938_s1 + $0x11a8] ss:$16 sps:$4 sm:$0xff]   ;;  %v7987_v38 = vld [vmem:[%s10938_s1 + $0x11c4] ss:$16 sps:$4 sm:$0xff]  }
 0x200   :  { %5157 = vmatprep.subr.bf16.mxu0 %v7903_v54  ;;  %5649 = vmatprep.subr.bf16.mxu1 %v7906_v55  ;;  %v7990_v54 = vld [vmem:[%s10938_s1 + $0x11cc] ss:$16 sps:$4 sm:$0xff]   ;;  %v7985_v55 = vld [vmem:[%s10938_s1 + $0x11c0] ss:$16 sps:$4 sm:$0xff]  }
 0x202   :  { %5149 = vmatmul.mubr.bf16.vlgmr.msra.gmra.mrb[0].mxu0 %v913_v47  ;;  %5641 = vmatmul.mubr.bf16.vlgmr.msra.gmra.mrb[0].mxu1 %v913_v47  ;;  %v7993_v47 = vld [vmem:[%s10938_s1 + $0x11e4] ss:$16 sps:$4 sm:$0xff]  }
 0x203   :  { %5158 = vmatpush1.bf16.msra.mxu0 %v7901_v57  ;;  %5650 = vmatpush1.bf16.msra.mxu1 %v7904_v58  ;;  %v7996_v57 = vld [vmem:[%s10938_s1 + $0x11ec] ss:$16 sps:$4 sm:$0xff]   ;;  %v7991_v58 = vld [vmem:[%s10938_s1 + $0x11e0] ss:$16 sps:$4 sm:$0xff]  }
 0x204   :  { %5159 = vmatprep.subr.bf16.mxu0 %v7909_v59  ;;  %5651 = vmatprep.subr.bf16.mxu1 %v7912_v48  ;;  %v7994_v59 = vld [vmem:[%s10938_s1 + $0x11e8] ss:$16 sps:$4 sm:$0xff]   ;;  %v7999_v48 = vld [vmem:[%s10938_s1 + $0x1204] ss:$16 sps:$4 sm:$0xff]  }
 0x205   :  { %5189 = vmatprep.mubr.bf16.mxu0 %v10033_v60  ;;  %5681 = vmatprep.mubr.bf16.mxu1 %v10033_v60 }
 0x207   :  { %5160 = vmatpush1.bf16.msra.mxu0 %v7907_v61  ;;  %5652 = vmatpush1.bf16.msra.mxu1 %v7910_v62  ;;  %v8002_v61 = vld [vmem:[%s10938_s1 + $0x120c] ss:$16 sps:$4 sm:$0xff]   ;;  %v10219_v62 = vrot.slane %v10002_v51, %v8515_v49 }
 0x208   :  { %5161 = vmatprep.subr.bf16.mxu0 %v7915_v63  ;;  %5653 = vmatprep.subr.bf16.mxu1 %v7918_v0  ;;  %v7997_v63 = vld [vmem:[%s10938_s1 + $0x1200] ss:$16 sps:$4 sm:$0xff]   ;;  %v8000_v0 = vld [vmem:[%s10938_s1 + $0x1208] ss:$16 sps:$4 sm:$0xff]   ;;  %v8008_v51 = vld [vmem:[%s10938_s1 + $0x122c] ss:$16 sps:$4 sm:$0xff]  }
 0x20b   :  { %5162 = vmatpush1.bf16.msra.mxu0 %v7913_v1  ;;  %5654 = vmatpush1.bf16.msra.mxu1 %v7916_v2  ;;  %v8005_v1 = vld [vmem:[%s10938_s1 + $0x1224] ss:$16 sps:$4 sm:$0xff]   ;;  %v963_v2 = vcombine.high %v10033_v60, %v10033_v60 }
 0x20c   :  { %5163 = vmatprep.subr.bf16.mxu0 %v7921_v3  ;;  %5655 = vmatprep.subr.bf16.mxu1 %v7924_v4  ;;  %v8003_v3 = vld [vmem:[%s10938_s1 + $0x1220] ss:$16 sps:$4 sm:$0xff]   ;;  %v8006_v4 = vld [vmem:[%s10938_s1 + $0x1228] ss:$16 sps:$4 sm:$0xff]   ;;  %v8011_v60 = vld [vmem:[%s10938_s1 + $0x1244] ss:$16 sps:$4 sm:$0xff]  }
 0x20f   :  { %5164 = vmatpush1.bf16.msra.mxu0 %v7919_v5  ;;  %5656 = vmatpush1.bf16.msra.mxu1 %v7922_v6  ;;  %v8014_v5 = vld [vmem:[%s10938_s1 + $0x124c] ss:$16 sps:$4 sm:$0xff]   ;;  %v8009_v6 = vld [vmem:[%s10938_s1 + $0x1240] ss:$16 sps:$4 sm:$0xff]  }
 0x210   :  { %5165 = vmatprep.subr.bf16.mxu0 %v7927_v7  ;;  %5657 = vmatprep.subr.bf16.mxu1 %v7930_v8  ;;  %v8012_v7 = vld [vmem:[%s10938_s1 + $0x1248] ss:$16 sps:$4 sm:$0xff]   ;;  %v8017_v8 = vld [vmem:[%s10938_s1 + $0x1264] ss:$16 sps:$4 sm:$0xff]  }
 0x213   :  { %5166 = vmatpush1.bf16.msra.mxu0 %v7925_v9  ;;  %5658 = vmatpush1.bf16.msra.mxu1 %v7928_v10  ;;  %v8020_v9 = vld [vmem:[%s10938_s1 + $0x126c] ss:$16 sps:$4 sm:$0xff]   ;;  %v8015_v10 = vld [vmem:[%s10938_s1 + $0x1260] ss:$16 sps:$4 sm:$0xff]  }
 0x214   :  { %5167 = vmatprep.subr.bf16.mxu0 %v7933_v11  ;;  %5659 = vmatprep.subr.bf16.mxu1 %v7936_v12  ;;  %v8018_v11 = vld [vmem:[%s10938_s1 + $0x1268] ss:$16 sps:$4 sm:$0xff]   ;;  %v8023_v12 = vld [vmem:[%s10938_s1 + $0x1284] ss:$16 sps:$4 sm:$0xff]  }
 0x217   :  { %5168 = vmatpush1.bf16.msra.mxu0 %v7931_v52  ;;  %5660 = vmatpush1.bf16.msra.mxu1 %v7934_v15  ;;  %v8026_v52 = vld [vmem:[%s10938_s1 + $0x128c] ss:$16 sps:$4 sm:$0xff]   ;;  %v8021_v15 = vld [vmem:[%s10938_s1 + $0x1280] ss:$16 sps:$4 sm:$0xff]  }
 0x218   :  { %5169 = vmatprep.subr.bf16.mxu0 %v7939_v16  ;;  %5661 = vmatprep.subr.bf16.mxu1 %v7942_v17  ;;  %v8024_v16 = vld [vmem:[%s10938_s1 + $0x1288] ss:$16 sps:$4 sm:$0xff]   ;;  %v8029_v17 = vld [vmem:[%s10938_s1 + $0x12a4] ss:$16 sps:$4 sm:$0xff]  }
 0x21b   :  { %5170 = vmatpush1.bf16.msra.mxu0 %v7937_v18  ;;  %5662 = vmatpush1.bf16.msra.mxu1 %v7940_v19  ;;  %v8032_v18 = vld [vmem:[%s10938_s1 + $0x12ac] ss:$16 sps:$4 sm:$0xff]   ;;  %v8027_v19 = vld [vmem:[%s10938_s1 + $0x12a0] ss:$16 sps:$4 sm:$0xff]  }
 0x21c   :  { %5171 = vmatprep.subr.bf16.mxu0 %v7945_v20  ;;  %5663 = vmatprep.subr.bf16.mxu1 %v7948_v22  ;;  %v8030_v20 = vld [vmem:[%s10938_s1 + $0x12a8] ss:$16 sps:$4 sm:$0xff]   ;;  %v8035_v22 = vld [vmem:[%s10938_s1 + $0x12c4] ss:$16 sps:$4 sm:$0xff]  }
 0x21f   :  { %5172 = vmatpush1.bf16.msra.mxu0 %v7943_v23  ;;  %5664 = vmatpush1.bf16.msra.mxu1 %v7946_v24  ;;  %v8038_v23 = vld [vmem:[%s10938_s1 + $0x12cc] ss:$16 sps:$4 sm:$0xff]   ;;  %v8033_v24 = vld [vmem:[%s10938_s1 + $0x12c0] ss:$16 sps:$4 sm:$0xff]  }
 0x220   :  { %5173 = vmatprep.subr.bf16.mxu0 %v7951_v13  ;;  %5665 = vmatprep.subr.bf16.mxu1 %v7954_v27  ;;  %v8036_v13 = vld [vmem:[%s10938_s1 + $0x12c8] ss:$16 sps:$4 sm:$0xff]   ;;  %v8041_v27 = vld [vmem:[%s10938_s1 + $0x12e4] ss:$16 sps:$4 sm:$0xff]  }
 0x223   :  { %5174 = vmatpush1.bf16.msra.mxu0 %v7949_v28  ;;  %5666 = vmatpush1.bf16.msra.mxu1 %v7952_v29  ;;  %v8044_v28 = vld [vmem:[%s10938_s1 + $0x12ec] ss:$16 sps:$4 sm:$0xff]   ;;  %v8039_v29 = vld [vmem:[%s10938_s1 + $0x12e0] ss:$16 sps:$4 sm:$0xff]  }
 0x224   :  { %5175 = vmatprep.subr.bf16.mxu0 %v7957_v14  ;;  %5667 = vmatprep.subr.bf16.mxu1 %v7960_v30  ;;  %v8042_v14 = vld [vmem:[%s10938_s1 + $0x12e8] ss:$16 sps:$4 sm:$0xff]   ;;  %v8047_v30 = vld [vmem:[%s10938_s1 + $0x1304] ss:$16 sps:$4 sm:$0xff]  }
 0x227   :  { %5176 = vmatpush1.bf16.msra.mxu0 %v7955_v31  ;;  %5668 = vmatpush1.bf16.msra.mxu1 %v7958_v25  ;;  %v8050_v31 = vld [vmem:[%s10938_s1 + $0x130c] ss:$16 sps:$4 sm:$0xff]   ;;  %v8045_v25 = vld [vmem:[%s10938_s1 + $0x1300] ss:$16 sps:$4 sm:$0xff]  }
 0x228   :  { %5177 = vmatprep.subr.bf16.mxu0 %v7963_v32  ;;  %5669 = vmatprep.subr.bf16.mxu1 %v7966_v33  ;;  %v8048_v32 = vld [vmem:[%s10938_s1 + $0x1308] ss:$16 sps:$4 sm:$0xff]   ;;  %v8053_v33 = vld [vmem:[%s10938_s1 + $0x1324] ss:$16 sps:$4 sm:$0xff]  }
 0x22b   :  { %5178 = vmatpush1.bf16.msra.mxu0 %v7961_v26  ;;  %5670 = vmatpush1.bf16.msra.mxu1 %v7964_v36  ;;  %v8056_v26 = vld [vmem:[%s10938_s1 + $0x132c] ss:$16 sps:$4 sm:$0xff]   ;;  %v8051_v36 = vld [vmem:[%s10938_s1 + $0x1320] ss:$16 sps:$4 sm:$0xff]  }
 0x22c   :  { %5179 = vmatprep.subr.bf16.mxu0 %v7969_v37  ;;  %5671 = vmatprep.subr.bf16.mxu1 %v7972_v21  ;;  %v8054_v37 = vld [vmem:[%s10938_s1 + $0x1328] ss:$16 sps:$4 sm:$0xff]   ;;  %v8059_v21 = vld [vmem:[%s10938_s1 + $0x1344] ss:$16 sps:$4 sm:$0xff]  }
 0x22f   :  { %5180 = vmatpush1.bf16.msra.mxu0 %v7967_v39  ;;  %5672 = vmatpush1.bf16.msra.mxu1 %v7970_v40  ;;  %v8062_v39 = vld [vmem:[%s10938_s1 + $0x134c] ss:$16 sps:$4 sm:$0xff]   ;;  %v8057_v40 = vld [vmem:[%s10938_s1 + $0x1340] ss:$16 sps:$4 sm:$0xff]  }
 0x230   :  { %5181 = vmatprep.subr.bf16.mxu0 %v7975_v41  ;;  %5673 = vmatprep.subr.bf16.mxu1 %v7978_v34  ;;  %v8060_v41 = vld [vmem:[%s10938_s1 + $0x1348] ss:$16 sps:$4 sm:$0xff]   ;;  %v8065_v34 = vld [vmem:[%s10938_s1 + $0x1364] ss:$16 sps:$4 sm:$0xff]  }
 0x233   :  { %5182 = vmatpush1.bf16.msra.mxu0 %v7973_v43  ;;  %5674 = vmatpush1.bf16.msra.mxu1 %v7976_v45  ;;  %v8068_v43 = vld [vmem:[%s10938_s1 + $0x136c] ss:$16 sps:$4 sm:$0xff]   ;;  %v8063_v45 = vld [vmem:[%s10938_s1 + $0x1360] ss:$16 sps:$4 sm:$0xff]  }
 0x234   :  { %5183 = vmatprep.subr.bf16.mxu0 %v7981_v46  ;;  %5675 = vmatprep.subr.bf16.mxu1 %v7984_v35  ;;  %v8066_v46 = vld [vmem:[%s10938_s1 + $0x1368] ss:$16 sps:$4 sm:$0xff]   ;;  %v8071_v35 = vld [vmem:[%s10938_s1 + $0x1384] ss:$16 sps:$4 sm:$0xff]  }
 0x237   :  { %5184 = vmatpush1.bf16.msra.mxu0 %v7979_v50  ;;  %5676 = vmatpush1.bf16.msra.mxu1 %v7982_v53  ;;  %v8074_v50 = vld [vmem:[%s10938_s1 + $0x138c] ss:$16 sps:$4 sm:$0xff]   ;;  %v8069_v53 = vld [vmem:[%s10938_s1 + $0x1380] ss:$16 sps:$4 sm:$0xff]  }
 0x238   :  { %5185 = vmatprep.subr.bf16.mxu0 %v7987_v38  ;;  %5677 = vmatprep.subr.bf16.mxu1 %v7990_v54  ;;  %v8072_v38 = vld [vmem:[%s10938_s1 + $0x1388] ss:$16 sps:$4 sm:$0xff]   ;;  %v8077_v54 = vld [vmem:[%s10938_s1 + $0x13a4] ss:$16 sps:$4 sm:$0xff]  }
 0x23b   :  { %5186 = vmatpush1.bf16.msra.mxu0 %v7985_v55  ;;  %5678 = vmatpush1.bf16.msra.mxu1 %v7988_v56  ;;  %v8080_v55 = vld [vmem:[%s10938_s1 + $0x13ac] ss:$16 sps:$4 sm:$0xff]   ;;  %v8075_v56 = vld [vmem:[%s10938_s1 + $0x13a0] ss:$16 sps:$4 sm:$0xff]  }
 0x23c   :  { %5187 = vmatprep.subr.bf16.mxu0 %v7993_v47  ;;  %5679 = vmatprep.subr.bf16.mxu1 %v7996_v57  ;;  %v8078_v47 = vld [vmem:[%s10938_s1 + $0x13a8] ss:$16 sps:$4 sm:$0xff]   ;;  %v8083_v57 = vld [vmem:[%s10938_s1 + $0x13c4] ss:$16 sps:$4 sm:$0xff]  }
 0x23f   :  { %5188 = vmatpush1.bf16.msra.mxu0 %v7991_v58  ;;  %5680 = vmatpush1.bf16.msra.mxu1 %v7994_v59  ;;  %v8086_v58 = vld [vmem:[%s10938_s1 + $0x13cc] ss:$16 sps:$4 sm:$0xff]   ;;  %v916_v59 = vcombine.high %v9986_v44, %v9986_v44 }
 0x240   :  { %5198 = vmatprep.subr.bf16.mxu0 %v7999_v48  ;;  %5690 = vmatprep.subr.bf16.mxu1 %v8002_v61  ;;  %v8081_v48 = vld [vmem:[%s10938_s1 + $0x13c0] ss:$16 sps:$4 sm:$0xff]   ;;  %v8084_v61 = vld [vmem:[%s10938_s1 + $0x13c8] ss:$16 sps:$4 sm:$0xff]   ;;  %v8092_v44 = vld [vmem:[%s10938_s1 + $0x13ec] ss:$16 sps:$4 sm:$0xff]  }
 0x242   :  { %5190 = vmatmul.mubr.bf16.vlgmr.msra.gmra.mrb[0].mxu0 %v10219_v62  ;;  %5682 = vmatmul.mubr.bf16.vlgmr.msra.gmra.mrb[0].mxu1 %v10219_v62 }
 0x243   :  { %5199 = vmatpush1.bf16.msra.mxu0 %v7997_v63  ;;  %5691 = vmatpush1.bf16.msra.mxu1 %v8000_v0  ;;  %v8089_v63 = vld [vmem:[%s10938_s1 + $0x13e4] ss:$16 sps:$4 sm:$0xff]   ;;  %v10408_v0 = vrot.slane %v916_v59, %v8515_v49  ;;  %v8168_v59 = vld [vmem:[%s10938_s1 + $0x1588] ss:$16 sps:$4 sm:$0xff]  }
 0x244   :  { %5200 = vmatprep.subr.bf16.mxu0 %v8005_v1  ;;  %5692 = vmatprep.subr.bf16.mxu1 %v8008_v51  ;;  %v8087_v1 = vld [vmem:[%s10938_s1 + $0x13e0] ss:$16 sps:$4 sm:$0xff]   ;;  %v8090_v51 = vld [vmem:[%s10938_s1 + $0x13e8] ss:$16 sps:$4 sm:$0xff]  }
 0x245   :  { %5230 = vmatprep.mubr.bf16.mxu0 %v963_v2  ;;  %5722 = vmatprep.mubr.bf16.mxu1 %v963_v2  ;;  %v8095_v2 = vld [vmem:[%s10938_s1 + $0x1404] ss:$16 sps:$4 sm:$0xff]  }
 0x247   :  { %5201 = vmatpush1.bf16.msra.mxu0 %v8003_v3  ;;  %5693 = vmatpush1.bf16.msra.mxu1 %v8006_v4  ;;  %v8098_v3 = vld [vmem:[%s10938_s1 + $0x140c] ss:$16 sps:$4 sm:$0xff]   ;;  %v932_v4 = vcombine.high %v10408_v0, %v10408_v0 }
 0x248   :  { %5202 = vmatprep.subr.bf16.mxu0 %v8011_v60  ;;  %5694 = vmatprep.subr.bf16.mxu1 %v8014_v5  ;;  %v961_v60 = vcombine.high %v10219_v62, %v10219_v62  ;;  %v8093_v5 = vld [vmem:[%s10938_s1 + $0x1400] ss:$16 sps:$4 sm:$0xff]   ;;  %v8104_v62 = vld [vmem:[%s10938_s1 + $0x142c] ss:$16 sps:$4 sm:$0xff]  }
 0x24b   :  { %5203 = vmatpush1.bf16.msra.mxu0 %v8009_v6  ;;  %5695 = vmatpush1.bf16.msra.mxu1 %v8012_v7  ;;  %v8096_v6 = vld [vmem:[%s10938_s1 + $0x1408] ss:$16 sps:$4 sm:$0xff]   ;;  %v8101_v7 = vld [vmem:[%s10938_s1 + $0x1424] ss:$16 sps:$4 sm:$0xff]  }
 0x24c   :  { %5204 = vmatprep.subr.bf16.mxu0 %v8017_v8  ;;  %5696 = vmatprep.subr.bf16.mxu1 %v8020_v9  ;;  %v10439_v8 = vrot.slane %v932_v4, %v8515_v49  ;;  %v8099_v9 = vld [vmem:[%s10938_s1 + $0x1420] ss:$16 sps:$4 sm:$0xff]   ;;  %v8185_v4 = vld [vmem:[%s10938_s1 + $0x15e4] ss:$16 sps:$4 sm:$0xff]  }
 0x24f   :  { %5205 = vmatpush1.bf16.msra.mxu0 %v8015_v10  ;;  %5697 = vmatpush1.bf16.msra.mxu1 %v8018_v11  ;;  %v8102_v10 = vld [vmem:[%s10938_s1 + $0x1428] ss:$16 sps:$4 sm:$0xff]   ;;  %v8107_v11 = vld [vmem:[%s10938_s1 + $0x1444] ss:$16 sps:$4 sm:$0xff]  }
 0x250   :  { %5206 = vmatprep.subr.bf16.mxu0 %v8023_v12  ;;  %5698 = vmatprep.subr.bf16.mxu1 %v8026_v52  ;;  %v8110_v12 = vld [vmem:[%s10938_s1 + $0x144c] ss:$16 sps:$4 sm:$0xff]   ;;  %v8105_v52 = vld [vmem:[%s10938_s1 + $0x1440] ss:$16 sps:$4 sm:$0xff]  }
 0x253   :  { %5207 = vmatpush1.bf16.msra.mxu0 %v8021_v15  ;;  %5699 = vmatpush1.bf16.msra.mxu1 %v8024_v16  ;;  %v8108_v15 = vld [vmem:[%s10938_s1 + $0x1448] ss:$16 sps:$4 sm:$0xff]   ;;  %v8113_v16 = vld [vmem:[%s10938_s1 + $0x1464] ss:$16 sps:$4 sm:$0xff]  }
 0x254   :  { %5208 = vmatprep.subr.bf16.mxu0 %v8029_v17  ;;  %5700 = vmatprep.subr.bf16.mxu1 %v8032_v18  ;;  %v8116_v17 = vld [vmem:[%s10938_s1 + $0x146c] ss:$16 sps:$4 sm:$0xff]   ;;  %v8111_v18 = vld [vmem:[%s10938_s1 + $0x1460] ss:$16 sps:$4 sm:$0xff]  }
 0x257   :  { %5209 = vmatpush1.bf16.msra.mxu0 %v8027_v19  ;;  %5701 = vmatpush1.bf16.msra.mxu1 %v8030_v20  ;;  %v8114_v19 = vld [vmem:[%s10938_s1 + $0x1468] ss:$16 sps:$4 sm:$0xff]   ;;  %v8119_v20 = vld [vmem:[%s10938_s1 + $0x1484] ss:$16 sps:$4 sm:$0xff]  }
 0x258   :  { %5210 = vmatprep.subr.bf16.mxu0 %v8035_v22  ;;  %5702 = vmatprep.subr.bf16.mxu1 %v8038_v23  ;;  %v8122_v22 = vld [vmem:[%s10938_s1 + $0x148c] ss:$16 sps:$4 sm:$0xff]   ;;  %v8117_v23 = vld [vmem:[%s10938_s1 + $0x1480] ss:$16 sps:$4 sm:$0xff]  }
 0x25b   :  { %5211 = vmatpush1.bf16.msra.mxu0 %v8033_v24  ;;  %5703 = vmatpush1.bf16.msra.mxu1 %v8036_v13  ;;  %v8120_v24 = vld [vmem:[%s10938_s1 + $0x1488] ss:$16 sps:$4 sm:$0xff]   ;;  %v8125_v13 = vld [vmem:[%s10938_s1 + $0x14a4] ss:$16 sps:$4 sm:$0xff]  }
 0x25c   :  { %5212 = vmatprep.subr.bf16.mxu0 %v8041_v27  ;;  %5704 = vmatprep.subr.bf16.mxu1 %v8044_v28  ;;  %v8128_v27 = vld [vmem:[%s10938_s1 + $0x14ac] ss:$16 sps:$4 sm:$0xff]   ;;  %v8123_v28 = vld [vmem:[%s10938_s1 + $0x14a0] ss:$16 sps:$4 sm:$0xff]  }
 0x25f   :  { %5213 = vmatpush1.bf16.msra.mxu0 %v8039_v29  ;;  %5705 = vmatpush1.bf16.msra.mxu1 %v8042_v14  ;;  %v8126_v29 = vld [vmem:[%s10938_s1 + $0x14a8] ss:$16 sps:$4 sm:$0xff]   ;;  %v8131_v14 = vld [vmem:[%s10938_s1 + $0x14c4] ss:$16 sps:$4 sm:$0xff]  }
 0x260   :  { %5214 = vmatprep.subr.bf16.mxu0 %v8047_v30  ;;  %5706 = vmatprep.subr.bf16.mxu1 %v8050_v31  ;;  %v8134_v30 = vld [vmem:[%s10938_s1 + $0x14cc] ss:$16 sps:$4 sm:$0xff]   ;;  %v8129_v31 = vld [vmem:[%s10938_s1 + $0x14c0] ss:$16 sps:$4 sm:$0xff]  }
 0x263   :  { %5215 = vmatpush1.bf16.msra.mxu0 %v8045_v25  ;;  %5707 = vmatpush1.bf16.msra.mxu1 %v8048_v32  ;;  %v8132_v25 = vld [vmem:[%s10938_s1 + $0x14c8] ss:$16 sps:$4 sm:$0xff]   ;;  %v8137_v32 = vld [vmem:[%s10938_s1 + $0x14e4] ss:$16 sps:$4 sm:$0xff]  }
 0x264   :  { %5216 = vmatprep.subr.bf16.mxu0 %v8053_v33  ;;  %5708 = vmatprep.subr.bf16.mxu1 %v8056_v26  ;;  %v8140_v33 = vld [vmem:[%s10938_s1 + $0x14ec] ss:$16 sps:$4 sm:$0xff]   ;;  %v8135_v26 = vld [vmem:[%s10938_s1 + $0x14e0] ss:$16 sps:$4 sm:$0xff]  }
 0x267   :  { %5217 = vmatpush1.bf16.msra.mxu0 %v8051_v36  ;;  %5709 = vmatpush1.bf16.msra.mxu1 %v8054_v37  ;;  %v8138_v36 = vld [vmem:[%s10938_s1 + $0x14e8] ss:$16 sps:$4 sm:$0xff]   ;;  %v8143_v37 = vld [vmem:[%s10938_s1 + $0x1504] ss:$16 sps:$4 sm:$0xff]  }
 0x268   :  { %5218 = vmatprep.subr.bf16.mxu0 %v8059_v21  ;;  %5710 = vmatprep.subr.bf16.mxu1 %v8062_v39  ;;  %v8146_v21 = vld [vmem:[%s10938_s1 + $0x150c] ss:$16 sps:$4 sm:$0xff]   ;;  %v8141_v39 = vld [vmem:[%s10938_s1 + $0x1500] ss:$16 sps:$4 sm:$0xff]  }
 0x26b   :  { %5219 = vmatpush1.bf16.msra.mxu0 %v8057_v40  ;;  %5711 = vmatpush1.bf16.msra.mxu1 %v8060_v41  ;;  %v8144_v40 = vld [vmem:[%s10938_s1 + $0x1508] ss:$16 sps:$4 sm:$0xff]   ;;  %v8149_v41 = vld [vmem:[%s10938_s1 + $0x1524] ss:$16 sps:$4 sm:$0xff]  }
 0x26c   :  { %5220 = vmatprep.subr.bf16.mxu0 %v8065_v34  ;;  %5712 = vmatprep.subr.bf16.mxu1 %v8068_v43  ;;  %v8152_v34 = vld [vmem:[%s10938_s1 + $0x152c] ss:$16 sps:$4 sm:$0xff]   ;;  %v8147_v43 = vld [vmem:[%s10938_s1 + $0x1520] ss:$16 sps:$4 sm:$0xff]  }
 0x26f   :  { %5221 = vmatpush1.bf16.msra.mxu0 %v8063_v45  ;;  %5713 = vmatpush1.bf16.msra.mxu1 %v8066_v46  ;;  %v8150_v45 = vld [vmem:[%s10938_s1 + $0x1528] ss:$16 sps:$4 sm:$0xff]   ;;  %v8155_v46 = vld [vmem:[%s10938_s1 + $0x1544] ss:$16 sps:$4 sm:$0xff]  }
 0x270   :  { %5222 = vmatprep.subr.bf16.mxu0 %v8071_v35  ;;  %5714 = vmatprep.subr.bf16.mxu1 %v8074_v50  ;;  %v8158_v35 = vld [vmem:[%s10938_s1 + $0x154c] ss:$16 sps:$4 sm:$0xff]   ;;  %v8153_v50 = vld [vmem:[%s10938_s1 + $0x1540] ss:$16 sps:$4 sm:$0xff]  }
 0x273   :  { %5223 = vmatpush1.bf16.msra.mxu0 %v8069_v53  ;;  %5715 = vmatpush1.bf16.msra.mxu1 %v8072_v38  ;;  %v8156_v53 = vld [vmem:[%s10938_s1 + $0x1548] ss:$16 sps:$4 sm:$0xff]   ;;  %v8161_v38 = vld [vmem:[%s10938_s1 + $0x1564] ss:$16 sps:$4 sm:$0xff]  }
 0x274   :  { %5224 = vmatprep.subr.bf16.mxu0 %v8077_v54  ;;  %5716 = vmatprep.subr.bf16.mxu1 %v8080_v55  ;;  %v8164_v54 = vld [vmem:[%s10938_s1 + $0x156c] ss:$16 sps:$4 sm:$0xff]   ;;  %v8159_v55 = vld [vmem:[%s10938_s1 + $0x1560] ss:$16 sps:$4 sm:$0xff]  }
 0x277   :  { %5225 = vmatpush1.bf16.msra.mxu0 %v8075_v56  ;;  %5717 = vmatpush1.bf16.msra.mxu1 %v8078_v47  ;;  %v8162_v56 = vld [vmem:[%s10938_s1 + $0x1568] ss:$16 sps:$4 sm:$0xff]   ;;  %v8167_v47 = vld [vmem:[%s10938_s1 + $0x1584] ss:$16 sps:$4 sm:$0xff]  }
 0x278   :  { %5226 = vmatprep.subr.bf16.mxu0 %v8083_v57  ;;  %5718 = vmatprep.subr.bf16.mxu1 %v8086_v58  ;;  %v8170_v57 = vld [vmem:[%s10938_s1 + $0x158c] ss:$16 sps:$4 sm:$0xff]   ;;  %v8165_v58 = vld [vmem:[%s10938_s1 + $0x1580] ss:$16 sps:$4 sm:$0xff]  }
 0x27b   :  { %5227 = vmatpush1.bf16.msra.mxu0 %v8081_v48  ;;  %5719 = vmatpush1.bf16.msra.mxu1 %v8084_v61  ;;  %v8173_v48 = vld [vmem:[%s10938_s1 + $0x15a4] ss:$16 sps:$4 sm:$0xff]   ;;  %v8176_v61 = vld [vmem:[%s10938_s1 + $0x15ac] ss:$16 sps:$4 sm:$0xff]  }
 0x27c   :  { %5228 = vmatprep.subr.bf16.mxu0 %v8089_v63  ;;  %5720 = vmatprep.subr.bf16.mxu1 %v8092_v44  ;;  %v8171_v63 = vld [vmem:[%s10938_s1 + $0x15a0] ss:$16 sps:$4 sm:$0xff]   ;;  %v8174_v44 = vld [vmem:[%s10938_s1 + $0x15a8] ss:$16 sps:$4 sm:$0xff]  }
 0x27f   :  { %5229 = vmatpush1.bf16.msra.mxu0 %v8087_v1  ;;  %5721 = vmatpush1.bf16.msra.mxu1 %v8090_v51  ;;  %v8179_v1 = vld [vmem:[%s10938_s1 + $0x15c4] ss:$16 sps:$4 sm:$0xff]   ;;  %v8182_v51 = vld [vmem:[%s10938_s1 + $0x15cc] ss:$16 sps:$4 sm:$0xff]  }
 0x280   :  { %5239 = vmatprep.subr.bf16.mxu0 %v8095_v2  ;;  %5731 = vmatprep.subr.bf16.mxu1 %v8098_v3  ;;  %v8177_v2 = vld [vmem:[%s10938_s1 + $0x15c0] ss:$16 sps:$4 sm:$0xff]   ;;  %v8180_v3 = vld [vmem:[%s10938_s1 + $0x15c8] ss:$16 sps:$4 sm:$0xff]  }
 0x282   :  { %5231 = vmatmul.mubr.bf16.vlgmr.msra.gmra.mrb[0].mxu0 %v961_v60  ;;  %5723 = vmatmul.mubr.bf16.vlgmr.msra.gmra.mrb[0].mxu1 %v961_v60  ;;  %v8188_v60 = vld [vmem:[%s10938_s1 + $0x15ec] ss:$16 sps:$4 sm:$0xff]  }
 0x283   :  { %5240 = vmatpush1.bf16.msra.mxu0 %v8093_v5  ;;  %5732 = vmatpush1.bf16.msra.mxu1 %v8096_v6  ;;  %v8183_v5 = vld [vmem:[%s10938_s1 + $0x15e0] ss:$16 sps:$4 sm:$0xff]   ;;  %v8186_v6 = vld [vmem:[%s10938_s1 + $0x15e8] ss:$16 sps:$4 sm:$0xff]  }
 0x284   :  { %5241 = vmatprep.subr.bf16.mxu0 %v8101_v7  ;;  %5733 = vmatprep.subr.bf16.mxu1 %v8104_v62  ;;  %v8192_v7 = vld [vmem:[%s10938_s1 + $0x1604] ss:$16 sps:$4 sm:$0xff]   ;;  %v8195_v62 = vld [vmem:[%s10938_s1 + $0x160c] ss:$16 sps:$4 sm:$0xff]  }
 0x285   :  { %5271 = vmatprep.mubr.bf16.mxu0 %v10439_v8  ;;  %5763 = vmatprep.mubr.bf16.mxu1 %v10439_v8 }
 0x287   :  { %5242 = vmatpush1.bf16.msra.mxu0 %v8099_v9  ;;  %5734 = vmatpush1.bf16.msra.mxu1 %v8102_v10  ;;  %v10625_v9 = vrot.slane %v10408_v0, %v8515_v49  ;;  %v8190_v10 = vld [vmem:[%s10938_s1 + $0x1600] ss:$16 sps:$4 sm:$0xff]   ;;  %v8201_v49 = vld [vmem:[%s10938_s1 + $0x162c] ss:$16 sps:$4 sm:$0xff]   ;;  %v964_v0 = vcombine.high %v10439_v8, %v10439_v8  ;;  %v8204_v8 = vld [vmem:[%s10938_s1 + $0x1644] ss:$16 sps:$4 sm:$0xff]  }
 0x288   :  { %5243 = vmatprep.subr.bf16.mxu0 %v8107_v11  ;;  %5735 = vmatprep.subr.bf16.mxu1 %v8110_v12  ;;  %v8193_v11 = vld [vmem:[%s10938_s1 + $0x1608] ss:$16 sps:$4 sm:$0xff]   ;;  %v8198_v12 = vld [vmem:[%s10938_s1 + $0x1624] ss:$16 sps:$4 sm:$0xff]  }
 0x28b   :  { %5244 = vmatpush1.bf16.msra.mxu0 %v8105_v52  ;;  %5736 = vmatpush1.bf16.msra.mxu1 %v8108_v15  ;;  %v8196_v52 = vld [vmem:[%s10938_s1 + $0x1620] ss:$16 sps:$4 sm:$0xff]   ;;  %v8199_v15 = vld [vmem:[%s10938_s1 + $0x1628] ss:$16 sps:$4 sm:$0xff]  }
 0x28c   :  { %5245 = vmatprep.subr.bf16.mxu0 %v8113_v16  ;;  %5737 = vmatprep.subr.bf16.mxu1 %v8116_v17  ;;  %v8207_v16 = vld [vmem:[%s10938_s1 + $0x164c] ss:$16 sps:$4 sm:$0xff]   ;;  %v8202_v17 = vld [vmem:[%s10938_s1 + $0x1640] ss:$16 sps:$4 sm:$0xff]  }
 0x28f   :  { %5246 = vmatpush1.bf16.msra.mxu0 %v8111_v18  ;;  %5738 = vmatpush1.bf16.msra.mxu1 %v8114_v19  ;;  %v8205_v18 = vld [vmem:[%s10938_s1 + $0x1648] ss:$16 sps:$4 sm:$0xff]   ;;  %v8210_v19 = vld [vmem:[%s10938_s1 + $0x1664] ss:$16 sps:$4 sm:$0xff]  }
 0x290   :  { %5247 = vmatprep.subr.bf16.mxu0 %v8119_v20  ;;  %5739 = vmatprep.subr.bf16.mxu1 %v8122_v22  ;;  %v8213_v20 = vld [vmem:[%s10938_s1 + $0x166c] ss:$16 sps:$4 sm:$0xff]   ;;  %v8208_v22 = vld [vmem:[%s10938_s1 + $0x1660] ss:$16 sps:$4 sm:$0xff]  }
 0x293   :  { %5248 = vmatpush1.bf16.msra.mxu0 %v8117_v23  ;;  %5740 = vmatpush1.bf16.msra.mxu1 %v8120_v24  ;;  %v8211_v23 = vld [vmem:[%s10938_s1 + $0x1668] ss:$16 sps:$4 sm:$0xff]   ;;  %v8216_v24 = vld [vmem:[%s10938_s1 + $0x1684] ss:$16 sps:$4 sm:$0xff]  }
 0x294   :  { %5249 = vmatprep.subr.bf16.mxu0 %v8125_v13  ;;  %5741 = vmatprep.subr.bf16.mxu1 %v8128_v27  ;;  %v8219_v13 = vld [vmem:[%s10938_s1 + $0x168c] ss:$16 sps:$4 sm:$0xff]   ;;  %v8214_v27 = vld [vmem:[%s10938_s1 + $0x1680] ss:$16 sps:$4 sm:$0xff]  }
 0x297   :  { %5250 = vmatpush1.bf16.msra.mxu0 %v8123_v28  ;;  %5742 = vmatpush1.bf16.msra.mxu1 %v8126_v29  ;;  %v8217_v28 = vld [vmem:[%s10938_s1 + $0x1688] ss:$16 sps:$4 sm:$0xff]   ;;  %v8222_v29 = vld [vmem:[%s10938_s1 + $0x16a4] ss:$16 sps:$4 sm:$0xff]  }
 0x298   :  { %5251 = vmatprep.subr.bf16.mxu0 %v8131_v14  ;;  %5743 = vmatprep.subr.bf16.mxu1 %v8134_v30  ;;  %v8225_v14 = vld [vmem:[%s10938_s1 + $0x16ac] ss:$16 sps:$4 sm:$0xff]   ;;  %v8220_v30 = vld [vmem:[%s10938_s1 + $0x16a0] ss:$16 sps:$4 sm:$0xff]  }
 0x29b   :  { %5252 = vmatpush1.bf16.msra.mxu0 %v8129_v31  ;;  %5744 = vmatpush1.bf16.msra.mxu1 %v8132_v25  ;;  %v8223_v31 = vld [vmem:[%s10938_s1 + $0x16a8] ss:$16 sps:$4 sm:$0xff]   ;;  %v8228_v25 = vld [vmem:[%s10938_s1 + $0x16c4] ss:$16 sps:$4 sm:$0xff]  }
 0x29c   :  { %5253 = vmatprep.subr.bf16.mxu0 %v8137_v32  ;;  %5745 = vmatprep.subr.bf16.mxu1 %v8140_v33  ;;  %v8231_v32 = vld [vmem:[%s10938_s1 + $0x16cc] ss:$16 sps:$4 sm:$0xff]   ;;  %v8226_v33 = vld [vmem:[%s10938_s1 + $0x16c0] ss:$16 sps:$4 sm:$0xff]  }
 0x29f   :  { %5254 = vmatpush1.bf16.msra.mxu0 %v8135_v26  ;;  %5746 = vmatpush1.bf16.msra.mxu1 %v8138_v36  ;;  %v8229_v26 = vld [vmem:[%s10938_s1 + $0x16c8] ss:$16 sps:$4 sm:$0xff]   ;;  %v8234_v36 = vld [vmem:[%s10938_s1 + $0x16e4] ss:$16 sps:$4 sm:$0xff]  }
 0x2a0   :  { %5255 = vmatprep.subr.bf16.mxu0 %v8143_v37  ;;  %5747 = vmatprep.subr.bf16.mxu1 %v8146_v21  ;;  %v8237_v37 = vld [vmem:[%s10938_s1 + $0x16ec] ss:$16 sps:$4 sm:$0xff]   ;;  %v8232_v21 = vld [vmem:[%s10938_s1 + $0x16e0] ss:$16 sps:$4 sm:$0xff]  }
 0x2a3   :  { %5256 = vmatpush1.bf16.msra.mxu0 %v8141_v39  ;;  %5748 = vmatpush1.bf16.msra.mxu1 %v8144_v40  ;;  %v8235_v39 = vld [vmem:[%s10938_s1 + $0x16e8] ss:$16 sps:$4 sm:$0xff]   ;;  %v8240_v40 = vld [vmem:[%s10938_s1 + $0x1704] ss:$16 sps:$4 sm:$0xff]  }
 0x2a4   :  { %5257 = vmatprep.subr.bf16.mxu0 %v8149_v41  ;;  %5749 = vmatprep.subr.bf16.mxu1 %v8152_v34  ;;  %v8243_v41 = vld [vmem:[%s10938_s1 + $0x170c] ss:$16 sps:$4 sm:$0xff]   ;;  %v8238_v34 = vld [vmem:[%s10938_s1 + $0x1700] ss:$16 sps:$4 sm:$0xff]  }
 0x2a7   :  { %5258 = vmatpush1.bf16.msra.mxu0 %v8147_v43  ;;  %5750 = vmatpush1.bf16.msra.mxu1 %v8150_v45  ;;  %v8241_v43 = vld [vmem:[%s10938_s1 + $0x1708] ss:$16 sps:$4 sm:$0xff]   ;;  %v8246_v45 = vld [vmem:[%s10938_s1 + $0x1724] ss:$16 sps:$4 sm:$0xff]  }
 0x2a8   :  { %5259 = vmatprep.subr.bf16.mxu0 %v8155_v46  ;;  %5751 = vmatprep.subr.bf16.mxu1 %v8158_v35  ;;  %v8249_v46 = vld [vmem:[%s10938_s1 + $0x172c] ss:$16 sps:$4 sm:$0xff]   ;;  %v8244_v35 = vld [vmem:[%s10938_s1 + $0x1720] ss:$16 sps:$4 sm:$0xff]  }
 0x2ab   :  { %5260 = vmatpush1.bf16.msra.mxu0 %v8153_v50  ;;  %5752 = vmatpush1.bf16.msra.mxu1 %v8156_v53  ;;  %v8247_v50 = vld [vmem:[%s10938_s1 + $0x1728] ss:$16 sps:$4 sm:$0xff]   ;;  %v8252_v53 = vld [vmem:[%s10938_s1 + $0x1744] ss:$16 sps:$4 sm:$0xff]  }
 0x2ac   :  { %5261 = vmatprep.subr.bf16.mxu0 %v8161_v38  ;;  %5753 = vmatprep.subr.bf16.mxu1 %v8164_v54  ;;  %v8255_v38 = vld [vmem:[%s10938_s1 + $0x174c] ss:$16 sps:$4 sm:$0xff]   ;;  %v8250_v54 = vld [vmem:[%s10938_s1 + $0x1740] ss:$16 sps:$4 sm:$0xff]  }
 0x2af   :  { %5262 = vmatpush1.bf16.msra.mxu0 %v8159_v55  ;;  %5754 = vmatpush1.bf16.msra.mxu1 %v8162_v56  ;;  %v8253_v55 = vld [vmem:[%s10938_s1 + $0x1748] ss:$16 sps:$4 sm:$0xff]   ;;  %v8258_v56 = vld [vmem:[%s10938_s1 + $0x1764] ss:$16 sps:$4 sm:$0xff]  }
 0x2b0   :  { %5263 = vmatprep.subr.bf16.mxu0 %v8167_v47  ;;  %5755 = vmatprep.subr.bf16.mxu1 %v8170_v57  ;;  %v8261_v47 = vld [vmem:[%s10938_s1 + $0x176c] ss:$16 sps:$4 sm:$0xff]   ;;  %v8256_v57 = vld [vmem:[%s10938_s1 + $0x1760] ss:$16 sps:$4 sm:$0xff]  }
 0x2b3   :  { %5264 = vmatpush1.bf16.msra.mxu0 %v8165_v58  ;;  %5756 = vmatpush1.bf16.msra.mxu1 %v8168_v59  ;;  %v8259_v58 = vld [vmem:[%s10938_s1 + $0x1768] ss:$16 sps:$4 sm:$0xff]   ;;  %v8264_v59 = vld [vmem:[%s10938_s1 + $0x1784] ss:$16 sps:$4 sm:$0xff]  }
 0x2b4   :  { %5265 = vmatprep.subr.bf16.mxu0 %v8173_v48  ;;  %5757 = vmatprep.subr.bf16.mxu1 %v8176_v61  ;;  %v8267_v48 = vld [vmem:[%s10938_s1 + $0x178c] ss:$16 sps:$4 sm:$0xff]   ;;  %v8262_v61 = vld [vmem:[%s10938_s1 + $0x1780] ss:$16 sps:$4 sm:$0xff]  }
 0x2b7   :  { %5266 = vmatpush1.bf16.msra.mxu0 %v8171_v63  ;;  %5758 = vmatpush1.bf16.msra.mxu1 %v8174_v44  ;;  %v8265_v63 = vld [vmem:[%s10938_s1 + $0x1788] ss:$16 sps:$4 sm:$0xff]   ;;  %v8270_v44 = vld [vmem:[%s10938_s1 + $0x17a4] ss:$16 sps:$4 sm:$0xff]  }
 0x2b8   :  { %5267 = vmatprep.subr.bf16.mxu0 %v8179_v1  ;;  %5759 = vmatprep.subr.bf16.mxu1 %v8182_v51  ;;  %v8273_v1 = vld [vmem:[%s10938_s1 + $0x17ac] ss:$16 sps:$4 sm:$0xff]   ;;  %v8268_v51 = vld [vmem:[%s10938_s1 + $0x17a0] ss:$16 sps:$4 sm:$0xff]  }
 0x2bb   :  { %5268 = vmatpush1.bf16.msra.mxu0 %v8177_v2  ;;  %5760 = vmatpush1.bf16.msra.mxu1 %v8180_v3  ;;  %v8271_v2 = vld [vmem:[%s10938_s1 + $0x17a8] ss:$16 sps:$4 sm:$0xff]   ;;  %v8276_v3 = vld [vmem:[%s10938_s1 + $0x17c4] ss:$16 sps:$4 sm:$0xff]  }
 0x2bc   :  { %5269 = vmatprep.subr.bf16.mxu0 %v8185_v4  ;;  %5761 = vmatprep.subr.bf16.mxu1 %v8188_v60  ;;  %v8279_v4 = vld [vmem:[%s10938_s1 + $0x17cc] ss:$16 sps:$4 sm:$0xff]   ;;  %v8274_v60 = vld [vmem:[%s10938_s1 + $0x17c0] ss:$16 sps:$4 sm:$0xff]  }
 0x2bf   :  { %5270 = vmatpush1.bf16.msra.mxu0 %v8183_v5  ;;  %5762 = vmatpush1.bf16.msra.mxu1 %v8186_v6  ;;  %v8277_v5 = vld [vmem:[%s10938_s1 + $0x17c8] ss:$16 sps:$4 sm:$0xff]   ;;  %v8282_v6 = vld [vmem:[%s10938_s1 + $0x17e4] ss:$16 sps:$4 sm:$0xff]  }
 0x2c0   :  { %5280 = vmatprep.subr.bf16.mxu0 %v8192_v7  ;;  %5772 = vmatprep.subr.bf16.mxu1 %v8195_v62  ;;  %v8285_v7 = vld [vmem:[%s10938_s1 + $0x17ec] ss:$16 sps:$4 sm:$0xff]   ;;  %v8280_v62 = vld [vmem:[%s10938_s1 + $0x17e0] ss:$16 sps:$4 sm:$0xff]  }
 0x2c2   :  { %5272 = vmatmul.mubr.bf16.vlgmr.msra.gmra.mrb[0].mxu0 %v10625_v9  ;;  %5764 = vmatmul.mubr.bf16.vlgmr.msra.gmra.mrb[0].mxu1 %v10625_v9 }
 0x2c3   :  { %5281 = vmatpush1.bf16.msra.mxu0 %v8190_v10  ;;  %5773 = vmatpush1.bf16.msra.mxu1 %v8193_v11  ;;  %v8283_v10 = vld [vmem:[%s10938_s1 + $0x17e8] ss:$16 sps:$4 sm:$0xff]   ;;  %v8286_v11 = vld [vmem:[%s10940_s3 + $0x40] sm:$0xff]  }
 0x2c4   :  { %5282 = vmatprep.subr.bf16.mxu0 %v8198_v12  ;;  %5774 = vmatprep.subr.bf16.mxu1 %v8201_v49  ;;  %v8287_v12 = vld [vmem:[%s10940_s3 + $0xc0] sm:$0xff]   ;;  %v962_v49 = vcombine.high %v10625_v9, %v10625_v9  ;;  %v8291_v9 = vld [vmem:[%s10940_s3 + $0xc8] sm:$0xff]  }
 0x2c5   :  { %5312 = vmatprep.mubr.bf16.mxu0 %v964_v0  ;;  %5804 = vmatprep.mubr.bf16.mxu1 %v964_v0  ;;  %v8288_v0 = vld [vmem:[%s10940_s3] sm:$0xff]  }
 0x2c7   :  { %5283 = vmatpush1.bf16.msra.mxu0 %v8196_v52  ;;  %5775 = vmatpush1.bf16.msra.mxu1 %v8199_v15  ;;  %v8289_v52 = vld [vmem:[%s10940_s3 + $0x80] sm:$0xff]   ;;  %v8290_v15 = vld [vmem:[%s10940_s3 + $0x48] sm:$0xff]  }
 0x2c8   :  { %5284 = vmatprep.subr.bf16.mxu0 %v8204_v8  ;;  %5776 = vmatprep.subr.bf16.mxu1 %v8207_v16  ;;  %v8292_v8 = vld [vmem:[%s10940_s3 + $0x8] sm:$0xff]  }
 0x2c9   :  { %v8293_v16 = vld [vmem:[%s10940_s3 + $0x88] sm:$0xff]  }
 0x2cb   :  { %5285 = vmatpush1.bf16.msra.mxu0 %v8202_v17  ;;  %5777 = vmatpush1.bf16.msra.mxu1 %v8205_v18  ;;  %v8294_v17 = vld [vmem:[%s10940_s3 + $0x50] sm:$0xff]  }
 0x2cc   :  { %5286 = vmatprep.subr.bf16.mxu0 %v8210_v19  ;;  %5778 = vmatprep.subr.bf16.mxu1 %v8213_v20  ;;  %v8295_v18 = vld [vmem:[%s10940_s3 + $0xd0] sm:$0xff]  }
 0x2cd   :  { %v8296_v19 = vld [vmem:[%s10940_s3 + $0x10] sm:$0xff]  }
 0x2ce   :  { %v8297_v20 = vld [vmem:[%s10940_s3 + $0x90] sm:$0xff]  }
 0x2cf   :  { %5287 = vmatpush1.bf16.msra.mxu0 %v8208_v22  ;;  %5779 = vmatpush1.bf16.msra.mxu1 %v8211_v23  ;;  %v8298_v22 = vld [vmem:[%s10940_s3 + $0x58] sm:$0xff]  }
 0x2d0   :  { %5288 = vmatprep.subr.bf16.mxu0 %v8216_v24  ;;  %5780 = vmatprep.subr.bf16.mxu1 %v8219_v13  ;;  %v8299_v23 = vld [vmem:[%s10940_s3 + $0xd8] sm:$0xff]  }
 0x2d1   :  { %v8300_v24 = vld [vmem:[%s10940_s3 + $0x18] sm:$0xff]  }
 0x2d2   :  { %v8301_v13 = vld [vmem:[%s10940_s3 + $0x98] sm:$0xff]  }
 0x2d3   :  { %5289 = vmatpush1.bf16.msra.mxu0 %v8214_v27  ;;  %5781 = vmatpush1.bf16.msra.mxu1 %v8217_v28  ;;  %v8302_v27 = vld [vmem:[%s10940_s3 + $0x60] sm:$0xff]  }
 0x2d4   :  { %5290 = vmatprep.subr.bf16.mxu0 %v8222_v29  ;;  %5782 = vmatprep.subr.bf16.mxu1 %v8225_v14  ;;  %v8303_v28 = vld [vmem:[%s10940_s3 + $0xe0] sm:$0xff]  }
 0x2d5   :  { %v8304_v29 = vld [vmem:[%s10940_s3 + $0x20] sm:$0xff]  }
 0x2d6   :  { %v8305_v14 = vld [vmem:[%s10940_s3 + $0xa0] sm:$0xff]  }
 0x2d7   :  { %5291 = vmatpush1.bf16.msra.mxu0 %v8220_v30  ;;  %5783 = vmatpush1.bf16.msra.mxu1 %v8223_v31  ;;  %v8306_v30 = vld [vmem:[%s10940_s3 + $0x68] sm:$0xff]  }
 0x2d8   :  { %5292 = vmatprep.subr.bf16.mxu0 %v8228_v25  ;;  %5784 = vmatprep.subr.bf16.mxu1 %v8231_v32  ;;  %v8307_v31 = vld [vmem:[%s10940_s3 + $0xe8] sm:$0xff]  }
 0x2d9   :  { %v8308_v25 = vld [vmem:[%s10940_s3 + $0x28] sm:$0xff]  }
 0x2da   :  { %v8309_v32 = vld [vmem:[%s10940_s3 + $0xa8] sm:$0xff]  }
 0x2db   :  { %5293 = vmatpush1.bf16.msra.mxu0 %v8226_v33  ;;  %5785 = vmatpush1.bf16.msra.mxu1 %v8229_v26  ;;  %v8310_v33 = vld [vmem:[%s10940_s3 + $0x70] sm:$0xff]  }
 0x2dc   :  { %5294 = vmatprep.subr.bf16.mxu0 %v8234_v36  ;;  %5786 = vmatprep.subr.bf16.mxu1 %v8237_v37  ;;  %v8311_v26 = vld [vmem:[%s10940_s3 + $0xf0] sm:$0xff]  }
 0x2dd   :  { %v8312_v36 = vld [vmem:[%s10940_s3 + $0x30] sm:$0xff]  }
 0x2de   :  { %v8313_v37 = vld [vmem:[%s10940_s3 + $0xb0] sm:$0xff]  }
 0x2df   :  { %5295 = vmatpush1.bf16.msra.mxu0 %v8232_v21  ;;  %5787 = vmatpush1.bf16.msra.mxu1 %v8235_v39  ;;  %v8314_v21 = vld [vmem:[%s10940_s3 + $0x78] sm:$0xff]  }
 0x2e0   :  { %5296 = vmatprep.subr.bf16.mxu0 %v8240_v40  ;;  %5788 = vmatprep.subr.bf16.mxu1 %v8243_v41  ;;  %v8315_v39 = vld [vmem:[%s10940_s3 + $0xf8] sm:$0xff]  }
 0x2e1   :  { %v8316_v40 = vld [vmem:[%s10940_s3 + $0x38] sm:$0xff]  }
 0x2e2   :  { %v8317_v41 = vld [vmem:[%s10940_s3 + $0xb8] sm:$0xff]  }
 0x2e3   :  { %5297 = vmatpush1.bf16.msra.mxu0 %v8238_v34  ;;  %5789 = vmatpush1.bf16.msra.mxu1 %v8241_v43  ;;  %v797_v34 = vsub.s32 0, %v8497_v42  ;;  %v805_v43 = vsub.s32 2, %v8497_v42 }
 0x2e4   :  { %5298 = vmatprep.subr.bf16.mxu0 %v8246_v45  ;;  %5790 = vmatprep.subr.bf16.mxu1 %v8249_v46  ;;  %v793_v45 = vld [vmem:[%s10939_s2] sm:$0xf]  ;;  %v801_v46 = vsub.s32 1, %v8497_v42 }
 0x2e7   :  { %5299 = vmatpush1.bf16.msra.mxu0 %v8244_v35  ;;  %5791 = vmatpush1.bf16.msra.mxu1 %v8247_v50  ;;  %v809_v35 = vsub.s32 3, %v8497_v42  ;;  %v798_v50 = vrot.slane %v793_v45, %v797_v34 }
 0x2e8   :  { %5300 = vmatprep.subr.bf16.mxu0 %v8252_v53  ;;  %5792 = vmatprep.subr.bf16.mxu1 %v8255_v38  ;;  %v806_v53 = vrot.slane %v793_v45, %v805_v43  ;;  %v802_v38 = vrot.slane %v793_v45, %v801_v46 }
 0x2eb   :  { %5301 = vmatpush1.bf16.msra.mxu0 %v8250_v54  ;;  %5793 = vmatpush1.bf16.msra.mxu1 %v8253_v55  ;;  %v810_v54 = vrot.slane %v793_v45, %v809_v35 }
 0x2ec   :  { %5302 = vmatprep.subr.bf16.mxu0 %v8258_v56  ;;  %5794 = vmatprep.subr.bf16.mxu1 %v8261_v47 }
 0x2ef   :  { %5303 = vmatpush1.bf16.msra.mxu0 %v8256_v57  ;;  %5795 = vmatpush1.bf16.msra.mxu1 %v8259_v58 }
 0x2f0   :  { %5304 = vmatprep.subr.bf16.mxu0 %v8264_v59  ;;  %5796 = vmatprep.subr.bf16.mxu1 %v8267_v48 }
 0x2f3   :  { %5305 = vmatpush1.bf16.msra.mxu0 %v8262_v61  ;;  %5797 = vmatpush1.bf16.msra.mxu1 %v8265_v63 }
 0x2f4   :  { %5306 = vmatprep.subr.bf16.mxu0 %v8270_v44  ;;  %5798 = vmatprep.subr.bf16.mxu1 %v8273_v1 }
 0x2f7   :  { %5307 = vmatpush1.bf16.msra.mxu0 %v8268_v51  ;;  %5799 = vmatpush1.bf16.msra.mxu1 %v8271_v2 }
 0x2f8   :  { %5308 = vmatprep.subr.bf16.mxu0 %v8276_v3  ;;  %5800 = vmatprep.subr.bf16.mxu1 %v8279_v4 }
 0x2fb   :  { %5309 = vmatpush1.bf16.msra.mxu0 %v8274_v60  ;;  %5801 = vmatpush1.bf16.msra.mxu1 %v8277_v5 }
 0x2fc   :  { %5310 = vmatprep.subr.bf16.mxu0 %v8282_v6  ;;  %5802 = vmatprep.subr.bf16.mxu1 %v8285_v7 }
 0x2ff   :  { %5311 = vmatpush1.bf16.msra.mxu0 %v8280_v62  ;;  %5803 = vmatpush1.bf16.msra.mxu1 %v8283_v10 }
 0x300   :  { %6993 = vmatprep.subr.bf16.mxu0 %v8286_v11  ;;  %7015 = vmatprep.subr.bf16.mxu1 %v8287_v12  ;;  %v6960_v11 = vld [vmem:[%s10941_s4] ss:$0 sm:$0xff]  ;;  %s8349_s4 = smov [#allocation2]  }
 0x301   :  { %s6184_s27 = sshll.u32 %s8349_s4, 4  ;;  %s6185_s27 = int_to_ptr.vmem [resolvable:$true] %s6184_s27 }
 0x302   :  { %5313 = vmatmul.mubr.bf16.vlgmr.msra.gmra.mrb[0].mxu0 %v962_v49  ;;  %5805 = vmatmul.mubr.bf16.vlgmr.msra.gmra.mrb[0].mxu1 %v962_v49  ;;  %s8324_s28 = scalar_lea.vmem %s6185_s27, 32  ;;  %p8329_p1 = scmp.lt.s32.totalorder %s6185_s27, %s6185_s27 }
 0x303   :  { %6994 = vmatpush3.bf16.msra.mxu0 %v8288_v0  ;;  %7016 = vmatpush3.bf16.msra.mxu1 %v8289_v52  ;;  %p8325_p0 = scmp.ne.s32.totalorder %s6185_s27, %s8324_s28  ;;  %p8330_p2 = scmp.lt.s32.totalorder %s8324_s28, %s8324_s28 }
 0x304   :  { %6995 = vmatprep.subr.bf16.mxu0 %v8290_v15  ;;  %7017 = vmatprep.subr.bf16.mxu1 %v8291_v9 }
 0x305   :  { %p8331_p3 = por %p8330_p2, %p8329_p1 }
 0x307   :  { %6996 = vmatpush3.bf16.msra.mxu0 %v8292_v8  ;;  %7018 = vmatpush3.bf16.msra.mxu1 %v8293_v16  ;;  %p8332_p4 = pnand %p8331_p3, %p8325_p0 }
 0x308   :  { %6997 = vmatprep.subr.bf16.mxu0 %v8294_v17  ;;  %7019 = vmatprep.subr.bf16.mxu1 %v8295_v18 }
 0x30b   :  { %6998 = vmatpush3.bf16.msra.mxu0 %v8296_v19  ;;  %7020 = vmatpush3.bf16.msra.mxu1 %v8297_v20 }
 0x30c   :  { %6999 = vmatprep.subr.bf16.mxu0 %v8298_v22  ;;  %7021 = vmatprep.subr.bf16.mxu1 %v8299_v23 }
 0x30f   :  { %7000 = vmatpush3.bf16.msra.mxu0 %v8300_v24  ;;  %7022 = vmatpush3.bf16.msra.mxu1 %v8301_v13 }
 0x310   :  { %7001 = vmatprep.subr.bf16.mxu0 %v8302_v27  ;;  %7023 = vmatprep.subr.bf16.mxu1 %v8303_v28 }
 0x313   :  { %7002 = vmatpush3.bf16.msra.mxu0 %v8304_v29  ;;  %7024 = vmatpush3.bf16.msra.mxu1 %v8305_v14 }
 0x314   :  { %7003 = vmatprep.subr.bf16.mxu0 %v8306_v30  ;;  %7025 = vmatprep.subr.bf16.mxu1 %v8307_v31 }
 0x317   :  { %7004 = vmatpush3.bf16.msra.mxu0 %v8308_v25  ;;  %7026 = vmatpush3.bf16.msra.mxu1 %v8309_v32 }
 0x318   :  { %7005 = vmatprep.subr.bf16.mxu0 %v8310_v33  ;;  %7027 = vmatprep.subr.bf16.mxu1 %v8311_v26 }
 0x31b   :  { %7006 = vmatpush3.bf16.msra.mxu0 %v8312_v36  ;;  %7028 = vmatpush3.bf16.msra.mxu1 %v8313_v37 }
 0x31c   :  { %7007 = vmatprep.subr.bf16.mxu0 %v8314_v21  ;;  %7029 = vmatprep.subr.bf16.mxu1 %v8315_v39 }
 0x31f   :  { %7008 = vmatpush3.bf16.msra.mxu0 %v8316_v40  ;;  %7030 = vmatpush3.bf16.msra.mxu1 %v8317_v41 }
 0x3d5   :  { %v5314_v55 = vpop.f32.mrb[0].mxu0  ;;  %v5806_v56 = vpop.f32.mrb[0].mxu1 }
 0x3d6   :  { %v7037_v47 = vadd.f32 %v5314_v55, %v798_v50  ;;  %v7039_v57 = vadd.f32 %v5806_v56, %v806_v53  ;;  %v5316_v58 = vpop.f32.mrb[1].mxu0  ;;  %v5808_v59 = vpop.f32.mrb[1].mxu1 }
 0x3d7   :  { %v7038_v48 = vadd.f32 %v5316_v58, %v802_v38  ;;  %v7040_v61 = vadd.f32 %v5808_v59, %v810_v54  ;;  %v5318_v63 = vpop.f32.mrb[2].mxu0  ;;  %v5810_v44 = vpop.f32.mrb[2].mxu1 }
 0x3d8   :  { %v5813_v1 = vmax.f32 %v7037_v47, 0.0  ;;  %v5815_v51 = vmax.f32 %v7039_v57, 0.0  ;;  %v5319_v2 = vpop.f32.mrb[3].mxu0  ;;  %v5811_v3 = vpop.f32.mrb[3].mxu1 }
 0x3d9   :  { %v5814_v4 = vmax.f32 %v7038_v48, 0.0  ;;  %v5816_v42 = vmax.f32 %v7040_v61, 0.0 }
 0x3da   :  { %v5817_v6 = vpack.c.bf16 %v5813_v1, %v5813_v1  ;;  %v5819_v7 = vpack.c.bf16 %v5815_v51, %v5815_v51 }
 0x3db   :  { %v5818_v60 = vpack.c.bf16 %v5814_v4, %v5814_v4  ;;  %v5820_v5 = vpack.c.bf16 %v5816_v42, %v5816_v42 }
 0x3dd   :  { %6116 = vmatprep.mubr.bf16.mxu0 %v5818_v60  ;;  %6156 = vmatprep.mubr.bf16.mxu1 %v5820_v5 }
 0x3de   :  { %6117 = vmatmul.mubr.bf16.vlgmr.msra.gmra.mrb[4].mxu0 %v5817_v6  ;;  %6157 = vmatmul.mubr.bf16.vlgmr.msra.gmra.mrb[4].mxu1 %v5819_v7 }
 0x4b1   :  { %v7009_v62 = vpop.f32.mrb[4].mxu0  ;;  %v7031_v10 = vpop.f32.mrb[4].mxu1 }
 0x4b2   :  { %v7010_v12 = vpop.f32.mrb[5].mxu0  ;;  %v7032_v49 = vpop.f32.mrb[5].mxu1 }
 0x4b3   :  { %v7011_v0 = vadd.f32 %v7010_v12, %v7009_v62  ;;  %v7033_v52 = vadd.f32 %v7032_v49, %v7031_v10  ;;  %v7012_v15 = vpop.f32.mrb[6].mxu0  ;;  %v7034_v9 = vpop.f32.mrb[6].mxu1 }
 0x4b4   :  { %v7013_v8 = vpop.f32.mrb[7].mxu0  ;;  %v7035_v16 = vpop.f32.mrb[7].mxu1 }
 0x4b5   :  { %v6119_v17 = vadd.f32 %v7011_v0, %v6960_v11 }
 0x4b7   :  { %v6159_v18 = vadd.f32 %v7033_v52, %v6119_v17 }
 0x4b9   :  { %v6165_v19 = vsel %vm6164_vm0, %v6159_v18, -inf }
 0x4ba   :  { %6166 = vmax.xlane.f32.xlu0 %v6165_v19 }
 0x547   :  { %v6167_v20 = vpop.xlane.xlu0 %6166 }
 0x548   :  { %v6168_v22 = vsub.f32 %v6159_v18, %v6167_v20 }
 0x54a   :  { %v6169_v23 = vmul.f32 1.442695, %v6168_v22 }
 0x54c   :  { %8318 = vpow2.f32 %v6169_v23 }
 0x556   :  { %v8319_v24 = vpop.eup %8318 }
 0x557   :  { %v6171_v13 = vsel %vm6164_vm0, %v8319_v24, 0.0 }
 0x558   :  { %6172 = vadd.xlane.f32.xlu0 %v6171_v13 }
 0x5e5   :  { %v6173_v27 = vpop.xlane.xlu0 %6172 }
 0x5e6   :  { %8320 = vlog2.f32 %v6173_v27 }
 0x5f0   :  { %v8321_v28 = vpop.eup %8320 }
 0x5f1   :  { %v6175_v29 = vmul.f32 0.6931472, %v8321_v28 }
 0x5f3   :  { %v6176_v14 = vsub.f32 %v6168_v22, %v6175_v29 }
 0x5f5   :  { %6177 = vst [vmem:[#allocation2] sm:$0x3] %v6176_v14 }
 0x5f6   :  { %8335 = shalt.err (!%p8332_p4)
}
 0x5f7   :  { %s8336_s6 = scalar_lea.hbm %s10942_s5, 32 }
 0x5f8   :  { %p8337_p5 = scmp.ne.s32.totalorder %s10942_s5, %s8336_s6  ;;  %p8340_p6 = scmp.lt.u32.totalorder %s8336_s6, %s10942_s5 }
 0x5fa   :  { %p8342_p7 = pnand %p8340_p6, %p8337_p5 }
 0x5fc   :  { %8345 = shalt.err (!%p8342_p7)
}
 0x5fd   :  { %6187 = dma.vmem_to_hbm [thread:$0]  %s6185_s27, 32, %s10942_s5, [#allocation3]  }
 0x5fe   :  { %8346 = dma.done.wait [#allocation3], 32  }
 0x5ff   :  { %8347 = vsyncadd [#allocation3], 4294967264 }
 0x600   :  { %6191 = vsyncpa [#allocation3], 1 }

</bundles_post_ra>
